<compile_context>
chip_gen: v5e
topology: v5e:2x2
jax: 0.10.0
libtpu: 0.0.40
codegen_flags: <defaults>
</compile_context>

<pallas_src>
import functools

import jax
import jax.numpy as jnp
from jax import lax
from jax.experimental import pallas as pl
from jax.experimental.pallas import tpu as pltpu


# ----------------------------- Pallas kernel ------------------------------- #

def cldnn_kernel(p_ref, wconv_ref, wih1_ref, badd_ref, wcomb_ref, o_ref, *, Tp, Hp):
    """Fused Conv1d + MaxPool1d + LSTM1 + LSTM2 (pipelined recurrence).

    p_ref:     (2*Tp, B, K*Cin) im2col patches, time-major; [:Tp]=even, [Tp:]=odd
    wconv_ref: (K*Cin, Cout)    flattened conv weight
    wih1_ref:  (Cout, 8*Hp)     LSTM1 input projection in fused gate-column layout
                                [i1 i2 f1 f2 o1 o2 g1 g2] (layer-2 columns zero,
                                g-columns pre-scaled by 2)
    badd_ref:  (1, 8*Hp)        biases: layer-1 cols = b1 + conv-bias fold,
                                layer-2 cols = b2 (g-columns pre-scaled by 2)
    wcomb_ref: (2*Hp, 8*Hp)     bf16 combined recurrent weight:
                                rows 0:Hp = h1 -> {whh1 | wih2}, rows Hp:2Hp = h2 -> {0 | whh2}
    o_ref:     (Tp, B, Hp)      h2 outputs, lane-dense (Hp=128), sliced to H in wrapper
    """
    B = p_ref.shape[1]
    f32 = jnp.float32
    bf16 = jnp.bfloat16
    G8 = 8 * Hp
    H2 = 2 * Hp
    dn = (((2,), (0,)), ((), ()))       # contract last dim of lhs with dim 0 of rhs

    def sig(x):                          # sigmoid via a single tanh EUP push
        return 0.5 * jnp.tanh(0.5 * x) + 0.5

    # ---- Conv1d (both pooling phases in one matmul) + fused MaxPool(2,2) ----
    y = lax.dot_general(p_ref[...], wconv_ref[...], dimension_numbers=dn,
                        preferred_element_type=f32)            # (2*Tp, B, Cout)
    pooled = jnp.maximum(y[:Tp], y[Tp:])                        # (Tp, B, Cout)
    # max(a + b_conv, c + b_conv) == max(a, c) + b_conv; the conv bias is folded
    # into badd (through wih1) at parameter-prep time.

    # ---- Hoisted LSTM1 input projection, time-major, fused gate-column order ----
    xadd = lax.dot_general(pooled, wih1_ref[...], dimension_numbers=dn,
                           preferred_element_type=f32)          # (Tp, B, 8*Hp)
    badd = badd_ref[...]                                        # (1, 8*Hp)
    xadd = xadd + badd[None]                                    # broadcast once, hoisted
    badd_b = jnp.broadcast_to(badd, (B, G8))                    # hoisted (last-step add)

    wcomb = wcomb_ref[...]                                      # bf16 (2*Hp, 8*Hp)

    # ---- Prologue: LSTM1 step 0 (h1_{-1} = 0 => recurrent term is 0) ----
    x0 = xadd[0]                                                # (B, 8*Hp)
    i1 = sig(x0[:, 0 * Hp:1 * Hp])
    o1 = sig(x0[:, 4 * Hp:5 * Hp])
    g1 = 2.0 * sig(x0[:, 6 * Hp:7 * Hp]) - 1.0                  # tanh (g cols pre-scaled x2)
    c1 = i1 * g1                                                # f1 * c_prev == 0
    h1 = o1 * jnp.tanh(c1)
    zeros_h = jnp.zeros((B, Hp), f32)
    hh = jnp.concatenate([h1, zeros_h], axis=1)                 # [h1_0 | h2_{-1}]
    cc = jnp.concatenate([c1, zeros_h], axis=1)                 # [c1_0 | c2_{-1}]

    # ---- Pipelined recurrence: one combined MXU push per step ----
    # Iteration t consumes hh=[h1_t | h2_{t-1}] and produces hh=[h1_{t+1} | h2_t].
    for t in range(Tp):
        gg = jnp.dot(hh.astype(bf16), wcomb, preferred_element_type=f32)   # (B, 8*Hp)
        if t + 1 < Tp:
            gg = gg + xadd[t + 1]        # layer-1 cols: xw1[t+1]+b1; layer-2 cols: b2
        else:
            gg = gg + badd_b             # last step: layer-1 half is discarded, layer-2 gets b2
        act = sig(gg)                    # one EUP pass over all gates of both layers
        i_cat = act[:, 0:H2]             # [i1 | i2]
        f_cat = act[:, H2:2 * H2]        # [f1 | f2]
        o_cat = act[:, 2 * H2:3 * H2]    # [o1 | o2]
        g_cat = 2.0 * act[:, 3 * H2:4 * H2] - 1.0               # tanh (pre-scaled x2)
        cc = f_cat * cc + i_cat * g_cat                         # [c1_{t+1} | c2_t]
        hh = o_cat * jnp.tanh(cc)                               # [h1_{t+1} | h2_t]
        # dropout1 / dropout2 are identity in eval mode.
        o_ref[t, :, :] = hh[:, Hp:H2]                           # h2_t, full 128-lane store


# ------------------------- Parameter preparation ---------------------------- #

def prepare_params(params, Hp=128):
    """One-time re-layout of PyTorch-style parameters for the fused kernel."""
    Cout, Cin, K = params["conv_w"].shape
    H = params["lstm1_w_hh"].shape[1]
    assert Hp >= H
    G8 = 8 * Hp

    # Conv weight (Cout, Cin, K) -> (K*Cin, Cout), matching im2col patch layout
    # patch[..., k*Cin + c] = x[b, c, pos + k].
    w_conv = jnp.transpose(params["conv_w"], (2, 1, 0)).reshape(K * Cin, Cout).astype(jnp.float32)
    b_conv = params["conv_b"].reshape(1, Cout).astype(jnp.float32)

    # Fused gate-column layout (each block Hp wide, lane-tile aligned):
    #   [ i1 | i2 | f1 | f2 | o1 | o2 | g1 | g2 ]
    # PyTorch gate order in w_ih / w_hh / b is (i, f, g, o).
    l1_blk = (0, 2, 6, 4)                 # layer-1 gate j -> column block
    l2_blk = (1, 3, 7, 5)                 # layer-2 gate j -> column block
    g_scale = (1.0, 1.0, 2.0, 1.0)        # pre-scale g columns by 2: tanh(x) = 2*sigma(2x)-1

    wih1 = jnp.zeros((Cout, G8), jnp.float32)      # LSTM1 input proj (layer-2 cols zero)
    wcomb = jnp.zeros((2 * Hp, G8), jnp.float32)   # [h1 | h2] -> all gates of both layers
    badd = jnp.zeros((1, G8), jnp.float32)

    b1 = params["lstm1_b_ih"] + params["lstm1_b_hh"]
    b2 = params["lstm2_b_ih"] + params["lstm2_b_hh"]
    for j in range(4):
        s = g_scale[j]
        r = slice(j * H, (j + 1) * H)
        c1 = slice(l1_blk[j] * Hp, l1_blk[j] * Hp + H)
        c2 = slice(l2_blk[j] * Hp, l2_blk[j] * Hp + H)
        wih1 = wih1.at[:, c1].set(s * params["lstm1_w_ih"][r, :].T)
        wcomb = wcomb.at[:H, c1].set(s * params["lstm1_w_hh"][r, :].T)          # h1 -> L1 gates
        wcomb = wcomb.at[:H, c2].set(s * params["lstm2_w_ih"][r, :].T)          # h1 -> L2 gates
        wcomb = wcomb.at[Hp:Hp + H, c2].set(s * params["lstm2_w_hh"][r, :].T)   # h2 -> L2 gates
        badd = badd.at[0, c1].set(s * b1[r])
        badd = badd.at[0, c2].set(s * b2[r])

    # Fold the conv bias through LSTM1's input projection (exact: the bias is
    # identical for both maxpool inputs, so it commutes with the maxpool).
    badd = badd + b_conv @ wih1           # wih1 layer-2 columns are zero -> only L1 cols move

    return {"w_conv": w_conv, "wih1_ext": wih1, "badd": badd,
            "wcomb": wcomb.astype(jnp.bfloat16)}   # bf16 MXU operand, cast once


# ------------------------------ JAX wrapper --------------------------------- #

@functools.partial(jax.jit, static_argnames=("H", "Hp"))
def cldnn_g_forward(x_ncw, prepped, *, H=64, Hp=128):
    """Forward pass matching CLDNN_G.forward. x_ncw: (B, 2, L) like PyTorch."""
    B, Cin, L = x_ncw.shape
    KC, Cout = prepped["w_conv"].shape
    K = KC // Cin
    Tc = L - K + 1
    Tp = Tc // 2
    T2 = 2 * Tp

    # NCW -> NLC + im2col, time-major; even conv positions in [:Tp], odd in [Tp:].
    x_blc = jnp.transpose(x_ncw, (0, 2, 1))                              # (B, L, Cin)
    patches = jnp.stack([x_blc[:, k:k + T2, :] for k in range(K)], axis=2)
    patches = patches.reshape(B, T2, KC)                                 # (B, 2Tp, K*Cin)
    patches = jnp.transpose(patches, (1, 0, 2))                          # (2Tp, B, K*Cin)
    patches = jnp.concatenate([patches[0::2], patches[1::2]], axis=0)    # even | odd halves

    kern = functools.partial(cldnn_kernel, Tp=Tp, Hp=Hp)
    out = pl.pallas_call(
        kern,
        out_shape=jax.ShapeDtypeStruct((Tp, B, Hp), jnp.float32),
        in_specs=[pl.BlockSpec(memory_space=pltpu.MemorySpace.VMEM)] * 5,
        out_specs=pl.BlockSpec(memory_space=pltpu.MemorySpace.VMEM),
    )(patches, prepped["w_conv"], prepped["wih1_ext"], prepped["badd"], prepped["wcomb"])

    # Lane-padding slice + transpose + flatten: free layout plumbing in the wrapper.
    return jnp.transpose(out[:, :, :H], (1, 0, 2)).reshape(B, Tp * H)


# ------------------------- Pure-JAX reference check ------------------------- #

def ref_lstm(x, w_ih, w_hh, b_ih, b_hh):
    B, T, Hin = x.shape
    H = w_hh.shape[1]

    def step(carry, x_t):
        h, c = carry
        gates = x_t @ w_ih.T + h @ w_hh.T + b_ih + b_hh
        i, f, g, o = jnp.split(gates, 4, axis=-1)
        c = jax.nn.sigmoid(f) * c + jax.nn.sigmoid(i) * jnp.tanh(g)
        h = jax.nn.sigmoid(o) * jnp.tanh(c)
        return (h, c), h

    carry0 = (jnp.zeros((B, H), jnp.float32), jnp.zeros((B, H), jnp.float32))
    _, hs = lax.scan(step, carry0, jnp.swapaxes(x, 0, 1))
    return jnp.swapaxes(hs, 0, 1)


def ref_forward(x_ncw, params):
    y = lax.conv_general_dilated(
        x_ncw, params["conv_w"], window_strides=(1,), padding="VALID",
        dimension_numbers=("NCH", "OIH", "NCH"))
    y = y + params["conv_b"][None, :, None]                      # (B, 64, Tc)
    B, C, Tc = y.shape
    Tp = Tc // 2
    y = jnp.max(y[:, :, :2 * Tp].reshape(B, C, Tp, 2), axis=-1)  # (B, 64, Tp)
    h = jnp.transpose(y, (0, 2, 1))                              # (B, Tp, 64)
    h = ref_lstm(h, params["lstm1_w_ih"], params["lstm1_w_hh"],
                 params["lstm1_b_ih"], params["lstm1_b_hh"])
    h = ref_lstm(h, params["lstm2_w_ih"], params["lstm2_w_hh"],
                 params["lstm2_b_ih"], params["lstm2_b_hh"])
    return h.reshape(B, -1)


# ---------------------------------- main ------------------------------------ #

if __name__ == "__main__":
    key = jax.random.PRNGKey(0)
    B, Cin, L = 2, 2, 40            # conv out: 33 -> pool: 16 -> flatten 16*64
    H, Cout, K = 64, 64, 8

    ks = jax.random.split(key, 11)
    scale = 0.125
    u = lambda k, shape: jax.random.uniform(k, shape, jnp.float32, -scale, scale)

    params = {
        "conv_w": u(ks[0], (Cout, Cin, K)),
        "conv_b": u(ks[1], (Cout,)),
        "lstm1_w_ih": u(ks[2], (4 * H, Cout)),
        "lstm1_w_hh": u(ks[3], (4 * H, H)),
        "lstm1_b_ih": u(ks[4], (4 * H,)),
        "lstm1_b_hh": u(ks[5], (4 * H,)),
        "lstm2_w_ih": u(ks[6], (4 * H, H)),
        "lstm2_w_hh": u(ks[7], (4 * H, H)),
        "lstm2_b_ih": u(ks[8], (4 * H,)),
        "lstm2_b_hh": u(ks[9], (4 * H,)),
    }
    x = jax.random.normal(ks[10], (B, Cin, L), jnp.float32)

    prepped = prepare_params(params, Hp=128)     # one-time parameter re-layout

    out = cldnn_g_forward(x, prepped, H=H, Hp=128)
    out = jax.block_until_ready(out)

    expected_T = (L - K + 1) // 2
    assert out.shape == (B, expected_T * H), out.shape

    ref = jax.block_until_ready(ref_forward(x, params))
    max_err = float(jnp.max(jnp.abs(out - ref)))
    # Tolerance accounts for bf16 recurrent-matmul operands (f32 accumulation);
    # observed error is well below this.
    assert max_err < 5e-3, f"max abs error {max_err}"

    print("KERNEL_OK")
</pallas_src>

<mosaic_0001>
module attributes {stable_mosaic.version = 11 : i64} {
  func.func @cldnn_kernel(%arg0: memref<32x2x16xf32, #tpu.memory_space<vmem>>, %arg1: memref<16x64xf32, #tpu.memory_space<vmem>>, %arg2: memref<64x1024xf32, #tpu.memory_space<vmem>>, %arg3: memref<1x1024xf32, #tpu.memory_space<vmem>>, %arg4: memref<256x1024xbf16, #tpu.memory_space<vmem>>, %arg5: memref<16x2x128xf32, #tpu.memory_space<vmem>>) attributes {dimension_semantics = [], scalar_prefetch = 0 : i64, scratch_operands = 0 : i64, tpu.core_type = #tpu.core_type<tc>} {
    %c0 = arith.constant 0 : index
    %c0_0 = arith.constant 0 : index
    %c0_1 = arith.constant 0 : index
    %0 = vector.load %arg0[%c0, %c0_0, %c0_1] : memref<32x2x16xf32, #tpu.memory_space<vmem>>, vector<32x2x16xf32>
    %c0_2 = arith.constant 0 : index
    %c0_3 = arith.constant 0 : index
    %1 = vector.load %arg1[%c0_2, %c0_3] : memref<16x64xf32, #tpu.memory_space<vmem>>, vector<16x64xf32>
    %cst = arith.constant dense<0.000000e+00> : vector<32x2x64xf32>
    %2 = tpu.matmul %0, %1, %cst {dimension_numbers = #tpu.dot_dimension_numbers<[2], [0], [0, 1], [1], [0, 0, 0, 1, 1, 1], [], []>} : vector<32x2x16xf32>, vector<16x64xf32>, vector<32x2x64xf32> -> vector<32x2x64xf32>
    %3 = vector.extract_strided_slice %2 {offsets = [0, 0, 0], sizes = [16, 2, 64], strides = [1, 1, 1]} : vector<32x2x64xf32> to vector<16x2x64xf32>
    %4 = vector.extract_strided_slice %2 {offsets = [16, 0, 0], sizes = [16, 2, 64], strides = [1, 1, 1]} : vector<32x2x64xf32> to vector<16x2x64xf32>
    %5 = arith.maximumf %3, %4 : vector<16x2x64xf32>
    %c0_4 = arith.constant 0 : index
    %c0_5 = arith.constant 0 : index
    %6 = vector.load %arg2[%c0_4, %c0_5] : memref<64x1024xf32, #tpu.memory_space<vmem>>, vector<64x1024xf32>
    %cst_6 = arith.constant dense<0.000000e+00> : vector<16x2x1024xf32>
    %7 = tpu.matmul %5, %6, %cst_6 {dimension_numbers = #tpu.dot_dimension_numbers<[2], [0], [0, 1], [1], [0, 0, 0, 1, 1, 1], [], []>} : vector<16x2x64xf32>, vector<64x1024xf32>, vector<16x2x1024xf32> -> vector<16x2x1024xf32>
    %c0_7 = arith.constant 0 : index
    %c0_8 = arith.constant 0 : index
    %8 = vector.load %arg3[%c0_7, %c0_8] : memref<1x1024xf32, #tpu.memory_space<vmem>>, vector<1x1024xf32>
    %9 = vector.shape_cast %8 : vector<1x1024xf32> to vector<1x1x1024xf32>
    %10 = vector.broadcast %9 : vector<1x1x1024xf32> to vector<16x2x1024xf32>
    %11 = arith.addf %7, %10 : vector<16x2x1024xf32>
    %12 = vector.shape_cast %8 : vector<1x1024xf32> to vector<1x1024xf32>
    %13 = vector.broadcast %12 : vector<1x1024xf32> to vector<2x1024xf32>
    %c0_9 = arith.constant 0 : index
    %c0_10 = arith.constant 0 : index
    %14 = vector.load %arg4[%c0_9, %c0_10] : memref<256x1024xbf16, #tpu.memory_space<vmem>>, vector<256x1024xbf16>
    %15 = vector.extract_strided_slice %11 {offsets = [0, 0, 0], sizes = [1, 2, 1024], strides = [1, 1, 1]} : vector<16x2x1024xf32> to vector<1x2x1024xf32>
    %16 = vector.shape_cast %15 : vector<1x2x1024xf32> to vector<2x1024xf32>
    %17 = vector.extract_strided_slice %16 {offsets = [0, 0], sizes = [2, 128], strides = [1, 1]} : vector<2x1024xf32> to vector<2x128xf32>
    %cst_11 = arith.constant 5.000000e-01 : f32
    %18 = vector.broadcast %cst_11 : f32 to vector<2x128xf32>
    %19 = arith.mulf %18, %17 : vector<2x128xf32>
    %20 = math.tanh %19 : vector<2x128xf32>
    %cst_12 = arith.constant 5.000000e-01 : f32
    %21 = vector.broadcast %cst_12 : f32 to vector<2x128xf32>
    %22 = arith.mulf %21, %20 : vector<2x128xf32>
    %cst_13 = arith.constant 5.000000e-01 : f32
    %23 = vector.broadcast %cst_13 : f32 to vector<2x128xf32>
    %24 = arith.addf %22, %23 : vector<2x128xf32>
    %25 = vector.extract_strided_slice %16 {offsets = [0, 512], sizes = [2, 128], strides = [1, 1]} : vector<2x1024xf32> to vector<2x128xf32>
    %cst_14 = arith.constant 5.000000e-01 : f32
    %26 = vector.broadcast %cst_14 : f32 to vector<2x128xf32>
    %27 = arith.mulf %26, %25 : vector<2x128xf32>
    %28 = math.tanh %27 : vector<2x128xf32>
    %cst_15 = arith.constant 5.000000e-01 : f32
    %29 = vector.broadcast %cst_15 : f32 to vector<2x128xf32>
    %30 = arith.mulf %29, %28 : vector<2x128xf32>
    %cst_16 = arith.constant 5.000000e-01 : f32
    %31 = vector.broadcast %cst_16 : f32 to vector<2x128xf32>
    %32 = arith.addf %30, %31 : vector<2x128xf32>
    %33 = vector.extract_strided_slice %16 {offsets = [0, 768], sizes = [2, 128], strides = [1, 1]} : vector<2x1024xf32> to vector<2x128xf32>
    %cst_17 = arith.constant 5.000000e-01 : f32
    %34 = vector.broadcast %cst_17 : f32 to vector<2x128xf32>
    %35 = arith.mulf %34, %33 : vector<2x128xf32>
    %36 = math.tanh %35 : vector<2x128xf32>
    %cst_18 = arith.constant 5.000000e-01 : f32
    %37 = vector.broadcast %cst_18 : f32 to vector<2x128xf32>
    %38 = arith.mulf %37, %36 : vector<2x128xf32>
    %cst_19 = arith.constant 5.000000e-01 : f32
    %39 = vector.broadcast %cst_19 : f32 to vector<2x128xf32>
    %40 = arith.addf %38, %39 : vector<2x128xf32>
    %cst_20 = arith.constant 2.000000e+00 : f32
    %41 = vector.broadcast %cst_20 : f32 to vector<2x128xf32>
    %42 = arith.mulf %41, %40 : vector<2x128xf32>
    %cst_21 = arith.constant 1.000000e+00 : f32
    %43 = vector.broadcast %cst_21 : f32 to vector<2x128xf32>
    %44 = arith.subf %42, %43 : vector<2x128xf32>
    %45 = arith.mulf %24, %44 : vector<2x128xf32>
    %46 = math.tanh %45 : vector<2x128xf32>
    %47 = arith.mulf %32, %46 : vector<2x128xf32>
    %cst_22 = arith.constant 0.000000e+00 : f32
    %48 = vector.broadcast %cst_22 : f32 to vector<2x128xf32>
    %49 = tpu.concatenate %47, %48 in 1 : vector<2x128xf32>, vector<2x128xf32> -> vector<2x256xf32>
    %50 = tpu.concatenate %45, %48 in 1 : vector<2x128xf32>, vector<2x128xf32> -> vector<2x256xf32>
    %51 = arith.truncf %49 : vector<2x256xf32> to vector<2x256xbf16>
    %cst_23 = arith.constant dense<0.000000e+00> : vector<2x1024xf32>
    %52 = tpu.matmul %51, %14, %cst_23 {dimension_numbers = #tpu.dot_dimension_numbers<[1], [0], [0], [1], [0, 0, 1, 1], [], []>} : vector<2x256xbf16>, vector<256x1024xbf16>, vector<2x1024xf32> -> vector<2x1024xf32>
    %53 = vector.extract_strided_slice %11 {offsets = [1, 0, 0], sizes = [1, 2, 1024], strides = [1, 1, 1]} : vector<16x2x1024xf32> to vector<1x2x1024xf32>
    %54 = vector.shape_cast %53 : vector<1x2x1024xf32> to vector<2x1024xf32>
    %55 = arith.addf %52, %54 : vector<2x1024xf32>
    %cst_24 = arith.constant 5.000000e-01 : f32
    %56 = vector.broadcast %cst_24 : f32 to vector<2x1024xf32>
    %57 = arith.mulf %56, %55 : vector<2x1024xf32>
    %58 = math.tanh %57 : vector<2x1024xf32>
    %cst_25 = arith.constant 5.000000e-01 : f32
    %59 = vector.broadcast %cst_25 : f32 to vector<2x1024xf32>
    %60 = arith.mulf %59, %58 : vector<2x1024xf32>
    %cst_26 = arith.constant 5.000000e-01 : f32
    %61 = vector.broadcast %cst_26 : f32 to vector<2x1024xf32>
    %62 = arith.addf %60, %61 : vector<2x1024xf32>
    %63 = vector.extract_strided_slice %62 {offsets = [0, 0], sizes = [2, 256], strides = [1, 1]} : vector<2x1024xf32> to vector<2x256xf32>
    %64 = vector.extract_strided_slice %62 {offsets = [0, 256], sizes = [2, 256], strides = [1, 1]} : vector<2x1024xf32> to vector<2x256xf32>
    %65 = vector.extract_strided_slice %62 {offsets = [0, 512], sizes = [2, 256], strides = [1, 1]} : vector<2x1024xf32> to vector<2x256xf32>
    %66 = vector.extract_strided_slice %62 {offsets = [0, 768], sizes = [2, 256], strides = [1, 1]} : vector<2x1024xf32> to vector<2x256xf32>
    %cst_27 = arith.constant 2.000000e+00 : f32
    %67 = vector.broadcast %cst_27 : f32 to vector<2x256xf32>
    %68 = arith.mulf %67, %66 : vector<2x256xf32>
    %cst_28 = arith.constant 1.000000e+00 : f32
    %69 = vector.broadcast %cst_28 : f32 to vector<2x256xf32>
    %70 = arith.subf %68, %69 : vector<2x256xf32>
    %71 = arith.mulf %64, %50 : vector<2x256xf32>
    %72 = arith.mulf %63, %70 : vector<2x256xf32>
    %73 = arith.addf %71, %72 : vector<2x256xf32>
    %74 = math.tanh %73 : vector<2x256xf32>
    %75 = arith.mulf %65, %74 : vector<2x256xf32>
    %76 = vector.extract_strided_slice %75 {offsets = [0, 128], sizes = [2, 128], strides = [1, 1]} : vector<2x256xf32> to vector<2x128xf32>
    %c0_29 = arith.constant 0 : index
    %c0_30 = arith.constant 0 : index
    %c0_31 = arith.constant 0 : index
    %77 = vector.load %arg5[%c0_29, %c0_30, %c0_31] : memref<16x2x128xf32, #tpu.memory_space<vmem>>, vector<1x2x128xf32>
    %78 = vector.shape_cast %77 : vector<1x2x128xf32> to vector<2x128xf32>
    %79 = vector.shape_cast %76 : vector<2x128xf32> to vector<1x2x128xf32>
    tpu.vector_store %arg5[%c0_29, %c0_30, %c0_31], %79 {strides = array<i32>} : memref<16x2x128xf32, #tpu.memory_space<vmem>>, vector<1x2x128xf32>,
    %80 = arith.truncf %75 : vector<2x256xf32> to vector<2x256xbf16>
    %cst_32 = arith.constant dense<0.000000e+00> : vector<2x1024xf32>
    %81 = tpu.matmul %80, %14, %cst_32 {dimension_numbers = #tpu.dot_dimension_numbers<[1], [0], [0], [1], [0, 0, 1, 1], [], []>} : vector<2x256xbf16>, vector<256x1024xbf16>, vector<2x1024xf32> -> vector<2x1024xf32>
    %82 = vector.extract_strided_slice %11 {offsets = [2, 0, 0], sizes = [1, 2, 1024], strides = [1, 1, 1]} : vector<16x2x1024xf32> to vector<1x2x1024xf32>
    %83 = vector.shape_cast %82 : vector<1x2x1024xf32> to vector<2x1024xf32>
    %84 = arith.addf %81, %83 : vector<2x1024xf32>
    %cst_33 = arith.constant 5.000000e-01 : f32
    %85 = vector.broadcast %cst_33 : f32 to vector<2x1024xf32>
    %86 = arith.mulf %85, %84 : vector<2x1024xf32>
    %87 = math.tanh %86 : vector<2x1024xf32>
    %cst_34 = arith.constant 5.000000e-01 : f32
    %88 = vector.broadcast %cst_34 : f32 to vector<2x1024xf32>
    %89 = arith.mulf %88, %87 : vector<2x1024xf32>
    %cst_35 = arith.constant 5.000000e-01 : f32
    %90 = vector.broadcast %cst_35 : f32 to vector<2x1024xf32>
    %91 = arith.addf %89, %90 : vector<2x1024xf32>
    %92 = vector.extract_strided_slice %91 {offsets = [0, 0], sizes = [2, 256], strides = [1, 1]} : vector<2x1024xf32> to vector<2x256xf32>
    %93 = vector.extract_strided_slice %91 {offsets = [0, 256], sizes = [2, 256], strides = [1, 1]} : vector<2x1024xf32> to vector<2x256xf32>
    %94 = vector.extract_strided_slice %91 {offsets = [0, 512], sizes = [2, 256], strides = [1, 1]} : vector<2x1024xf32> to vector<2x256xf32>
    %95 = vector.extract_strided_slice %91 {offsets = [0, 768], sizes = [2, 256], strides = [1, 1]} : vector<2x1024xf32> to vector<2x256xf32>
    %cst_36 = arith.constant 2.000000e+00 : f32
    %96 = vector.broadcast %cst_36 : f32 to vector<2x256xf32>
    %97 = arith.mulf %96, %95 : vector<2x256xf32>
    %cst_37 = arith.constant 1.000000e+00 : f32
    %98 = vector.broadcast %cst_37 : f32 to vector<2x256xf32>
    %99 = arith.subf %97, %98 : vector<2x256xf32>
    %100 = arith.mulf %93, %73 : vector<2x256xf32>
    %101 = arith.mulf %92, %99 : vector<2x256xf32>
    %102 = arith.addf %100, %101 : vector<2x256xf32>
    %103 = math.tanh %102 : vector<2x256xf32>
    %104 = arith.mulf %94, %103 : vector<2x256xf32>
    %105 = vector.extract_strided_slice %104 {offsets = [0, 128], sizes = [2, 128], strides = [1, 1]} : vector<2x256xf32> to vector<2x128xf32>
    %c1 = arith.constant 1 : index
    %c0_38 = arith.constant 0 : index
    %c0_39 = arith.constant 0 : index
    %106 = vector.load %arg5[%c1, %c0_38, %c0_39] : memref<16x2x128xf32, #tpu.memory_space<vmem>>, vector<1x2x128xf32>
    %107 = vector.shape_cast %106 : vector<1x2x128xf32> to vector<2x128xf32>
    %108 = vector.shape_cast %105 : vector<2x128xf32> to vector<1x2x128xf32>
    tpu.vector_store %arg5[%c1, %c0_38, %c0_39], %108 {strides = array<i32>} : memref<16x2x128xf32, #tpu.memory_space<vmem>>, vector<1x2x128xf32>,
    %109 = arith.truncf %104 : vector<2x256xf32> to vector<2x256xbf16>
    %cst_40 = arith.constant dense<0.000000e+00> : vector<2x1024xf32>
    %110 = tpu.matmul %109, %14, %cst_40 {dimension_numbers = #tpu.dot_dimension_numbers<[1], [0], [0], [1], [0, 0, 1, 1], [], []>} : vector<2x256xbf16>, vector<256x1024xbf16>, vector<2x1024xf32> -> vector<2x1024xf32>
    %111 = vector.extract_strided_slice %11 {offsets = [3, 0, 0], sizes = [1, 2, 1024], strides = [1, 1, 1]} : vector<16x2x1024xf32> to vector<1x2x1024xf32>
    %112 = vector.shape_cast %111 : vector<1x2x1024xf32> to vector<2x1024xf32>
    %113 = arith.addf %110, %112 : vector<2x1024xf32>
    %cst_41 = arith.constant 5.000000e-01 : f32
    %114 = vector.broadcast %cst_41 : f32 to vector<2x1024xf32>
    %115 = arith.mulf %114, %113 : vector<2x1024xf32>
    %116 = math.tanh %115 : vector<2x1024xf32>
    %cst_42 = arith.constant 5.000000e-01 : f32
    %117 = vector.broadcast %cst_42 : f32 to vector<2x1024xf32>
    %118 = arith.mulf %117, %116 : vector<2x1024xf32>
    %cst_43 = arith.constant 5.000000e-01 : f32
    %119 = vector.broadcast %cst_43 : f32 to vector<2x1024xf32>
    %120 = arith.addf %118, %119 : vector<2x1024xf32>
    %121 = vector.extract_strided_slice %120 {offsets = [0, 0], sizes = [2, 256], strides = [1, 1]} : vector<2x1024xf32> to vector<2x256xf32>
    %122 = vector.extract_strided_slice %120 {offsets = [0, 256], sizes = [2, 256], strides = [1, 1]} : vector<2x1024xf32> to vector<2x256xf32>
    %123 = vector.extract_strided_slice %120 {offsets = [0, 512], sizes = [2, 256], strides = [1, 1]} : vector<2x1024xf32> to vector<2x256xf32>
    %124 = vector.extract_strided_slice %120 {offsets = [0, 768], sizes = [2, 256], strides = [1, 1]} : vector<2x1024xf32> to vector<2x256xf32>
    %cst_44 = arith.constant 2.000000e+00 : f32
    %125 = vector.broadcast %cst_44 : f32 to vector<2x256xf32>
    %126 = arith.mulf %125, %124 : vector<2x256xf32>
    %cst_45 = arith.constant 1.000000e+00 : f32
    %127 = vector.broadcast %cst_45 : f32 to vector<2x256xf32>
    %128 = arith.subf %126, %127 : vector<2x256xf32>
    %129 = arith.mulf %122, %102 : vector<2x256xf32>
    %130 = arith.mulf %121, %128 : vector<2x256xf32>
    %131 = arith.addf %129, %130 : vector<2x256xf32>
    %132 = math.tanh %131 : vector<2x256xf32>
    %133 = arith.mulf %123, %132 : vector<2x256xf32>
    %134 = vector.extract_strided_slice %133 {offsets = [0, 128], sizes = [2, 128], strides = [1, 1]} : vector<2x256xf32> to vector<2x128xf32>
    %c2 = arith.constant 2 : index
    %c0_46 = arith.constant 0 : index
    %c0_47 = arith.constant 0 : index
    %135 = vector.load %arg5[%c2, %c0_46, %c0_47] : memref<16x2x128xf32, #tpu.memory_space<vmem>>, vector<1x2x128xf32>
    %136 = vector.shape_cast %135 : vector<1x2x128xf32> to vector<2x128xf32>
    %137 = vector.shape_cast %134 : vector<2x128xf32> to vector<1x2x128xf32>
    tpu.vector_store %arg5[%c2, %c0_46, %c0_47], %137 {strides = array<i32>} : memref<16x2x128xf32, #tpu.memory_space<vmem>>, vector<1x2x128xf32>,
    %138 = arith.truncf %133 : vector<2x256xf32> to vector<2x256xbf16>
    %cst_48 = arith.constant dense<0.000000e+00> : vector<2x1024xf32>
    %139 = tpu.matmul %138, %14, %cst_48 {dimension_numbers = #tpu.dot_dimension_numbers<[1], [0], [0], [1], [0, 0, 1, 1], [], []>} : vector<2x256xbf16>, vector<256x1024xbf16>, vector<2x1024xf32> -> vector<2x1024xf32>
    %140 = vector.extract_strided_slice %11 {offsets = [4, 0, 0], sizes = [1, 2, 1024], strides = [1, 1, 1]} : vector<16x2x1024xf32> to vector<1x2x1024xf32>
    %141 = vector.shape_cast %140 : vector<1x2x1024xf32> to vector<2x1024xf32>
    %142 = arith.addf %139, %141 : vector<2x1024xf32>
    %cst_49 = arith.constant 5.000000e-01 : f32
    %143 = vector.broadcast %cst_49 : f32 to vector<2x1024xf32>
    %144 = arith.mulf %143, %142 : vector<2x1024xf32>
    %145 = math.tanh %144 : vector<2x1024xf32>
    %cst_50 = arith.constant 5.000000e-01 : f32
    %146 = vector.broadcast %cst_50 : f32 to vector<2x1024xf32>
    %147 = arith.mulf %146, %145 : vector<2x1024xf32>
    %cst_51 = arith.constant 5.000000e-01 : f32
    %148 = vector.broadcast %cst_51 : f32 to vector<2x1024xf32>
    %149 = arith.addf %147, %148 : vector<2x1024xf32>
    %150 = vector.extract_strided_slice %149 {offsets = [0, 0], sizes = [2, 256], strides = [1, 1]} : vector<2x1024xf32> to vector<2x256xf32>
    %151 = vector.extract_strided_slice %149 {offsets = [0, 256], sizes = [2, 256], strides = [1, 1]} : vector<2x1024xf32> to vector<2x256xf32>
    %152 = vector.extract_strided_slice %149 {offsets = [0, 512], sizes = [2, 256], strides = [1, 1]} : vector<2x1024xf32> to vector<2x256xf32>
    %153 = vector.extract_strided_slice %149 {offsets = [0, 768], sizes = [2, 256], strides = [1, 1]} : vector<2x1024xf32> to vector<2x256xf32>
    %cst_52 = arith.constant 2.000000e+00 : f32
    %154 = vector.broadcast %cst_52 : f32 to vector<2x256xf32>
    %155 = arith.mulf %154, %153 : vector<2x256xf32>
    %cst_53 = arith.constant 1.000000e+00 : f32
    %156 = vector.broadcast %cst_53 : f32 to vector<2x256xf32>
    %157 = arith.subf %155, %156 : vector<2x256xf32>
    %158 = arith.mulf %151, %131 : vector<2x256xf32>
    %159 = arith.mulf %150, %157 : vector<2x256xf32>
    %160 = arith.addf %158, %159 : vector<2x256xf32>
    %161 = math.tanh %160 : vector<2x256xf32>
    %162 = arith.mulf %152, %161 : vector<2x256xf32>
    %163 = vector.extract_strided_slice %162 {offsets = [0, 128], sizes = [2, 128], strides = [1, 1]} : vector<2x256xf32> to vector<2x128xf32>
    %c3 = arith.constant 3 : index
    %c0_54 = arith.constant 0 : index
    %c0_55 = arith.constant 0 : index
    %164 = vector.load %arg5[%c3, %c0_54, %c0_55] : memref<16x2x128xf32, #tpu.memory_space<vmem>>, vector<1x2x128xf32>
    %165 = vector.shape_cast %164 : vector<1x2x128xf32> to vector<2x128xf32>
    %166 = vector.shape_cast %163 : vector<2x128xf32> to vector<1x2x128xf32>
    tpu.vector_store %arg5[%c3, %c0_54, %c0_55], %166 {strides = array<i32>} : memref<16x2x128xf32, #tpu.memory_space<vmem>>, vector<1x2x128xf32>,
    %167 = arith.truncf %162 : vector<2x256xf32> to vector<2x256xbf16>
    %cst_56 = arith.constant dense<0.000000e+00> : vector<2x1024xf32>
    %168 = tpu.matmul %167, %14, %cst_56 {dimension_numbers = #tpu.dot_dimension_numbers<[1], [0], [0], [1], [0, 0, 1, 1], [], []>} : vector<2x256xbf16>, vector<256x1024xbf16>, vector<2x1024xf32> -> vector<2x1024xf32>
    %169 = vector.extract_strided_slice %11 {offsets = [5, 0, 0], sizes = [1, 2, 1024], strides = [1, 1, 1]} : vector<16x2x1024xf32> to vector<1x2x1024xf32>
    %170 = vector.shape_cast %169 : vector<1x2x1024xf32> to vector<2x1024xf32>
    %171 = arith.addf %168, %170 : vector<2x1024xf32>
    %cst_57 = arith.constant 5.000000e-01 : f32
    %172 = vector.broadcast %cst_57 : f32 to vector<2x1024xf32>
    %173 = arith.mulf %172, %171 : vector<2x1024xf32>
    %174 = math.tanh %173 : vector<2x1024xf32>
    %cst_58 = arith.constant 5.000000e-01 : f32
    %175 = vector.broadcast %cst_58 : f32 to vector<2x1024xf32>
    %176 = arith.mulf %175, %174 : vector<2x1024xf32>
    %cst_59 = arith.constant 5.000000e-01 : f32
    %177 = vector.broadcast %cst_59 : f32 to vector<2x1024xf32>
    %178 = arith.addf %176, %177 : vector<2x1024xf32>
    %179 = vector.extract_strided_slice %178 {offsets = [0, 0], sizes = [2, 256], strides = [1, 1]} : vector<2x1024xf32> to vector<2x256xf32>
    %180 = vector.extract_strided_slice %178 {offsets = [0, 256], sizes = [2, 256], strides = [1, 1]} : vector<2x1024xf32> to vector<2x256xf32>
    %181 = vector.extract_strided_slice %178 {offsets = [0, 512], sizes = [2, 256], strides = [1, 1]} : vector<2x1024xf32> to vector<2x256xf32>
    %182 = vector.extract_strided_slice %178 {offsets = [0, 768], sizes = [2, 256], strides = [1, 1]} : vector<2x1024xf32> to vector<2x256xf32>
    %cst_60 = arith.constant 2.000000e+00 : f32
    %183 = vector.broadcast %cst_60 : f32 to vector<2x256xf32>
    %184 = arith.mulf %183, %182 : vector<2x256xf32>
    %cst_61 = arith.constant 1.000000e+00 : f32
    %185 = vector.broadcast %cst_61 : f32 to vector<2x256xf32>
    %186 = arith.subf %184, %185 : vector<2x256xf32>
    %187 = arith.mulf %180, %160 : vector<2x256xf32>
    %188 = arith.mulf %179, %186 : vector<2x256xf32>
    %189 = arith.addf %187, %188 : vector<2x256xf32>
    %190 = math.tanh %189 : vector<2x256xf32>
    %191 = arith.mulf %181, %190 : vector<2x256xf32>
    %192 = vector.extract_strided_slice %191 {offsets = [0, 128], sizes = [2, 128], strides = [1, 1]} : vector<2x256xf32> to vector<2x128xf32>
    %c4 = arith.constant 4 : index
    %c0_62 = arith.constant 0 : index
    %c0_63 = arith.constant 0 : index
    %193 = vector.load %arg5[%c4, %c0_62, %c0_63] : memref<16x2x128xf32, #tpu.memory_space<vmem>>, vector<1x2x128xf32>
    %194 = vector.shape_cast %193 : vector<1x2x128xf32> to vector<2x128xf32>
    %195 = vector.shape_cast %192 : vector<2x128xf32> to vector<1x2x128xf32>
    tpu.vector_store %arg5[%c4, %c0_62, %c0_63], %195 {strides = array<i32>} : memref<16x2x128xf32, #tpu.memory_space<vmem>>, vector<1x2x128xf32>,
    %196 = arith.truncf %191 : vector<2x256xf32> to vector<2x256xbf16>
    %cst_64 = arith.constant dense<0.000000e+00> : vector<2x1024xf32>
    %197 = tpu.matmul %196, %14, %cst_64 {dimension_numbers = #tpu.dot_dimension_numbers<[1], [0], [0], [1], [0, 0, 1, 1], [], []>} : vector<2x256xbf16>, vector<256x1024xbf16>, vector<2x1024xf32> -> vector<2x1024xf32>
    %198 = vector.extract_strided_slice %11 {offsets = [6, 0, 0], sizes = [1, 2, 1024], strides = [1, 1, 1]} : vector<16x2x1024xf32> to vector<1x2x1024xf32>
    %199 = vector.shape_cast %198 : vector<1x2x1024xf32> to vector<2x1024xf32>
    %200 = arith.addf %197, %199 : vector<2x1024xf32>
    %cst_65 = arith.constant 5.000000e-01 : f32
    %201 = vector.broadcast %cst_65 : f32 to vector<2x1024xf32>
    %202 = arith.mulf %201, %200 : vector<2x1024xf32>
    %203 = math.tanh %202 : vector<2x1024xf32>
    %cst_66 = arith.constant 5.000000e-01 : f32
    %204 = vector.broadcast %cst_66 : f32 to vector<2x1024xf32>
    %205 = arith.mulf %204, %203 : vector<2x1024xf32>
    %cst_67 = arith.constant 5.000000e-01 : f32
    %206 = vector.broadcast %cst_67 : f32 to vector<2x1024xf32>
    %207 = arith.addf %205, %206 : vector<2x1024xf32>
    %208 = vector.extract_strided_slice %207 {offsets = [0, 0], sizes = [2, 256], strides = [1, 1]} : vector<2x1024xf32> to vector<2x256xf32>
    %209 = vector.extract_strided_slice %207 {offsets = [0, 256], sizes = [2, 256], strides = [1, 1]} : vector<2x1024xf32> to vector<2x256xf32>
    %210 = vector.extract_strided_slice %207 {offsets = [0, 512], sizes = [2, 256], strides = [1, 1]} : vector<2x1024xf32> to vector<2x256xf32>
    %211 = vector.extract_strided_slice %207 {offsets = [0, 768], sizes = [2, 256], strides = [1, 1]} : vector<2x1024xf32> to vector<2x256xf32>
    %cst_68 = arith.constant 2.000000e+00 : f32
    %212 = vector.broadcast %cst_68 : f32 to vector<2x256xf32>
    %213 = arith.mulf %212, %211 : vector<2x256xf32>
    %cst_69 = arith.constant 1.000000e+00 : f32
    %214 = vector.broadcast %cst_69 : f32 to vector<2x256xf32>
    %215 = arith.subf %213, %214 : vector<2x256xf32>
    %216 = arith.mulf %209, %189 : vector<2x256xf32>
    %217 = arith.mulf %208, %215 : vector<2x256xf32>
    %218 = arith.addf %216, %217 : vector<2x256xf32>
    %219 = math.tanh %218 : vector<2x256xf32>
    %220 = arith.mulf %210, %219 : vector<2x256xf32>
    %221 = vector.extract_strided_slice %220 {offsets = [0, 128], sizes = [2, 128], strides = [1, 1]} : vector<2x256xf32> to vector<2x128xf32>
    %c5 = arith.constant 5 : index
    %c0_70 = arith.constant 0 : index
    %c0_71 = arith.constant 0 : index
    %222 = vector.load %arg5[%c5, %c0_70, %c0_71] : memref<16x2x128xf32, #tpu.memory_space<vmem>>, vector<1x2x128xf32>
    %223 = vector.shape_cast %222 : vector<1x2x128xf32> to vector<2x128xf32>
    %224 = vector.shape_cast %221 : vector<2x128xf32> to vector<1x2x128xf32>
    tpu.vector_store %arg5[%c5, %c0_70, %c0_71], %224 {strides = array<i32>} : memref<16x2x128xf32, #tpu.memory_space<vmem>>, vector<1x2x128xf32>,
    %225 = arith.truncf %220 : vector<2x256xf32> to vector<2x256xbf16>
    %cst_72 = arith.constant dense<0.000000e+00> : vector<2x1024xf32>
    %226 = tpu.matmul %225, %14, %cst_72 {dimension_numbers = #tpu.dot_dimension_numbers<[1], [0], [0], [1], [0, 0, 1, 1], [], []>} : vector<2x256xbf16>, vector<256x1024xbf16>, vector<2x1024xf32> -> vector<2x1024xf32>
    %227 = vector.extract_strided_slice %11 {offsets = [7, 0, 0], sizes = [1, 2, 1024], strides = [1, 1, 1]} : vector<16x2x1024xf32> to vector<1x2x1024xf32>
    %228 = vector.shape_cast %227 : vector<1x2x1024xf32> to vector<2x1024xf32>
    %229 = arith.addf %226, %228 : vector<2x1024xf32>
    %cst_73 = arith.constant 5.000000e-01 : f32
    %230 = vector.broadcast %cst_73 : f32 to vector<2x1024xf32>
    %231 = arith.mulf %230, %229 : vector<2x1024xf32>
    %232 = math.tanh %231 : vector<2x1024xf32>
    %cst_74 = arith.constant 5.000000e-01 : f32
    %233 = vector.broadcast %cst_74 : f32 to vector<2x1024xf32>
    %234 = arith.mulf %233, %232 : vector<2x1024xf32>
    %cst_75 = arith.constant 5.000000e-01 : f32
    %235 = vector.broadcast %cst_75 : f32 to vector<2x1024xf32>
    %236 = arith.addf %234, %235 : vector<2x1024xf32>
    %237 = vector.extract_strided_slice %236 {offsets = [0, 0], sizes = [2, 256], strides = [1, 1]} : vector<2x1024xf32> to vector<2x256xf32>
    %238 = vector.extract_strided_slice %236 {offsets = [0, 256], sizes = [2, 256], strides = [1, 1]} : vector<2x1024xf32> to vector<2x256xf32>
    %239 = vector.extract_strided_slice %236 {offsets = [0, 512], sizes = [2, 256], strides = [1, 1]} : vector<2x1024xf32> to vector<2x256xf32>
    %240 = vector.extract_strided_slice %236 {offsets = [0, 768], sizes = [2, 256], strides = [1, 1]} : vector<2x1024xf32> to vector<2x256xf32>
    %cst_76 = arith.constant 2.000000e+00 : f32
    %241 = vector.broadcast %cst_76 : f32 to vector<2x256xf32>
    %242 = arith.mulf %241, %240 : vector<2x256xf32>
    %cst_77 = arith.constant 1.000000e+00 : f32
    %243 = vector.broadcast %cst_77 : f32 to vector<2x256xf32>
    %244 = arith.subf %242, %243 : vector<2x256xf32>
    %245 = arith.mulf %238, %218 : vector<2x256xf32>
    %246 = arith.mulf %237, %244 : vector<2x256xf32>
    %247 = arith.addf %245, %246 : vector<2x256xf32>
    %248 = math.tanh %247 : vector<2x256xf32>
    %249 = arith.mulf %239, %248 : vector<2x256xf32>
    %250 = vector.extract_strided_slice %249 {offsets = [0, 128], sizes = [2, 128], strides = [1, 1]} : vector<2x256xf32> to vector<2x128xf32>
    %c6 = arith.constant 6 : index
    %c0_78 = arith.constant 0 : index
    %c0_79 = arith.constant 0 : index
    %251 = vector.load %arg5[%c6, %c0_78, %c0_79] : memref<16x2x128xf32, #tpu.memory_space<vmem>>, vector<1x2x128xf32>
    %252 = vector.shape_cast %251 : vector<1x2x128xf32> to vector<2x128xf32>
    %253 = vector.shape_cast %250 : vector<2x128xf32> to vector<1x2x128xf32>
    tpu.vector_store %arg5[%c6, %c0_78, %c0_79], %253 {strides = array<i32>} : memref<16x2x128xf32, #tpu.memory_space<vmem>>, vector<1x2x128xf32>,
    %254 = arith.truncf %249 : vector<2x256xf32> to vector<2x256xbf16>
    %cst_80 = arith.constant dense<0.000000e+00> : vector<2x1024xf32>
    %255 = tpu.matmul %254, %14, %cst_80 {dimension_numbers = #tpu.dot_dimension_numbers<[1], [0], [0], [1], [0, 0, 1, 1], [], []>} : vector<2x256xbf16>, vector<256x1024xbf16>, vector<2x1024xf32> -> vector<2x1024xf32>
    %256 = vector.extract_strided_slice %11 {offsets = [8, 0, 0], sizes = [1, 2, 1024], strides = [1, 1, 1]} : vector<16x2x1024xf32> to vector<1x2x1024xf32>
    %257 = vector.shape_cast %256 : vector<1x2x1024xf32> to vector<2x1024xf32>
    %258 = arith.addf %255, %257 : vector<2x1024xf32>
    %cst_81 = arith.constant 5.000000e-01 : f32
    %259 = vector.broadcast %cst_81 : f32 to vector<2x1024xf32>
    %260 = arith.mulf %259, %258 : vector<2x1024xf32>
    %261 = math.tanh %260 : vector<2x1024xf32>
    %cst_82 = arith.constant 5.000000e-01 : f32
    %262 = vector.broadcast %cst_82 : f32 to vector<2x1024xf32>
    %263 = arith.mulf %262, %261 : vector<2x1024xf32>
    %cst_83 = arith.constant 5.000000e-01 : f32
    %264 = vector.broadcast %cst_83 : f32 to vector<2x1024xf32>
    %265 = arith.addf %263, %264 : vector<2x1024xf32>
    %266 = vector.extract_strided_slice %265 {offsets = [0, 0], sizes = [2, 256], strides = [1, 1]} : vector<2x1024xf32> to vector<2x256xf32>
    %267 = vector.extract_strided_slice %265 {offsets = [0, 256], sizes = [2, 256], strides = [1, 1]} : vector<2x1024xf32> to vector<2x256xf32>
    %268 = vector.extract_strided_slice %265 {offsets = [0, 512], sizes = [2, 256], strides = [1, 1]} : vector<2x1024xf32> to vector<2x256xf32>
    %269 = vector.extract_strided_slice %265 {offsets = [0, 768], sizes = [2, 256], strides = [1, 1]} : vector<2x1024xf32> to vector<2x256xf32>
    %cst_84 = arith.constant 2.000000e+00 : f32
    %270 = vector.broadcast %cst_84 : f32 to vector<2x256xf32>
    %271 = arith.mulf %270, %269 : vector<2x256xf32>
    %cst_85 = arith.constant 1.000000e+00 : f32
    %272 = vector.broadcast %cst_85 : f32 to vector<2x256xf32>
    %273 = arith.subf %271, %272 : vector<2x256xf32>
    %274 = arith.mulf %267, %247 : vector<2x256xf32>
    %275 = arith.mulf %266, %273 : vector<2x256xf32>
    %276 = arith.addf %274, %275 : vector<2x256xf32>
    %277 = math.tanh %276 : vector<2x256xf32>
    %278 = arith.mulf %268, %277 : vector<2x256xf32>
    %279 = vector.extract_strided_slice %278 {offsets = [0, 128], sizes = [2, 128], strides = [1, 1]} : vector<2x256xf32> to vector<2x128xf32>
    %c7 = arith.constant 7 : index
    %c0_86 = arith.constant 0 : index
    %c0_87 = arith.constant 0 : index
    %280 = vector.load %arg5[%c7, %c0_86, %c0_87] : memref<16x2x128xf32, #tpu.memory_space<vmem>>, vector<1x2x128xf32>
    %281 = vector.shape_cast %280 : vector<1x2x128xf32> to vector<2x128xf32>
    %282 = vector.shape_cast %279 : vector<2x128xf32> to vector<1x2x128xf32>
    tpu.vector_store %arg5[%c7, %c0_86, %c0_87], %282 {strides = array<i32>} : memref<16x2x128xf32, #tpu.memory_space<vmem>>, vector<1x2x128xf32>,
    %283 = arith.truncf %278 : vector<2x256xf32> to vector<2x256xbf16>
    %cst_88 = arith.constant dense<0.000000e+00> : vector<2x1024xf32>
    %284 = tpu.matmul %283, %14, %cst_88 {dimension_numbers = #tpu.dot_dimension_numbers<[1], [0], [0], [1], [0, 0, 1, 1], [], []>} : vector<2x256xbf16>, vector<256x1024xbf16>, vector<2x1024xf32> -> vector<2x1024xf32>
    %285 = vector.extract_strided_slice %11 {offsets = [9, 0, 0], sizes = [1, 2, 1024], strides = [1, 1, 1]} : vector<16x2x1024xf32> to vector<1x2x1024xf32>
    %286 = vector.shape_cast %285 : vector<1x2x1024xf32> to vector<2x1024xf32>
    %287 = arith.addf %284, %286 : vector<2x1024xf32>
    %cst_89 = arith.constant 5.000000e-01 : f32
    %288 = vector.broadcast %cst_89 : f32 to vector<2x1024xf32>
    %289 = arith.mulf %288, %287 : vector<2x1024xf32>
    %290 = math.tanh %289 : vector<2x1024xf32>
    %cst_90 = arith.constant 5.000000e-01 : f32
    %291 = vector.broadcast %cst_90 : f32 to vector<2x1024xf32>
    %292 = arith.mulf %291, %290 : vector<2x1024xf32>
    %cst_91 = arith.constant 5.000000e-01 : f32
    %293 = vector.broadcast %cst_91 : f32 to vector<2x1024xf32>
    %294 = arith.addf %292, %293 : vector<2x1024xf32>
    %295 = vector.extract_strided_slice %294 {offsets = [0, 0], sizes = [2, 256], strides = [1, 1]} : vector<2x1024xf32> to vector<2x256xf32>
    %296 = vector.extract_strided_slice %294 {offsets = [0, 256], sizes = [2, 256], strides = [1, 1]} : vector<2x1024xf32> to vector<2x256xf32>
    %297 = vector.extract_strided_slice %294 {offsets = [0, 512], sizes = [2, 256], strides = [1, 1]} : vector<2x1024xf32> to vector<2x256xf32>
    %298 = vector.extract_strided_slice %294 {offsets = [0, 768], sizes = [2, 256], strides = [1, 1]} : vector<2x1024xf32> to vector<2x256xf32>
    %cst_92 = arith.constant 2.000000e+00 : f32
    %299 = vector.broadcast %cst_92 : f32 to vector<2x256xf32>
    %300 = arith.mulf %299, %298 : vector<2x256xf32>
    %cst_93 = arith.constant 1.000000e+00 : f32
    %301 = vector.broadcast %cst_93 : f32 to vector<2x256xf32>
    %302 = arith.subf %300, %301 : vector<2x256xf32>
    %303 = arith.mulf %296, %276 : vector<2x256xf32>
    %304 = arith.mulf %295, %302 : vector<2x256xf32>
    %305 = arith.addf %303, %304 : vector<2x256xf32>
    %306 = math.tanh %305 : vector<2x256xf32>
    %307 = arith.mulf %297, %306 : vector<2x256xf32>
    %308 = vector.extract_strided_slice %307 {offsets = [0, 128], sizes = [2, 128], strides = [1, 1]} : vector<2x256xf32> to vector<2x128xf32>
    %c8 = arith.constant 8 : index
    %c0_94 = arith.constant 0 : index
    %c0_95 = arith.constant 0 : index
    %309 = vector.load %arg5[%c8, %c0_94, %c0_95] : memref<16x2x128xf32, #tpu.memory_space<vmem>>, vector<1x2x128xf32>
    %310 = vector.shape_cast %309 : vector<1x2x128xf32> to vector<2x128xf32>
    %311 = vector.shape_cast %308 : vector<2x128xf32> to vector<1x2x128xf32>
    tpu.vector_store %arg5[%c8, %c0_94, %c0_95], %311 {strides = array<i32>} : memref<16x2x128xf32, #tpu.memory_space<vmem>>, vector<1x2x128xf32>,
    %312 = arith.truncf %307 : vector<2x256xf32> to vector<2x256xbf16>
    %cst_96 = arith.constant dense<0.000000e+00> : vector<2x1024xf32>
    %313 = tpu.matmul %312, %14, %cst_96 {dimension_numbers = #tpu.dot_dimension_numbers<[1], [0], [0], [1], [0, 0, 1, 1], [], []>} : vector<2x256xbf16>, vector<256x1024xbf16>, vector<2x1024xf32> -> vector<2x1024xf32>
    %314 = vector.extract_strided_slice %11 {offsets = [10, 0, 0], sizes = [1, 2, 1024], strides = [1, 1, 1]} : vector<16x2x1024xf32> to vector<1x2x1024xf32>
    %315 = vector.shape_cast %314 : vector<1x2x1024xf32> to vector<2x1024xf32>
    %316 = arith.addf %313, %315 : vector<2x1024xf32>
    %cst_97 = arith.constant 5.000000e-01 : f32
    %317 = vector.broadcast %cst_97 : f32 to vector<2x1024xf32>
    %318 = arith.mulf %317, %316 : vector<2x1024xf32>
    %319 = math.tanh %318 : vector<2x1024xf32>
    %cst_98 = arith.constant 5.000000e-01 : f32
    %320 = vector.broadcast %cst_98 : f32 to vector<2x1024xf32>
    %321 = arith.mulf %320, %319 : vector<2x1024xf32>
    %cst_99 = arith.constant 5.000000e-01 : f32
    %322 = vector.broadcast %cst_99 : f32 to vector<2x1024xf32>
    %323 = arith.addf %321, %322 : vector<2x1024xf32>
    %324 = vector.extract_strided_slice %323 {offsets = [0, 0], sizes = [2, 256], strides = [1, 1]} : vector<2x1024xf32> to vector<2x256xf32>
    %325 = vector.extract_strided_slice %323 {offsets = [0, 256], sizes = [2, 256], strides = [1, 1]} : vector<2x1024xf32> to vector<2x256xf32>
    %326 = vector.extract_strided_slice %323 {offsets = [0, 512], sizes = [2, 256], strides = [1, 1]} : vector<2x1024xf32> to vector<2x256xf32>
    %327 = vector.extract_strided_slice %323 {offsets = [0, 768], sizes = [2, 256], strides = [1, 1]} : vector<2x1024xf32> to vector<2x256xf32>
    %cst_100 = arith.constant 2.000000e+00 : f32
    %328 = vector.broadcast %cst_100 : f32 to vector<2x256xf32>
    %329 = arith.mulf %328, %327 : vector<2x256xf32>
    %cst_101 = arith.constant 1.000000e+00 : f32
    %330 = vector.broadcast %cst_101 : f32 to vector<2x256xf32>
    %331 = arith.subf %329, %330 : vector<2x256xf32>
    %332 = arith.mulf %325, %305 : vector<2x256xf32>
    %333 = arith.mulf %324, %331 : vector<2x256xf32>
    %334 = arith.addf %332, %333 : vector<2x256xf32>
    %335 = math.tanh %334 : vector<2x256xf32>
    %336 = arith.mulf %326, %335 : vector<2x256xf32>
    %337 = vector.extract_strided_slice %336 {offsets = [0, 128], sizes = [2, 128], strides = [1, 1]} : vector<2x256xf32> to vector<2x128xf32>
    %c9 = arith.constant 9 : index
    %c0_102 = arith.constant 0 : index
    %c0_103 = arith.constant 0 : index
    %338 = vector.load %arg5[%c9, %c0_102, %c0_103] : memref<16x2x128xf32, #tpu.memory_space<vmem>>, vector<1x2x128xf32>
    %339 = vector.shape_cast %338 : vector<1x2x128xf32> to vector<2x128xf32>
    %340 = vector.shape_cast %337 : vector<2x128xf32> to vector<1x2x128xf32>
    tpu.vector_store %arg5[%c9, %c0_102, %c0_103], %340 {strides = array<i32>} : memref<16x2x128xf32, #tpu.memory_space<vmem>>, vector<1x2x128xf32>,
    %341 = arith.truncf %336 : vector<2x256xf32> to vector<2x256xbf16>
    %cst_104 = arith.constant dense<0.000000e+00> : vector<2x1024xf32>
    %342 = tpu.matmul %341, %14, %cst_104 {dimension_numbers = #tpu.dot_dimension_numbers<[1], [0], [0], [1], [0, 0, 1, 1], [], []>} : vector<2x256xbf16>, vector<256x1024xbf16>, vector<2x1024xf32> -> vector<2x1024xf32>
    %343 = vector.extract_strided_slice %11 {offsets = [11, 0, 0], sizes = [1, 2, 1024], strides = [1, 1, 1]} : vector<16x2x1024xf32> to vector<1x2x1024xf32>
    %344 = vector.shape_cast %343 : vector<1x2x1024xf32> to vector<2x1024xf32>
    %345 = arith.addf %342, %344 : vector<2x1024xf32>
    %cst_105 = arith.constant 5.000000e-01 : f32
    %346 = vector.broadcast %cst_105 : f32 to vector<2x1024xf32>
    %347 = arith.mulf %346, %345 : vector<2x1024xf32>
    %348 = math.tanh %347 : vector<2x1024xf32>
    %cst_106 = arith.constant 5.000000e-01 : f32
    %349 = vector.broadcast %cst_106 : f32 to vector<2x1024xf32>
    %350 = arith.mulf %349, %348 : vector<2x1024xf32>
    %cst_107 = arith.constant 5.000000e-01 : f32
    %351 = vector.broadcast %cst_107 : f32 to vector<2x1024xf32>
    %352 = arith.addf %350, %351 : vector<2x1024xf32>
    %353 = vector.extract_strided_slice %352 {offsets = [0, 0], sizes = [2, 256], strides = [1, 1]} : vector<2x1024xf32> to vector<2x256xf32>
    %354 = vector.extract_strided_slice %352 {offsets = [0, 256], sizes = [2, 256], strides = [1, 1]} : vector<2x1024xf32> to vector<2x256xf32>
    %355 = vector.extract_strided_slice %352 {offsets = [0, 512], sizes = [2, 256], strides = [1, 1]} : vector<2x1024xf32> to vector<2x256xf32>
    %356 = vector.extract_strided_slice %352 {offsets = [0, 768], sizes = [2, 256], strides = [1, 1]} : vector<2x1024xf32> to vector<2x256xf32>
    %cst_108 = arith.constant 2.000000e+00 : f32
    %357 = vector.broadcast %cst_108 : f32 to vector<2x256xf32>
    %358 = arith.mulf %357, %356 : vector<2x256xf32>
    %cst_109 = arith.constant 1.000000e+00 : f32
    %359 = vector.broadcast %cst_109 : f32 to vector<2x256xf32>
    %360 = arith.subf %358, %359 : vector<2x256xf32>
    %361 = arith.mulf %354, %334 : vector<2x256xf32>
    %362 = arith.mulf %353, %360 : vector<2x256xf32>
    %363 = arith.addf %361, %362 : vector<2x256xf32>
    %364 = math.tanh %363 : vector<2x256xf32>
    %365 = arith.mulf %355, %364 : vector<2x256xf32>
    %366 = vector.extract_strided_slice %365 {offsets = [0, 128], sizes = [2, 128], strides = [1, 1]} : vector<2x256xf32> to vector<2x128xf32>
    %c10 = arith.constant 10 : index
    %c0_110 = arith.constant 0 : index
    %c0_111 = arith.constant 0 : index
    %367 = vector.load %arg5[%c10, %c0_110, %c0_111] : memref<16x2x128xf32, #tpu.memory_space<vmem>>, vector<1x2x128xf32>
    %368 = vector.shape_cast %367 : vector<1x2x128xf32> to vector<2x128xf32>
    %369 = vector.shape_cast %366 : vector<2x128xf32> to vector<1x2x128xf32>
    tpu.vector_store %arg5[%c10, %c0_110, %c0_111], %369 {strides = array<i32>} : memref<16x2x128xf32, #tpu.memory_space<vmem>>, vector<1x2x128xf32>,
    %370 = arith.truncf %365 : vector<2x256xf32> to vector<2x256xbf16>
    %cst_112 = arith.constant dense<0.000000e+00> : vector<2x1024xf32>
    %371 = tpu.matmul %370, %14, %cst_112 {dimension_numbers = #tpu.dot_dimension_numbers<[1], [0], [0], [1], [0, 0, 1, 1], [], []>} : vector<2x256xbf16>, vector<256x1024xbf16>, vector<2x1024xf32> -> vector<2x1024xf32>
    %372 = vector.extract_strided_slice %11 {offsets = [12, 0, 0], sizes = [1, 2, 1024], strides = [1, 1, 1]} : vector<16x2x1024xf32> to vector<1x2x1024xf32>
    %373 = vector.shape_cast %372 : vector<1x2x1024xf32> to vector<2x1024xf32>
    %374 = arith.addf %371, %373 : vector<2x1024xf32>
    %cst_113 = arith.constant 5.000000e-01 : f32
    %375 = vector.broadcast %cst_113 : f32 to vector<2x1024xf32>
    %376 = arith.mulf %375, %374 : vector<2x1024xf32>
    %377 = math.tanh %376 : vector<2x1024xf32>
    %cst_114 = arith.constant 5.000000e-01 : f32
    %378 = vector.broadcast %cst_114 : f32 to vector<2x1024xf32>
    %379 = arith.mulf %378, %377 : vector<2x1024xf32>
    %cst_115 = arith.constant 5.000000e-01 : f32
    %380 = vector.broadcast %cst_115 : f32 to vector<2x1024xf32>
    %381 = arith.addf %379, %380 : vector<2x1024xf32>
    %382 = vector.extract_strided_slice %381 {offsets = [0, 0], sizes = [2, 256], strides = [1, 1]} : vector<2x1024xf32> to vector<2x256xf32>
    %383 = vector.extract_strided_slice %381 {offsets = [0, 256], sizes = [2, 256], strides = [1, 1]} : vector<2x1024xf32> to vector<2x256xf32>
    %384 = vector.extract_strided_slice %381 {offsets = [0, 512], sizes = [2, 256], strides = [1, 1]} : vector<2x1024xf32> to vector<2x256xf32>
    %385 = vector.extract_strided_slice %381 {offsets = [0, 768], sizes = [2, 256], strides = [1, 1]} : vector<2x1024xf32> to vector<2x256xf32>
    %cst_116 = arith.constant 2.000000e+00 : f32
    %386 = vector.broadcast %cst_116 : f32 to vector<2x256xf32>
    %387 = arith.mulf %386, %385 : vector<2x256xf32>
    %cst_117 = arith.constant 1.000000e+00 : f32
    %388 = vector.broadcast %cst_117 : f32 to vector<2x256xf32>
    %389 = arith.subf %387, %388 : vector<2x256xf32>
    %390 = arith.mulf %383, %363 : vector<2x256xf32>
    %391 = arith.mulf %382, %389 : vector<2x256xf32>
    %392 = arith.addf %390, %391 : vector<2x256xf32>
    %393 = math.tanh %392 : vector<2x256xf32>
    %394 = arith.mulf %384, %393 : vector<2x256xf32>
    %395 = vector.extract_strided_slice %394 {offsets = [0, 128], sizes = [2, 128], strides = [1, 1]} : vector<2x256xf32> to vector<2x128xf32>
    %c11 = arith.constant 11 : index
    %c0_118 = arith.constant 0 : index
    %c0_119 = arith.constant 0 : index
    %396 = vector.load %arg5[%c11, %c0_118, %c0_119] : memref<16x2x128xf32, #tpu.memory_space<vmem>>, vector<1x2x128xf32>
    %397 = vector.shape_cast %396 : vector<1x2x128xf32> to vector<2x128xf32>
    %398 = vector.shape_cast %395 : vector<2x128xf32> to vector<1x2x128xf32>
    tpu.vector_store %arg5[%c11, %c0_118, %c0_119], %398 {strides = array<i32>} : memref<16x2x128xf32, #tpu.memory_space<vmem>>, vector<1x2x128xf32>,
    %399 = arith.truncf %394 : vector<2x256xf32> to vector<2x256xbf16>
    %cst_120 = arith.constant dense<0.000000e+00> : vector<2x1024xf32>
    %400 = tpu.matmul %399, %14, %cst_120 {dimension_numbers = #tpu.dot_dimension_numbers<[1], [0], [0], [1], [0, 0, 1, 1], [], []>} : vector<2x256xbf16>, vector<256x1024xbf16>, vector<2x1024xf32> -> vector<2x1024xf32>
    %401 = vector.extract_strided_slice %11 {offsets = [13, 0, 0], sizes = [1, 2, 1024], strides = [1, 1, 1]} : vector<16x2x1024xf32> to vector<1x2x1024xf32>
    %402 = vector.shape_cast %401 : vector<1x2x1024xf32> to vector<2x1024xf32>
    %403 = arith.addf %400, %402 : vector<2x1024xf32>
    %cst_121 = arith.constant 5.000000e-01 : f32
    %404 = vector.broadcast %cst_121 : f32 to vector<2x1024xf32>
    %405 = arith.mulf %404, %403 : vector<2x1024xf32>
    %406 = math.tanh %405 : vector<2x1024xf32>
    %cst_122 = arith.constant 5.000000e-01 : f32
    %407 = vector.broadcast %cst_122 : f32 to vector<2x1024xf32>
    %408 = arith.mulf %407, %406 : vector<2x1024xf32>
    %cst_123 = arith.constant 5.000000e-01 : f32
    %409 = vector.broadcast %cst_123 : f32 to vector<2x1024xf32>
    %410 = arith.addf %408, %409 : vector<2x1024xf32>
    %411 = vector.extract_strided_slice %410 {offsets = [0, 0], sizes = [2, 256], strides = [1, 1]} : vector<2x1024xf32> to vector<2x256xf32>
    %412 = vector.extract_strided_slice %410 {offsets = [0, 256], sizes = [2, 256], strides = [1, 1]} : vector<2x1024xf32> to vector<2x256xf32>
    %413 = vector.extract_strided_slice %410 {offsets = [0, 512], sizes = [2, 256], strides = [1, 1]} : vector<2x1024xf32> to vector<2x256xf32>
    %414 = vector.extract_strided_slice %410 {offsets = [0, 768], sizes = [2, 256], strides = [1, 1]} : vector<2x1024xf32> to vector<2x256xf32>
    %cst_124 = arith.constant 2.000000e+00 : f32
    %415 = vector.broadcast %cst_124 : f32 to vector<2x256xf32>
    %416 = arith.mulf %415, %414 : vector<2x256xf32>
    %cst_125 = arith.constant 1.000000e+00 : f32
    %417 = vector.broadcast %cst_125 : f32 to vector<2x256xf32>
    %418 = arith.subf %416, %417 : vector<2x256xf32>
    %419 = arith.mulf %412, %392 : vector<2x256xf32>
    %420 = arith.mulf %411, %418 : vector<2x256xf32>
    %421 = arith.addf %419, %420 : vector<2x256xf32>
    %422 = math.tanh %421 : vector<2x256xf32>
    %423 = arith.mulf %413, %422 : vector<2x256xf32>
    %424 = vector.extract_strided_slice %423 {offsets = [0, 128], sizes = [2, 128], strides = [1, 1]} : vector<2x256xf32> to vector<2x128xf32>
    %c12 = arith.constant 12 : index
    %c0_126 = arith.constant 0 : index
    %c0_127 = arith.constant 0 : index
    %425 = vector.load %arg5[%c12, %c0_126, %c0_127] : memref<16x2x128xf32, #tpu.memory_space<vmem>>, vector<1x2x128xf32>
    %426 = vector.shape_cast %425 : vector<1x2x128xf32> to vector<2x128xf32>
    %427 = vector.shape_cast %424 : vector<2x128xf32> to vector<1x2x128xf32>
    tpu.vector_store %arg5[%c12, %c0_126, %c0_127], %427 {strides = array<i32>} : memref<16x2x128xf32, #tpu.memory_space<vmem>>, vector<1x2x128xf32>,
    %428 = arith.truncf %423 : vector<2x256xf32> to vector<2x256xbf16>
    %cst_128 = arith.constant dense<0.000000e+00> : vector<2x1024xf32>
    %429 = tpu.matmul %428, %14, %cst_128 {dimension_numbers = #tpu.dot_dimension_numbers<[1], [0], [0], [1], [0, 0, 1, 1], [], []>} : vector<2x256xbf16>, vector<256x1024xbf16>, vector<2x1024xf32> -> vector<2x1024xf32>
    %430 = vector.extract_strided_slice %11 {offsets = [14, 0, 0], sizes = [1, 2, 1024], strides = [1, 1, 1]} : vector<16x2x1024xf32> to vector<1x2x1024xf32>
    %431 = vector.shape_cast %430 : vector<1x2x1024xf32> to vector<2x1024xf32>
    %432 = arith.addf %429, %431 : vector<2x1024xf32>
    %cst_129 = arith.constant 5.000000e-01 : f32
    %433 = vector.broadcast %cst_129 : f32 to vector<2x1024xf32>
    %434 = arith.mulf %433, %432 : vector<2x1024xf32>
    %435 = math.tanh %434 : vector<2x1024xf32>
    %cst_130 = arith.constant 5.000000e-01 : f32
    %436 = vector.broadcast %cst_130 : f32 to vector<2x1024xf32>
    %437 = arith.mulf %436, %435 : vector<2x1024xf32>
    %cst_131 = arith.constant 5.000000e-01 : f32
    %438 = vector.broadcast %cst_131 : f32 to vector<2x1024xf32>
    %439 = arith.addf %437, %438 : vector<2x1024xf32>
    %440 = vector.extract_strided_slice %439 {offsets = [0, 0], sizes = [2, 256], strides = [1, 1]} : vector<2x1024xf32> to vector<2x256xf32>
    %441 = vector.extract_strided_slice %439 {offsets = [0, 256], sizes = [2, 256], strides = [1, 1]} : vector<2x1024xf32> to vector<2x256xf32>
    %442 = vector.extract_strided_slice %439 {offsets = [0, 512], sizes = [2, 256], strides = [1, 1]} : vector<2x1024xf32> to vector<2x256xf32>
    %443 = vector.extract_strided_slice %439 {offsets = [0, 768], sizes = [2, 256], strides = [1, 1]} : vector<2x1024xf32> to vector<2x256xf32>
    %cst_132 = arith.constant 2.000000e+00 : f32
    %444 = vector.broadcast %cst_132 : f32 to vector<2x256xf32>
    %445 = arith.mulf %444, %443 : vector<2x256xf32>
    %cst_133 = arith.constant 1.000000e+00 : f32
    %446 = vector.broadcast %cst_133 : f32 to vector<2x256xf32>
    %447 = arith.subf %445, %446 : vector<2x256xf32>
    %448 = arith.mulf %441, %421 : vector<2x256xf32>
    %449 = arith.mulf %440, %447 : vector<2x256xf32>
    %450 = arith.addf %448, %449 : vector<2x256xf32>
    %451 = math.tanh %450 : vector<2x256xf32>
    %452 = arith.mulf %442, %451 : vector<2x256xf32>
    %453 = vector.extract_strided_slice %452 {offsets = [0, 128], sizes = [2, 128], strides = [1, 1]} : vector<2x256xf32> to vector<2x128xf32>
    %c13 = arith.constant 13 : index
    %c0_134 = arith.constant 0 : index
    %c0_135 = arith.constant 0 : index
    %454 = vector.load %arg5[%c13, %c0_134, %c0_135] : memref<16x2x128xf32, #tpu.memory_space<vmem>>, vector<1x2x128xf32>
    %455 = vector.shape_cast %454 : vector<1x2x128xf32> to vector<2x128xf32>
    %456 = vector.shape_cast %453 : vector<2x128xf32> to vector<1x2x128xf32>
    tpu.vector_store %arg5[%c13, %c0_134, %c0_135], %456 {strides = array<i32>} : memref<16x2x128xf32, #tpu.memory_space<vmem>>, vector<1x2x128xf32>,
    %457 = arith.truncf %452 : vector<2x256xf32> to vector<2x256xbf16>
    %cst_136 = arith.constant dense<0.000000e+00> : vector<2x1024xf32>
    %458 = tpu.matmul %457, %14, %cst_136 {dimension_numbers = #tpu.dot_dimension_numbers<[1], [0], [0], [1], [0, 0, 1, 1], [], []>} : vector<2x256xbf16>, vector<256x1024xbf16>, vector<2x1024xf32> -> vector<2x1024xf32>
    %459 = vector.extract_strided_slice %11 {offsets = [15, 0, 0], sizes = [1, 2, 1024], strides = [1, 1, 1]} : vector<16x2x1024xf32> to vector<1x2x1024xf32>
    %460 = vector.shape_cast %459 : vector<1x2x1024xf32> to vector<2x1024xf32>
    %461 = arith.addf %458, %460 : vector<2x1024xf32>
    %cst_137 = arith.constant 5.000000e-01 : f32
    %462 = vector.broadcast %cst_137 : f32 to vector<2x1024xf32>
    %463 = arith.mulf %462, %461 : vector<2x1024xf32>
    %464 = math.tanh %463 : vector<2x1024xf32>
    %cst_138 = arith.constant 5.000000e-01 : f32
    %465 = vector.broadcast %cst_138 : f32 to vector<2x1024xf32>
    %466 = arith.mulf %465, %464 : vector<2x1024xf32>
    %cst_139 = arith.constant 5.000000e-01 : f32
    %467 = vector.broadcast %cst_139 : f32 to vector<2x1024xf32>
    %468 = arith.addf %466, %467 : vector<2x1024xf32>
    %469 = vector.extract_strided_slice %468 {offsets = [0, 0], sizes = [2, 256], strides = [1, 1]} : vector<2x1024xf32> to vector<2x256xf32>
    %470 = vector.extract_strided_slice %468 {offsets = [0, 256], sizes = [2, 256], strides = [1, 1]} : vector<2x1024xf32> to vector<2x256xf32>
    %471 = vector.extract_strided_slice %468 {offsets = [0, 512], sizes = [2, 256], strides = [1, 1]} : vector<2x1024xf32> to vector<2x256xf32>
    %472 = vector.extract_strided_slice %468 {offsets = [0, 768], sizes = [2, 256], strides = [1, 1]} : vector<2x1024xf32> to vector<2x256xf32>
    %cst_140 = arith.constant 2.000000e+00 : f32
    %473 = vector.broadcast %cst_140 : f32 to vector<2x256xf32>
    %474 = arith.mulf %473, %472 : vector<2x256xf32>
    %cst_141 = arith.constant 1.000000e+00 : f32
    %475 = vector.broadcast %cst_141 : f32 to vector<2x256xf32>
    %476 = arith.subf %474, %475 : vector<2x256xf32>
    %477 = arith.mulf %470, %450 : vector<2x256xf32>
    %478 = arith.mulf %469, %476 : vector<2x256xf32>
    %479 = arith.addf %477, %478 : vector<2x256xf32>
    %480 = math.tanh %479 : vector<2x256xf32>
    %481 = arith.mulf %471, %480 : vector<2x256xf32>
    %482 = vector.extract_strided_slice %481 {offsets = [0, 128], sizes = [2, 128], strides = [1, 1]} : vector<2x256xf32> to vector<2x128xf32>
    %c14 = arith.constant 14 : index
    %c0_142 = arith.constant 0 : index
    %c0_143 = arith.constant 0 : index
    %483 = vector.load %arg5[%c14, %c0_142, %c0_143] : memref<16x2x128xf32, #tpu.memory_space<vmem>>, vector<1x2x128xf32>
    %484 = vector.shape_cast %483 : vector<1x2x128xf32> to vector<2x128xf32>
    %485 = vector.shape_cast %482 : vector<2x128xf32> to vector<1x2x128xf32>
    tpu.vector_store %arg5[%c14, %c0_142, %c0_143], %485 {strides = array<i32>} : memref<16x2x128xf32, #tpu.memory_space<vmem>>, vector<1x2x128xf32>,
    %486 = arith.truncf %481 : vector<2x256xf32> to vector<2x256xbf16>
    %cst_144 = arith.constant dense<0.000000e+00> : vector<2x1024xf32>
    %487 = tpu.matmul %486, %14, %cst_144 {dimension_numbers = #tpu.dot_dimension_numbers<[1], [0], [0], [1], [0, 0, 1, 1], [], []>} : vector<2x256xbf16>, vector<256x1024xbf16>, vector<2x1024xf32> -> vector<2x1024xf32>
    %488 = arith.addf %487, %13 : vector<2x1024xf32>
    %cst_145 = arith.constant 5.000000e-01 : f32
    %489 = vector.broadcast %cst_145 : f32 to vector<2x1024xf32>
    %490 = arith.mulf %489, %488 : vector<2x1024xf32>
    %491 = math.tanh %490 : vector<2x1024xf32>
    %cst_146 = arith.constant 5.000000e-01 : f32
    %492 = vector.broadcast %cst_146 : f32 to vector<2x1024xf32>
    %493 = arith.mulf %492, %491 : vector<2x1024xf32>
    %cst_147 = arith.constant 5.000000e-01 : f32
    %494 = vector.broadcast %cst_147 : f32 to vector<2x1024xf32>
    %495 = arith.addf %493, %494 : vector<2x1024xf32>
    %496 = vector.extract_strided_slice %495 {offsets = [0, 0], sizes = [2, 256], strides = [1, 1]} : vector<2x1024xf32> to vector<2x256xf32>
    %497 = vector.extract_strided_slice %495 {offsets = [0, 256], sizes = [2, 256], strides = [1, 1]} : vector<2x1024xf32> to vector<2x256xf32>
    %498 = vector.extract_strided_slice %495 {offsets = [0, 512], sizes = [2, 256], strides = [1, 1]} : vector<2x1024xf32> to vector<2x256xf32>
    %499 = vector.extract_strided_slice %495 {offsets = [0, 768], sizes = [2, 256], strides = [1, 1]} : vector<2x1024xf32> to vector<2x256xf32>
    %cst_148 = arith.constant 2.000000e+00 : f32
    %500 = vector.broadcast %cst_148 : f32 to vector<2x256xf32>
    %501 = arith.mulf %500, %499 : vector<2x256xf32>
    %cst_149 = arith.constant 1.000000e+00 : f32
    %502 = vector.broadcast %cst_149 : f32 to vector<2x256xf32>
    %503 = arith.subf %501, %502 : vector<2x256xf32>
    %504 = arith.mulf %497, %479 : vector<2x256xf32>
    %505 = arith.mulf %496, %503 : vector<2x256xf32>
    %506 = arith.addf %504, %505 : vector<2x256xf32>
    %507 = math.tanh %506 : vector<2x256xf32>
    %508 = arith.mulf %498, %507 : vector<2x256xf32>
    %509 = vector.extract_strided_slice %508 {offsets = [0, 128], sizes = [2, 128], strides = [1, 1]} : vector<2x256xf32> to vector<2x128xf32>
    %c15 = arith.constant 15 : index
    %c0_150 = arith.constant 0 : index
    %c0_151 = arith.constant 0 : index
    %510 = vector.load %arg5[%c15, %c0_150, %c0_151] : memref<16x2x128xf32, #tpu.memory_space<vmem>>, vector<1x2x128xf32>
    %511 = vector.shape_cast %510 : vector<1x2x128xf32> to vector<2x128xf32>
    %512 = vector.shape_cast %509 : vector<2x128xf32> to vector<1x2x128xf32>
    tpu.vector_store %arg5[%c15, %c0_150, %c0_151], %512 {strides = array<i32>} : memref<16x2x128xf32, #tpu.memory_space<vmem>>, vector<1x2x128xf32>,
    return
  }
}

</mosaic_0001>

<bundles_post_ra>
// kernel: cldnn_g_forward.1
= control target key start
LH: loop header
LB: loop body
LE: loop exit
PB: predicated region body
PF: predicated region fallthrough
CT: control target
= control target key end

     0   :  { %10 = vsyncpa [#allocation3], 0  ;;  %s10936_s0 = inlined_call_operand.vmem [shape: f32[32,2,16], index: 0, kind: input, shape index: {}]   ;;  %s10937_s1 = inlined_call_operand.vmem [shape: f32[16,64], index: 1, kind: input, shape index: {}]   ;;  %s10938_s2 = inlined_call_operand.hbm [shape: f32[64,1024], index: 2, kind: input, shape index: {}]   ;;  %s10939_s3 = inlined_call_operand.vmem [shape: f32[1,1024], index: 3, kind: input, shape index: {}]   ;;  %s10940_s4 = inlined_call_operand.hbm [shape: bf16[256,1024], index: 4, kind: input, shape index: {}]   ;;  %s10941_s5 = inlined_call_operand.vmem [shape: f32[16,2,128], index: 5, kind: output, shape index: {}]  }
   0x1   :  { %s20_s20 = sshll.u32 %s10938_s2, 4  ;;  %s21_s20 = int_to_ptr.hbm [resolvable:$true] %s20_s20 }
   0x2   :  { %11 = vsyncpa [#allocation5], 0  ;;  %s7146_s21 = smov [#allocation2]   ;;  %s35_s25 = sshll.u32 %s10940_s4, 4  ;;  %s36_s25 = int_to_ptr.hbm [resolvable:$true] %s35_s25 }
   0x3   :  { %s22_s22 = sshll.u32 %s7146_s21, 4  ;;  %s7147_s26 = smov 1024   ;;  %s23_s22 = int_to_ptr.vmem [resolvable:$true] %s22_s22 }
   0x4   :  { %s7148_s27 = smov 64   ;;  %s7149_s28 = smov [#allocation4]  }
   0x5   :  { %28 = dma.hbm_to_vmem [thread:$0]  %s21_s20, 8192, %s23_s22, [#allocation3], %s7147_s26, %s7147_s26, %s7148_s27  }
   0x6   :  { %s37_s29 = sshll.u32 %s7149_s28, 4  ;;  %s7150_s30 = smov 512   ;;  %s38_s29 = int_to_ptr.vmem [resolvable:$true] %s37_s29 }
   0x7   :  { %s7151_s6 = smov 32  }
   0x8   :  { %43 = dma.hbm_to_vmem [thread:$0]  %s36_s25, 16384, %s38_s29, [#allocation5], %s7150_s30, %s7150_s30, %s7151_s6  }
   0x9   :  { %7142 = dma.done.wait [#allocation3], 8192  }
   0xa   :  { %7143 = vsyncadd [#allocation3], 4294959104 }
   0xb   :  { %7144 = dma.done.wait [#allocation5], 16384  }
   0xc   :  { %7145 = vsyncadd [#allocation5], 4294950912  ;;  %v85_v0 = vld [vmem:[%s10937_s1 + $0x8] sm:$0xff]  ;;  %v84_v1 = vld [vmem:[%s10937_s1] sm:$0xff]  ;;  %vm165_vm0 = vcmask 130048   ;;  %vm530_vm1 = vcmask 523264  }
   0xd   :  { %v52_v2 = vld [vmem:[%s10936_s0] sm:$0x3]  ;;  %196 = vmatpush.msra.mxu0 %v85_v0  ;;  %v53_v3 = vld [vmem:[%s10936_s0 + $0x2] sm:$0x3]  ;;  %v54_v4 = vld [vmem:[%s10936_s0 + $0x4] sm:$0x3] }
   0xe   :  { %v55_v5 = vld [vmem:[%s10936_s0 + $0x6] sm:$0x3]  ;;  %118 = vst [vmem:[#allocation1] ss:$4 sm:$0xff] %v52_v2  ;;  %v56_v6 = vld [vmem:[%s10936_s0 + $0x8] sm:$0x3] }
   0xf   :  { %197 = vmatpush.msra.mxu0 %v84_v1  ;;  %120 = vst [vmem:[#allocation1 + $0x1] ss:$4 sm:$0xff] %v53_v3  ;;  %v57_v7 = vld [vmem:[%s10936_s0 + $0xa] sm:$0x3]  ;;  %v58_v8 = vld [vmem:[%s10936_s0 + $0xc] sm:$0x3] }
  0x10   :  { %122 = vst [vmem:[#allocation1 + $0x2] ss:$4 sm:$0xff] %v54_v4  ;;  %v59_v9 = vld [vmem:[%s10936_s0 + $0xe] sm:$0x3]  ;;  %v60_v10 = vld [vmem:[%s10936_s0 + $0x10] sm:$0x3] }
  0x11   :  { %124 = vst [vmem:[#allocation1 + $0x3] ss:$4 sm:$0xff] %v55_v5  ;;  %v61_v11 = vld [vmem:[%s10936_s0 + $0x12] sm:$0x3]  ;;  %v62_v13 = vld [vmem:[%s10936_s0 + $0x14] sm:$0x3] }
  0x12   :  { %126 = vst [vmem:[#allocation1 + $0x20] ss:$4 sm:$0xff] %v56_v6  ;;  %v63_v14 = vld [vmem:[%s10936_s0 + $0x16] sm:$0x3]  ;;  %v64_v15 = vld [vmem:[%s10936_s0 + $0x18] sm:$0x3] }
  0x13   :  { %128 = vst [vmem:[#allocation1 + $0x21] ss:$4 sm:$0xff] %v57_v7  ;;  %v65_v16 = vld [vmem:[%s10936_s0 + $0x1a] sm:$0x3]  ;;  %v66_v17 = vld [vmem:[%s10936_s0 + $0x1c] sm:$0x3] }
  0x14   :  { %130 = vst [vmem:[#allocation1 + $0x22] ss:$4 sm:$0xff] %v58_v8  ;;  %v67_v19 = vld [vmem:[%s10936_s0 + $0x1e] sm:$0x3]  ;;  %v68_v20 = vld [vmem:[%s10936_s0 + $0x20] sm:$0x3] }
  0x15   :  { %132 = vst [vmem:[#allocation1 + $0x23] ss:$4 sm:$0xff] %v59_v9  ;;  %v69_v21 = vld [vmem:[%s10936_s0 + $0x22] sm:$0x3]  ;;  %v70_v23 = vld [vmem:[%s10936_s0 + $0x24] sm:$0x3] }
  0x16   :  { %v71_v24 = vld [vmem:[%s10936_s0 + $0x26] sm:$0x3]  ;;  %v72_v25 = vld [vmem:[%s10936_s0 + $0x28] sm:$0x3]  ;;  %v73_v26 = vld [vmem:[%s10936_s0 + $0x2a] sm:$0x3] }
  0x17   :  { %v74_v27 = vld [vmem:[%s10936_s0 + $0x2c] sm:$0x3]  ;;  %v75_v29 = vld [vmem:[%s10936_s0 + $0x2e] sm:$0x3]  ;;  %v76_v30 = vld [vmem:[%s10936_s0 + $0x30] sm:$0x3] }
  0x18   :  { %v133_v12 = vld.sshfl [vmem:[#allocation1] sm:$0xff pattern:$0x73625140]  ;;  %v77_v31 = vld [vmem:[%s10936_s0 + $0x32] sm:$0x3]  ;;  %v351_v42 = vld [vmem:[#allocation2 + $0x1c0] sm:$0xff] }
  0x19   :  { %6034 = vmatmul.msk.f32.vlgmr.msra.gmra.mxu0 %vm165_vm0, %v133_v12  ;;  %135 = vst [vmem:[#allocation1] ss:$4 sm:$0xff] %v60_v10  ;;  %v78_v33 = vld [vmem:[%s10936_s0 + $0x34] sm:$0x3]  ;;  %v79_v34 = vld [vmem:[%s10936_s0 + $0x36] sm:$0x3]  ;;  %547 = vmatpush.msra.mxu1 %v351_v42 }
  0x1a   :  { %136 = vst [vmem:[#allocation1 + $0x1] ss:$4 sm:$0xff] %v61_v11  ;;  %v80_v35 = vld [vmem:[%s10936_s0 + $0x38] sm:$0x3]  ;;  %v81_v36 = vld [vmem:[%s10936_s0 + $0x3a] sm:$0x3]  ;;  %6761 = vmatpush.msra.mxu2 %v351_v42 }
  0x1b   :  { %137 = vst [vmem:[#allocation1 + $0x2] ss:$4 sm:$0xff] %v62_v13  ;;  %v82_v37 = vld [vmem:[%s10936_s0 + $0x3c] sm:$0x3]  ;;  %v83_v39 = vld [vmem:[%s10936_s0 + $0x3e] sm:$0x3] }
  0x1c   :  { %v134_v18 = vld.sshfl [vmem:[#allocation1 + $0x20] sm:$0xff pattern:$0x73625140]  ;;  %138 = vst [vmem:[#allocation1 + $0x3] ss:$4 sm:$0xff] %v63_v14  ;;  %v353_v43 = vld [vmem:[#allocation2 + $0x1d0] sm:$0xff] }
  0x1d   :  { %139 = vst [vmem:[#allocation1 + $0x20] ss:$4 sm:$0xff] %v64_v15  ;;  %v357_v44 = vld [vmem:[#allocation2 + $0x1f0] sm:$0xff]  ;;  %605 = vmatpush.msra.mxu3 %v353_v43  ;;  %v343_v46 = vld [vmem:[#allocation2 + $0x180] sm:$0xff]  ;;  %v354_v5 = vld [vmem:[#allocation2 + $0x1d8] sm:$0xff]  ;;  %vm375_vm2 = vcmask 1041408  }
  0x1e   :  { %140 = vst [vmem:[#allocation1 + $0x21] ss:$4 sm:$0xff] %v65_v16  ;;  %721 = vmatpush.msrb.mxu0 %v357_v44  ;;  %v345_v47 = vld [vmem:[#allocation2 + $0x190] sm:$0xff]  ;;  %548 = vmatpush.msra.mxu1 %v343_v46  ;;  %v335_v49 = vld [vmem:[#allocation2 + $0x140] sm:$0xff]  ;;  %v346_v6 = vld [vmem:[#allocation2 + $0x198] sm:$0xff]  ;;  %vm377_vm3 = vcmask 1045508  }
  0x1f   :  { %141 = vst [vmem:[#allocation1 + $0x22] ss:$4 sm:$0xff] %v66_v17  ;;  %v349_v48 = vld [vmem:[#allocation2 + $0x1b0] sm:$0xff]  ;;  %606 = vmatpush.msra.mxu3 %v345_v47  ;;  %6762 = vmatpush.msra.mxu2 %v343_v46  ;;  %v327_v52 = vld [vmem:[#allocation2 + $0x100] sm:$0xff]  ;;  %v338_v7 = vld [vmem:[#allocation2 + $0x158] sm:$0xff]  ;;  %vm379_vm4 = vcmask 1043456  }
  0x20   :  { %142 = vst [vmem:[#allocation1 + $0x23] ss:$4 sm:$0xff] %v67_v19  ;;  %722 = vmatpush.msrb.mxu0 %v349_v48  ;;  %v337_v50 = vld [vmem:[#allocation2 + $0x150] sm:$0xff]  ;;  %549 = vmatpush.msra.mxu1 %v335_v49  ;;  %v319_v55 = vld [vmem:[#allocation2 + $0xc0] sm:$0xff]  ;;  %v330_v8 = vld [vmem:[#allocation2 + $0x118] sm:$0xff]  ;;  %vm833_vm5 = vcmask 1043458  }
  0x21   :  { %6035 = vmatmul.msk.f32.gmra.mxu0 %vm165_vm0, %v134_v18  ;;  %v341_v51 = vld [vmem:[#allocation2 + $0x170] sm:$0xff]  ;;  %607 = vmatpush.msra.mxu3 %v337_v50  ;;  %v311_v59 = vld [vmem:[#allocation2 + $0x80] sm:$0xff]  ;;  %v322_v10 = vld [vmem:[#allocation2 + $0xd8] sm:$0xff]  ;;  %vm835_vm6 = vcmask 1045504   ;;  %vm837_vm7 = vcmask 1045506  }
  0x22   :  { %723 = vmatpush.msrb.mxu0 %v341_v51  ;;  %v329_v53 = vld [vmem:[#allocation2 + $0x110] sm:$0xff]  ;;  %6763 = vmatpush.msra.mxu2 %v335_v49  ;;  %v303_v62 = vld [vmem:[#allocation2 + $0x40] sm:$0xff]  ;;  %v314_v11 = vld [vmem:[#allocation2 + $0x98] sm:$0xff] }
  0x23   :  { %v143_v22 = vld.sshfl [vmem:[#allocation1] sm:$0xff pattern:$0x73625140]  ;;  %v333_v54 = vld [vmem:[#allocation2 + $0x130] sm:$0xff]  ;;  %550 = vmatpush.msra.mxu1 %v327_v52  ;;  %608 = vmatpush.msra.mxu3 %v329_v53  ;;  %v295_v1 = vld [vmem:[#allocation2] sm:$0xff] }
  0x24   :  { %145 = vst [vmem:[#allocation1] ss:$4 sm:$0xff] %v68_v20  ;;  %724 = vmatpush.msrb.mxu0 %v333_v54  ;;  %v321_v56 = vld [vmem:[#allocation2 + $0xd0] sm:$0xff]  ;;  %6764 = vmatpush.msra.mxu2 %v327_v52  ;;  %v306_v16 = vld [vmem:[#allocation2 + $0x58] sm:$0xff]  ;;  %v324_v46 = vld [vmem:[#allocation2 + $0xe8] sm:$0xff] }
  0x25   :  { %146 = vst [vmem:[#allocation1 + $0x1] ss:$4 sm:$0xff] %v69_v21  ;;  %v325_v57 = vld [vmem:[#allocation2 + $0xf0] sm:$0xff]  ;;  %551 = vmatpush.msra.mxu1 %v319_v55  ;;  %609 = vmatpush.msra.mxu3 %v321_v56  ;;  %v298_v21 = vld [vmem:[#allocation2 + $0x18] sm:$0xff]  ;;  %v312_v50 = vld [vmem:[#allocation2 + $0x88] sm:$0xff] }
  0x26   :  { %147 = vst [vmem:[#allocation1 + $0x2] ss:$4 sm:$0xff] %v70_v23  ;;  %725 = vmatpush.msrb.mxu0 %v325_v57  ;;  %v313_v60 = vld [vmem:[#allocation2 + $0x90] sm:$0xff]  ;;  %6765 = vmatpush.msra.mxu2 %v319_v55  ;;  %v7318_v44 = vld [vmem:[%s10939_s3] sm:$0xff]  ;;  %v316_v51 = vld [vmem:[#allocation2 + $0xa8] sm:$0xff] }
  0x27   :  { %v144_v28 = vld.sshfl [vmem:[#allocation1 + $0x20] sm:$0xff pattern:$0x73625140]  ;;  %148 = vst [vmem:[#allocation1 + $0x3] ss:$4 sm:$0xff] %v71_v24  ;;  %v317_v61 = vld [vmem:[#allocation2 + $0xb0] sm:$0xff]  ;;  %552 = vmatpush.msra.mxu1 %v311_v59  ;;  %610 = vmatpush.msra.mxu3 %v313_v60 }
  0x28   :  { %149 = vst [vmem:[#allocation1 + $0x20] ss:$4 sm:$0xff] %v72_v25  ;;  %726 = vmatpush.msrb.mxu0 %v317_v61  ;;  %v305_v63 = vld [vmem:[#allocation2 + $0x50] sm:$0xff]  ;;  %6766 = vmatpush.msra.mxu2 %v311_v59  ;;  %v352_v25 = vld [vmem:[#allocation2 + $0x1c8] sm:$0xff]  ;;  %v10944_v54 = vperm.slane %v7318_v44, 1  ;;  %v363_v55 = vperm.slane %v7318_v44, 2 }
  0x29   :  { %6036 = vmatmul.msk.f32.gmra.mxu0 %vm165_vm0, %v143_v22  ;;  %150 = vst [vmem:[#allocation1 + $0x21] ss:$4 sm:$0xff] %v73_v26  ;;  %v309_v0 = vld [vmem:[#allocation2 + $0x70] sm:$0xff]  ;;  %553 = vmatpush.msra.mxu1 %v303_v62  ;;  %v356_v26 = vld [vmem:[#allocation2 + $0x1e8] sm:$0xff]  ;;  %v10945_v56 = vperm.slane %v7318_v44, 3 }
  0x2a   :  { %151 = vst [vmem:[#allocation1 + $0x22] ss:$4 sm:$0xff] %v74_v27  ;;  %611 = vmatpush.msra.mxu3 %v305_v63  ;;  %727 = vmatpush.msrb.mxu0 %v309_v0  ;;  %v297_v2 = vld [vmem:[#allocation2 + $0x10] sm:$0xff]  ;;  %v344_v27 = vld [vmem:[#allocation2 + $0x188] sm:$0xff] }
  0x2b   :  { %152 = vst [vmem:[#allocation1 + $0x23] ss:$4 sm:$0xff] %v75_v29  ;;  %v301_v3 = vld [vmem:[#allocation2 + $0x30] sm:$0xff]  ;;  %6767 = vmatpush.msra.mxu2 %v303_v62  ;;  %554 = vmatpush.msra.mxu1 %v295_v1  ;;  %v304_v61 = vld [vmem:[#allocation2 + $0x48] sm:$0xff] }
  0x2c   :  { %612 = vmatpush.msra.mxu3 %v297_v2  ;;  %728 = vmatpush.msrb.mxu0 %v301_v3  ;;  %11202 = vst [vmem:[#allocation8_spill] sm:$0xff] %v7318_v44  ;;  %v308_v62 = vld [vmem:[#allocation2 + $0x68] sm:$0xff] }
  0x2d   :  { %6768 = vmatpush.msra.mxu2 %v295_v1  ;;  %634 = vmatpush.msrb.mxu1 %v354_v5  ;;  %v296_v2 = vld [vmem:[#allocation2 + $0x8] sm:$0xff]  ;;  %v361_v5 = vperm.slane %v7318_v44, 0 }
  0x2e   :  { %v153_v32 = vld.sshfl [vmem:[#allocation1] sm:$0xff pattern:$0x73625140]  ;;  %692 = vmatpush.msrb.mxu3 %v356_v26  ;;  %v300_v3 = vld [vmem:[#allocation2 + $0x28] sm:$0xff] }
  0x2f   :  { %155 = vst [vmem:[#allocation1] ss:$4 sm:$0xff] %v76_v30  ;;  %635 = vmatpush.msrb.mxu1 %v346_v6  ;;  %576 = vmatpush.msrb.mxu2 %v352_v25  ;;  %v369_v6 = vrot.slane %v10944_v54, 6 }
  0x30   :  { %156 = vst [vmem:[#allocation1 + $0x1] ss:$4 sm:$0xff] %v77_v31 }
  0x31   :  { %6037 = vmatmul.msk.f32.gmra.mxu0 %vm165_vm0, %v144_v28  ;;  %157 = vst [vmem:[#allocation1 + $0x2] ss:$4 sm:$0xff] %v78_v33  ;;  %636 = vmatpush.msrb.mxu1 %v338_v7  ;;  %v348_v28 = vld [vmem:[#allocation2 + $0x1a8] sm:$0xff]  ;;  %v370_v7 = vrot.slane %v363_v55, 4  ;;  %v315_v55 = vld [vmem:[#allocation2 + $0xa0] sm:$0xff] }
  0x32   :  { %v154_v38 = vld.sshfl [vmem:[#allocation1 + $0x20] sm:$0xff pattern:$0x73625140]  ;;  %158 = vst [vmem:[#allocation1 + $0x3] ss:$4 sm:$0xff] %v79_v34  ;;  %577 = vmatpush.msrb.mxu2 %v344_v27  ;;  %693 = vmatpush.msrb.mxu3 %v348_v28  ;;  %v336_v33 = vld [vmem:[#allocation2 + $0x148] sm:$0xff] }
  0x33   :  { %159 = vst [vmem:[#allocation1 + $0x20] ss:$4 sm:$0xff] %v80_v35  ;;  %637 = vmatpush.msrb.mxu1 %v330_v8  ;;  %v340_v34 = vld [vmem:[#allocation2 + $0x168] sm:$0xff]  ;;  %v358_v8 = vld [vmem:[#allocation2 + $0x1f8] sm:$0xff] }
  0x34   :  { %160 = vst [vmem:[#allocation1 + $0x21] ss:$4 sm:$0xff] %v81_v36  ;;  %578 = vmatpush.msrb.mxu2 %v336_v33  ;;  %694 = vmatpush.msrb.mxu3 %v340_v34  ;;  %v326_v27 = vld [vmem:[#allocation2 + $0xf8] sm:$0xff] }
  0x35   :  { %161 = vst [vmem:[#allocation1 + $0x22] ss:$4 sm:$0xff] %v82_v37  ;;  %638 = vmatpush.msrb.mxu1 %v322_v10  ;;  %v310_v33 = vld [vmem:[#allocation2 + $0x78] sm:$0xff] }
  0x36   :  { %162 = vst [vmem:[#allocation1 + $0x23] ss:$4 sm:$0xff] %v83_v39  ;;  %v328_v39 = vld [vmem:[#allocation2 + $0x108] sm:$0xff]  ;;  %v302_v34 = vld [vmem:[#allocation2 + $0x38] sm:$0xff] }
  0x37   :  { %639 = vmatpush.msrb.mxu1 %v314_v11  ;;  %579 = vmatpush.msrb.mxu2 %v328_v39  ;;  %v350_v11 = vld [vmem:[#allocation2 + $0x1b8] sm:$0xff]  ;;  %v355_v39 = vld [vmem:[#allocation2 + $0x1e0] sm:$0xff] }
  0x39   :  { %6038 = vmatmul.msk.f32.gmra.mxu0 %vm165_vm0, %v153_v32  ;;  %v163_v40 = vld.sshfl [vmem:[#allocation1] sm:$0xff pattern:$0x73625140]  ;;  %640 = vmatpush.msrb.mxu1 %v306_v16 }
  0x3b   :  { %641 = vmatpush.msrb.mxu1 %v298_v21 }
  0x3d   :  { %v164_v41 = vld.sshfl [vmem:[#allocation1 + $0x20] sm:$0xff pattern:$0x73625140] }
  0x41   :  { %6039 = vmatmul.msk.f32.gmra.mxu0 %vm165_vm0, %v154_v38 }
  0x49   :  { %6040 = vmatmul.msk.f32.gmra.mxu0 %vm165_vm0, %v163_v40  ;;  %v332_v40 = vld [vmem:[#allocation2 + $0x128] sm:$0xff] }
  0x4a   :  { %695 = vmatpush.msrb.mxu3 %v332_v40  ;;  %v347_v40 = vld [vmem:[#allocation2 + $0x1a0] sm:$0xff] }
  0x4c   :  { %696 = vmatpush.msrb.mxu3 %v324_v46 }
  0x4e   :  { %697 = vmatpush.msrb.mxu3 %v316_v51 }
  0x50   :  { %698 = vmatpush.msrb.mxu3 %v308_v62 }
  0x51   :  { %6041 = vmatmul.msk.f32.gmra.mxu0 %vm165_vm0, %v164_v41 }
  0x52   :  { %699 = vmatpush.msrb.mxu3 %v300_v3 }
  0x96   :  { %v7299_v45 = vpop.f32.mrf.mxu0 }
  0x97   :  { %v231_v12 = vrot.slane %v7299_v45, 2  ;;  %v232_v13 = vrot.slane %v7299_v45, 4  ;;  %v233_v14 = vrot.slane %v7299_v45, 6 }
  0x9e   :  { %v7301_v58 = vpop.f32.mrf.mxu0 }
  0x9f   :  { %v234_v29 = vrot.slane %v7301_v58, 2  ;;  %v235_v30 = vrot.slane %v7301_v58, 4  ;;  %v236_v31 = vrot.slane %v7301_v58, 6 }
  0xa6   :  { %v7303_v4 = vpop.f32.mrf.mxu0 }
  0xa7   :  { %v237_v48 = vrot.slane %v7303_v4, 2  ;;  %v238_v49 = vrot.slane %v7303_v4, 4  ;;  %v239_v52 = vrot.slane %v7303_v4, 6 }
  0xae   :  { %v7305_v9 = vpop.f32.mrf.mxu0 }
  0xaf   :  { %v242_v26 = vrot.slane %v7305_v9, 6 }
  0xb6   :  { %v211_v15 = vpop.f32.mrf.mxu0 }
  0xb7   :  { %v243_v17 = vrot.slane %v211_v15, 2  ;;  %v244_v18 = vrot.slane %v211_v15, 4  ;;  %v245_v19 = vrot.slane %v211_v15, 6  ;;  %v279_v20 = vmax.f32 %v7299_v45, %v211_v15  ;;  %v320_v45 = vld [vmem:[#allocation2 + $0xc8] sm:$0xff] }
  0xb8   :  { %580 = vmatpush.msrb.mxu2 %v320_v45 }
  0xb9   :  { %v280_v22 = vmax.f32 %v231_v12, %v243_v17  ;;  %v281_v23 = vmax.f32 %v232_v13, %v244_v18  ;;  %v282_v24 = vmax.f32 %v233_v14, %v245_v19  ;;  %400 = vst [vmem:[#allocation1] ss:$4 sm:$0xff] %v279_v20  ;;  %v240_v12 = vrot.slane %v7305_v9, 2  ;;  %v342_v20 = vld [vmem:[#allocation2 + $0x178] sm:$0xff] }
  0xba   :  { %581 = vmatpush.msrb.mxu2 %v312_v50  ;;  %v241_v13 = vrot.slane %v7305_v9, 4  ;;  %v376_v14 = vsel %vm375_vm2, %v361_v5, %v369_v6  ;;  %v339_v50 = vld [vmem:[#allocation2 + $0x160] sm:$0xff] }
  0xbb   :  { %402 = vst [vmem:[#allocation1 + $0x1] ss:$4 sm:$0xff] %v280_v22 }
  0xbc   :  { %404 = vst [vmem:[#allocation1 + $0x2] ss:$4 sm:$0xff] %v281_v23  ;;  %582 = vmatpush.msrb.mxu2 %v304_v61 }
  0xbd   :  { %406 = vst [vmem:[#allocation1 + $0x3] ss:$4 sm:$0xff] %v282_v24  ;;  %v334_v24 = vld [vmem:[#allocation2 + $0x138] sm:$0xff] }
  0xbe   :  { %v214_v32 = vpop.f32.mrf.mxu0  ;;  %583 = vmatpush.msrb.mxu2 %v296_v2 }
  0xbf   :  { %v246_v35 = vrot.slane %v214_v32, 2  ;;  %v247_v36 = vrot.slane %v214_v32, 4  ;;  %v248_v37 = vrot.slane %v214_v32, 6  ;;  %v283_v38 = vmax.f32 %v7301_v58, %v214_v32 }
  0xc0   :  { %v10943_v32 = vperm.slane %v7318_v44, 7 }
  0xc1   :  { %v284_v41 = vmax.f32 %v234_v29, %v246_v35  ;;  %v285_v42 = vmax.f32 %v235_v30, %v247_v36  ;;  %v286_v43 = vmax.f32 %v236_v31, %v248_v37  ;;  %408 = vst [vmem:[#allocation1 + $0x20] ss:$4 sm:$0xff] %v283_v38  ;;  %v318_v30 = vld [vmem:[#allocation2 + $0xb8] sm:$0xff]  ;;  %v367_v31 = vperm.slane %v7318_v44, 6 }
  0xc2   :  { %v365_v35 = vperm.slane %v7318_v44, 4  ;;  %v374_v38 = vrot.slane %v10943_v32, 2 }
  0xc3   :  { %410 = vst [vmem:[#allocation1 + $0x21] ss:$4 sm:$0xff] %v284_v41  ;;  %v373_v37 = vrot.slane %v367_v31, 4  ;;  %v6693_v31 = vld [vmem:[#allocation4 + $0x1dc] sm:$0xf0] }
  0xc4   :  { %v7320_v47 = vld.sshfl [vmem:[#allocation1] sm:$0xff pattern:$0x73625140]  ;;  %412 = vst [vmem:[#allocation1 + $0x22] ss:$4 sm:$0xff] %v285_v42 }
  0xc5   :  { %414 = vst [vmem:[#allocation1 + $0x23] ss:$4 sm:$0xff] %v286_v43  ;;  %6042 = vmatmul.msk.f32.vlgmr.msra.gmra.mxu1 %vm530_vm1, %v7320_v47  ;;  %6050 = vmatmul.msk.f32.vlgmr.msra.gmra.mxu3 %vm530_vm1, %v7320_v47  ;;  %v382_v45 = vsel %vm377_vm3, %v373_v37, %v374_v38  ;;  %v6493_v37 = vld [vmem:[#allocation4 + $0x340] sm:$0xf] }
  0xc6   :  { %6066 = vmatmul.msk.f32.vlgmr.msrb.gmra.mxu0 %vm530_vm1, %v7320_v47  ;;  %v217_v53 = vpop.f32.mrf.mxu0  ;;  %750 = vmatpush.msra.mxu1 %v358_v8  ;;  %v6741_v38 = vld [vmem:[#allocation4 + $0x35c] sm:$0xf0] }
  0xc7   :  { %v249_v57 = vrot.slane %v217_v53, 2  ;;  %v250_v58 = vrot.slane %v217_v53, 4  ;;  %v251_v59 = vrot.slane %v217_v53, 6  ;;  %v287_v60 = vmax.f32 %v7303_v4, %v217_v53  ;;  %v323_v53 = vld [vmem:[#allocation2 + $0xe0] sm:$0xff] }
  0xc8   :  { %v371_v4 = vrot.slane %v10945_v56, 2  ;;  %751 = vmatpush.msra.mxu1 %v350_v11  ;;  %v6721_v56 = vld [vmem:[#allocation4 + $0x2c4] sm:$0xf] }
  0xc9   :  { %v288_v63 = vmax.f32 %v237_v48, %v249_v57  ;;  %v289_v0 = vmax.f32 %v238_v49, %v250_v58  ;;  %v290_v1 = vmax.f32 %v239_v52, %v251_v59  ;;  %417 = vst [vmem:[#allocation1] ss:$4 sm:$0xff] %v287_v60  ;;  %v331_v52 = vld [vmem:[#allocation2 + $0x120] sm:$0xff] }
  0xca   :  { %v378_v16 = vsel %vm377_vm3, %v370_v7, %v371_v4  ;;  %752 = vmatpush.msra.mxu1 %v342_v20  ;;  %v307_v57 = vld [vmem:[#allocation2 + $0x60] sm:$0xff] }
  0xcb   :  { %418 = vst [vmem:[#allocation1 + $0x1] ss:$4 sm:$0xff] %v288_v63  ;;  %v7354_v25 = vsel %vm379_vm4, %v376_v14, %v378_v16  ;;  %v299_v58 = vld [vmem:[#allocation2 + $0x20] sm:$0xff] }
  0xcc   :  { %v7340_v10 = vld.sshfl [vmem:[#allocation1 + $0x20] sm:$0xff pattern:$0x73625140]  ;;  %419 = vst [vmem:[#allocation1 + $0x2] ss:$4 sm:$0xff] %v289_v0  ;;  %753 = vmatpush.msra.mxu1 %v334_v24 }
  0xcd   :  { %420 = vst [vmem:[#allocation1 + $0x3] ss:$4 sm:$0xff] %v290_v1  ;;  %6043 = vmatmul.msk.f32.gmra.mxu1 %vm530_vm1, %v7340_v10  ;;  %6051 = vmatmul.msk.f32.gmra.mxu3 %vm530_vm1, %v7340_v10  ;;  %v6525_v24 = vld [vmem:[#allocation4 + $0x380] sm:$0xf] }
  0xce   :  { %6067 = vmatmul.msk.f32.gmra.mxu0 %vm530_vm1, %v7340_v10  ;;  %v220_v15 = vpop.f32.mrf.mxu0  ;;  %754 = vmatpush.msra.mxu1 %v326_v27 }
  0xcf   :  { %v252_v17 = vrot.slane %v220_v15, 2  ;;  %v253_v18 = vrot.slane %v220_v15, 4  ;;  %v291_v19 = vmax.f32 %v7305_v9, %v220_v15  ;;  %v254_v21 = vrot.slane %v220_v15, 6 }
  0xd0   :  { %v10942_v9 = vperm.slane %v7318_v44, 5  ;;  %755 = vmatpush.msra.mxu1 %v318_v30  ;;  %v6301_v30 = vld [vmem:[#allocation4 + $0x1c0] sm:$0xf]  ;;  %v6431_v44 = vld [vmem:[#allocation4 + $0x2e0] sm:$0xf0] }
  0xd1   :  { %v292_v22 = vmax.f32 %v240_v12, %v252_v17  ;;  %v293_v23 = vmax.f32 %v241_v13, %v253_v18  ;;  %421 = vst [vmem:[#allocation1 + $0x20] ss:$4 sm:$0xff] %v291_v19  ;;  %v294_v29 = vmax.f32 %v242_v26, %v254_v21  ;;  %v6557_v18 = vld [vmem:[#allocation4 + $0x3c0] sm:$0xf] }
  0xd2   :  { %756 = vmatpush.msra.mxu1 %v310_v33  ;;  %v372_v36 = vrot.slane %v10942_v9, 6  ;;  %v6757_v19 = vld [vmem:[#allocation4 + $0x3dc] sm:$0xf0]  ;;  %v7523_v33 = vor.u32 %v6693_v31, %v6301_v30  ;;  %v6673_v31 = vld [vmem:[#allocation4 + $0x144] sm:$0xf] }
  0xd3   :  { %422 = vst [vmem:[#allocation1 + $0x21] ss:$4 sm:$0xff] %v292_v22  ;;  %v7511_v21 = vor.u32 %v6757_v19, %v6557_v18  ;;  %v6749_v26 = vld [vmem:[#allocation4 + $0x39c] sm:$0xf0]  ;;  %v6745_v18 = vld [vmem:[#allocation4 + $0x384] sm:$0xf] }
  0xd4   :  { %v7357_v28 = vld.sshfl [vmem:[#allocation1] sm:$0xff pattern:$0x73625140]  ;;  %423 = vst [vmem:[#allocation1 + $0x22] ss:$4 sm:$0xff] %v293_v23  ;;  %757 = vmatpush.msra.mxu1 %v302_v34  ;;  %v381_v43 = vsel %vm375_vm2, %v365_v35, %v372_v36 }
  0xd5   :  { %427 = vst [vmem:[#allocation1] ss:$4 sm:$0xff] %v7354_v25  ;;  %6044 = vmatmul.msk.f32.vlgmr.msra.gmra.mxu2 %vm530_vm1, %v7357_v28  ;;  %6052 = vmatmul.msk.f32.gmra.mxu3 %vm530_vm1, %v7357_v28  ;;  %v7396_v51 = vsel %vm379_vm4, %v381_v43, %v382_v45  ;;  %v6689_v34 = vld [vmem:[#allocation4 + $0x1c4] sm:$0xf]  ;;  %v7534_v43 = vor.u32 %v6741_v38, %v6493_v37  ;;  %v6725_v37 = vld [vmem:[#allocation4 + $0x2dc] sm:$0xf0] }
  0xd6   :  { %429 = vst [vmem:[#allocation1 + $0x1] ss:$4 sm:$0xff] %v7354_v25  ;;  %6054 = vmatmul.msk.f32.vlgmr.msrb.gmra.mxu1 %vm530_vm1, %v7320_v47  ;;  %6068 = vmatmul.msk.f32.gmra.mxu0 %vm530_vm1, %v7357_v28  ;;  %v6303_v35 = vld [vmem:[#allocation4 + $0x1e0] sm:$0xf0] }
  0xd7   :  { %431 = vst [vmem:[#allocation1 + $0x2] ss:$4 sm:$0xff] %v7354_v25  ;;  %663 = vmatpush.msra.mxu2 %v355_v39  ;;  %1777 = vmatpush.bf16.msra.mxu3 %v7511_v21  ;;  %v6753_v39 = vld [vmem:[#allocation4 + $0x3c4] sm:$0xf] }
  0xd8   :  { %433 = vst [vmem:[#allocation1 + $0x3] ss:$4 sm:$0xff] %v7354_v25  ;;  %v6559_v45 = vld [vmem:[#allocation4 + $0x3e0] sm:$0xf0] }
  0xd9   :  { %424 = vst [vmem:[#allocation1 + $0x23] ss:$4 sm:$0xff] %v294_v29  ;;  %664 = vmatpush.msra.mxu2 %v347_v40  ;;  %v7532_v40 = vor.u32 %v6689_v34, %v6303_v35  ;;  %v6239_v34 = vld [vmem:[#allocation4 + $0x160] sm:$0xf0]  ;;  %v6429_v35 = vld [vmem:[#allocation4 + $0x2c0] sm:$0xf] }
  0xda   :  { %11207 = vst [vmem:[#allocation13_spill] sm:$0xff] %v7511_v21  ;;  %v6737_v38 = vld [vmem:[#allocation4 + $0x344] sm:$0xf] }
  0xdb   :  { %665 = vmatpush.msra.mxu2 %v339_v50  ;;  %11209 = vst [vmem:[#allocation15_spill] sm:$0xff] %v7523_v33  ;;  %v6681_v50 = vld [vmem:[#allocation4 + $0x184] sm:$0xf]  ;;  %1790 = vmatpush.bf16.msra.mxu0 %v7532_v40 }
  0xdc   :  { %11210 = vst [vmem:[#allocation16_spill] sm:$0xff] %v7532_v40  ;;  %v6079_v40 = vld [vmem:[#allocation4 + $0x20] sm:$0xf0] }
  0xdd   :  { %666 = vmatpush.msra.mxu2 %v331_v52  ;;  %11211 = vst [vmem:[#allocation17_spill] sm:$0xff] %v7534_v43 }
  0xde   :  { %6055 = vmatmul.msk.f32.gmra.mxu1 %vm530_vm1, %v7340_v10 }
  0xdf   :  { %v7381_v41 = vld.sshfl [vmem:[#allocation1] sm:$0xff pattern:$0x73625140]  ;;  %v7383_v42 = vld.sshfl [vmem:[#allocation1 + $0x8] sm:$0xff pattern:$0x73625140]  ;;  %667 = vmatpush.msra.mxu2 %v323_v53 }
  0xe0   :  { %v7387_v46 = vld.sshfl [vmem:[#allocation1 + $0x10] sm:$0xff pattern:$0x73625140]  ;;  %v7389_v48 = vld.sshfl [vmem:[#allocation1 + $0x18] sm:$0xff pattern:$0x73625140] }
  0xe1   :  { %450 = vst [vmem:[#allocation1] ss:$4 sm:$0xff] %v7354_v25  ;;  %v7392_v49 = vld.sshfl [vmem:[#allocation1 + $0x20] sm:$0xff pattern:$0x73625140]  ;;  %668 = vmatpush.msra.mxu2 %v315_v55 }
  0xe2   :  { %451 = vst [vmem:[#allocation1 + $0x1] ss:$4 sm:$0xff] %v7354_v25  ;;  %6045 = vmatmul.msk.f32.gmra.mxu2 %vm530_vm1, %v7392_v49  ;;  %6053 = vmatmul.msk.f32.gmra.mxu3 %vm530_vm1, %v7392_v49  ;;  %v6271_v55 = vld [vmem:[#allocation4 + $0x1a0] sm:$0xf0] }
  0xe3   :  { %452 = vst [vmem:[#allocation1 + $0x2] ss:$4 sm:$0xff] %v7354_v25  ;;  %6069 = vmatmul.msk.f32.gmra.mxu0 %vm530_vm1, %v7392_v49  ;;  %669 = vmatpush.msra.mxu2 %v307_v57  ;;  %v7547_v57 = vor.u32 %v6681_v50, %v6271_v55  ;;  %v6205_v55 = vld [vmem:[#allocation4 + $0x100] sm:$0xf] }
  0xe4   :  { %453 = vst [vmem:[#allocation1 + $0x3] ss:$4 sm:$0xff] %v7354_v25 }
  0xe5   :  { %435 = vst [vmem:[#allocation1 + $0x20] ss:$4 sm:$0xff] %v7396_v51  ;;  %670 = vmatpush.msra.mxu2 %v299_v58  ;;  %v6461_v58 = vld [vmem:[#allocation4 + $0x300] sm:$0xf]  ;;  %1791 = vmatpush.bf16.msra.mxu0 %v7547_v57 }
  0xe6   :  { %437 = vst [vmem:[#allocation1 + $0x21] ss:$4 sm:$0xff] %v7396_v51  ;;  %6056 = vmatmul.msk.f32.gmra.mxu1 %vm530_vm1, %v7357_v28 }
  0xe7   :  { %439 = vst [vmem:[#allocation1 + $0x22] ss:$4 sm:$0xff] %v7396_v51 }
  0xe8   :  { %441 = vst [vmem:[#allocation1 + $0x23] ss:$4 sm:$0xff] %v7396_v51 }
  0xe9   :  { %11214 = vst [vmem:[#allocation20_spill] sm:$0xff] %v7547_v57  ;;  %v6641_v57 = vld [vmem:[#allocation4 + $0x44] sm:$0xf] }
  0xea   :  { %6046 = vmatmul.msk.f32.vlgmr.msrb.gmra.mxu2 %vm530_vm1, %v7320_v47  ;;  %6062 = vmatmul.msk.f32.vlgmr.msrb.gmra.mxu3 %vm530_vm1, %v7320_v47 }
  0xeb   :  { %v7416_v59 = vld.sshfl [vmem:[#allocation1] sm:$0xff pattern:$0x73625140]  ;;  %v7418_v60 = vld.sshfl [vmem:[#allocation1 + $0x8] sm:$0xff pattern:$0x73625140]  ;;  %1764 = vmatpush.bf16.msrb.mxu2 %v7523_v33 }
  0xec   :  { %v7420_v61 = vld.sshfl [vmem:[#allocation1 + $0x10] sm:$0xff pattern:$0x73625140]  ;;  %v7422_v62 = vld.sshfl [vmem:[#allocation1 + $0x18] sm:$0xff pattern:$0x73625140] }
  0xed   :  { %466 = vst [vmem:[#allocation1] ss:$4 sm:$0xff] %v7354_v25 }
  0xee   :  { %467 = vst [vmem:[#allocation1 + $0x1] ss:$4 sm:$0xff] %v7354_v25  ;;  %6057 = vmatmul.msk.f32.gmra.mxu1 %vm530_vm1, %v7392_v49 }
  0xef   :  { %468 = vst [vmem:[#allocation1 + $0x2] ss:$4 sm:$0xff] %v7354_v25  ;;  %v7429_v63 = vld.sshfl [vmem:[#allocation1 + $0x20] sm:$0xff pattern:$0x73625140] }
  0xf0   :  { %469 = vst [vmem:[#allocation1 + $0x3] ss:$4 sm:$0xff] %v7354_v25  ;;  %v7432_v0 = vld.sshfl [vmem:[#allocation1 + $0x28] sm:$0xff pattern:$0x73625140] }
  0xf1   :  { %v7434_v1 = vld.sshfl [vmem:[#allocation1 + $0x30] sm:$0xff pattern:$0x73625140]  ;;  %v7436_v2 = vld.sshfl [vmem:[#allocation1 + $0x38] sm:$0xff pattern:$0x73625140] }
  0xf2   :  { %454 = vst [vmem:[#allocation1 + $0x20] ss:$4 sm:$0xff] %v7396_v51  ;;  %6047 = vmatmul.msk.f32.gmra.mxu2 %vm530_vm1, %v7340_v10  ;;  %6063 = vmatmul.msk.f32.gmra.mxu3 %vm530_vm1, %v7340_v10 }
  0xf3   :  { %455 = vst [vmem:[#allocation1 + $0x21] ss:$4 sm:$0xff] %v7396_v51 }
  0xf4   :  { %456 = vst [vmem:[#allocation1 + $0x22] ss:$4 sm:$0xff] %v7396_v51 }
  0xf5   :  { %457 = vst [vmem:[#allocation1 + $0x23] ss:$4 sm:$0xff] %v7396_v51 }
  0xf6   :  { %6070 = vmatmul.msk.f32.vlgmr.msra.gmra.mxu1 %vm530_vm1, %v7320_v47 }
  0xf7   :  { %v7493_v13 = vld.sshfl [vmem:[#allocation1 + $0x10] sm:$0xff pattern:$0x73625140]  ;;  %v7500_v14 = vld.sshfl [vmem:[#allocation1 + $0x18] sm:$0xff pattern:$0x73625140] }
  0xfa   :  { %6048 = vmatmul.msk.f32.gmra.mxu2 %vm530_vm1, %v7357_v28  ;;  %6064 = vmatmul.msk.f32.gmra.mxu3 %vm530_vm1, %v7357_v28 }
  0xfc   :  { %v7452_v3 = vld.sshfl [vmem:[#allocation1 + $0x20] sm:$0xff pattern:$0x73625140]  ;;  %v7454_v5 = vld.sshfl [vmem:[#allocation1 + $0x28] sm:$0xff pattern:$0x73625140] }
  0xfd   :  { %v7456_v6 = vld.sshfl [vmem:[#allocation1 + $0x30] sm:$0xff pattern:$0x73625140]  ;;  %v7458_v7 = vld.sshfl [vmem:[#allocation1 + $0x38] sm:$0xff pattern:$0x73625140] }
  0xfe   :  { %470 = vst [vmem:[#allocation1 + $0x20] ss:$4 sm:$0xff] %v7396_v51  ;;  %6071 = vmatmul.msk.f32.gmra.mxu1 %vm530_vm1, %v7340_v10 }
  0xff   :  { %471 = vst [vmem:[#allocation1 + $0x21] ss:$4 sm:$0xff] %v7396_v51 }
 0x100   :  { %472 = vst [vmem:[#allocation1 + $0x22] ss:$4 sm:$0xff] %v7396_v51 }
 0x101   :  { %473 = vst [vmem:[#allocation1 + $0x23] ss:$4 sm:$0xff] %v7396_v51 }
 0x102   :  { %6049 = vmatmul.msk.f32.gmra.mxu2 %vm530_vm1, %v7392_v49  ;;  %6065 = vmatmul.msk.f32.gmra.mxu3 %vm530_vm1, %v7392_v49 }
 0x106   :  { %6072 = vmatmul.msk.f32.gmra.mxu1 %vm530_vm1, %v7357_v28 }
 0x108   :  { %v7482_v4 = vld.sshfl [vmem:[#allocation1 + $0x30] sm:$0xff pattern:$0x73625140]  ;;  %v7484_v8 = vld.sshfl [vmem:[#allocation1 + $0x20] sm:$0xff pattern:$0x73625140] }
 0x109   :  { %11203 = vst [vmem:[#allocation9_spill] sm:$0xff] %v7482_v4  ;;  %v7486_v11 = vld.sshfl [vmem:[#allocation1 + $0x28] sm:$0xff pattern:$0x73625140]  ;;  %v6738_v4 = vld [vmem:[#allocation4 + $0x34c] sm:$0xf] }
 0x10a   :  { %6058 = vmatmul.msk.f32.vlgmr.msra.gmra.mxu2 %vm530_vm1, %v7320_v47  ;;  %11204 = vst [vmem:[#allocation10_spill] sm:$0xff] %v7484_v8  ;;  %v7488_v12 = vld.sshfl [vmem:[#allocation1 + $0x38] sm:$0xff pattern:$0x73625140]  ;;  %v6309_v8 = vld [vmem:[#allocation4 + $0x1c8] sm:$0xf] }
 0x10b   :  { %11205 = vst [vmem:[#allocation11_spill] sm:$0xff] %v7486_v11  ;;  %v7490_v47 = vld.sshfl [vmem:[#allocation1] sm:$0xff pattern:$0x73625140]  ;;  %v6726_v11 = vld [vmem:[#allocation4 + $0x2e4] sm:$0xf0] }
 0x10c   :  { %11206 = vst [vmem:[#allocation12_spill] sm:$0xff] %v7488_v12 }
 0x10d   :  { %486 = vst [vmem:[#allocation1 + $0x20] ss:$4 sm:$0xff] %v7396_v51 }
 0x10e   :  { %6073 = vmatmul.msk.f32.gmra.mxu1 %vm530_vm1, %v7392_v49  ;;  %487 = vst [vmem:[#allocation1 + $0x21] ss:$4 sm:$0xff] %v7396_v51 }
 0x10f   :  { %488 = vst [vmem:[#allocation1 + $0x22] ss:$4 sm:$0xff] %v7396_v51 }
 0x110   :  { %489 = vst [vmem:[#allocation1 + $0x23] ss:$4 sm:$0xff] %v7396_v51 }
 0x112   :  { %6059 = vmatmul.msk.f32.gmra.mxu2 %vm530_vm1, %v7340_v10  ;;  %v7497_v10 = vld.sshfl [vmem:[#allocation1 + $0x8] sm:$0xff pattern:$0x73625140] }
 0x113   :  { %482 = vst [vmem:[#allocation1] ss:$4 sm:$0xff] %v7354_v25 }
 0x114   :  { %483 = vst [vmem:[#allocation1 + $0x1] ss:$4 sm:$0xff] %v7354_v25 }
 0x115   :  { %484 = vst [vmem:[#allocation1 + $0x2] ss:$4 sm:$0xff] %v7354_v25 }
 0x116   :  { %485 = vst [vmem:[#allocation1 + $0x3] ss:$4 sm:$0xff] %v7354_v25  ;;  %v7517_v25 = vor.u32 %v6749_v26, %v6525_v24  ;;  %v6677_v24 = vld [vmem:[#allocation4 + $0x15c] sm:$0xf0] }
 0x118   :  { %11208 = vst [vmem:[#allocation14_spill] sm:$0xff] %v7517_v25  ;;  %1778 = vmatpush.bf16.msra.mxu3 %v7517_v25 }
 0x11a   :  { %6060 = vmatmul.msk.f32.gmra.mxu2 %vm530_vm1, %v7357_v28 }
 0x11c   :  { %1779 = vmatpush.bf16.msra.mxu3 %v7534_v43 }
 0x122   :  { %6061 = vmatmul.msk.f32.gmra.mxu2 %vm530_vm1, %v7392_v49  ;;  %v6685_v49 = vld [vmem:[#allocation4 + $0x19c] sm:$0xf0] }
 0x142   :  { %v7504_v15 = vpop.f32.mrf.mxu1 }
 0x148   :  { %v614_v17 = vpop.f32.mrf.mxu3 }
 0x149   :  { %v615_v20 = vadd.f32 %v614_v17, %v7387_v46  ;;  %v7536_v46 = vor.u32 %v6753_v39, %v6559_v45  ;;  %v6733_v17 = vld [vmem:[#allocation4 + $0x31c] sm:$0xf0]  ;;  %v7560_v39 = vor.u32 %v6673_v31, %v6239_v34  ;;  %v7562_v45 = vor.u32 %v6725_v37, %v6429_v35 }
 0x14a   :  { %v7508_v16 = vpop.f32.mrf.mxu1  ;;  %v7550_v19 = vor.u32 %v6733_v17, %v6461_v58  ;;  %v6669_v58 = vld [vmem:[#allocation4 + $0x11c] sm:$0xf0]  ;;  %v6665_v17 = vld [vmem:[#allocation4 + $0x104] sm:$0xf] }
 0x14b   :  { %v7519_v28 = vrot.slane %v615_v20, 4  ;;  %11212 = vst [vmem:[#allocation18_spill] sm:$0xff] %v7536_v46  ;;  %1803 = vmatpush.bf16.msrb.mxu1 %v7536_v46  ;;  %v6527_v20 = vld [vmem:[#allocation4 + $0x3a0] sm:$0xf0]  ;;  %1792 = vmatpush.bf16.msra.mxu0 %v7560_v39  ;;  %v6397_v34 = vld [vmem:[#allocation4 + $0x280] sm:$0xf] }
 0x14c   :  { %11215 = vst [vmem:[#allocation21_spill] sm:$0xff] %v7550_v19  ;;  %1780 = vmatpush.bf16.msra.mxu3 %v7550_v19  ;;  %v6717_v35 = vld [vmem:[#allocation4 + $0x29c] sm:$0xf0] }
 0x14d   :  { %11218 = vst [vmem:[#allocation24_spill] sm:$0xff] %v7560_v39  ;;  %v7578_v37 = vor.u32 %v6717_v35, %v6397_v34  ;;  %v6649_v39 = vld [vmem:[#allocation4 + $0x84] sm:$0xf] }
 0x14e   :  { %11219 = vst [vmem:[#allocation25_spill] sm:$0xff] %v7562_v45 }
 0x14f   :  { %11224 = vst [vmem:[#allocation30_spill] sm:$0xff] %v7578_v37 }
 0x150   :  { %v7515_v27 = vpop.f32.mrf.mxu3  ;;  %1781 = vmatpush.bf16.msra.mxu3 %v7562_v45 }
 0x153   :  { %v643_v22 = vpop.f32.mrf.mxu1 }
 0x154   :  { %v644_v23 = vadd.f32 %v643_v22, %v7389_v48  ;;  %v6269_v48 = vld [vmem:[#allocation4 + $0x180] sm:$0xf]  ;;  %v7552_v22 = vor.u32 %v6745_v18, %v6527_v20  ;;  %v7568_v20 = vor.u32 %v6669_v58, %v6205_v55  ;;  %1782 = vmatpush.bf16.msra.mxu3 %v7578_v37 }
 0x155   :  { %v7543_v53 = vor.u32 %v6685_v49, %v6269_v48  ;;  %v6495_v48 = vld [vmem:[#allocation4 + $0x360] sm:$0xf0]  ;;  %v6173_v58 = vld [vmem:[#allocation4 + $0xc0] sm:$0xf] }
 0x156   :  { %v7521_v29 = vrot.slane %v644_v23, 2  ;;  %11216 = vst [vmem:[#allocation22_spill] sm:$0xff] %v7552_v22  ;;  %v6237_v23 = vld [vmem:[#allocation4 + $0x140] sm:$0xf]  ;;  %1804 = vmatpush.bf16.msrb.mxu1 %v7552_v22  ;;  %v7565_v50 = vor.u32 %v6737_v38, %v6495_v48  ;;  %v6463_v38 = vld [vmem:[#allocation4 + $0x320] sm:$0xf0] }
 0x157   :  { %11213 = vst [vmem:[#allocation19_spill] sm:$0xff] %v7543_v53  ;;  %1765 = vmatpush.bf16.msrb.mxu2 %v7543_v53  ;;  %v7555_v30 = vor.u32 %v6677_v24, %v6237_v23  ;;  %v6207_v23 = vld [vmem:[#allocation4 + $0x120] sm:$0xf0] }
 0x158   :  { %v7528_v36 = vsel %vm833_vm5, %v7519_v28, %v7521_v29  ;;  %v7538_v51 = vpop.f32.mrf.mxu2  ;;  %v620_v26 = vpop.f32.mrf.mxu3  ;;  %11220 = vst [vmem:[#allocation26_spill] sm:$0xff] %v7565_v50  ;;  %v7572_v31 = vor.u32 %v6665_v17, %v6207_v23  ;;  %v6661_v17 = vld [vmem:[#allocation4 + $0xdc] sm:$0xf0]  ;;  %v6175_v23 = vld [vmem:[#allocation4 + $0xe0] sm:$0xf0] }
 0x159   :  { %11217 = vst [vmem:[#allocation23_spill] sm:$0xff] %v7555_v30  ;;  %v621_v49 = vadd.f32 %v620_v26, %v7493_v13  ;;  %v6729_v13 = vld [vmem:[#allocation4 + $0x304] sm:$0xf] }
 0x15a   :  { %11221 = vst [vmem:[#allocation27_spill] sm:$0xff] %v7568_v20  ;;  %1805 = vmatpush.bf16.msrb.mxu1 %v7565_v50  ;;  %1793 = vmatpush.bf16.msra.mxu0 %v7572_v31 }
 0x15b   :  { %v7540_v52 = vpop.f32.mrf.mxu1  ;;  %1766 = vmatpush.bf16.msrb.mxu2 %v7555_v30  ;;  %11222 = vst [vmem:[#allocation28_spill] sm:$0xff] %v7572_v31  ;;  %v816_v48 = vrot.slane %v621_v49, 4  ;;  %v6365_v49 = vld [vmem:[#allocation4 + $0x240] sm:$0xf] }
 0x15c   :  { %v6141_v31 = vld [vmem:[#allocation4 + $0x80] sm:$0xf] }
 0x15d   :  { %v6645_v30 = vld [vmem:[#allocation4 + $0x5c] sm:$0xf0] }
 0x15f   :  { %1767 = vmatpush.bf16.msrb.mxu2 %v7568_v20  ;;  %v6653_v20 = vld [vmem:[#allocation4 + $0x9c] sm:$0xf0] }
 0x163   :  { %v649_v18 = vpop.f32.mrf.mxu1 }
 0x164   :  { %v650_v24 = vadd.f32 %v649_v18, %v7500_v14  ;;  %v7580_v14 = vor.u32 %v6729_v13, %v6463_v38  ;;  %v6657_v18 = vld [vmem:[#allocation4 + $0xc4] sm:$0xf]  ;;  %v7597_v13 = vor.u32 %v6661_v17, %v6173_v58  ;;  %v6333_v17 = vld [vmem:[#allocation4 + $0x200] sm:$0xf] }
 0x165   :  { %v7574_v26 = vpop.f32.mrf.mxu2  ;;  %v7599_v38 = vor.u32 %v6657_v18, %v6175_v23  ;;  %v6701_v18 = vld [vmem:[#allocation4 + $0x21c] sm:$0xf0]  ;;  %v6713_v23 = vld [vmem:[#allocation4 + $0x284] sm:$0xf] }
 0x166   :  { %11223 = vst [vmem:[#allocation29_spill] sm:$0xff] %v7574_v26  ;;  %v817_v55 = vrot.slane %v650_v24, 2  ;;  %v6709_v24 = vld [vmem:[#allocation4 + $0x25c] sm:$0xf0]  ;;  %1806 = vmatpush.bf16.msrb.mxu1 %v7580_v14  ;;  %v7603_v26 = vor.u32 %v6721_v56, %v6431_v44  ;;  %1768 = vmatpush.bf16.msrb.mxu2 %v7597_v13  ;;  %v7613_v44 = vor.u32 %v6701_v18, %v6333_v17  ;;  %v6399_v56 = vld [vmem:[#allocation4 + $0x2a0] sm:$0xf0] }
 0x167   :  { %11225 = vst [vmem:[#allocation31_spill] sm:$0xff] %v7580_v14  ;;  %v7601_v54 = vor.u32 %v6709_v24, %v6365_v49  ;;  %1794 = vmatpush.bf16.msra.mxu0 %v7599_v38  ;;  %v6565_v24 = vld [vmem:[#allocation4 + $0x3c8] sm:$0xf]  ;;  %v6111_v17 = vld [vmem:[#allocation4 + $0x60] sm:$0xf0]  ;;  %v7626_v18 = vadd.f32 %v7504_v15, %v7381_v41  ;;  %v836_v41 = vsel %vm835_vm6, %v7521_v29, %v7519_v28 }
 0x168   :  { %v7584_v9 = vsel %vm377_vm3, %v816_v48, %v817_v55  ;;  %v7587_v32 = vsel %vm835_vm6, %v817_v55, %v816_v48  ;;  %v7590_v34 = vsel %vm375_vm2, %v816_v48, %v817_v55  ;;  %v7594_v35 = vsel %vm833_vm5, %v816_v48, %v817_v55  ;;  %11226 = vst [vmem:[#allocation32_spill] sm:$0xff] %v7597_v13  ;;  %v6143_v55 = vld [vmem:[#allocation4 + $0xa0] sm:$0xf0]  ;;  %v6758_v13 = vld [vmem:[#allocation4 + $0x3e4] sm:$0xf0] }
 0x169   :  { %11227 = vst [vmem:[#allocation33_spill] sm:$0xff] %v7599_v38  ;;  %v7607_v48 = vor.u32 %v6653_v20, %v6141_v31  ;;  %1783 = vmatpush.bf16.msra.mxu3 %v7601_v54  ;;  %v7610_v58 = vor.u32 %v6649_v39, %v6143_v55  ;;  %v7616_v20 = vor.u32 %v6713_v23, %v6399_v56  ;;  %v6109_v31 = vld [vmem:[#allocation4 + $0x40] sm:$0xf]  ;;  %v6367_v23 = vld [vmem:[#allocation4 + $0x260] sm:$0xf0] }
 0x16a   :  { %11228 = vst [vmem:[#allocation34_spill] sm:$0xff] %v7601_v54  ;;  %1807 = vmatpush.bf16.msrb.mxu1 %v7603_v26  ;;  %v7620_v39 = vor.u32 %v6758_v13, %v6565_v24  ;;  %v7622_v55 = vor.u32 %v6645_v30, %v6109_v31  ;;  %v7635_v13 = vor.u32 %v6641_v57, %v6111_v17  ;;  %v6705_v30 = vld [vmem:[#allocation4 + $0x244] sm:$0xf]  ;;  %v6750_v56 = vld [vmem:[#allocation4 + $0x3a4] sm:$0xf0] }
 0x16b   :  { %11229 = vst [vmem:[#allocation35_spill] sm:$0xff] %v7603_v26  ;;  %1769 = vmatpush.bf16.msrb.mxu2 %v7607_v48  ;;  %1795 = vmatpush.bf16.msra.mxu0 %v7610_v58  ;;  %v6077_v24 = vld [vmem:[#allocation4] sm:$0xf]  ;;  %v7646_v57 = vld.sshfl [vmem:[#allocation1] sm:$0xff pattern:$0x73625140] }
 0x16c   :  { %11230 = vst [vmem:[#allocation36_spill] sm:$0xff] %v7607_v48  ;;  %v6637_v31 = vld [vmem:[#allocation4 + $0x1c] sm:$0xf0]  ;;  %v7648_v17 = vld.sshfl [vmem:[#allocation1 + $0x10] sm:$0xff pattern:$0x73625140] }
 0x16d   :  { %11231 = vst [vmem:[#allocation37_spill] sm:$0xff] %v7610_v58  ;;  %v585_v49 = vpop.f32.mrf.mxu2  ;;  %1784 = vmatpush.bf16.msra.mxu3 %v7613_v44  ;;  %v7655_v48 = vld.sshfl [vmem:[#allocation1 + $0x18] sm:$0xff pattern:$0x73625140] }
 0x16e   :  { %11232 = vst [vmem:[#allocation38_spill] sm:$0xff] %v7613_v44  ;;  %v586_v38 = vadd.f32 %v585_v49, %v7383_v42  ;;  %v7631_v42 = vld.sshfl [vmem:[#allocation1 + $0x8] sm:$0xff pattern:$0x73625140]  ;;  %1808 = vmatpush.bf16.msrb.mxu1 %v7616_v20  ;;  %v6533_v49 = vld [vmem:[#allocation4 + $0x388] sm:$0xf] }
 0x16f   :  { %11233 = vst [vmem:[#allocation39_spill] sm:$0xff] %v7616_v20  ;;  %1770 = vmatpush.bf16.msrb.mxu2 %v7622_v55  ;;  %1796 = vmatpush.bf16.msra.mxu0 %v7635_v13  ;;  %v6694_v44 = vld [vmem:[#allocation4 + $0x1e4] sm:$0xf0]  ;;  %v6335_v20 = vld [vmem:[#allocation4 + $0x220] sm:$0xf0] }
 0x170   :  { %11234 = vst [vmem:[#allocation40_spill] sm:$0xff] %v7620_v39  ;;  %v7628_v53 = vrot.slane %v586_v38, 6 }
 0x171   :  { %11235 = vst [vmem:[#allocation41_spill] sm:$0xff] %v7622_v55  ;;  %1829 = vmatpush.bf16.msrb.mxu3 %v7620_v39  ;;  %v6633_v39 = vld [vmem:[#allocation4 + $0x4] sm:$0xf] }
 0x172   :  { %11236 = vst [vmem:[#allocation42_spill] sm:$0xff] %v7631_v42  ;;  %v834_v15 = vsel %vm833_vm5, %v7626_v18, %v7628_v53  ;;  %v852_v38 = vsel %vm835_vm6, %v7628_v53, %v7626_v18  ;;  %v7667_v55 = vor.u32 %v6633_v39, %v6079_v40  ;;  %v7681_v40 = vpop.f32.mrf.mxu1  ;;  %v6754_v39 = vld [vmem:[#allocation4 + $0x3cc] sm:$0xf] }
 0x173   :  { %11237 = vst [vmem:[#allocation43_spill] sm:$0xff] %v7635_v13  ;;  %v838_v42 = vsel %vm837_vm7, %v834_v15, %v836_v41  ;;  %v7653_v58 = vsel %vm837_vm7, %v7528_v36, %v852_v38  ;;  %v7663_v41 = vor.u32 %v6750_v56, %v6533_v49  ;;  %v7665_v15 = vor.u32 %v6637_v31, %v6077_v24  ;;  %v6690_v36 = vld [vmem:[#allocation4 + $0x1cc] sm:$0xf]  ;;  %v6742_v49 = vld [vmem:[#allocation4 + $0x364] sm:$0xf0] }
 0x174   :  { %11238 = vst [vmem:[#allocation44_spill] sm:$0xff] %v7646_v57  ;;  %v839_v33 = vrot.slane %v838_v42, 2  ;;  %v6311_v38 = vld [vmem:[#allocation4 + $0x1e8] sm:$0xf0]  ;;  %v6501_v42 = vld [vmem:[#allocation4 + $0x348] sm:$0xf]  ;;  %v7671_v13 = vor.u32 %v6694_v44, %v6309_v8  ;;  %1797 = vmatpush.bf16.msra.mxu0 %v7667_v55 }
 0x175   :  { %11239 = vst [vmem:[#allocation45_spill] sm:$0xff] %v7648_v17  ;;  %v7659_v57 = vpop.f32.mrf.mxu2  ;;  %v7661_v17 = vor.u32 %v6705_v30, %v6367_v23  ;;  %1830 = vmatpush.bf16.msrb.mxu3 %v7663_v41  ;;  %v7673_v30 = vor.u32 %v6690_v36, %v6311_v38  ;;  %1771 = vmatpush.bf16.msrb.mxu2 %v7665_v15  ;;  %v6567_v56 = vld [vmem:[#allocation4 + $0x3e8] sm:$0xf0]  ;;  %v6277_v24 = vld [vmem:[#allocation4 + $0x188] sm:$0xf] }
 0x176   :  { %11240 = vst [vmem:[#allocation46_spill] sm:$0xff] %v7655_v48  ;;  %v6697_v48 = vld [vmem:[#allocation4 + $0x204] sm:$0xf]  ;;  %v6686_v8 = vld [vmem:[#allocation4 + $0x1a4] sm:$0xf0] }
 0x177   :  { %11241 = vst [vmem:[#allocation47_spill] sm:$0xff] %v7661_v17  ;;  %1809 = vmatpush.bf16.msrb.mxu1 %v7661_v17  ;;  %v7675_v23 = vor.u32 %v6697_v48, %v6335_v20  ;;  %v6682_v44 = vld [vmem:[#allocation4 + $0x18c] sm:$0xf]  ;;  %v6469_v20 = vld [vmem:[#allocation4 + $0x308] sm:$0xf] }
 0x178   :  { %11242 = vst [vmem:[#allocation48_spill] sm:$0xff] %v7663_v41  ;;  %1842 = vmatpush.bf16.msrb.mxu0 %v7673_v30  ;;  %v6279_v48 = vld [vmem:[#allocation4 + $0x1a8] sm:$0xf0]  ;;  %v6734_v31 = vld [vmem:[#allocation4 + $0x324] sm:$0xf0] }
 0x179   :  { %11243 = vst [vmem:[#allocation49_spill] sm:$0xff] %v7665_v15  ;;  %1816 = vmatpush.bf16.msra.mxu2 %v7671_v13  ;;  %v6746_v36 = vld [vmem:[#allocation4 + $0x38c] sm:$0xf]  ;;  %v6678_v15 = vld [vmem:[#allocation4 + $0x164] sm:$0xf0]  ;;  %v7696_v12 = vor.u32 %v6734_v31, %v6469_v20 }
 0x17a   :  { %1745 = vst [vmem:[#allocation1] ss:$4 sm:$0xff] %v839_v33  ;;  %v7679_v33 = vor.u32 %v6742_v49, %v6501_v42  ;;  %v6535_v38 = vld [vmem:[#allocation4 + $0x3a8] sm:$0xf0]  ;;  %v6245_v42 = vld [vmem:[#allocation4 + $0x148] sm:$0xf]  ;;  %v7687_v49 = vpop.f32.mrf.mxu3 }
 0x17b   :  { %11244 = vst [vmem:[#allocation50_spill] sm:$0xff] %v7667_v55  ;;  %1810 = vmatpush.bf16.msrb.mxu1 %v7675_v23  ;;  %v7691_v55 = vor.u32 %v6686_v8, %v6277_v24  ;;  %v6674_v41 = vld [vmem:[#allocation4 + $0x14c] sm:$0xf]  ;;  %v563_v24 = vadd.f32 %v7538_v51, %v7490_v47  ;;  %v6213_v20 = vld [vmem:[#allocation4 + $0x108] sm:$0xf] }
 0x17c   :  { %11245 = vst [vmem:[#allocation51_spill] sm:$0xff] %v7671_v13  ;;  %1831 = vmatpush.bf16.msrb.mxu3 %v7679_v33  ;;  %v7689_v13 = vor.u32 %v6754_v39, %v6567_v56  ;;  %v6247_v17 = vld [vmem:[#allocation4 + $0x168] sm:$0xf0]  ;;  %v7700_v39 = vor.u32 %v6746_v36, %v6535_v38  ;;  %v6670_v31 = vld [vmem:[#allocation4 + $0x124] sm:$0xf0] }
 0x17d   :  { %11246 = vst [vmem:[#allocation52_spill] sm:$0xff] %v7673_v30  ;;  %v7693_v30 = vor.u32 %v6682_v44, %v6279_v48  ;;  %1817 = vmatpush.bf16.msra.mxu2 %v7691_v55  ;;  %v6503_v56 = vld [vmem:[#allocation4 + $0x368] sm:$0xf0] }
 0x17e   :  { %11247 = vst [vmem:[#allocation53_spill] sm:$0xff] %v7675_v23  ;;  %v7712_v48 = vor.u32 %v6738_v4, %v6503_v56  ;;  %v6666_v36 = vld [vmem:[#allocation4 + $0x10c] sm:$0xf] }
 0x17f   :  { %11248 = vst [vmem:[#allocation54_spill] sm:$0xff] %v7679_v33  ;;  %v6437_v33 = vld [vmem:[#allocation4 + $0x2c8] sm:$0xf]  ;;  %1855 = vmatpush.bf16.msra.mxu1 %v7689_v13  ;;  %1843 = vmatpush.bf16.msrb.mxu0 %v7693_v30  ;;  %v6471_v56 = vld [vmem:[#allocation4 + $0x328] sm:$0xf0] }
 0x180   :  { %11249 = vst [vmem:[#allocation55_spill] sm:$0xff] %v7681_v40  ;;  %v591_v40 = vpop.f32.mrf.mxu2  ;;  %1832 = vmatpush.bf16.msrb.mxu3 %v7696_v12  ;;  %v7710_v44 = vor.u32 %v6726_v11, %v6437_v33 }
 0x181   :  { %11250 = vst [vmem:[#allocation56_spill] sm:$0xff] %v7687_v49  ;;  %v592_v23 = vadd.f32 %v591_v40, %v7497_v10  ;;  %v7706_v10 = vor.u32 %v6678_v15, %v6245_v42  ;;  %v7708_v40 = vor.u32 %v6674_v41, %v6247_v17  ;;  %v6405_v15 = vld [vmem:[#allocation4 + $0x288] sm:$0xf]  ;;  %v759_v17 = vpop.f32.mrf.mxu1 }
 0x182   :  { %11251 = vst [vmem:[#allocation57_spill] sm:$0xff] %v7689_v13  ;;  %v6718_v42 = vld [vmem:[#allocation4 + $0x2a4] sm:$0xf0]  ;;  %v701_v49 = vpop.f32.mrf.mxu3 }
 0x183   :  { %11252 = vst [vmem:[#allocation58_spill] sm:$0xff] %v7691_v55  ;;  %v815_v8 = vrot.slane %v592_v23, 6  ;;  %1856 = vmatpush.bf16.msra.mxu1 %v7700_v39  ;;  %1818 = vmatpush.bf16.msra.mxu2 %v7706_v10  ;;  %v6710_v55 = vld [vmem:[#allocation4 + $0x264] sm:$0xf0] }
 0x184   :  { %11253 = vst [vmem:[#allocation59_spill] sm:$0xff] %v7693_v30  ;;  %v6215_v30 = vld [vmem:[#allocation4 + $0x128] sm:$0xf0]  ;;  %1844 = vmatpush.bf16.msrb.mxu0 %v7708_v40  ;;  %1833 = vmatpush.bf16.msrb.mxu3 %v7710_v44 }
 0x185   :  { %11254 = vst [vmem:[#allocation60_spill] sm:$0xff] %v7696_v12  ;;  %v890_v38 = vsel %vm375_vm2, %v563_v24, %v815_v8  ;;  %v896_v47 = vsel %vm833_vm5, %v563_v24, %v815_v8  ;;  %v904_v51 = vsel %vm377_vm3, %v563_v24, %v815_v8  ;;  %v912_v23 = vsel %vm835_vm6, %v815_v8, %v563_v24  ;;  %v6181_v24 = vld [vmem:[#allocation4 + $0xc8] sm:$0xf]  ;;  %v6634_v12 = vld [vmem:[#allocation4 + $0xc] sm:$0xf] }
 0x186   :  { %11255 = vst [vmem:[#allocation61_spill] sm:$0xff] %v7700_v39  ;;  %v7720_v11 = vsel %vm379_vm4, %v890_v38, %v7584_v9  ;;  %v7724_v4 = vsel %vm837_vm7, %v896_v47, %v7587_v32  ;;  %v7728_v41 = vsel %vm379_vm4, %v7590_v34, %v904_v51  ;;  %v7732_v33 = vsel %vm837_vm7, %v7594_v35, %v912_v23  ;;  %v6730_v9 = vld [vmem:[#allocation4 + $0x30c] sm:$0xf]  ;;  %v6662_v35 = vld [vmem:[#allocation4 + $0xe4] sm:$0xf0]  ;;  %v730_v23 = vpop.f32.mrf.mxu0 }
 0x187   :  { %11256 = vst [vmem:[#allocation62_spill] sm:$0xff] %v7706_v10  ;;  %v7740_v32 = vor.u32 %v6670_v31, %v6213_v20  ;;  %v7742_v34 = vor.u32 %v6666_v36, %v6215_v30  ;;  %v7744_v38 = vor.u32 %v6718_v42, %v6405_v15  ;;  %v6658_v47 = vld [vmem:[#allocation4 + $0xcc] sm:$0xf]  ;;  %v760_v10 = vadd.f32 %v759_v17, %v7436_v2  ;;  %v6149_v42 = vld [vmem:[#allocation4 + $0x88] sm:$0xf] }
 0x188   :  { %11257 = vst [vmem:[#allocation63_spill] sm:$0xff] %v7708_v40  ;;  %v7737_v8 = vpop.f32.mrf.mxu2  ;;  %v6183_v51 = vld [vmem:[#allocation4 + $0xe8] sm:$0xf0]  ;;  %v6373_v40 = vld [vmem:[#allocation4 + $0x248] sm:$0xf]  ;;  %1857 = vmatpush.bf16.msra.mxu1 %v7712_v48  ;;  %v7752_v30 = vor.u32 %v6662_v35, %v6181_v24  ;;  %v731_v15 = vadd.f32 %v730_v23, %v7434_v1  ;;  %v827_v1 = vsel %vm375_vm2, %v7626_v18, %v7628_v53 }
 0x189   :  { %11258 = vst [vmem:[#allocation64_spill] sm:$0xff] %v7710_v44  ;;  %1819 = vmatpush.bf16.msra.mxu2 %v7740_v32  ;;  %1845 = vmatpush.bf16.msrb.mxu0 %v7742_v34  ;;  %v7754_v20 = vor.u32 %v6658_v47, %v6183_v51  ;;  %v6722_v31 = vld [vmem:[#allocation4 + $0x2cc] sm:$0xf]  ;;  %v7758_v2 = vor.u32 %v6710_v55, %v6373_v40  ;;  %v6654_v17 = vld [vmem:[#allocation4 + $0xa4] sm:$0xf0] }
 0x18a   :  { %11259 = vst [vmem:[#allocation65_spill] sm:$0xff] %v7712_v48  ;;  %v6439_v36 = vld [vmem:[#allocation4 + $0x2e8] sm:$0xf0]  ;;  %1834 = vmatpush.bf16.msrb.mxu3 %v7744_v38  ;;  %v6341_v35 = vld [vmem:[#allocation4 + $0x208] sm:$0xf]  ;;  %v7773_v40 = vrot.slane %v731_v15, 4 }
 0x18b   :  { %11260 = vst [vmem:[#allocation66_spill] sm:$0xff] %v7728_v41  ;;  %v7764_v24 = vor.u32 %v6722_v31, %v6439_v36  ;;  %v6702_v47 = vld [vmem:[#allocation4 + $0x224] sm:$0xf0]  ;;  %v6714_v51 = vld [vmem:[#allocation4 + $0x28c] sm:$0xf]  ;;  %v11018_v15 = vmov 0.0|0.0  }
 0x18c   :  { %11261 = vst [vmem:[#allocation67_spill] sm:$0xff] %v7732_v33  ;;  %v7748_v33 = vor.u32 %v6730_v9, %v6471_v56  ;;  %v702_v9 = vadd.f32 %v701_v49, %v7432_v0  ;;  %v7761_v56 = vrot.slane %v760_v10, 2  ;;  %v7771_v0 = vor.u32 %v6654_v17, %v6149_v42  ;;  %v6407_v55 = vld [vmem:[#allocation4 + $0x2a8] sm:$0xf0]  ;;  %v6573_v49 = vld [vmem:[#allocation4 + $0x3d0] sm:$0xf]  ;;  %1785 = vmatmul.bf16.vlgmr.msra.gmra.mxu3 %v11018_v15 }
 0x18d   :  { %11262 = vst [vmem:[#allocation68_spill] sm:$0xff] %v7737_v8  ;;  %1820 = vmatpush.bf16.msra.mxu2 %v7752_v30  ;;  %1846 = vmatpush.bf16.msrb.mxu0 %v7754_v20  ;;  %v6759_v10 = vld [vmem:[#allocation4 + $0x3ec] sm:$0xf0]  ;;  %v6117_v36 = vld [vmem:[#allocation4 + $0x48] sm:$0xf]  ;;  %v7786_v17 = vor.u32 %v6702_v47, %v6341_v35 }
 0x18e   :  { %11263 = vst [vmem:[#allocation69_spill] sm:$0xff] %v7740_v32  ;;  %v6650_v32 = vld [vmem:[#allocation4 + $0x8c] sm:$0xf]  ;;  %1858 = vmatpush.bf16.msra.mxu1 %v7748_v33  ;;  %1835 = vmatpush.bf16.msrb.mxu3 %v7758_v2  ;;  %v6646_v8 = vld [vmem:[#allocation4 + $0x64] sm:$0xf0]  ;;  %v7799_v35 = vor.u32 %v6759_v10, %v6573_v49 }
 0x18f   :  { %11264 = vst [vmem:[#allocation70_spill] sm:$0xff] %v7742_v34  ;;  %v6151_v34 = vld [vmem:[#allocation4 + $0xa8] sm:$0xf0]  ;;  %1811 = vmatmul.bf16.vlgmr.msrb.gmra.mxu1 %v11018_v15  ;;  %v7811_v15 = vor.u32 %v6646_v8, %v6117_v36  ;;  %v6751_v49 = vld [vmem:[#allocation4 + $0x3ac] sm:$0xf0] }
 0x190   :  { %11265 = vst [vmem:[#allocation71_spill] sm:$0xff] %v7744_v38  ;;  %v672_v23 = vpop.f32.mrf.mxu2  ;;  %v7776_v31 = vor.u32 %v6650_v32, %v6151_v34  ;;  %v7781_v38 = vrot.slane %v702_v9, 6  ;;  %v831_v34 = vsel %vm377_vm3, %v7773_v40, %v7761_v56  ;;  %v7794_v9 = vld.sshfl [vmem:[#allocation1 + $0x20] sm:$0xff pattern:$0x73625140] }
 0x191   :  { %11266 = vst [vmem:[#allocation72_spill] sm:$0xff] %v7748_v33  ;;  %v7784_v42 = vadd.f32 %v672_v23, %v7429_v63  ;;  %v7797_v63 = vor.u32 %v6714_v51, %v6407_v55  ;;  %v6706_v47 = vld [vmem:[#allocation4 + $0x24c] sm:$0xf]  ;;  %v841_v23 = vsel %vm835_vm6, %v7761_v56, %v7773_v40  ;;  %1821 = vmatpush.bf16.msra.mxu2 %v7771_v0  ;;  %v6541_v55 = vld [vmem:[#allocation4 + $0x390] sm:$0xf] }
 0x192   :  { %11267 = vst [vmem:[#allocation73_spill] sm:$0xff] %v7752_v30  ;;  %v828_v30 = vsel %vm377_vm3, %v7519_v28, %v7521_v29  ;;  %1859 = vmatpush.bf16.msra.mxu1 %v7764_v24  ;;  %v6375_v51 = vld [vmem:[#allocation4 + $0x268] sm:$0xf0]  ;;  %v7819_v33 = vld.sshfl [vmem:[#allocation1 + $0x38] sm:$0xff pattern:$0x73625140]  ;;  %1847 = vmatpush.bf16.msrb.mxu0 %v7776_v31 }
 0x193   :  { %11268 = vst [vmem:[#allocation74_spill] sm:$0xff] %v7754_v20  ;;  %v6642_v20 = vld [vmem:[#allocation4 + $0x4c] sm:$0xf]  ;;  %v829_v32 = vsel %vm379_vm4, %v827_v1, %v828_v30  ;;  %v830_v30 = vsel %vm375_vm2, %v7784_v42, %v7781_v38  ;;  %v840_v1 = vsel %vm833_vm5, %v7784_v42, %v7781_v38  ;;  %v6638_v8 = vld [vmem:[#allocation4 + $0x24] sm:$0xf0]  ;;  %1836 = vmatpush.bf16.msrb.mxu3 %v7786_v17 }
 0x194   :  { %11269 = vst [vmem:[#allocation75_spill] sm:$0xff] %v7758_v2  ;;  %v6119_v2 = vld [vmem:[#allocation4 + $0x68] sm:$0xf0]  ;;  %v842_v41 = vsel %vm837_vm7, %v840_v1, %v841_v23  ;;  %v1084_v36 = vmul.f32 0.5, %v829_v32  ;;  %v7829_v23 = vor.u32 %v6751_v49, %v6541_v55  ;;  %v6743_v32 = vld [vmem:[#allocation4 + $0x36c] sm:$0xf0] }
 0x195   :  { %11270 = vst [vmem:[#allocation76_spill] sm:$0xff] %v7764_v24  ;;  %v7813_v10 = vld.sshfl [vmem:[#allocation1 + $0x30] sm:$0xff pattern:$0x73625140]  ;;  %v832_v24 = vsel %vm379_vm4, %v830_v30, %v831_v34  ;;  %v7822_v44 = vor.u32 %v6642_v20, %v6119_v2  ;;  %v843_v48 = vrot.slane %v842_v41, 2  ;;  %v7827_v34 = vor.u32 %v6706_v47, %v6375_v51  ;;  %1822 = vmatpush.bf16.msra.mxu2 %v7811_v15 }
 0x196   :  { %11271 = vst [vmem:[#allocation77_spill] sm:$0xff] %v7771_v0  ;;  %v6085_v0 = vld [vmem:[#allocation4 + $0x8] sm:$0xf]  ;;  %v1092_v39 = vrot.slane %v832_v24, 4  ;;  %1860 = vmatpush.bf16.msra.mxu1 %v7797_v63  ;;  %v6698_v30 = vld [vmem:[#allocation4 + $0x20c] sm:$0xf]  ;;  %6776 = vtanh.f32 %v1084_v36 }
 0x197   :  { %11272 = vst [vmem:[#allocation78_spill] sm:$0xff] %v7776_v31  ;;  %1881 = vmatpush.bf16.msra.mxu3 %v7799_v35  ;;  %v6343_v20 = vld [vmem:[#allocation4 + $0x228] sm:$0xf0]  ;;  %v7832_v2 = vor.u32 %v6638_v8, %v6085_v0  ;;  %v6509_v41 = vld [vmem:[#allocation4 + $0x350] sm:$0xf]  ;;  %1848 = vmatpush.bf16.msrb.mxu0 %v7822_v44 }
 0x198   :  { %11273 = vst [vmem:[#allocation79_spill] sm:$0xff] %v7786_v17  ;;  %v1094_v1 = vmul.f32 0.5, %v1092_v39  ;;  %v7841_v47 = vor.u32 %v6743_v32, %v6509_v41  ;;  %v6477_v39 = vld [vmem:[#allocation4 + $0x310] sm:$0xf]  ;;  %v6747_v55 = vld [vmem:[#allocation4 + $0x394] sm:$0xf] }
 0x199   :  { %11274 = vst [vmem:[#allocation80_spill] sm:$0xff] %v7794_v9  ;;  %v7815_v9 = vld.sshfl [vmem:[#allocation1 + $0x28] sm:$0xff pattern:$0x73625140]  ;;  %1823 = vmatpush.bf16.msra.mxu2 %v7832_v2  ;;  %v6735_v51 = vld [vmem:[#allocation4 + $0x32c] sm:$0xf0] }
 0x19a   :  { %11275 = vst [vmem:[#allocation81_spill] sm:$0xff] %v7797_v63  ;;  %6778 = vtanh.f32 %v1094_v1  ;;  %1861 = vmatpush.bf16.msra.mxu1 %v7827_v34  ;;  %v6543_v49 = vld [vmem:[#allocation4 + $0x3b0] sm:$0xf0]  ;;  %v11290_v32 = vmov 0.0|0.0  }
 0x19b   :  { %11276 = vst [vmem:[#allocation82_spill] sm:$0xff] %v7799_v35  ;;  %v6575_v35 = vld [vmem:[#allocation4 + $0x3f0] sm:$0xf0]  ;;  %1882 = vmatpush.bf16.msra.mxu3 %v7829_v23  ;;  %v7852_v36 = vor.u32 %v6747_v55, %v6543_v49  ;;  %v6413_v49 = vld [vmem:[#allocation4 + $0x290] sm:$0xf] }
 0x19c   :  { %11277 = vst [vmem:[#allocation83_spill] sm:$0xff] %v7811_v15  ;;  %v6777_v8 = vpop.eup %6776  ;;  %1837 = vmatmul.bf16.vlgmr.msrb.gmra.mxu3 %v11290_v32 }
 0x19d   :  { %11278 = vst [vmem:[#allocation84_spill] sm:$0xff] %v7813_v10  ;;  %v6087_v10 = vld [vmem:[#allocation4 + $0x28] sm:$0xf0] }
 0x19e   :  { %11279 = vst [vmem:[#allocation85_spill] sm:$0xff] %v7819_v33  ;;  %v7835_v31 = vor.u32 %v6634_v12, %v6087_v10  ;;  %v6755_v33 = vld [vmem:[#allocation4 + $0x3d4] sm:$0xf]  ;;  %v1088_v12 = vmul.f32 0.5, %v832_v24  ;;  %v7849_v10 = vor.u32 %v6735_v51, %v6477_v39  ;;  %v844_v39 = vsel %vm377_vm3, %v7626_v18, %v7628_v53 }
 0x19f   :  { %11280 = vst [vmem:[#allocation86_spill] sm:$0xff] %v7822_v44  ;;  %v7844_v0 = vor.u32 %v6755_v33, %v6575_v35  ;;  %1883 = vmatpush.bf16.msra.mxu3 %v7841_v47  ;;  %v6445_v33 = vld [vmem:[#allocation4 + $0x2d0] sm:$0xf]  ;;  %v6739_v24 = vld [vmem:[#allocation4 + $0x354] sm:$0xf]  ;;  %v1086_v51 = vmul.f32 0.5, %v6777_v8 }
 0x1a0   :  { %11281 = vst [vmem:[#allocation87_spill] sm:$0xff] %v7827_v34  ;;  %1849 = vmatpush.bf16.msrb.mxu0 %v7835_v31  ;;  %v6727_v35 = vld [vmem:[#allocation4 + $0x2ec] sm:$0xf0]  ;;  %6780 = vtanh.f32 %v1088_v12  ;;  %v6551_v44 = vld [vmem:[#allocation4 + $0x3b8] sm:$0xf0] }
 0x1a1   :  { %11282 = vst [vmem:[#allocation88_spill] sm:$0xff] %v7829_v23  ;;  %v7857_v1 = vor.u32 %v6727_v35, %v6445_v33  ;;  %v6479_v23 = vld [vmem:[#allocation4 + $0x330] sm:$0xf0]  ;;  %v1087_v18 = vadd.f32 0.5, %v1086_v51 }
 0x1a2   :  { %1747 = vst [vmem:[#allocation1 + $0x20] ss:$4 sm:$0xff] %v843_v48  ;;  %v7839_v48 = vor.u32 %v6698_v30, %v6343_v20  ;;  %v6779_v30 = vpop.eup %6778  ;;  %v6511_v20 = vld [vmem:[#allocation4 + $0x370] sm:$0xf0] }
 0x1a3   :  { %11283 = vst [vmem:[#allocation89_spill] sm:$0xff] %v7832_v2  ;;  %v1096_v41 = vmul.f32 0.5, %v6779_v30  ;;  %1884 = vmatpush.bf16.msra.mxu3 %v7849_v10  ;;  %v7863_v12 = vor.u32 %v6739_v24, %v6511_v20  ;;  %v6719_v30 = vld [vmem:[#allocation4 + $0x2ac] sm:$0xf0] }
 0x1a4   :  { %11284 = vst [vmem:[#allocation90_spill] sm:$0xff] %v7835_v31  ;;  %1862 = vmatpush.bf16.msra.mxu1 %v7839_v48  ;;  %v7870_v53 = vor.u32 %v6719_v30, %v6413_v49  ;;  %v6381_v20 = vld [vmem:[#allocation4 + $0x250] sm:$0xf]  ;;  %v6447_v31 = vld [vmem:[#allocation4 + $0x2f0] sm:$0xf0] }
 0x1a5   :  { %11285 = vst [vmem:[#allocation91_spill] sm:$0xff] %v7839_v48  ;;  %v1097_v55 = vadd.f32 0.5, %v1096_v41  ;;  %v6711_v41 = vld [vmem:[#allocation4 + $0x26c] sm:$0xf0]  ;;  %v6715_v30 = vld [vmem:[#allocation4 + $0x294] sm:$0xf] }
 0x1a6   :  { %11286 = vst [vmem:[#allocation92_spill] sm:$0xff] %v7841_v47  ;;  %v6731_v47 = vld [vmem:[#allocation4 + $0x314] sm:$0xf]  ;;  %v6781_v35 = vpop.eup %6780  ;;  %v7875_v2 = vld.sshfl [vmem:[#allocation1 + $0x8] sm:$0xff pattern:$0x73625140] }
 0x1a7   :  { %11287 = vst [vmem:[#allocation93_spill] sm:$0xff] %v7844_v0  ;;  %1863 = vmatmul.bf16.vlgmr.msra.gmra.mxu1 %v11290_v32  ;;  %v1098_v33 = vmul.f32 2.0, %v1097_v55  ;;  %1885 = vmatpush.bf16.msra.mxu3 %v7857_v1  ;;  %v7873_v24 = vor.u32 %v6731_v47, %v6479_v23  ;;  %v7884_v51 = vld.sshfl [vmem:[#allocation1 + $0x18] sm:$0xff pattern:$0x73625140] }
 0x1a8   :  { %11288 = vst [vmem:[#allocation94_spill] sm:$0xff] %v7849_v10  ;;  %1907 = vmatpush.bf16.msrb.mxu1 %v7844_v0  ;;  %v845_v10 = vsel %vm375_vm2, %v7519_v28, %v7521_v29  ;;  %v1090_v29 = vmul.f32 0.5, %v6781_v35  ;;  %v7886_v23 = vld.sshfl [vmem:[#allocation1 + $0x10] sm:$0xff pattern:$0x73625140] }
 0x1a9   :  { %11289 = vst [vmem:[#allocation95_spill] sm:$0xff] %v7852_v36  ;;  %v846_v0 = vsel %vm379_vm4, %v845_v10, %v844_v39  ;;  %v6074_v8 = vadd.f32 -1.0, %v1098_v33  ;;  %v7879_v10 = vld.sshfl [vmem:[#allocation1] sm:$0xff pattern:$0x73625140]  ;;  %v7882_v39 = vor.u32 %v6711_v41, %v6381_v20  ;;  %v733_v33 = vpop.f32.mrf.mxu0 }
 0x1aa   :  { %11291 = vst [vmem:[#allocation96_spill] sm:$0xff] %v7857_v1  ;;  %v847_v28 = vrot.slane %v846_v0, 4  ;;  %v6349_v0 = vld [vmem:[#allocation4 + $0x210] sm:$0xf]  ;;  %v6415_v35 = vld [vmem:[#allocation4 + $0x2b0] sm:$0xf0]  ;;  %v734_v41 = vadd.f32 %v733_v33, %v7456_v6 }
 0x1ab   :  { %11292 = vst [vmem:[#allocation97_spill] sm:$0xff] %v7863_v12  ;;  %v7877_v55 = vmul.f32 %v6074_v8, %v1087_v18  ;;  %1886 = vmatpush.bf16.msra.mxu3 %v7870_v53  ;;  %v6703_v49 = vld [vmem:[#allocation4 + $0x22c] sm:$0xf0]  ;;  %v6581_v18 = vld [vmem:[#allocation4 + $0x3d8] sm:$0xf] }
 0x1ac   :  { %1908 = vmatpush.bf16.msrb.mxu1 %v7852_v36  ;;  %11293 = vst [vmem:[#allocation98_spill] sm:$0xff] %v7870_v53  ;;  %v6723_v36 = vld [vmem:[#allocation4 + $0x2d4] sm:$0xf]  ;;  %v6760_v8 = vld [vmem:[#allocation4 + $0x3f4] sm:$0xf0]  ;;  %v7893_v20 = vor.u32 %v6703_v49, %v6349_v0  ;;  %v618_v53 = vadd.f32 %v7515_v27, %v7420_v61  ;;  %v7904_v61 = vrot.slane %v734_v41, 4 }
 0x1ad   :  { %11294 = vst [vmem:[#allocation99_spill] sm:$0xff] %v7873_v24  ;;  %6782 = vtanh.f32 %v7877_v55  ;;  %v7890_v47 = vor.u32 %v6723_v36, %v6447_v31  ;;  %v6317_v1 = vld [vmem:[#allocation4 + $0x1d0] sm:$0xf]  ;;  %v6691_v36 = vld [vmem:[#allocation4 + $0x1d4] sm:$0xf] }
 0x1ae   :  { %11295 = vst [vmem:[#allocation100_spill] sm:$0xff] %v7875_v2  ;;  %v6695_v31 = vld [vmem:[#allocation4 + $0x1ec] sm:$0xf0]  ;;  %v6383_v0 = vld [vmem:[#allocation4 + $0x270] sm:$0xf0]  ;;  %v7906_v27 = vrot.slane %v618_v53, 4 }
 0x1af   :  { %11296 = vst [vmem:[#allocation101_spill] sm:$0xff] %v7877_v55  ;;  %1887 = vmatpush.bf16.msra.mxu3 %v7882_v39  ;;  %v1091_v55 = vadd.f32 0.5, %v1090_v29  ;;  %v6549_v49 = vld [vmem:[#allocation4 + $0x398] sm:$0xf]  ;;  %v7908_v33 = vor.u32 %v6695_v31, %v6317_v1  ;;  %v647_v29 = vadd.f32 %v7540_v52, %v7422_v62  ;;  %v6699_v1 = vld [vmem:[#allocation4 + $0x214] sm:$0xf]  ;;  %v848_v31 = vsel %vm377_vm3, %v7784_v42, %v7781_v38 }
 0x1b0   :  { %1909 = vmatpush.bf16.msrb.mxu1 %v7863_v12  ;;  %11297 = vst [vmem:[#allocation102_spill] sm:$0xff] %v7879_v10  ;;  %v7901_v12 = vor.u32 %v6760_v8, %v6581_v18  ;;  %v6687_v18 = vld [vmem:[#allocation4 + $0x1ac] sm:$0xf0]  ;;  %v6287_v8 = vld [vmem:[#allocation4 + $0x1b0] sm:$0xf0] }
 0x1b1   :  { %11298 = vst [vmem:[#allocation103_spill] sm:$0xff] %v7882_v39  ;;  %v6253_v62 = vld [vmem:[#allocation4 + $0x150] sm:$0xf]  ;;  %v6756_v52 = vld [vmem:[#allocation4 + $0x3dc] sm:$0xf] }
 0x1b2   :  { %11299 = vst [vmem:[#allocation104_spill] sm:$0xff] %v7884_v51  ;;  %v6752_v51 = vld [vmem:[#allocation4 + $0x3b4] sm:$0xf0]  ;;  %v7952_v15 = vld.sshfl [vmem:[#allocation1 + $0x38] sm:$0xff pattern:$0x73625140] }
 0x1b3   :  { %11300 = vst [vmem:[#allocation105_spill] sm:$0xff] %v7886_v23  ;;  %v6707_v23 = vld [vmem:[#allocation4 + $0x254] sm:$0xf]  ;;  %v6783_v39 = vpop.eup %6782  ;;  %1888 = vmatpush.bf16.msra.mxu3 %v7893_v20  ;;  %v7920_v53 = vor.u32 %v6752_v51, %v6549_v49  ;;  %v849_v51 = vsel %vm375_vm2, %v7773_v40, %v7761_v56 }
 0x1b4   :  { %1910 = vmatpush.bf16.msrb.mxu1 %v7873_v24  ;;  %11301 = vst [vmem:[#allocation106_spill] sm:$0xff] %v7890_v47  ;;  %v7899_v24 = vor.u32 %v6715_v30, %v6415_v35  ;;  %v1102_v6 = vmul.f32 %v6783_v39, %v1091_v55  ;;  %v6285_v35 = vld [vmem:[#allocation4 + $0x190] sm:$0xf]  ;;  %v6683_v39 = vld [vmem:[#allocation4 + $0x194] sm:$0xf]  ;;  %v7918_v41 = vor.u32 %v6707_v23, %v6383_v0 }
 0x1b5   :  { %2021 = vst [vmem:[#allocation1] ss:$4 sm:$0xff] %v847_v28  ;;  %v6319_v28 = vld [vmem:[#allocation4 + $0x1f0] sm:$0xf0]  ;;  %v6583_v23 = vld [vmem:[#allocation4 + $0x3f8] sm:$0xf0]  ;;  %v7933_v0 = vor.u32 %v6687_v18, %v6285_v35  ;;  %v7935_v49 = vor.u32 %v6683_v39, %v6287_v8  ;;  %v850_v10 = vsel %vm379_vm4, %v849_v51, %v848_v31 }
 0x1b6   :  { %11302 = vst [vmem:[#allocation107_spill] sm:$0xff] %v7893_v20  ;;  %v7910_v30 = vor.u32 %v6691_v36, %v6319_v28  ;;  %v7916_v55 = vpack.c.bf16 %v1102_v6, %v1102_v6  ;;  %v6351_v36 = vld [vmem:[#allocation4 + $0x230] sm:$0xf0]  ;;  %v6517_v28 = vld [vmem:[#allocation4 + $0x358] sm:$0xf]  ;;  %1889 = vmatmul.bf16.vlgmr.msra.gmra.mxu3 %v11290_v32  ;;  %v7950_v39 = vor.u32 %v6756_v52, %v6583_v23  ;;  %v704_v23 = vpop.f32.mrf.mxu3 }
 0x1b7   :  { %11303 = vst [vmem:[#allocation108_spill] sm:$0xff] %v7899_v24  ;;  %1933 = vmatpush.bf16.msrb.mxu3 %v7901_v12  ;;  %v6744_v20 = vld [vmem:[#allocation4 + $0x374] sm:$0xf0]  ;;  %v6679_v6 = vld [vmem:[#allocation4 + $0x16c] sm:$0xf0]  ;;  %v7942_v2 = vor.u32 %v6699_v1, %v6351_v36  ;;  %v851_v1 = vrot.slane %v850_v10, 4  ;;  %v589_v52 = vadd.f32 %v7659_v57, %v7418_v60  ;;  %v705_v57 = vadd.f32 %v704_v23, %v7454_v5 }
 0x1b8   :  { %1911 = vmatpush.bf16.msrb.mxu1 %v7890_v47  ;;  %11304 = vst [vmem:[#allocation109_spill] sm:$0xff] %v7901_v12  ;;  %1772 = vmatmul.bf16.vlgmr.msrb.gmra.mxu2 %v7916_v55  ;;  %v6675_v12 = vld [vmem:[#allocation4 + $0x154] sm:$0xf]  ;;  %v7937_v47 = vrot.slane %v647_v29, 2  ;;  %v6736_v8 = vld [vmem:[#allocation4 + $0x334] sm:$0xf0] }
 0x1b9   :  { %11305 = vst [vmem:[#allocation110_spill] sm:$0xff] %v7908_v33  ;;  %1798 = vmatmul.bf16.vlgmr.msra.gmra.mxu0 %v7916_v55  ;;  %1868 = vmatpush.bf16.msrb.mxu2 %v7908_v33  ;;  %v7944_v33 = vor.u32 %v6744_v20, %v6517_v28  ;;  %v7946_v35 = vld.sshfl [vmem:[#allocation1 + $0x28] sm:$0xff pattern:$0x73625140]  ;;  %v6748_v29 = vld [vmem:[#allocation4 + $0x39c] sm:$0xf]  ;;  %v7959_v20 = vor.u32 %v6679_v6, %v6253_v62 }
 0x1ba   :  { %11306 = vst [vmem:[#allocation111_spill] sm:$0xff] %v7910_v30  ;;  %1894 = vmatpush.bf16.msra.mxu0 %v7910_v30  ;;  %v6485_v30 = vld [vmem:[#allocation4 + $0x318] sm:$0xf]  ;;  %v7954_v31 = vld.sshfl [vmem:[#allocation1 + $0x30] sm:$0xff pattern:$0x73625140]  ;;  %v7970_v62 = vor.u32 %v6748_v29, %v6551_v44 }
 0x1bb   :  { %11307 = vst [vmem:[#allocation112_spill] sm:$0xff] %v7918_v41  ;;  %1934 = vmatpush.bf16.msrb.mxu3 %v7920_v53  ;;  %v7948_v18 = vld.sshfl [vmem:[#allocation1 + $0x20] sm:$0xff pattern:$0x73625140]  ;;  %v6221_v28 = vld [vmem:[#allocation4 + $0x110] sm:$0xf]  ;;  %v7967_v10 = vor.u32 %v6736_v8, %v6485_v30 }
 0x1bc   :  { %1912 = vmatpush.bf16.msrb.mxu1 %v7899_v24  ;;  %11308 = vst [vmem:[#allocation113_spill] sm:$0xff] %v7920_v53  ;;  %v6255_v24 = vld [vmem:[#allocation4 + $0x170] sm:$0xf0]  ;;  %v6671_v53 = vld [vmem:[#allocation4 + $0x12c] sm:$0xf0]  ;;  %v7979_v29 = vrot.slane %v589_v52, 6  ;;  %v856_v52 = vsel %vm835_vm6, %v7781_v38, %v7784_v42  ;;  %v857_v38 = vsel %vm833_vm5, %v7773_v40, %v7761_v56 }
 0x1bd   :  { %11309 = vst [vmem:[#allocation114_spill] sm:$0xff] %v7942_v2  ;;  %1869 = vmatpush.bf16.msrb.mxu2 %v7933_v0  ;;  %v7961_v36 = vor.u32 %v6675_v12, %v6255_v24  ;;  %v6453_v12 = vld [vmem:[#allocation4 + $0x2d8] sm:$0xf]  ;;  %v6189_v6 = vld [vmem:[#allocation4 + $0xd0] sm:$0xf] }
 0x1be   :  { %11310 = vst [vmem:[#allocation115_spill] sm:$0xff] %v7944_v33  ;;  %1895 = vmatpush.bf16.msra.mxu0 %v7935_v49  ;;  %v6728_v24 = vld [vmem:[#allocation4 + $0x2f4] sm:$0xf0]  ;;  %v6740_v51 = vld [vmem:[#allocation4 + $0x35c] sm:$0xf] }
 0x1bf   :  { %11311 = vst [vmem:[#allocation116_spill] sm:$0xff] %v7948_v18  ;;  %v6223_v18 = vld [vmem:[#allocation4 + $0x130] sm:$0xf0]  ;;  %1935 = vmatpush.bf16.msrb.mxu3 %v7944_v33  ;;  %v6519_v60 = vld [vmem:[#allocation4 + $0x378] sm:$0xf0] }
 0x1c0   :  { %1913 = vmatpush.bf16.msrb.mxu1 %v7918_v41  ;;  %11312 = vst [vmem:[#allocation117_spill] sm:$0xff] %v7950_v39  ;;  %v6667_v41 = vld [vmem:[#allocation4 + $0x114] sm:$0xf]  ;;  %v6663_v8 = vld [vmem:[#allocation4 + $0xec] sm:$0xf0] }
 0x1c1   :  { %11313 = vst [vmem:[#allocation118_spill] sm:$0xff] %v7959_v20  ;;  %1870 = vmatpush.bf16.msrb.mxu2 %v7959_v20  ;;  %v7977_v30 = vor.u32 %v6667_v41, %v6223_v18  ;;  %v6659_v33 = vld [vmem:[#allocation4 + $0xd4] sm:$0xf]  ;;  %v6421_v5 = vld [vmem:[#allocation4 + $0x298] sm:$0xf]  ;;  %v7990_v41 = vor.u32 %v6740_v51, %v6519_v60  ;;  %v8004_v51 = vor.u32 %v6663_v8, %v6189_v6  ;;  %v11327_v8 = vrot.slane %v7653_v58, 6 }
 0x1c2   :  { %11314 = vst [vmem:[#allocation119_spill] sm:$0xff] %v7961_v36  ;;  %1896 = vmatpush.bf16.msra.mxu0 %v7961_v36  ;;  %v6191_v44 = vld [vmem:[#allocation4 + $0xf0] sm:$0xf0]  ;;  %v7985_v23 = vld.sshfl [vmem:[#allocation1 + $0x8] sm:$0xff pattern:$0x73625140] }
 0x1c3   :  { %11315 = vst [vmem:[#allocation120_spill] sm:$0xff] %v7967_v10  ;;  %1936 = vmatpush.bf16.msrb.mxu3 %v7967_v10  ;;  %v7987_v36 = vld.sshfl [vmem:[#allocation1] sm:$0xff pattern:$0x73625140]  ;;  %v8006_v60 = vor.u32 %v6659_v33, %v6191_v44  ;;  %v6655_v42 = vld [vmem:[#allocation4 + $0xac] sm:$0xf0] }
 0x1c4   :  { %1914 = vmatpush.bf16.msrb.mxu1 %v7942_v2  ;;  %11316 = vst [vmem:[#allocation121_spill] sm:$0xff] %v7970_v62  ;;  %v7975_v2 = vor.u32 %v6671_v53, %v6221_v28  ;;  %v6720_v53 = vld [vmem:[#allocation4 + $0x2b4] sm:$0xf0]  ;;  %v6732_v18 = vld [vmem:[#allocation4 + $0x31c] sm:$0xf] }
 0x1c5   :  { %2023 = vst [vmem:[#allocation1 + $0x20] ss:$4 sm:$0xff] %v851_v1  ;;  %v7983_v1 = vor.u32 %v6728_v24, %v6453_v12  ;;  %v6487_v28 = vld [vmem:[#allocation4 + $0x338] sm:$0xf0]  ;;  %v7999_v24 = vrot.slane %v705_v57, 6  ;;  %v8012_v57 = vor.u32 %v6720_v53, %v6421_v5 }
 0x1c6   :  { %11318 = vst [vmem:[#allocation123_spill] sm:$0xff] %v7985_v23  ;;  %v7995_v20 = vld.sshfl [vmem:[#allocation1 + $0x18] sm:$0xff pattern:$0x73625140]  ;;  %1871 = vmatpush.bf16.msrb.mxu2 %v7975_v2  ;;  %1897 = vmatpush.bf16.msra.mxu0 %v7977_v30  ;;  %v6389_v33 = vld [vmem:[#allocation4 + $0x258] sm:$0xf] }
 0x1c7   :  { %1915 = vmatmul.bf16.vlgmr.msrb.gmra.mxu1 %v11290_v32  ;;  %11317 = vst [vmem:[#allocation122_spill] sm:$0xff] %v7983_v1  ;;  %v7997_v12 = vld.sshfl [vmem:[#allocation1 + $0x10] sm:$0xff pattern:$0x73625140]  ;;  %1937 = vmatpush.bf16.msrb.mxu3 %v7983_v1  ;;  %v6712_v6 = vld [vmem:[#allocation4 + $0x274] sm:$0xf0] }
 0x1c8   :  { %1959 = vmatpush.bf16.msra.mxu1 %v7950_v39  ;;  %v762_v39 = vpop.f32.mrf.mxu1  ;;  %11319 = vst [vmem:[#allocation124_spill] sm:$0xff] %v7987_v36  ;;  %v6157_v36 = vld [vmem:[#allocation4 + $0x90] sm:$0xf]  ;;  %1824 = vmatmul.bf16.vlgmr.msra.gmra.mxu2 %v7916_v55  ;;  %v6643_v44 = vld [vmem:[#allocation4 + $0x54] sm:$0xf] }
 0x1c9   :  { %11320 = vst [vmem:[#allocation125_spill] sm:$0xff] %v7990_v41  ;;  %v763_v23 = vadd.f32 %v762_v39, %v7458_v7  ;;  %v858_v7 = vsel %vm837_vm7, %v857_v38, %v856_v52  ;;  %v8016_v39 = vor.u32 %v6732_v18, %v6487_v28  ;;  %1850 = vmatmul.bf16.vlgmr.msrb.gmra.mxu0 %v7916_v55  ;;  %v6125_v56 = vld [vmem:[#allocation4 + $0x50] sm:$0xf]  ;;  %v6724_v5 = vld [vmem:[#allocation4 + $0x2dc] sm:$0xf] }
 0x1ca   :  { %11321 = vst [vmem:[#allocation126_spill] sm:$0xff] %v7995_v20  ;;  %v6651_v20 = vld [vmem:[#allocation4 + $0x94] sm:$0xf]  ;;  %v6647_v40 = vld [vmem:[#allocation4 + $0x6c] sm:$0xf0]  ;;  %1872 = vmatpush.bf16.msrb.mxu2 %v8004_v51  ;;  %1898 = vmatpush.bf16.msra.mxu0 %v8006_v60  ;;  %v8026_v18 = vor.u32 %v6655_v42, %v6157_v36  ;;  %v859_v38 = vrot.slane %v858_v7, 6 }
 0x1cb   :  { %11322 = vst [vmem:[#allocation127_spill] sm:$0xff] %v7997_v12  ;;  %v6159_v12 = vld [vmem:[#allocation4 + $0xb0] sm:$0xf0]  ;;  %v6455_v53 = vld [vmem:[#allocation4 + $0x2f8] sm:$0xf0]  ;;  %v8022_v1 = vrot.slane %v763_v23, 2  ;;  %1938 = vmatpush.bf16.msrb.mxu3 %v8012_v57  ;;  %v675_v23 = vpop.f32.mrf.mxu2 }
 0x1cc   :  { %1960 = vmatpush.bf16.msra.mxu1 %v7970_v62  ;;  %11323 = vst [vmem:[#allocation128_spill] sm:$0xff] %v8004_v51  ;;  %v8028_v28 = vor.u32 %v6651_v20, %v6159_v12  ;;  %v6127_v58 = vld [vmem:[#allocation4 + $0x70] sm:$0xf0]  ;;  %v8030_v52 = vld.sshfl [vmem:[#allocation1 + $0x28] sm:$0xff pattern:$0x73625140]  ;;  %v8038_v62 = vor.u32 %v6724_v5, %v6455_v53 }
 0x1cd   :  { %11324 = vst [vmem:[#allocation129_spill] sm:$0xff] %v8006_v60  ;;  %v6357_v10 = vld [vmem:[#allocation4 + $0x218] sm:$0xf]  ;;  %v6716_v42 = vld [vmem:[#allocation4 + $0x29c] sm:$0xf]  ;;  %v8052_v5 = vor.u32 %v6643_v44, %v6127_v58 }
 0x1ce   :  { %11325 = vst [vmem:[#allocation130_spill] sm:$0xff] %v8012_v57  ;;  %v6704_v36 = vld [vmem:[#allocation4 + $0x234] sm:$0xf0]  ;;  %v6423_v20 = vld [vmem:[#allocation4 + $0x2b8] sm:$0xf0]  ;;  %1873 = vmatpush.bf16.msrb.mxu2 %v8026_v18  ;;  %1899 = vmatpush.bf16.msra.mxu0 %v8028_v28 }
 0x1cf   :  { %11326 = vst [vmem:[#allocation131_spill] sm:$0xff] %v8016_v39  ;;  %v6093_v12 = vld [vmem:[#allocation4 + $0x10] sm:$0xf]  ;;  %v8042_v7 = vld.sshfl [vmem:[#allocation1 + $0x30] sm:$0xff pattern:$0x73625140] }
 0x1d0   :  { %1961 = vmatpush.bf16.msra.mxu1 %v7990_v41  ;;  %2298 = vst [vmem:[#allocation1] ss:$4 sm:$0xff] %v11327_v8  ;;  %v8033_v8 = vor.u32 %v6712_v6, %v6389_v33  ;;  %v8035_v41 = vld.sshfl [vmem:[#allocation1 + $0x20] sm:$0xff pattern:$0x73625140]  ;;  %v8046_v33 = vadd.f32 %v7508_v16, %v7416_v59  ;;  %v8050_v6 = vor.u32 %v6647_v40, %v6125_v56 }
 0x1d1   :  { %11328 = vst [vmem:[#allocation132_spill] sm:$0xff] %v8026_v18  ;;  %v6639_v60 = vld [vmem:[#allocation4 + $0x2c] sm:$0xf0]  ;;  %v6635_v53 = vld [vmem:[#allocation4 + $0x14] sm:$0xf]  ;;  %v8058_v59 = vor.u32 %v6704_v36, %v6357_v10  ;;  %v8064_v40 = vor.u32 %v6716_v42, %v6423_v20 }
 0x1d2   :  { %11329 = vst [vmem:[#allocation133_spill] sm:$0xff] %v8028_v28  ;;  %v8040_v51 = vld.sshfl [vmem:[#allocation1 + $0x38] sm:$0xff pattern:$0x73625140]  ;;  %v6692_v57 = vld [vmem:[#allocation4 + $0x1dc] sm:$0xf]  ;;  %1939 = vmatpush.bf16.msrb.mxu3 %v8033_v8  ;;  %v860_v16 = vsel %vm375_vm2, %v8046_v33, %v7979_v29  ;;  %v866_v10 = vsel %vm833_vm5, %v8046_v33, %v7979_v29  ;;  %1874 = vmatpush.bf16.msrb.mxu2 %v8050_v6 }
 0x1d3   :  { %11330 = vst [vmem:[#allocation134_spill] sm:$0xff] %v8030_v52  ;;  %v8055_v52 = vadd.f32 %v675_v23, %v7452_v3  ;;  %v6327_v56 = vld [vmem:[#allocation4 + $0x1f8] sm:$0xf0]  ;;  %v861_v3 = vsel %vm377_vm3, %v7906_v27, %v7937_v47  ;;  %1900 = vmatpush.bf16.msra.mxu0 %v8052_v5  ;;  %v8078_v36 = vor.u32 %v6639_v60, %v6093_v12  ;;  %v6293_v20 = vld [vmem:[#allocation4 + $0x198] sm:$0xf] }
 0x1d4   :  { %11331 = vst [vmem:[#allocation135_spill] sm:$0xff] %v8033_v8  ;;  %1962 = vmatpush.bf16.msra.mxu1 %v8016_v39  ;;  %v6708_v44 = vld [vmem:[#allocation4 + $0x25c] sm:$0xf]  ;;  %v6688_v8 = vld [vmem:[#allocation4 + $0x1b4] sm:$0xf0]  ;;  %v8088_v18 = vor.u32 %v6692_v57, %v6327_v56  ;;  %v864_v57 = vsel %vm377_vm3, %v7904_v61, %v8022_v1 }
 0x1d5   :  { %11332 = vst [vmem:[#allocation136_spill] sm:$0xff] %v8035_v41  ;;  %v6095_v41 = vld [vmem:[#allocation4 + $0x30] sm:$0xf0]  ;;  %v6391_v58 = vld [vmem:[#allocation4 + $0x278] sm:$0xf0] }
 0x1d6   :  { %11333 = vst [vmem:[#allocation137_spill] sm:$0xff] %v8038_v62  ;;  %v8080_v42 = vor.u32 %v6635_v53, %v6095_v41  ;;  %v6295_v39 = vld [vmem:[#allocation4 + $0x1b8] sm:$0xf0]  ;;  %1940 = vmatpush.bf16.msrb.mxu3 %v8058_v59  ;;  %v8096_v12 = vor.u32 %v6708_v44, %v6391_v58  ;;  %1875 = vmatpush.bf16.msrb.mxu2 %v8078_v36 }
 0x1d7   :  { %11334 = vst [vmem:[#allocation138_spill] sm:$0xff] %v8040_v51  ;;  %v6325_v51 = vld [vmem:[#allocation4 + $0x1d8] sm:$0xf]  ;;  %v8091_v60 = vld.sshfl [vmem:[#allocation1 + $0x18] sm:$0xff pattern:$0x73625140] }
 0x1d8   :  { %11335 = vst [vmem:[#allocation139_spill] sm:$0xff] %v8042_v7  ;;  %v6696_v7 = vld [vmem:[#allocation4 + $0x1f4] sm:$0xf0]  ;;  %1963 = vmatpush.bf16.msra.mxu1 %v8038_v62  ;;  %v6684_v62 = vld [vmem:[#allocation4 + $0x19c] sm:$0xf]  ;;  %1901 = vmatpush.bf16.msra.mxu0 %v8080_v42 }
 0x1d9   :  { %11336 = vst [vmem:[#allocation140_spill] sm:$0xff] %v8050_v6  ;;  %v8071_v23 = vld.sshfl [vmem:[#allocation1] sm:$0xff pattern:$0x73625140]  ;;  %v8086_v28 = vor.u32 %v6696_v7, %v6325_v51  ;;  %v867_v51 = vsel %vm835_vm6, %v7937_v47, %v7906_v27  ;;  %1941 = vmatmul.bf16.vlgmr.msrb.gmra.mxu3 %v11290_v32  ;;  %1876 = vmatmul.bf16.vlgmr.msrb.gmra.mxu2 %v7916_v55 }
 0x1da   :  { %2300 = vst [vmem:[#allocation1 + $0x20] ss:$4 sm:$0xff] %v859_v38  ;;  %v8069_v38 = vld.sshfl [vmem:[#allocation1 + $0x8] sm:$0xff pattern:$0x73625140]  ;;  %2053 = vmatpush.bf16.msra.mxu3 %v7511_v21  ;;  %v868_v44 = vsel %vm837_vm7, %v866_v10, %v867_v51  ;;  %v8124_v10 = vor.u32 %v6684_v62, %v6295_v39 }
 0x1db   :  { %11337 = vst [vmem:[#allocation141_spill] sm:$0xff] %v8058_v59  ;;  %v8093_v41 = vld.sshfl [vmem:[#allocation1 + $0x10] sm:$0xff pattern:$0x73625140]  ;;  %v6700_v53 = vld [vmem:[#allocation4 + $0x21c] sm:$0xf]  ;;  %1920 = vmatpush.bf16.msra.mxu2 %v8086_v28  ;;  %1902 = vmatmul.bf16.vlgmr.msra.gmra.mxu0 %v7916_v55 }
 0x1dc   :  { %11338 = vst [vmem:[#allocation142_spill] sm:$0xff] %v8064_v40  ;;  %1964 = vmatpush.bf16.msra.mxu1 %v8064_v40  ;;  %1946 = vmatpush.bf16.msrb.mxu0 %v8088_v18  ;;  %v6680_v51 = vld [vmem:[#allocation4 + $0x174] sm:$0xf0] }
 0x1dd   :  { %11339 = vst [vmem:[#allocation143_spill] sm:$0xff] %v8069_v38  ;;  %v862_v38 = vsel %vm379_vm4, %v860_v16, %v861_v3  ;;  %v6359_v16 = vld [vmem:[#allocation4 + $0x238] sm:$0xf0]  ;;  %v6229_v39 = vld [vmem:[#allocation4 + $0x118] sm:$0xf] }
 0x1de   :  { %11340 = vst [vmem:[#allocation144_spill] sm:$0xff] %v8071_v23  ;;  %v863_v23 = vsel %vm375_vm2, %v8055_v52, %v7999_v24  ;;  %2054 = vmatpush.bf16.msra.mxu3 %v7517_v25 }
 0x1df   :  { %11341 = vst [vmem:[#allocation145_spill] sm:$0xff] %v8078_v36  ;;  %v865_v58 = vsel %vm379_vm4, %v863_v23, %v864_v57  ;;  %v6261_v23 = vld [vmem:[#allocation4 + $0x158] sm:$0xf]  ;;  %v6676_v57 = vld [vmem:[#allocation4 + $0x15c] sm:$0xf] }
 0x1e0   :  { %11342 = vst [vmem:[#allocation146_spill] sm:$0xff] %v8080_v42  ;;  %1965 = vmatpush.bf16.msra.mxu1 %v8096_v12  ;;  %1947 = vmatpush.bf16.msrb.mxu0 %v8124_v10 }
 0x1e1   :  { %11343 = vst [vmem:[#allocation147_spill] sm:$0xff] %v8086_v28  ;;  %v8105_v7 = vld.sshfl [vmem:[#allocation1 + $0x28] sm:$0xff pattern:$0x73625140] }
 0x1e2   :  { %11344 = vst [vmem:[#allocation148_spill] sm:$0xff] %v8088_v18  ;;  %v8107_v56 = vld.sshfl [vmem:[#allocation1 + $0x20] sm:$0xff pattern:$0x73625140]  ;;  %2055 = vmatpush.bf16.msra.mxu3 %v7534_v43 }
 0x1e3   :  { %11345 = vst [vmem:[#allocation149_spill] sm:$0xff] %v8091_v60  ;;  %v8113_v3 = vld.sshfl [vmem:[#allocation1 + $0x38] sm:$0xff pattern:$0x73625140]  ;;  %v871_v60 = vsel %vm835_vm6, %v8022_v1, %v7904_v61  ;;  %v6199_v43 = vld [vmem:[#allocation4 + $0xf8] sm:$0xf0] }
 0x1e4   :  { %11346 = vst [vmem:[#allocation150_spill] sm:$0xff] %v8093_v41  ;;  %v870_v41 = vsel %vm833_vm5, %v8055_v52, %v7999_v24 }
 0x1e5   :  { %11347 = vst [vmem:[#allocation151_spill] sm:$0xff] %v8096_v12  ;;  %v872_v62 = vsel %vm837_vm7, %v870_v41, %v871_v60  ;;  %v878_v41 = vsel %vm377_vm3, %v8055_v52, %v7999_v24 }
 0x1e6   :  { %2575 = vst [vmem:[#allocation1] ss:$4 sm:$0xff] %v862_v38  ;;  %v8115_v38 = vld.sshfl [vmem:[#allocation1 + $0x30] sm:$0xff pattern:$0x73625140]  ;;  %2056 = vmatpush.bf16.msra.mxu3 %v7550_v19 }
 0x1e7   :  { %11348 = vst [vmem:[#allocation152_spill] sm:$0xff] %v8105_v7  ;;  %v6263_v7 = vld [vmem:[#allocation4 + $0x178] sm:$0xf0] }
 0x1e8   :  { %11349 = vst [vmem:[#allocation153_spill] sm:$0xff] %v8107_v56  ;;  %v8122_v56 = vor.u32 %v6688_v8, %v6293_v20  ;;  %v6672_v8 = vld [vmem:[#allocation4 + $0x134] sm:$0xf0]  ;;  %v6668_v20 = vld [vmem:[#allocation4 + $0x11c] sm:$0xf] }
 0x1e9   :  { %11350 = vst [vmem:[#allocation154_spill] sm:$0xff] %v8113_v3  ;;  %v869_v3 = vrot.slane %v868_v44, 2  ;;  %v8144_v44 = vor.u32 %v6676_v57, %v6263_v7  ;;  %v873_v7 = vrot.slane %v872_v62, 2  ;;  %v879_v57 = vsel %vm375_vm2, %v7904_v61, %v8022_v1 }
 0x1ea   :  { %11351 = vst [vmem:[#allocation155_spill] sm:$0xff] %v8115_v38  ;;  %v8128_v38 = vor.u32 %v6700_v53, %v6359_v16  ;;  %v874_v53 = vsel %vm377_vm3, %v8046_v33, %v7979_v29  ;;  %1921 = vmatpush.bf16.msra.mxu2 %v8122_v56  ;;  %v8142_v16 = vor.u32 %v6680_v51, %v6261_v23 }
 0x1eb   :  { %11352 = vst [vmem:[#allocation156_spill] sm:$0xff] %v8122_v56  ;;  %v875_v23 = vsel %vm375_vm2, %v7906_v27, %v7937_v47  ;;  %1948 = vmatpush.bf16.msrb.mxu0 %v8144_v44  ;;  %2057 = vmatpush.bf16.msra.mxu3 %v7562_v45 }
 0x1ec   :  { %11353 = vst [vmem:[#allocation157_spill] sm:$0xff] %v8124_v10  ;;  %1966 = vmatpush.bf16.msra.mxu1 %v8128_v38  ;;  %v876_v51 = vsel %vm379_vm4, %v875_v23, %v874_v53 }
 0x1ed   :  { %2577 = vst [vmem:[#allocation1 + $0x20] ss:$4 sm:$0xff] %v865_v58  ;;  %v6231_v58 = vld [vmem:[#allocation4 + $0x138] sm:$0xf0] }
 0x1ee   :  { %11354 = vst [vmem:[#allocation158_spill] sm:$0xff] %v8128_v38  ;;  %v8146_v21 = vld.sshfl [vmem:[#allocation1 + $0x8] sm:$0xff pattern:$0x73625140]  ;;  %v880_v38 = vsel %vm379_vm4, %v879_v57, %v878_v41  ;;  %1922 = vmatpush.bf16.msra.mxu2 %v8142_v16  ;;  %v8176_v62 = vor.u32 %v6668_v20, %v6231_v58  ;;  %v877_v41 = vrot.slane %v876_v51, 4 }
 0x1ef   :  { %11355 = vst [vmem:[#allocation159_spill] sm:$0xff] %v8142_v16  ;;  %v8148_v60 = vld.sshfl [vmem:[#allocation1] sm:$0xff pattern:$0x73625140]  ;;  %1967 = vmatmul.bf16.vlgmr.msra.gmra.mxu1 %v11290_v32  ;;  %v881_v57 = vrot.slane %v880_v38, 4  ;;  %v882_v38 = vsel %vm835_vm6, %v7979_v29, %v8046_v33  ;;  %2058 = vmatpush.bf16.msra.mxu3 %v7578_v37 }
 0x1f0   :  { %11356 = vst [vmem:[#allocation160_spill] sm:$0xff] %v8144_v44  ;;  %v8154_v25 = vld.sshfl [vmem:[#allocation1 + $0x18] sm:$0xff pattern:$0x73625140]  ;;  %2079 = vmatpush.bf16.msrb.mxu1 %v7536_v46  ;;  %v6660_v46 = vld [vmem:[#allocation4 + $0xdc] sm:$0xf]  ;;  %1949 = vmatpush.bf16.msrb.mxu0 %v8176_v62 }
 0x1f1   :  { %11357 = vst [vmem:[#allocation161_spill] sm:$0xff] %v8146_v21  ;;  %v8156_v59 = vld.sshfl [vmem:[#allocation1 + $0x10] sm:$0xff pattern:$0x73625140]  ;;  %v6664_v21 = vld [vmem:[#allocation4 + $0xf4] sm:$0xf0] }
 0x1f2   :  { %11358 = vst [vmem:[#allocation162_spill] sm:$0xff] %v8148_v60  ;;  %v6197_v60 = vld [vmem:[#allocation4 + $0xd8] sm:$0xf]  ;;  %v6652_v58 = vld [vmem:[#allocation4 + $0x9c] sm:$0xf] }
 0x1f3   :  { %11359 = vst [vmem:[#allocation163_spill] sm:$0xff] %v8154_v25  ;;  %v6656_v20 = vld [vmem:[#allocation4 + $0xb4] sm:$0xf0]  ;;  %2059 = vmatpush.bf16.msra.mxu3 %v7601_v54 }
 0x1f4   :  { %11360 = vst [vmem:[#allocation164_spill] sm:$0xff] %v8156_v59  ;;  %v8167_v25 = vld.sshfl [vmem:[#allocation1 + $0x28] sm:$0xff pattern:$0x73625140]  ;;  %2080 = vmatpush.bf16.msrb.mxu1 %v7552_v22  ;;  %v11392_v54 = vld [vmem:[#allocation39_spill] sm:$0xff] }
 0x1f5   :  { %2852 = vst [vmem:[#allocation1] ss:$4 sm:$0xff] %v869_v3  ;;  %v8169_v59 = vld.sshfl [vmem:[#allocation1 + $0x20] sm:$0xff pattern:$0x73625140]  ;;  %v8174_v3 = vor.u32 %v6672_v8, %v6229_v39  ;;  %v8187_v39 = vor.u32 %v6664_v21, %v6197_v60  ;;  %v8189_v8 = vor.u32 %v6660_v46, %v6199_v43 }
 0x1f6   :  { %11361 = vst [vmem:[#allocation165_spill] sm:$0xff] %v8167_v25  ;;  %v8178_v53 = vld.sshfl [vmem:[#allocation1 + $0x38] sm:$0xff pattern:$0x73625140]  ;;  %v6133_v21 = vld [vmem:[#allocation4 + $0x58] sm:$0xf] }
 0x1f7   :  { %11362 = vst [vmem:[#allocation166_spill] sm:$0xff] %v8169_v59  ;;  %v8180_v23 = vld.sshfl [vmem:[#allocation1 + $0x30] sm:$0xff pattern:$0x73625140]  ;;  %v6165_v59 = vld [vmem:[#allocation4 + $0x98] sm:$0xf]  ;;  %1923 = vmatpush.bf16.msra.mxu2 %v8174_v3  ;;  %1950 = vmatpush.bf16.msrb.mxu0 %v8189_v8 }
 0x1f8   :  { %11363 = vst [vmem:[#allocation167_spill] sm:$0xff] %v8174_v3  ;;  %2081 = vmatpush.bf16.msrb.mxu1 %v7565_v50  ;;  %v6648_v43 = vld [vmem:[#allocation4 + $0x74] sm:$0xf0]  ;;  %v6644_v46 = vld [vmem:[#allocation4 + $0x5c] sm:$0xf]  ;;  %v8209_v29 = vor.u32 %v6656_v20, %v6165_v59  ;;  %v887_v59 = vsel %vm833_vm5, %v7904_v61, %v8022_v1  ;;  %v707_v1 = vpop.f32.mrf.mxu3 }
 0x1f9   :  { %11364 = vst [vmem:[#allocation168_spill] sm:$0xff] %v8176_v62  ;;  %v6135_v60 = vld [vmem:[#allocation4 + $0x78] sm:$0xf0] }
 0x1fa   :  { %11365 = vst [vmem:[#allocation169_spill] sm:$0xff] %v8178_v53  ;;  %v8234_v20 = vor.u32 %v6644_v46, %v6135_v60 }
 0x1fb   :  { %11366 = vst [vmem:[#allocation170_spill] sm:$0xff] %v8180_v23  ;;  %v6167_v23 = vld [vmem:[#allocation4 + $0xb8] sm:$0xf0]  ;;  %1924 = vmatpush.bf16.msra.mxu2 %v8187_v39 }
 0x1fc   :  { %2854 = vst [vmem:[#allocation1 + $0x20] ss:$4 sm:$0xff] %v873_v7  ;;  %v8191_v32 = vld.sshfl [vmem:[#allocation1 + $0x8] sm:$0xff pattern:$0x73625140]  ;;  %v8211_v33 = vor.u32 %v6652_v58, %v6167_v23  ;;  %2082 = vmatpush.bf16.msrb.mxu1 %v7580_v14  ;;  %v8232_v23 = vor.u32 %v6648_v43, %v6133_v21 }
 0x1fd   :  { %11367 = vst [vmem:[#allocation171_spill] sm:$0xff] %v8187_v39  ;;  %v8193_v7 = vld.sshfl [vmem:[#allocation1] sm:$0xff pattern:$0x73625140] }
 0x1fe   :  { %11368 = vst [vmem:[#allocation172_spill] sm:$0xff] %v8189_v8  ;;  %v8199_v51 = vld.sshfl [vmem:[#allocation1 + $0x18] sm:$0xff pattern:$0x73625140]  ;;  %1951 = vmatpush.bf16.msrb.mxu0 %v8211_v33  ;;  %v6101_v58 = vld [vmem:[#allocation4 + $0x18] sm:$0xf] }
 0x1ff   :  { %11369 = vst [vmem:[#allocation173_spill] sm:$0xff] %v8191_v32  ;;  %v8201_v25 = vld.sshfl [vmem:[#allocation1 + $0x10] sm:$0xff pattern:$0x73625140]  ;;  %1925 = vmatpush.bf16.msra.mxu2 %v8209_v29 }
 0x200   :  { %11370 = vst [vmem:[#allocation174_spill] sm:$0xff] %v8193_v7  ;;  %v883_v7 = vsel %vm833_vm5, %v7906_v27, %v7937_v47  ;;  %v886_v47 = vsel %vm835_vm6, %v7999_v24, %v8055_v52  ;;  %v6640_v52 = vld [vmem:[#allocation4 + $0x34] sm:$0xf0]  ;;  %2083 = vmatpush.bf16.msrb.mxu1 %v7603_v26  ;;  %v11468_v26 = vld [vmem:[#allocation58_spill] sm:$0xff] }
 0x201   :  { %11371 = vst [vmem:[#allocation175_spill] sm:$0xff] %v8199_v51  ;;  %v884_v32 = vsel %vm837_vm7, %v883_v7, %v882_v38  ;;  %v888_v24 = vsel %vm837_vm7, %v887_v59, %v886_v47  ;;  %v6103_v7 = vld [vmem:[#allocation4 + $0x38] sm:$0xf0]  ;;  %v736_v38 = vpop.f32.mrf.mxu0  ;;  %v8249_v60 = vor.u32 %v6640_v52, %v6101_v58  ;;  %v678_v59 = vpop.f32.mrf.mxu2  ;;  %v11395_v52 = vld [vmem:[#allocation38_spill] sm:$0xff] }
 0x202   :  { %11372 = vst [vmem:[#allocation176_spill] sm:$0xff] %v8201_v25  ;;  %v885_v27 = vrot.slane %v884_v32, 6  ;;  %v889_v46 = vrot.slane %v888_v24, 6  ;;  %1952 = vmatpush.bf16.msrb.mxu0 %v8234_v20  ;;  %2060 = vmatpush.bf16.msra.mxu3 %v11395_v52 }
 0x203   :  { %3129 = vst [vmem:[#allocation1] ss:$4 sm:$0xff] %v877_v41  ;;  %v8213_v25 = vld.sshfl [vmem:[#allocation1 + $0x28] sm:$0xff pattern:$0x73625140]  ;;  %1926 = vmatpush.bf16.msra.mxu2 %v8232_v23 }
 0x204   :  { %11373 = vst [vmem:[#allocation177_spill] sm:$0xff] %v8209_v29  ;;  %v8215_v51 = vld.sshfl [vmem:[#allocation1 + $0x20] sm:$0xff pattern:$0x73625140]  ;;  %2084 = vmatpush.bf16.msrb.mxu1 %v11392_v54 }
 0x205   :  { %11374 = vst [vmem:[#allocation178_spill] sm:$0xff] %v8211_v33  ;;  %v8218_v53 = vld.sshfl [vmem:[#allocation1 + $0x38] sm:$0xff pattern:$0x73625140] }
 0x206   :  { %11375 = vst [vmem:[#allocation179_spill] sm:$0xff] %v8213_v25  ;;  %v8220_v41 = vld.sshfl [vmem:[#allocation1 + $0x30] sm:$0xff pattern:$0x73625140] }
 0x207   :  { %11376 = vst [vmem:[#allocation180_spill] sm:$0xff] %v8215_v51  ;;  %v765_v51 = vpop.f32.mrf.mxu1  ;;  %1927 = vmatpush.bf16.msra.mxu2 %v8249_v60 }
 0x208   :  { %11377 = vst [vmem:[#allocation181_spill] sm:$0xff] %v8218_v53 }
 0x209   :  { %11378 = vst [vmem:[#allocation182_spill] sm:$0xff] %v8220_v41  ;;  %v11389_v41 = vld [vmem:[#allocation9_spill] sm:$0xff] }
 0x20a   :  { %3131 = vst [vmem:[#allocation1 + $0x20] ss:$4 sm:$0xff] %v881_v57  ;;  %v6636_v57 = vld [vmem:[#allocation4 + $0x1c] sm:$0xf]  ;;  %v737_v25 = vadd.f32 %v736_v38, %v11389_v41  ;;  %1928 = vmatmul.bf16.vlgmr.msra.gmra.mxu2 %v7916_v55 }
 0x20b   :  { %11379 = vst [vmem:[#allocation183_spill] sm:$0xff] %v8232_v23  ;;  %v8238_v32 = vld.sshfl [vmem:[#allocation1 + $0x8] sm:$0xff pattern:$0x73625140]  ;;  %v8251_v47 = vor.u32 %v6636_v57, %v6103_v7  ;;  %v11397_v41 = vld [vmem:[#allocation15_spill] sm:$0xff] }
 0x20c   :  { %11380 = vst [vmem:[#allocation184_spill] sm:$0xff] %v8234_v20  ;;  %v8240_v61 = vld.sshfl [vmem:[#allocation1] sm:$0xff pattern:$0x73625140]  ;;  %2040 = vmatpush.bf16.msrb.mxu2 %v11397_v41  ;;  %v11398_v7 = vld [vmem:[#allocation16_spill] sm:$0xff] }
 0x20d   :  { %11381 = vst [vmem:[#allocation185_spill] sm:$0xff] %v8238_v32  ;;  %v8243_v21 = vld.sshfl [vmem:[#allocation1 + $0x18] sm:$0xff pattern:$0x73625140]  ;;  %1953 = vmatpush.bf16.msrb.mxu0 %v8251_v47 }
 0x20e   :  { %11382 = vst [vmem:[#allocation186_spill] sm:$0xff] %v8240_v61  ;;  %v8245_v43 = vld.sshfl [vmem:[#allocation1 + $0x10] sm:$0xff pattern:$0x73625140] }
 0x20f   :  { %11383 = vst [vmem:[#allocation187_spill] sm:$0xff] %v8243_v21  ;;  %v11390_v21 = vld [vmem:[#allocation11_spill] sm:$0xff] }
 0x210   :  { %11384 = vst [vmem:[#allocation188_spill] sm:$0xff] %v8245_v43  ;;  %v708_v53 = vadd.f32 %v707_v1, %v11390_v21  ;;  %v11391_v43 = vld [vmem:[#allocation12_spill] sm:$0xff]  ;;  %v11399_v21 = vld [vmem:[#allocation47_spill] sm:$0xff]  ;;  %1954 = vmatmul.bf16.vlgmr.msrb.gmra.mxu0 %v7916_v55 }
 0x211   :  { %11385 = vst [vmem:[#allocation189_spill] sm:$0xff] %v8249_v60  ;;  %v8253_v61 = vld.sshfl [vmem:[#allocation1 + $0x28] sm:$0xff pattern:$0x73625140]  ;;  %v766_v24 = vadd.f32 %v765_v51, %v11391_v43  ;;  %2066 = vmatpush.bf16.msra.mxu0 %v11398_v7  ;;  %v8273_v51 = vrot.slane %v737_v25, 4  ;;  %2085 = vmatpush.bf16.msrb.mxu1 %v11399_v21 }
 0x212   :  { %11386 = vst [vmem:[#allocation190_spill] sm:$0xff] %v8251_v47  ;;  %v8255_v32 = vld.sshfl [vmem:[#allocation1 + $0x20] sm:$0xff pattern:$0x73625140]  ;;  %v8275_v38 = vrot.slane %v708_v53, 6  ;;  %v11400_v43 = vld [vmem:[#allocation40_spill] sm:$0xff] }
 0x213   :  { %3406 = vst [vmem:[#allocation1] ss:$4 sm:$0xff] %v885_v27  ;;  %v8261_v37 = vld.sshfl [vmem:[#allocation1 + $0x38] sm:$0xff pattern:$0x73625140]  ;;  %v8277_v1 = vrot.slane %v766_v24, 2  ;;  %2105 = vmatpush.bf16.msrb.mxu3 %v11400_v43 }
 0x214   :  { %11387 = vst [vmem:[#allocation191_spill] sm:$0xff] %v8253_v61  ;;  %v8263_v58 = vld.sshfl [vmem:[#allocation1 + $0x30] sm:$0xff pattern:$0x73625140]  ;;  %v11396_v27 = vld [vmem:[#allocation10_spill] sm:$0xff]  ;;  %v11413_v43 = vld [vmem:[#allocation23_spill] sm:$0xff] }
 0x215   :  { %11388 = vst [vmem:[#allocation192_spill] sm:$0xff] %v8255_v32  ;;  %v8267_v57 = vadd.f32 %v678_v59, %v11396_v27  ;;  %v11405_v27 = vld [vmem:[#allocation19_spill] sm:$0xff]  ;;  %v11406_v32 = vld [vmem:[#allocation20_spill] sm:$0xff]  ;;  %v894_v55 = vsel %vm377_vm3, %v8273_v51, %v8277_v1 }
 0x216   :  { %11393 = vst [vmem:[#allocation9_spill] sm:$0xff] %v8261_v37  ;;  %2041 = vmatpush.bf16.msrb.mxu2 %v11405_v27  ;;  %2067 = vmatpush.bf16.msra.mxu0 %v11406_v32 }
 0x217   :  { %11394 = vst [vmem:[#allocation11_spill] sm:$0xff] %v8263_v58  ;;  %v893_v25 = vsel %vm375_vm2, %v8267_v57, %v8275_v38 }
 0x218   :  { %3408 = vst [vmem:[#allocation1 + $0x20] ss:$4 sm:$0xff] %v889_v46 }
 0x21a   :  { %v8283_v46 = vld.sshfl [vmem:[#allocation1 + $0x8] sm:$0xff pattern:$0x73625140]  ;;  %v8285_v59 = vld.sshfl [vmem:[#allocation1] sm:$0xff pattern:$0x73625140]  ;;  %2042 = vmatpush.bf16.msrb.mxu2 %v11413_v43 }
 0x21b   :  { %11401 = vst [vmem:[#allocation12_spill] sm:$0xff] %v8283_v46  ;;  %v8290_v53 = vld.sshfl [vmem:[#allocation1 + $0x18] sm:$0xff pattern:$0x73625140]  ;;  %v11407_v46 = vld [vmem:[#allocation53_spill] sm:$0xff] }
 0x21c   :  { %11402 = vst [vmem:[#allocation10_spill] sm:$0xff] %v8285_v59  ;;  %v8292_v24 = vld.sshfl [vmem:[#allocation1 + $0x10] sm:$0xff pattern:$0x73625140]  ;;  %2086 = vmatpush.bf16.msrb.mxu1 %v11407_v46  ;;  %v11408_v59 = vld [vmem:[#allocation48_spill] sm:$0xff] }
 0x21d   :  { %11403 = vst [vmem:[#allocation193_spill] sm:$0xff] %v8290_v53  ;;  %2106 = vmatpush.bf16.msrb.mxu3 %v11408_v59  ;;  %v11414_v59 = vld [vmem:[#allocation24_spill] sm:$0xff] }
 0x21e   :  { %11404 = vst [vmem:[#allocation194_spill] sm:$0xff] %v8292_v24  ;;  %v895_v24 = vsel %vm379_vm4, %v893_v25, %v894_v55  ;;  %2068 = vmatpush.bf16.msra.mxu0 %v11414_v59  ;;  %v11415_v25 = vld [vmem:[#allocation54_spill] sm:$0xff]  ;;  %v899_v55 = vrot.slane %v7724_v4, 2  ;;  %v11420_v46 = vld [vmem:[#allocation28_spill] sm:$0xff]  ;;  %v11424_v4 = vld [vmem:[#allocation65_spill] sm:$0xff] }
 0x21f   :  { %3683 = vst [vmem:[#allocation1] ss:$4 sm:$0xff] %v7720_v11  ;;  %v8302_v58 = vld.sshfl [vmem:[#allocation1 + $0x28] sm:$0xff pattern:$0x73625140]  ;;  %v900_v11 = vsel %vm833_vm5, %v8267_v57, %v8275_v38 }
 0x220   :  { %11409 = vst [vmem:[#allocation195_spill] sm:$0xff] %v8302_v58  ;;  %v8304_v61 = vld.sshfl [vmem:[#allocation1 + $0x20] sm:$0xff pattern:$0x73625140]  ;;  %2131 = vmatpush.bf16.msra.mxu1 %v7689_v13 }
 0x221   :  { %11410 = vst [vmem:[#allocation196_spill] sm:$0xff] %v8304_v61  ;;  %v8308_v53 = vld.sshfl [vmem:[#allocation1 + $0x38] sm:$0xff pattern:$0x73625140]  ;;  %v901_v61 = vsel %vm835_vm6, %v8277_v1, %v8273_v51  ;;  %2107 = vmatpush.bf16.msrb.mxu3 %v11415_v25  ;;  %v11423_v25 = vld [vmem:[#allocation60_spill] sm:$0xff] }
 0x222   :  { %11411 = vst [vmem:[#allocation197_spill] sm:$0xff] %v8308_v53  ;;  %v8310_v37 = vld.sshfl [vmem:[#allocation1 + $0x30] sm:$0xff pattern:$0x73625140]  ;;  %v902_v58 = vsel %vm837_vm7, %v900_v11, %v901_v61  ;;  %2069 = vmatpush.bf16.msra.mxu0 %v11420_v46 }
 0x223   :  { %11412 = vst [vmem:[#allocation198_spill] sm:$0xff] %v8310_v37  ;;  %v11416_v37 = vld [vmem:[#allocation61_spill] sm:$0xff]  ;;  %v903_v54 = vrot.slane %v902_v58, 2 }
 0x224   :  { %3685 = vst [vmem:[#allocation1 + $0x20] ss:$4 sm:$0xff] %v895_v24  ;;  %2132 = vmatpush.bf16.msra.mxu1 %v11416_v37  ;;  %v11419_v24 = vld [vmem:[#allocation27_spill] sm:$0xff]  ;;  %v11429_v37 = vld [vmem:[#allocation32_spill] sm:$0xff]  ;;  %v11430_v58 = vld [vmem:[#allocation33_spill] sm:$0xff] }
 0x225   :  { %2043 = vmatpush.bf16.msrb.mxu2 %v11419_v24  ;;  %2108 = vmatpush.bf16.msrb.mxu3 %v11423_v25  ;;  %v11434_v25 = vld [vmem:[#allocation36_spill] sm:$0xff] }
 0x226   :  { %v8324_v53 = vld.sshfl [vmem:[#allocation1 + $0x8] sm:$0xff pattern:$0x73625140]  ;;  %v8326_v13 = vld.sshfl [vmem:[#allocation1] sm:$0xff pattern:$0x73625140]  ;;  %2070 = vmatpush.bf16.msra.mxu0 %v11430_v58 }
 0x227   :  { %11417 = vst [vmem:[#allocation199_spill] sm:$0xff] %v8324_v53  ;;  %v8330_v52 = vld.sshfl [vmem:[#allocation1 + $0x18] sm:$0xff pattern:$0x73625140] }
 0x228   :  { %11418 = vst [vmem:[#allocation200_spill] sm:$0xff] %v8326_v13  ;;  %v8332_v21 = vld.sshfl [vmem:[#allocation1 + $0x10] sm:$0xff pattern:$0x73625140]  ;;  %2133 = vmatpush.bf16.msra.mxu1 %v11424_v4 }
 0x229   :  { %11421 = vst [vmem:[#allocation201_spill] sm:$0xff] %v8330_v52  ;;  %v908_v52 = vsel %vm377_vm3, %v8267_v57, %v8275_v38  ;;  %2044 = vmatpush.bf16.msrb.mxu2 %v11429_v37  ;;  %v11435_v4 = vld [vmem:[#allocation37_spill] sm:$0xff] }
 0x22a   :  { %11422 = vst [vmem:[#allocation202_spill] sm:$0xff] %v8332_v21  ;;  %2071 = vmatpush.bf16.msra.mxu0 %v11435_v4  ;;  %v11445_v4 = vld [vmem:[#allocation43_spill] sm:$0xff] }
 0x22b   :  { %3960 = vst [vmem:[#allocation1] ss:$4 sm:$0xff] %v899_v55  ;;  %v8336_v61 = vld.sshfl [vmem:[#allocation1 + $0x28] sm:$0xff pattern:$0x73625140] }
 0x22c   :  { %11425 = vst [vmem:[#allocation203_spill] sm:$0xff] %v8336_v61  ;;  %v8338_v11 = vld.sshfl [vmem:[#allocation1 + $0x20] sm:$0xff pattern:$0x73625140]  ;;  %v11431_v55 = vld [vmem:[#allocation64_spill] sm:$0xff]  ;;  %v909_v61 = vsel %vm375_vm2, %v8273_v51, %v8277_v1 }
 0x22d   :  { %11426 = vst [vmem:[#allocation204_spill] sm:$0xff] %v8338_v11  ;;  %v8340_v53 = vld.sshfl [vmem:[#allocation1 + $0x38] sm:$0xff pattern:$0x73625140]  ;;  %2109 = vmatpush.bf16.msrb.mxu3 %v11431_v55  ;;  %v11432_v11 = vld [vmem:[#allocation72_spill] sm:$0xff]  ;;  %2045 = vmatpush.bf16.msrb.mxu2 %v11434_v25 }
 0x22e   :  { %11427 = vst [vmem:[#allocation205_spill] sm:$0xff] %v8340_v53  ;;  %v8342_v13 = vld.sshfl [vmem:[#allocation1 + $0x30] sm:$0xff pattern:$0x73625140]  ;;  %2134 = vmatpush.bf16.msra.mxu1 %v11432_v11  ;;  %v11433_v53 = vld [vmem:[#allocation66_spill] sm:$0xff]  ;;  %v11441_v11 = vld [vmem:[#allocation76_spill] sm:$0xff]  ;;  %2072 = vmatpush.bf16.msra.mxu0 %v11445_v4 }
 0x22f   :  { %11428 = vst [vmem:[#allocation206_spill] sm:$0xff] %v8342_v13  ;;  %v907_v21 = vrot.slane %v11433_v53, 4  ;;  %v910_v13 = vsel %vm379_vm4, %v909_v61, %v908_v52  ;;  %v11444_v61 = vld [vmem:[#allocation41_spill] sm:$0xff] }
 0x230   :  { %3962 = vst [vmem:[#allocation1 + $0x20] ss:$4 sm:$0xff] %v903_v54  ;;  %v11438_v54 = vld [vmem:[#allocation71_spill] sm:$0xff]  ;;  %v911_v24 = vrot.slane %v910_v13, 4 }
 0x231   :  { %2110 = vmatpush.bf16.msrb.mxu3 %v11438_v54  ;;  %2046 = vmatpush.bf16.msrb.mxu2 %v11444_v61  ;;  %v11448_v13 = vld [vmem:[#allocation75_spill] sm:$0xff]  ;;  %v917_v54 = vsel %vm833_vm5, %v8273_v51, %v8277_v1  ;;  %v11452_v61 = vld [vmem:[#allocation49_spill] sm:$0xff] }
 0x232   :  { %v8358_v37 = vld.sshfl [vmem:[#allocation1 + $0x8] sm:$0xff pattern:$0x73625140]  ;;  %v8360_v58 = vld.sshfl [vmem:[#allocation1] sm:$0xff pattern:$0x73625140]  ;;  %2135 = vmatpush.bf16.msra.mxu1 %v11441_v11 }
 0x233   :  { %11436 = vst [vmem:[#allocation66_spill] sm:$0xff] %v8358_v37  ;;  %v8363_v55 = vld.sshfl [vmem:[#allocation1 + $0x18] sm:$0xff pattern:$0x73625140]  ;;  %v11451_v11 = vld [vmem:[#allocation67_spill] sm:$0xff] }
 0x234   :  { %11437 = vst [vmem:[#allocation207_spill] sm:$0xff] %v8360_v58  ;;  %v8365_v46 = vld.sshfl [vmem:[#allocation1 + $0x10] sm:$0xff pattern:$0x73625140]  ;;  %v11459_v51 = vld [vmem:[#allocation55_spill] sm:$0xff] }
 0x235   :  { %11439 = vst [vmem:[#allocation208_spill] sm:$0xff] %v8363_v55  ;;  %2111 = vmatpush.bf16.msrb.mxu3 %v11448_v13  ;;  %v710_v55 = vpop.f32.mrf.mxu3  ;;  %2047 = vmatpush.bf16.msrb.mxu2 %v11452_v61 }
 0x236   :  { %11440 = vst [vmem:[#allocation209_spill] sm:$0xff] %v8365_v46  ;;  %v916_v46 = vsel %vm835_vm6, %v8275_v38, %v8267_v57  ;;  %2136 = vmatpush.bf16.msra.mxu1 %v7797_v63  ;;  %v11453_v57 = vld [vmem:[#allocation50_spill] sm:$0xff]  ;;  %v11454_v38 = vld [vmem:[#allocation51_spill] sm:$0xff] }
 0x237   :  { %4237 = vst [vmem:[#allocation1] ss:$4 sm:$0xff] %v907_v21  ;;  %v8368_v53 = vld.sshfl [vmem:[#allocation1 + $0x28] sm:$0xff pattern:$0x73625140]  ;;  %v11449_v21 = vld [vmem:[#allocation42_spill] sm:$0xff]  ;;  %v918_v4 = vsel %vm837_vm7, %v917_v54, %v916_v46  ;;  %2073 = vmatpush.bf16.msra.mxu0 %v11453_v57 }
 0x238   :  { %11442 = vst [vmem:[#allocation210_spill] sm:$0xff] %v8368_v53  ;;  %v8370_v52 = vld.sshfl [vmem:[#allocation1 + $0x20] sm:$0xff pattern:$0x73625140]  ;;  %v11450_v53 = vld [vmem:[#allocation68_spill] sm:$0xff]  ;;  %v11458_v63 = vld [vmem:[#allocation46_spill] sm:$0xff] }
 0x239   :  { %11443 = vst [vmem:[#allocation211_spill] sm:$0xff] %v8370_v52  ;;  %v8374_v37 = vld.sshfl [vmem:[#allocation1 + $0x38] sm:$0xff pattern:$0x73625140]  ;;  %v595_v52 = vadd.f32 %v11450_v53, %v11449_v21  ;;  %2092 = vmatpush.bf16.msra.mxu2 %v11454_v38  ;;  %v739_v21 = vpop.f32.mrf.mxu0  ;;  %v653_v1 = vadd.f32 %v11459_v51, %v11458_v63  ;;  %2112 = vmatpush.bf16.msrb.mxu3 %v7786_v17  ;;  %v919_v38 = vrot.slane %v918_v4, 6  ;;  %v11466_v63 = vld [vmem:[#allocation84_spill] sm:$0xff] }
 0x23a   :  { %11446 = vst [vmem:[#allocation212_spill] sm:$0xff] %v8374_v37  ;;  %v8376_v58 = vld.sshfl [vmem:[#allocation1 + $0x30] sm:$0xff pattern:$0x73625140]  ;;  %v768_v37 = vpop.f32.mrf.mxu1  ;;  %2137 = vmatpush.bf16.msra.mxu1 %v7827_v34  ;;  %v740_v51 = vadd.f32 %v739_v21, %v11466_v63  ;;  %v711_v17 = vadd.f32 %v710_v55, %v7815_v9  ;;  %v11474_v9 = vld [vmem:[#allocation80_spill] sm:$0xff] }
 0x23b   :  { %11447 = vst [vmem:[#allocation213_spill] sm:$0xff] %v8376_v58  ;;  %v915_v58 = vrot.slane %v11451_v11, 6  ;;  %v8406_v54 = vrot.slane %v595_v52, 6  ;;  %v11467_v34 = vld [vmem:[#allocation85_spill] sm:$0xff]  ;;  %v11469_v52 = vld [vmem:[#allocation59_spill] sm:$0xff] }
 0x23c   :  { %4239 = vst [vmem:[#allocation1 + $0x20] ss:$4 sm:$0xff] %v911_v24  ;;  %v11455_v24 = vld [vmem:[#allocation52_spill] sm:$0xff] }
 0x23d   :  { %2118 = vmatpush.bf16.msrb.mxu0 %v11455_v24  ;;  %v11462_v24 = vld [vmem:[#allocation45_spill] sm:$0xff]  ;;  %2093 = vmatpush.bf16.msra.mxu2 %v11468_v26 }
 0x23e   :  { %v8394_v13 = vld.sshfl [vmem:[#allocation1 + $0x8] sm:$0xff pattern:$0x73625140]  ;;  %v8396_v53 = vld.sshfl [vmem:[#allocation1] sm:$0xff pattern:$0x73625140]  ;;  %2138 = vmatpush.bf16.msra.mxu1 %v7839_v48 }
 0x23f   :  { %11456 = vst [vmem:[#allocation42_spill] sm:$0xff] %v8394_v13  ;;  %v8402_v46 = vld.sshfl [vmem:[#allocation1 + $0x18] sm:$0xff pattern:$0x73625140]  ;;  %v11463_v13 = vld [vmem:[#allocation56_spill] sm:$0xff]  ;;  %v11493_v26 = vld [vmem:[#allocation77_spill] sm:$0xff] }
 0x240   :  { %11457 = vst [vmem:[#allocation68_spill] sm:$0xff] %v8396_v53  ;;  %v8404_v11 = vld.sshfl [vmem:[#allocation1 + $0x10] sm:$0xff pattern:$0x73625140]  ;;  %v624_v57 = vadd.f32 %v11463_v13, %v11462_v24  ;;  %v681_v53 = vpop.f32.mrf.mxu2  ;;  %v11472_v13 = vld [vmem:[#allocation44_spill] sm:$0xff] }
 0x241   :  { %11460 = vst [vmem:[#allocation67_spill] sm:$0xff] %v8402_v46  ;;  %v769_v46 = vadd.f32 %v768_v37, %v11467_v34  ;;  %2119 = vmatpush.bf16.msrb.mxu0 %v11469_v52  ;;  %v11473_v24 = vld [vmem:[#allocation29_spill] sm:$0xff]  ;;  %v8431_v55 = vadd.f32 %v681_v53, %v11474_v9  ;;  %v8433_v37 = vpop.f32.mrf.mxu3  ;;  %v11476_v53 = vld [vmem:[#allocation63_spill] sm:$0xff] }
 0x242   :  { %11461 = vst [vmem:[#allocation46_spill] sm:$0xff] %v8404_v11  ;;  %v8425_v11 = vadd.f32 %v11473_v24, %v11472_v13  ;;  %v8435_v34 = vpop.f32.mrf.mxu1  ;;  %v8437_v21 = vrot.slane %v624_v57, 4  ;;  %v8442_v13 = vrot.slane %v740_v51, 4  ;;  %v11487_v52 = vld [vmem:[#allocation73_spill] sm:$0xff] }
 0x243   :  { %4514 = vst [vmem:[#allocation1] ss:$4 sm:$0xff] %v915_v58  ;;  %v8410_v61 = vld.sshfl [vmem:[#allocation1 + $0x28] sm:$0xff pattern:$0x73625140]  ;;  %v8446_v24 = vrot.slane %v769_v46, 2 }
 0x244   :  { %11464 = vst [vmem:[#allocation55_spill] sm:$0xff] %v8410_v61  ;;  %v8412_v25 = vld.sshfl [vmem:[#allocation1 + $0x20] sm:$0xff pattern:$0x73625140]  ;;  %v8427_v61 = vrot.slane %v653_v1, 2  ;;  %v920_v63 = vsel %vm375_vm2, %v8425_v11, %v8406_v54  ;;  %v8444_v1 = vrot.slane %v711_v17, 6 }
 0x245   :  { %11465 = vst [vmem:[#allocation45_spill] sm:$0xff] %v8412_v25  ;;  %v8419_v4 = vld.sshfl [vmem:[#allocation1 + $0x38] sm:$0xff pattern:$0x73625140]  ;;  %2120 = vmatpush.bf16.msrb.mxu0 %v11476_v53 }
 0x246   :  { %11470 = vst [vmem:[#allocation56_spill] sm:$0xff] %v8419_v4  ;;  %v8421_v58 = vld.sshfl [vmem:[#allocation1 + $0x30] sm:$0xff pattern:$0x73625140]  ;;  %v921_v9 = vsel %vm377_vm3, %v8437_v21, %v8427_v61  ;;  %v923_v17 = vsel %vm375_vm2, %v8431_v55, %v8444_v1  ;;  %v926_v4 = vsel %vm833_vm5, %v8425_v11, %v8406_v54 }
 0x247   :  { %11471 = vst [vmem:[#allocation84_spill] sm:$0xff] %v8421_v58  ;;  %v922_v58 = vsel %vm379_vm4, %v920_v63, %v921_v9  ;;  %v11482_v63 = vld [vmem:[#allocation70_spill] sm:$0xff] }
 0x248   :  { %4516 = vst [vmem:[#allocation1 + $0x20] ss:$4 sm:$0xff] %v919_v38  ;;  %v11475_v38 = vld [vmem:[#allocation62_spill] sm:$0xff] }
 0x249   :  { %2094 = vmatpush.bf16.msra.mxu2 %v11475_v38  ;;  %2121 = vmatpush.bf16.msrb.mxu0 %v11482_v63  ;;  %v930_v63 = vsel %vm833_vm5, %v8431_v55, %v8444_v1 }
 0x24a   :  { %v8453_v57 = vld.sshfl [vmem:[#allocation1 + $0x8] sm:$0xff pattern:$0x73625140]  ;;  %v8455_v25 = vld.sshfl [vmem:[#allocation1] sm:$0xff pattern:$0x73625140] }
 0x24b   :  { %11477 = vst [vmem:[#allocation85_spill] sm:$0xff] %v8453_v57  ;;  %v8461_v46 = vld.sshfl [vmem:[#allocation1 + $0x18] sm:$0xff pattern:$0x73625140]  ;;  %v924_v57 = vsel %vm377_vm3, %v8442_v13, %v8446_v24 }
 0x24c   :  { %11478 = vst [vmem:[#allocation44_spill] sm:$0xff] %v8455_v25  ;;  %v8463_v51 = vld.sshfl [vmem:[#allocation1 + $0x10] sm:$0xff pattern:$0x73625140] }
 0x24d   :  { %11479 = vst [vmem:[#allocation29_spill] sm:$0xff] %v8461_v46  ;;  %v11481_v25 = vld [vmem:[#allocation69_spill] sm:$0xff]  ;;  %v925_v46 = vsel %vm379_vm4, %v923_v17, %v924_v57  ;;  %v11488_v57 = vld [vmem:[#allocation74_spill] sm:$0xff] }
 0x24e   :  { %11480 = vst [vmem:[#allocation80_spill] sm:$0xff] %v8463_v51  ;;  %2095 = vmatpush.bf16.msra.mxu2 %v11481_v25  ;;  %v927_v51 = vsel %vm835_vm6, %v8427_v61, %v8437_v21  ;;  %v1788_v25 = vpop.f32.mrf.mxu3  ;;  %2122 = vmatpush.bf16.msrb.mxu0 %v11488_v57 }
 0x24f   :  { %4791 = vst [vmem:[#allocation1] ss:$4 sm:$0xff] %v922_v58  ;;  %v8473_v9 = vld.sshfl [vmem:[#allocation1 + $0x28] sm:$0xff pattern:$0x73625140]  ;;  %v928_v38 = vsel %vm837_vm7, %v926_v4, %v927_v51 }
 0x250   :  { %11483 = vst [vmem:[#allocation214_spill] sm:$0xff] %v8473_v9  ;;  %v8475_v48 = vld.sshfl [vmem:[#allocation1 + $0x20] sm:$0xff pattern:$0x73625140]  ;;  %v1814_v9 = vpop.f32.mrf.mxu1  ;;  %v929_v17 = vrot.slane %v928_v38, 2 }
 0x251   :  { %11484 = vst [vmem:[#allocation215_spill] sm:$0xff] %v8475_v48  ;;  %v8481_v53 = vld.sshfl [vmem:[#allocation1 + $0x38] sm:$0xff pattern:$0x73625140]  ;;  %v931_v48 = vsel %vm835_vm6, %v8446_v24, %v8442_v13 }
 0x252   :  { %11485 = vst [vmem:[#allocation216_spill] sm:$0xff] %v8481_v53  ;;  %v8483_v58 = vld.sshfl [vmem:[#allocation1 + $0x30] sm:$0xff pattern:$0x73625140]  ;;  %2096 = vmatpush.bf16.msra.mxu2 %v11487_v52  ;;  %v11494_v52 = vld [vmem:[#allocation78_spill] sm:$0xff] }
 0x253   :  { %11486 = vst [vmem:[#allocation217_spill] sm:$0xff] %v8483_v58  ;;  %v932_v58 = vsel %vm837_vm7, %v930_v63, %v931_v48  ;;  %2123 = vmatpush.bf16.msrb.mxu0 %v11494_v52  ;;  %v935_v63 = vsel %vm375_vm2, %v8437_v21, %v8427_v61 }
 0x254   :  { %4793 = vst [vmem:[#allocation1 + $0x20] ss:$4 sm:$0xff] %v925_v46  ;;  %v934_v46 = vsel %vm377_vm3, %v8425_v11, %v8406_v54  ;;  %v933_v9 = vrot.slane %v932_v58, 2  ;;  %v938_v58 = vsel %vm377_vm3, %v8431_v55, %v8444_v1 }
 0x256   :  { %v8495_v53 = vld.sshfl [vmem:[#allocation1 + $0x8] sm:$0xff pattern:$0x73625140]  ;;  %v8497_v4 = vld.sshfl [vmem:[#allocation1] sm:$0xff pattern:$0x73625140]  ;;  %2097 = vmatpush.bf16.msra.mxu2 %v11493_v26 }
 0x257   :  { %11489 = vst [vmem:[#allocation218_spill] sm:$0xff] %v8495_v53  ;;  %v8499_v51 = vld.sshfl [vmem:[#allocation1 + $0x18] sm:$0xff pattern:$0x73625140] }
 0x258   :  { %11490 = vst [vmem:[#allocation219_spill] sm:$0xff] %v8497_v4  ;;  %v8501_v25 = vld.sshfl [vmem:[#allocation1 + $0x10] sm:$0xff pattern:$0x73625140]  ;;  %v936_v4 = vsel %vm379_vm4, %v935_v63, %v934_v46  ;;  %v1864_v52 = vpop.f32.mrf.mxu1  ;;  %v11504_v26 = vld [vmem:[#allocation90_spill] sm:$0xff] }
 0x259   :  { %11491 = vst [vmem:[#allocation220_spill] sm:$0xff] %v8499_v51  ;;  %v937_v53 = vrot.slane %v936_v4, 4  ;;  %v11503_v63 = vld [vmem:[#allocation89_spill] sm:$0xff] }
 0x25a   :  { %11492 = vst [vmem:[#allocation221_spill] sm:$0xff] %v8501_v25 }
 0x25b   :  { %5068 = vst [vmem:[#allocation1] ss:$4 sm:$0xff] %v929_v17  ;;  %v8508_v38 = vld.sshfl [vmem:[#allocation1 + $0x28] sm:$0xff pattern:$0x73625140]  ;;  %v11499_v17 = vld [vmem:[#allocation83_spill] sm:$0xff] }
 0x25c   :  { %11495 = vst [vmem:[#allocation222_spill] sm:$0xff] %v8508_v38  ;;  %v8510_v48 = vld.sshfl [vmem:[#allocation1 + $0x20] sm:$0xff pattern:$0x73625140]  ;;  %2098 = vmatpush.bf16.msra.mxu2 %v11499_v17  ;;  %v11500_v38 = vld [vmem:[#allocation86_spill] sm:$0xff] }
 0x25d   :  { %11496 = vst [vmem:[#allocation223_spill] sm:$0xff] %v8510_v48  ;;  %v8515_v51 = vld.sshfl [vmem:[#allocation1 + $0x38] sm:$0xff pattern:$0x73625140]  ;;  %2124 = vmatpush.bf16.msrb.mxu0 %v11500_v38  ;;  %v939_v48 = vsel %vm375_vm2, %v8442_v13, %v8446_v24  ;;  %v942_v38 = vsel %vm835_vm6, %v8406_v54, %v8425_v11  ;;  %v946_v11 = vsel %vm835_vm6, %v8444_v1, %v8431_v55  ;;  %v11515_v55 = vld [vmem:[#allocation100_spill] sm:$0xff] }
 0x25e   :  { %11497 = vst [vmem:[#allocation224_spill] sm:$0xff] %v8515_v51  ;;  %v8517_v25 = vld.sshfl [vmem:[#allocation1 + $0x30] sm:$0xff pattern:$0x73625140]  ;;  %v940_v51 = vsel %vm379_vm4, %v939_v48, %v938_v58  ;;  %v947_v54 = vsel %vm833_vm5, %v8442_v13, %v8446_v24 }
 0x25f   :  { %11498 = vst [vmem:[#allocation225_spill] sm:$0xff] %v8517_v25  ;;  %v941_v4 = vrot.slane %v940_v51, 4  ;;  %v948_v51 = vsel %vm837_vm7, %v947_v54, %v946_v11  ;;  %v1773_v11 = vpop.f32.mrf.mxu2  ;;  %v11520_v54 = vld [vmem:[#allocation102_spill] sm:$0xff] }
 0x260   :  { %5070 = vst [vmem:[#allocation1 + $0x20] ss:$4 sm:$0xff] %v933_v9  ;;  %2099 = vmatpush.bf16.msra.mxu2 %v11503_v63 }
 0x261   :  { %2125 = vmatpush.bf16.msrb.mxu0 %v11504_v26 }
 0x262   :  { %v8529_v25 = vld.sshfl [vmem:[#allocation1 + $0x8] sm:$0xff pattern:$0x73625140]  ;;  %v8531_v46 = vld.sshfl [vmem:[#allocation1] sm:$0xff pattern:$0x73625140] }
 0x263   :  { %11501 = vst [vmem:[#allocation226_spill] sm:$0xff] %v8529_v25  ;;  %v8535_v9 = vld.sshfl [vmem:[#allocation1 + $0x18] sm:$0xff pattern:$0x73625140] }
 0x264   :  { %11502 = vst [vmem:[#allocation227_spill] sm:$0xff] %v8531_v46  ;;  %v8537_v17 = vld.sshfl [vmem:[#allocation1 + $0x10] sm:$0xff pattern:$0x73625140]  ;;  %v943_v46 = vsel %vm833_vm5, %v8437_v21, %v8427_v61 }
 0x265   :  { %11505 = vst [vmem:[#allocation228_spill] sm:$0xff] %v8535_v9 }
 0x266   :  { %11506 = vst [vmem:[#allocation229_spill] sm:$0xff] %v8537_v17  ;;  %v944_v17 = vsel %vm837_vm7, %v943_v46, %v942_v38  ;;  %v949_v46 = vrot.slane %v948_v51, 6 }
 0x267   :  { %5345 = vst [vmem:[#allocation1] ss:$4 sm:$0xff] %v937_v53  ;;  %v8542_v48 = vld.sshfl [vmem:[#allocation1 + $0x28] sm:$0xff pattern:$0x73625140]  ;;  %v945_v53 = vrot.slane %v944_v17, 6 }
 0x268   :  { %11507 = vst [vmem:[#allocation230_spill] sm:$0xff] %v8542_v48  ;;  %v8544_v58 = vld.sshfl [vmem:[#allocation1 + $0x20] sm:$0xff pattern:$0x73625140] }
 0x269   :  { %11508 = vst [vmem:[#allocation231_spill] sm:$0xff] %v8544_v58  ;;  %v8549_v25 = vld.sshfl [vmem:[#allocation1 + $0x38] sm:$0xff pattern:$0x73625140]  ;;  %v1866_v58 = vpop.f32.mrf.mxu1 }
 0x26a   :  { %11509 = vst [vmem:[#allocation232_spill] sm:$0xff] %v8549_v25  ;;  %v8551_v26 = vld.sshfl [vmem:[#allocation1 + $0x30] sm:$0xff pattern:$0x73625140] }
 0x26b   :  { %11510 = vst [vmem:[#allocation233_spill] sm:$0xff] %v8551_v26  ;;  %v1799_v26 = vpop.f32.mrf.mxu0 }
 0x26c   :  { %5347 = vst [vmem:[#allocation1 + $0x20] ss:$4 sm:$0xff] %v941_v4  ;;  %v1800_v1 = vadd.f32 %v1799_v26, %v11515_v55  ;;  %v1838_v4 = vpop.f32.mrf.mxu3  ;;  %v1775_v55 = vpop.f32.mrf.mxu2 }
 0x26e   :  { %v8561_v61 = vld.sshfl [vmem:[#allocation1 + $0x8] sm:$0xff pattern:$0x73625140]  ;;  %v8563_v21 = vld.sshfl [vmem:[#allocation1] sm:$0xff pattern:$0x73625140]  ;;  %v1813_v24 = vadd.f32 %v8435_v34, %v1800_v1 }
 0x26f   :  { %11511 = vst [vmem:[#allocation234_spill] sm:$0xff] %v8561_v61  ;;  %v8565_v48 = vld.sshfl [vmem:[#allocation1 + $0x18] sm:$0xff pattern:$0x73625140] }
 0x270   :  { %11512 = vst [vmem:[#allocation235_spill] sm:$0xff] %v8563_v21  ;;  %v8567_v38 = vld.sshfl [vmem:[#allocation1 + $0x10] sm:$0xff pattern:$0x73625140] }
 0x271   :  { %11513 = vst [vmem:[#allocation236_spill] sm:$0xff] %v8565_v48  ;;  %v1774_v48 = vadd.f32 %v1773_v11, %v11520_v54  ;;  %v11521_v54 = vld [vmem:[#allocation104_spill] sm:$0xff] }
 0x272   :  { %11514 = vst [vmem:[#allocation237_spill] sm:$0xff] %v8567_v38 }
 0x273   :  { %5622 = vst [vmem:[#allocation1] ss:$4 sm:$0xff] %v945_v53  ;;  %v8570_v25 = vld.sshfl [vmem:[#allocation1 + $0x28] sm:$0xff pattern:$0x73625140]  ;;  %v1801_v38 = vpop.f32.mrf.mxu0  ;;  %v1787_v51 = vadd.f32 %v8433_v37, %v1774_v48  ;;  %v1916_v53 = vpop.f32.mrf.mxu1 }
 0x274   :  { %11516 = vst [vmem:[#allocation100_spill] sm:$0xff] %v8570_v25  ;;  %v8572_v13 = vld.sshfl [vmem:[#allocation1 + $0x20] sm:$0xff pattern:$0x73625140]  ;;  %v1840_v26 = vpop.f32.mrf.mxu3 }
 0x275   :  { %11517 = vst [vmem:[#allocation238_spill] sm:$0xff] %v8572_v13  ;;  %v8575_v17 = vld.sshfl [vmem:[#allocation1 + $0x38] sm:$0xff pattern:$0x73625140]  ;;  %v1825_v13 = vpop.f32.mrf.mxu2  ;;  %v11522_v26 = vld [vmem:[#allocation105_spill] sm:$0xff] }
 0x276   :  { %11518 = vst [vmem:[#allocation239_spill] sm:$0xff] %v8575_v17  ;;  %v8577_v58 = vld.sshfl [vmem:[#allocation1 + $0x30] sm:$0xff pattern:$0x73625140]  ;;  %v1826_v55 = vadd.f32 %v1825_v13, %v11522_v26 }
 0x277   :  { %11519 = vst [vmem:[#allocation240_spill] sm:$0xff] %v8577_v58 }
 0x278   :  { %5624 = vst [vmem:[#allocation1 + $0x20] ss:$4 sm:$0xff] %v949_v46 }
 0x27b   :  { %v1851_v21 = vpop.f32.mrf.mxu0  ;;  %v1918_v61 = vpop.f32.mrf.mxu1 }
 0x27c   :  { %v1890_v25 = vpop.f32.mrf.mxu3  ;;  %v1852_v37 = vadd.f32 %v1851_v21, %v11521_v54 }
 0x27d   :  { %v1827_v1 = vpop.f32.mrf.mxu2 }
 0x27e   :  { %v1865_v48 = vadd.f32 %v1864_v52, %v1852_v37  ;;  %v1972_v52 = vmul.f32 0.5, %v1787_v51 }
 0x280   :  { %v1975_v43 = vmul.f32 0.5, %v1865_v48 }
 0x282   :  { %6784 = vtanh.f32 %v1975_v43 }
 0x283   :  { %v1853_v9 = vpop.f32.mrf.mxu0  ;;  %v1968_v46 = vpop.f32.mrf.mxu1 }
 0x284   :  { %v1892_v34 = vpop.f32.mrf.mxu3  ;;  %v1973_v9 = vmul.f32 0.5, %v1813_v24 }
 0x285   :  { %v1877_v58 = vpop.f32.mrf.mxu2  ;;  %v1839_v34 = vadd.f32 %v1838_v4, %v1826_v55  ;;  %v11523_v4 = vld [vmem:[#allocation116_spill] sm:$0xff] }
 0x286   :  { %6786 = vtanh.f32 %v1973_v9  ;;  %v1878_v43 = vadd.f32 %v1877_v58, %v11523_v4  ;;  %v11524_v4 = vld [vmem:[#allocation101_spill] sm:$0xff] }
 0x288   :  { %v6785_v37 = vpop.eup %6784  ;;  %v1891_v26 = vadd.f32 %v1890_v25, %v1878_v43 }
 0x28b   :  { %v1903_v17 = vpop.f32.mrf.mxu0  ;;  %v1970_v38 = vpop.f32.mrf.mxu1 }
 0x28c   :  { %v1942_v63 = vpop.f32.mrf.mxu3 }
 0x28d   :  { %v1879_v11 = vpop.f32.mrf.mxu2 }
 0x28e   :  { %v1974_v11 = vmul.f32 0.5, %v1839_v34 }
 0x293   :  { %v1905_v57 = vpop.f32.mrf.mxu0 }
 0x294   :  { %v1944_v45 = vpop.f32.mrf.mxu3  ;;  %v1904_v57 = vadd.f32 %v1903_v17, %v7946_v35 }
 0x295   :  { %v1929_v45 = vpop.f32.mrf.mxu2 }
 0x296   :  { %v1930_v21 = vadd.f32 %v1929_v45, %v7954_v31  ;;  %v1917_v54 = vadd.f32 %v1916_v53, %v1904_v57 }
 0x298   :  { %v1943_v13 = vadd.f32 %v1942_v63, %v1930_v21  ;;  %v1977_v35 = vmul.f32 0.5, %v1917_v54 }
 0x29b   :  { %v1955_v59 = vpop.f32.mrf.mxu0 }
 0x29c   :  { %v1956_v61 = vadd.f32 %v1955_v59, %v7952_v15  ;;  %v1978_v15 = vmul.f32 0.5, %v1943_v13  ;;  %v6787_v59 = vpop.eup %6786 }
 0x29d   :  { %v1931_v48 = vpop.f32.mrf.mxu2 }
 0x29e   :  { %v1969_v1 = vadd.f32 %v1968_v46, %v1956_v61  ;;  %v1991_v46 = vmul.f32 0.5, %v6785_v37 }
 0x2a0   :  { %v1979_v14 = vmul.f32 0.5, %v1969_v1  ;;  %v1999_v63 = vadd.f32 0.5, %v1991_v46  ;;  %v1976_v1 = vmul.f32 0.5, %v1891_v26 }
 0x2a2   :  { %6788 = vtanh.f32 %v1979_v14  ;;  %v1989_v14 = vmul.f32 0.5, %v6787_v59 }
 0x2a3   :  { %v1957_v38 = vpop.f32.mrf.mxu0  ;;  %6790 = vtanh.f32 %v1974_v11  ;;  %v2009_v11 = vmul.f32 0.0, %v1999_v63  ;;  %v11525_v63 = vld [vmem:[#allocation82_spill] sm:$0xff] }
 0x2a4   :  { %6792 = vtanh.f32 %v1972_v52  ;;  %v1997_v9 = vadd.f32 0.5, %v1989_v14 }
 0x2a5   :  { %6794 = vtanh.f32 %v1978_v15 }
 0x2a6   :  { %6796 = vtanh.f32 %v1977_v35 }
 0x2a7   :  { %6798 = vtanh.f32 %v1976_v1  ;;  %v11528_v1 = vld [vmem:[#allocation95_spill] sm:$0xff] }
 0x2a8   :  { %v6789_v24 = vpop.eup %6788 }
 0x2a9   :  { %v1995_v17 = vmul.f32 0.5, %v6789_v24  ;;  %v6791_v51 = vpop.eup %6790 }
 0x2aa   :  { %v6793_v55 = vpop.eup %6792  ;;  %v1990_v34 = vmul.f32 0.5, %v6791_v51 }
 0x2ab   :  { %v2003_v31 = vadd.f32 0.5, %v1995_v17  ;;  %v6795_v61 = vpop.eup %6794  ;;  %v1988_v45 = vmul.f32 0.5, %v6793_v55 }
 0x2ac   :  { %v1994_v58 = vmul.f32 0.5, %v6795_v61  ;;  %v6797_v38 = vpop.eup %6796  ;;  %v1998_v13 = vadd.f32 0.5, %v1990_v34  ;;  %v11527_v34 = vld [vmem:[#allocation88_spill] sm:$0xff] }
 0x2ad   :  { %v2005_v53 = vmul.f32 2.0, %v2003_v31  ;;  %v1996_v37 = vadd.f32 0.5, %v1988_v45  ;;  %v1993_v59 = vmul.f32 0.5, %v6797_v38  ;;  %v6799_v46 = vpop.eup %6798  ;;  %v11531_v45 = vld [vmem:[#allocation92_spill] sm:$0xff]  ;;  %v11535_v38 = vld [vmem:[#allocation118_spill] sm:$0xff] }
 0x2ae   :  { %v2002_v52 = vadd.f32 0.5, %v1994_v58  ;;  %v2008_v43 = vmul.f32 %v1998_v13, %v11524_v4  ;;  %v1992_v14 = vmul.f32 0.5, %v6799_v46  ;;  %v11530_v58 = vld [vmem:[#allocation111_spill] sm:$0xff]  ;;  %v11541_v4 = vld [vmem:[#allocation128_spill] sm:$0xff] }
 0x2af   :  { %v6588_v57 = vadd.f32 -1.0, %v2005_v53  ;;  %v2001_v17 = vadd.f32 0.5, %v1993_v59  ;;  %v11526_v53 = vld [vmem:[#allocation93_spill] sm:$0xff]  ;;  %v11536_v13 = vld [vmem:[#allocation119_spill] sm:$0xff]  ;;  %v11540_v59 = vld [vmem:[#allocation108_spill] sm:$0xff] }
 0x2b0   :  { %v2004_v54 = vmul.f32 2.0, %v2002_v52  ;;  %v2000_v51 = vadd.f32 0.5, %v1992_v14  ;;  %v11534_v52 = vld [vmem:[#allocation99_spill] sm:$0xff]  ;;  %v11544_v46 = vld [vmem:[#allocation112_spill] sm:$0xff] }
 0x2b1   :  { %v2011_v21 = vmul.f32 %v6588_v57, %v1997_v9  ;;  %v11529_v57 = vld [vmem:[#allocation110_spill] sm:$0xff]  ;;  %v11547_v14 = vld [vmem:[#allocation107_spill] sm:$0xff] }
 0x2b2   :  { %v6587_v15 = vadd.f32 -1.0, %v2004_v54  ;;  %v11537_v54 = vld [vmem:[#allocation96_spill] sm:$0xff] }
 0x2b3   :  { %v8587_v25 = vadd.f32 %v2011_v21, %v2009_v11  ;;  %v11532_v11 = vld [vmem:[#allocation97_spill] sm:$0xff]  ;;  %v11533_v21 = vld [vmem:[#allocation94_spill] sm:$0xff] }
 0x2b4   :  { %v2010_v24 = vmul.f32 %v6587_v15, %v1996_v37  ;;  %v11538_v37 = vld [vmem:[#allocation106_spill] sm:$0xff] }
 0x2b5   :  { %6800 = vtanh.f32 %v8587_v25  ;;  %v11539_v15 = vld [vmem:[#allocation98_spill] sm:$0xff] }
 0x2b6   :  { %v8591_v35 = vadd.f32 %v2010_v24, %v2008_v43  ;;  %v11542_v43 = vld [vmem:[#allocation129_spill] sm:$0xff]  ;;  %v11543_v24 = vld [vmem:[#allocation103_spill] sm:$0xff] }
 0x2b8   :  { %6802 = vtanh.f32 %v8591_v35 }
 0x2bb   :  { %v6801_v48 = vpop.eup %6800 }
 0x2bc   :  { %v2017_v26 = vmul.f32 %v6801_v48, %v2001_v17  ;;  %v11545_v17 = vld [vmem:[#allocation132_spill] sm:$0xff]  ;;  %v11546_v48 = vld [vmem:[#allocation133_spill] sm:$0xff] }
 0x2be   :  { %2018 = vst [vmem:[%s10941_s5] sm:$0x3] %v2017_v26  ;;  %v8597_v31 = vpack.c.bf16 %v2017_v26, %v2017_v26  ;;  %v6803_v55 = vpop.eup %6802  ;;  %v11548_v26 = vld [vmem:[#allocation114_spill] sm:$0xff] }
 0x2bf   :  { %v2016_v61 = vmul.f32 %v6803_v55, %v2000_v51  ;;  %v11549_v51 = vld [vmem:[#allocation109_spill] sm:$0xff] }
 0x2c0   :  { %2061 = vmatmul.bf16.vlgmr.msra.gmra.mxu3 %v8597_v31  ;;  %2087 = vmatmul.bf16.vlgmr.msrb.gmra.mxu1 %v8597_v31  ;;  %v11550_v55 = vld [vmem:[#allocation117_spill] sm:$0xff] }
 0x2c1   :  { %2157 = vmatpush.bf16.msra.mxu3 %v11525_v63  ;;  %2183 = vmatpush.bf16.msrb.mxu1 %v11526_v53  ;;  %v8603_v9 = vpack.c.bf16 %v2016_v61, %v2016_v61  ;;  %v11551_v61 = vld [vmem:[#allocation113_spill] sm:$0xff] }
 0x2c3   :  { %2048 = vmatmul.bf16.vlgmr.msrb.gmra.mxu2 %v8603_v9  ;;  %2074 = vmatmul.bf16.vlgmr.msra.gmra.mxu0 %v8603_v9 }
 0x2c4   :  { %2144 = vmatpush.bf16.msrb.mxu2 %v11529_v57  ;;  %2170 = vmatpush.bf16.msra.mxu0 %v11530_v58 }
 0x2c5   :  { %2158 = vmatpush.bf16.msra.mxu3 %v11527_v34  ;;  %2184 = vmatpush.bf16.msrb.mxu1 %v11528_v1 }
 0x2c8   :  { %2145 = vmatpush.bf16.msrb.mxu2 %v7933_v0  ;;  %2171 = vmatpush.bf16.msra.mxu0 %v7935_v49 }
 0x2c9   :  { %2159 = vmatpush.bf16.msra.mxu3 %v11531_v45  ;;  %2185 = vmatpush.bf16.msrb.mxu1 %v11532_v11 }
 0x2cc   :  { %2146 = vmatpush.bf16.msrb.mxu2 %v11535_v38  ;;  %2172 = vmatpush.bf16.msra.mxu0 %v11536_v13 }
 0x2cd   :  { %2160 = vmatpush.bf16.msra.mxu3 %v11533_v21  ;;  %2186 = vmatpush.bf16.msrb.mxu1 %v11534_v52 }
 0x2d0   :  { %2113 = vmatmul.bf16.vlgmr.msrb.gmra.mxu3 %v8597_v31  ;;  %2139 = vmatmul.bf16.vlgmr.msra.gmra.mxu1 %v8597_v31 }
 0x2d1   :  { %2161 = vmatpush.bf16.msra.mxu3 %v11537_v54  ;;  %2187 = vmatpush.bf16.msrb.mxu1 %v11538_v37 }
 0x2d2   :  { %2147 = vmatpush.bf16.msrb.mxu2 %v7975_v2  ;;  %2173 = vmatpush.bf16.msra.mxu0 %v7977_v30 }
 0x2d3   :  { %2100 = vmatmul.bf16.vlgmr.msra.gmra.mxu2 %v8603_v9  ;;  %2126 = vmatmul.bf16.vlgmr.msrb.gmra.mxu0 %v8603_v9 }
 0x2d5   :  { %2162 = vmatpush.bf16.msra.mxu3 %v11539_v15  ;;  %2188 = vmatpush.bf16.msrb.mxu1 %v11540_v59 }
 0x2d6   :  { %2148 = vmatpush.bf16.msrb.mxu2 %v11541_v4  ;;  %2174 = vmatpush.bf16.msra.mxu0 %v11542_v43 }
 0x2d9   :  { %2163 = vmatpush.bf16.msra.mxu3 %v11543_v24  ;;  %2189 = vmatpush.bf16.msrb.mxu1 %v11544_v46 }
 0x2da   :  { %2149 = vmatpush.bf16.msrb.mxu2 %v11545_v17  ;;  %2175 = vmatpush.bf16.msra.mxu0 %v11546_v48  ;;  %v11552_v17 = vld [vmem:[#allocation121_spill] sm:$0xff] }
 0x2dd   :  { %2164 = vmatpush.bf16.msra.mxu3 %v11547_v14  ;;  %2190 = vmatpush.bf16.msrb.mxu1 %v11548_v26 }
 0x2de   :  { %2150 = vmatpush.bf16.msrb.mxu2 %v8050_v6  ;;  %2176 = vmatpush.bf16.msra.mxu0 %v8052_v5  ;;  %v11554_v6 = vld [vmem:[#allocation125_spill] sm:$0xff] }
 0x2e0   :  { %2165 = vmatmul.bf16.vlgmr.msra.gmra.mxu3 %v8597_v31  ;;  %2191 = vmatmul.bf16.vlgmr.msrb.gmra.mxu1 %v8597_v31 }
 0x2e1   :  { %2209 = vmatpush.bf16.msrb.mxu3 %v11549_v51  ;;  %2235 = vmatpush.bf16.msra.mxu1 %v11550_v55  ;;  %v11553_v55 = vld [vmem:[#allocation115_spill] sm:$0xff] }
 0x2e2   :  { %2151 = vmatpush.bf16.msrb.mxu2 %v8078_v36  ;;  %2177 = vmatpush.bf16.msra.mxu0 %v8080_v42  ;;  %v11556_v36 = vld [vmem:[#allocation131_spill] sm:$0xff] }
 0x2e5   :  { %2210 = vmatpush.bf16.msrb.mxu3 %v11551_v61  ;;  %2236 = vmatpush.bf16.msra.mxu1 %v11552_v17  ;;  %v11555_v17 = vld [vmem:[#allocation120_spill] sm:$0xff] }
 0x2e6   :  { %2196 = vmatpush.bf16.msra.mxu2 %v8086_v28  ;;  %2222 = vmatpush.bf16.msrb.mxu0 %v8088_v18  ;;  %v11557_v18 = vld [vmem:[#allocation122_spill] sm:$0xff] }
 0x2e7   :  { %2152 = vmatmul.bf16.vlgmr.msrb.gmra.mxu2 %v8603_v9  ;;  %2178 = vmatmul.bf16.vlgmr.msra.gmra.mxu0 %v8603_v9 }
 0x2e9   :  { %2211 = vmatpush.bf16.msrb.mxu3 %v11553_v55  ;;  %2237 = vmatpush.bf16.msra.mxu1 %v11554_v6  ;;  %v11558_v55 = vld [vmem:[#allocation137_spill] sm:$0xff]  ;;  %v11559_v6 = vld [vmem:[#allocation130_spill] sm:$0xff] }
 0x2ea   :  { %2197 = vmatpush.bf16.msra.mxu2 %v8122_v56  ;;  %2223 = vmatpush.bf16.msrb.mxu0 %v8124_v10 }
 0x2ed   :  { %2212 = vmatpush.bf16.msrb.mxu3 %v11555_v17  ;;  %2238 = vmatpush.bf16.msra.mxu1 %v11556_v36  ;;  %v11560_v36 = vld [vmem:[#allocation135_spill] sm:$0xff] }
 0x2ee   :  { %2198 = vmatpush.bf16.msra.mxu2 %v8142_v16  ;;  %2224 = vmatpush.bf16.msrb.mxu0 %v8144_v44 }
 0x2f1   :  { %2213 = vmatpush.bf16.msrb.mxu3 %v11557_v18  ;;  %2239 = vmatpush.bf16.msra.mxu1 %v11558_v55  ;;  %v11561_v55 = vld [vmem:[#allocation141_spill] sm:$0xff] }
 0x2f2   :  { %2199 = vmatpush.bf16.msra.mxu2 %v8174_v3  ;;  %2225 = vmatpush.bf16.msrb.mxu0 %v8176_v62  ;;  %v11562_v3 = vld [vmem:[#allocation158_spill] sm:$0xff]  ;;  %v11563_v62 = vld [vmem:[#allocation13_spill] sm:$0xff] }
 0x2f5   :  { %2214 = vmatpush.bf16.msrb.mxu3 %v11559_v6  ;;  %2240 = vmatpush.bf16.msra.mxu1 %v8064_v40  ;;  %v11564_v6 = vld [vmem:[#allocation18_spill] sm:$0xff] }
 0x2f6   :  { %2200 = vmatpush.bf16.msra.mxu2 %v8187_v39  ;;  %2226 = vmatpush.bf16.msrb.mxu0 %v8189_v8 }
 0x2f9   :  { %2215 = vmatpush.bf16.msrb.mxu3 %v11560_v36  ;;  %2241 = vmatpush.bf16.msra.mxu1 %v8096_v12  ;;  %v11565_v12 = vld [vmem:[#allocation14_spill] sm:$0xff] }
 0x2fa   :  { %2201 = vmatpush.bf16.msra.mxu2 %v8209_v29  ;;  %2227 = vmatpush.bf16.msrb.mxu0 %v8211_v33 }
 0x2fd   :  { %2216 = vmatpush.bf16.msrb.mxu3 %v11561_v55  ;;  %2242 = vmatpush.bf16.msra.mxu1 %v11562_v3 }
 0x2fe   :  { %2202 = vmatpush.bf16.msra.mxu2 %v8232_v23  ;;  %2228 = vmatpush.bf16.msrb.mxu0 %v8234_v20  ;;  %v11566_v20 = vld [vmem:[#allocation17_spill] sm:$0xff] }
 0x300   :  { %2217 = vmatmul.bf16.vlgmr.msrb.gmra.mxu3 %v8597_v31  ;;  %2243 = vmatmul.bf16.vlgmr.msra.gmra.mxu1 %v8597_v31  ;;  %v11567_v31 = vld [vmem:[#allocation31_spill] sm:$0xff] }
 0x301   :  { %2330 = vmatpush.bf16.msra.mxu3 %v11563_v62  ;;  %2356 = vmatpush.bf16.msrb.mxu1 %v11564_v6  ;;  %v11621_v6 = vld [vmem:[#allocation124_spill] sm:$0xff] }
 0x302   :  { %2203 = vmatpush.bf16.msra.mxu2 %v8249_v60  ;;  %2229 = vmatpush.bf16.msrb.mxu0 %v8251_v47  ;;  %v11568_v47 = vld [vmem:[#allocation23_spill] sm:$0xff] }
 0x303   :  { %v11571_v60 = vld [vmem:[#allocation35_spill] sm:$0xff] }
 0x305   :  { %2331 = vmatpush.bf16.msra.mxu3 %v11565_v12  ;;  %2357 = vmatpush.bf16.msrb.mxu1 %v7552_v22 }
 0x306   :  { %2317 = vmatpush.bf16.msrb.mxu2 %v11397_v41  ;;  %2343 = vmatpush.bf16.msra.mxu0 %v11398_v7  ;;  %v11569_v41 = vld [vmem:[#allocation24_spill] sm:$0xff]  ;;  %v11570_v7 = vld [vmem:[#allocation25_spill] sm:$0xff] }
 0x307   :  { %2204 = vmatmul.bf16.vlgmr.msra.gmra.mxu2 %v8603_v9  ;;  %2230 = vmatmul.bf16.vlgmr.msrb.gmra.mxu0 %v8603_v9  ;;  %v11572_v9 = vld [vmem:[#allocation27_spill] sm:$0xff] }
 0x309   :  { %2332 = vmatpush.bf16.msra.mxu3 %v11566_v20  ;;  %2358 = vmatpush.bf16.msrb.mxu1 %v7565_v50  ;;  %v11573_v20 = vld [vmem:[#allocation28_spill] sm:$0xff]  ;;  %v11574_v50 = vld [vmem:[#allocation30_spill] sm:$0xff] }
 0x30a   :  { %2318 = vmatpush.bf16.msrb.mxu2 %v11405_v27  ;;  %2344 = vmatpush.bf16.msra.mxu0 %v11406_v32  ;;  %v11575_v27 = vld [vmem:[#allocation39_spill] sm:$0xff]  ;;  %v11576_v32 = vld [vmem:[#allocation32_spill] sm:$0xff] }
 0x30d   :  { %2333 = vmatpush.bf16.msra.mxu3 %v7550_v19  ;;  %2359 = vmatpush.bf16.msrb.mxu1 %v11567_v31  ;;  %v11577_v19 = vld [vmem:[#allocation33_spill] sm:$0xff]  ;;  %v11578_v31 = vld [vmem:[#allocation34_spill] sm:$0xff] }
 0x30e   :  { %2319 = vmatpush.bf16.msrb.mxu2 %v11568_v47  ;;  %2345 = vmatpush.bf16.msra.mxu0 %v11569_v41  ;;  %v11579_v47 = vld [vmem:[#allocation47_spill] sm:$0xff]  ;;  %v11580_v41 = vld [vmem:[#allocation36_spill] sm:$0xff] }
 0x311   :  { %2334 = vmatpush.bf16.msra.mxu3 %v11570_v7  ;;  %2360 = vmatpush.bf16.msrb.mxu1 %v11571_v60  ;;  %v11581_v7 = vld [vmem:[#allocation37_spill] sm:$0xff]  ;;  %v11582_v60 = vld [vmem:[#allocation38_spill] sm:$0xff] }
 0x312   :  { %2320 = vmatpush.bf16.msrb.mxu2 %v11572_v9  ;;  %2346 = vmatpush.bf16.msra.mxu0 %v11573_v20  ;;  %v11583_v9 = vld [vmem:[#allocation53_spill] sm:$0xff]  ;;  %v11584_v20 = vld [vmem:[#allocation40_spill] sm:$0xff] }
 0x315   :  { %2335 = vmatpush.bf16.msra.mxu3 %v11574_v50  ;;  %2361 = vmatpush.bf16.msrb.mxu1 %v11575_v27  ;;  %v11585_v50 = vld [vmem:[#allocation57_spill] sm:$0xff] }
 0x316   :  { %2321 = vmatpush.bf16.msrb.mxu2 %v11576_v32  ;;  %2347 = vmatpush.bf16.msra.mxu0 %v11577_v19  ;;  %v11586_v27 = vld [vmem:[#allocation41_spill] sm:$0xff]  ;;  %v11587_v32 = vld [vmem:[#allocation43_spill] sm:$0xff]  ;;  %v11588_v19 = vld [vmem:[#allocation48_spill] sm:$0xff] }
 0x319   :  { %2336 = vmatpush.bf16.msra.mxu3 %v11578_v31  ;;  %2362 = vmatpush.bf16.msrb.mxu1 %v11579_v47  ;;  %v11589_v31 = vld [vmem:[#allocation61_spill] sm:$0xff] }
 0x31a   :  { %2322 = vmatpush.bf16.msrb.mxu2 %v11580_v41  ;;  %2348 = vmatpush.bf16.msra.mxu0 %v11581_v7  ;;  %v11590_v47 = vld [vmem:[#allocation49_spill] sm:$0xff]  ;;  %v11591_v41 = vld [vmem:[#allocation50_spill] sm:$0xff]  ;;  %v11592_v7 = vld [vmem:[#allocation51_spill] sm:$0xff] }
 0x31d   :  { %2337 = vmatpush.bf16.msra.mxu3 %v11582_v60  ;;  %2363 = vmatpush.bf16.msrb.mxu1 %v11583_v9  ;;  %v11593_v60 = vld [vmem:[#allocation52_spill] sm:$0xff]  ;;  %v11594_v9 = vld [vmem:[#allocation54_spill] sm:$0xff] }
 0x31e   :  { %2323 = vmatpush.bf16.msrb.mxu2 %v11586_v27  ;;  %2349 = vmatpush.bf16.msra.mxu0 %v11587_v32  ;;  %v11597_v27 = vld [vmem:[#allocation59_spill] sm:$0xff]  ;;  %v11598_v32 = vld [vmem:[#allocation60_spill] sm:$0xff] }
 0x321   :  { %2382 = vmatpush.bf16.msrb.mxu3 %v11584_v20  ;;  %2408 = vmatpush.bf16.msra.mxu1 %v11585_v50  ;;  %v11595_v20 = vld [vmem:[#allocation65_spill] sm:$0xff]  ;;  %v11596_v50 = vld [vmem:[#allocation58_spill] sm:$0xff] }
 0x322   :  { %2324 = vmatpush.bf16.msrb.mxu2 %v11590_v47  ;;  %2350 = vmatpush.bf16.msra.mxu0 %v11591_v41  ;;  %v11601_v47 = vld [vmem:[#allocation63_spill] sm:$0xff]  ;;  %v11602_v41 = vld [vmem:[#allocation64_spill] sm:$0xff] }
 0x325   :  { %2383 = vmatpush.bf16.msrb.mxu3 %v11588_v19  ;;  %2409 = vmatpush.bf16.msra.mxu1 %v11589_v31  ;;  %v11599_v19 = vld [vmem:[#allocation72_spill] sm:$0xff]  ;;  %v11600_v31 = vld [vmem:[#allocation62_spill] sm:$0xff] }
 0x326   :  { %2369 = vmatpush.bf16.msra.mxu2 %v11592_v7  ;;  %2395 = vmatpush.bf16.msrb.mxu0 %v11593_v60  ;;  %v11603_v7 = vld [vmem:[#allocation76_spill] sm:$0xff]  ;;  %v11604_v60 = vld [vmem:[#allocation69_spill] sm:$0xff] }
 0x329   :  { %2384 = vmatpush.bf16.msrb.mxu3 %v11594_v9  ;;  %2410 = vmatpush.bf16.msra.mxu1 %v11595_v20  ;;  %v11605_v9 = vld [vmem:[#allocation70_spill] sm:$0xff]  ;;  %v11606_v20 = vld [vmem:[#allocation71_spill] sm:$0xff] }
 0x32a   :  { %2370 = vmatpush.bf16.msra.mxu2 %v11596_v50  ;;  %2396 = vmatpush.bf16.msrb.mxu0 %v11597_v27  ;;  %v11607_v50 = vld [vmem:[#allocation81_spill] sm:$0xff] }
 0x32b   :  { %v11608_v27 = vld [vmem:[#allocation73_spill] sm:$0xff] }
 0x32d   :  { %2385 = vmatpush.bf16.msrb.mxu3 %v11598_v32  ;;  %2411 = vmatpush.bf16.msra.mxu1 %v11599_v19  ;;  %v11609_v32 = vld [vmem:[#allocation74_spill] sm:$0xff]  ;;  %v11610_v19 = vld [vmem:[#allocation75_spill] sm:$0xff] }
 0x32e   :  { %2371 = vmatpush.bf16.msra.mxu2 %v11600_v31  ;;  %2397 = vmatpush.bf16.msrb.mxu0 %v11601_v47  ;;  %v11611_v31 = vld [vmem:[#allocation87_spill] sm:$0xff]  ;;  %v11612_v47 = vld [vmem:[#allocation77_spill] sm:$0xff] }
 0x331   :  { %2386 = vmatpush.bf16.msrb.mxu3 %v11602_v41  ;;  %2412 = vmatpush.bf16.msra.mxu1 %v11603_v7  ;;  %v11613_v41 = vld [vmem:[#allocation78_spill] sm:$0xff]  ;;  %v11614_v7 = vld [vmem:[#allocation79_spill] sm:$0xff] }
 0x332   :  { %2372 = vmatpush.bf16.msra.mxu2 %v11604_v60  ;;  %2398 = vmatpush.bf16.msrb.mxu0 %v11605_v9  ;;  %v11615_v60 = vld [vmem:[#allocation91_spill] sm:$0xff] }
 0x333   :  { %v11616_v9 = vld [vmem:[#allocation83_spill] sm:$0xff] }
 0x335   :  { %2387 = vmatpush.bf16.msrb.mxu3 %v11606_v20  ;;  %2413 = vmatpush.bf16.msra.mxu1 %v11607_v50  ;;  %v11617_v20 = vld [vmem:[#allocation86_spill] sm:$0xff]  ;;  %v11618_v50 = vld [vmem:[#allocation89_spill] sm:$0xff] }
 0x336   :  { %2373 = vmatpush.bf16.msra.mxu2 %v11608_v27  ;;  %2399 = vmatpush.bf16.msrb.mxu0 %v11609_v32  ;;  %v11619_v27 = vld [vmem:[#allocation90_spill] sm:$0xff] }
 0x339   :  { %2388 = vmatpush.bf16.msrb.mxu3 %v11610_v19  ;;  %2414 = vmatpush.bf16.msra.mxu1 %v11611_v31  ;;  %v11620_v31 = vld [vmem:[#allocation123_spill] sm:$0xff] }
 0x33a   :  { %2374 = vmatpush.bf16.msra.mxu2 %v11612_v47  ;;  %2400 = vmatpush.bf16.msrb.mxu0 %v11613_v41 }
 0x33d   :  { %2389 = vmatpush.bf16.msrb.mxu3 %v11614_v7  ;;  %2415 = vmatpush.bf16.msra.mxu1 %v11615_v60  ;;  %v2088_v32 = vpop.f32.mrf.mxu1 }
 0x33e   :  { %2375 = vmatpush.bf16.msra.mxu2 %v11616_v9  ;;  %2401 = vmatpush.bf16.msrb.mxu0 %v11617_v20 }
 0x340   :  { %v2075_v22 = vpop.f32.mrf.mxu0 }
 0x341   :  { %v2076_v12 = vadd.f32 %v2075_v22, %v11620_v31 }
 0x342   :  { %2376 = vmatpush.bf16.msra.mxu2 %v11618_v50  ;;  %2402 = vmatpush.bf16.msrb.mxu0 %v11619_v27 }
 0x343   :  { %v2062_v19 = vpop.f32.mrf.mxu3  ;;  %v2089_v23 = vadd.f32 %v2088_v32, %v2076_v12 }
 0x345   :  { %v2090_v47 = vpop.f32.mrf.mxu1  ;;  %v2249_v16 = vmul.f32 0.5, %v2089_v23 }
 0x346   :  { %v2049_v41 = vpop.f32.mrf.mxu2 }
 0x347   :  { %v2050_v7 = vadd.f32 %v2049_v41, %v11621_v6 }
 0x348   :  { %v2077_v60 = vpop.f32.mrf.mxu0 }
 0x349   :  { %v2063_v3 = vadd.f32 %v2062_v19, %v2050_v7  ;;  %v11623_v7 = vld [vmem:[#allocation127_spill] sm:$0xff] }
 0x34b   :  { %v2064_v62 = vpop.f32.mrf.mxu3 }
 0x34c   :  { %v11622_v62 = vld [vmem:[#allocation126_spill] sm:$0xff] }
 0x34d   :  { %v2140_v9 = vpop.f32.mrf.mxu1 }
 0x34e   :  { %v2051_v55 = vpop.f32.mrf.mxu2 }
 0x350   :  { %v2127_v33 = vpop.f32.mrf.mxu0 }
 0x351   :  { %v2128_v60 = vadd.f32 %v2127_v33, %v11622_v62 }
 0x353   :  { %v2114_v20 = vpop.f32.mrf.mxu3  ;;  %v2141_v41 = vadd.f32 %v2140_v9, %v2128_v60  ;;  %v11626_v9 = vld [vmem:[#allocation139_spill] sm:$0xff] }
 0x355   :  { %v2142_v50 = vpop.f32.mrf.mxu1  ;;  %v2251_v44 = vmul.f32 0.5, %v2141_v41 }
 0x356   :  { %v2101_v29 = vpop.f32.mrf.mxu2 }
 0x357   :  { %v2102_v55 = vadd.f32 %v2101_v29, %v11623_v7  ;;  %6804 = vtanh.f32 %v2251_v44  ;;  %v2248_v29 = vmul.f32 0.5, %v2063_v3  ;;  %v11627_v44 = vld [vmem:[#allocation136_spill] sm:$0xff] }
 0x358   :  { %v2129_v36 = vpop.f32.mrf.mxu0  ;;  %6806 = vtanh.f32 %v2249_v16 }
 0x359   :  { %v2115_v17 = vadd.f32 %v2114_v20, %v2102_v55 }
 0x35b   :  { %v2116_v27 = vpop.f32.mrf.mxu3  ;;  %v2250_v33 = vmul.f32 0.5, %v2115_v17 }
 0x35c   :  { %v11624_v27 = vld [vmem:[#allocation138_spill] sm:$0xff] }
 0x35d   :  { %v2192_v8 = vpop.f32.mrf.mxu1 }
 0x35e   :  { %v2103_v39 = vpop.f32.mrf.mxu2 }
 0x363   :  { %v2166_v40 = vpop.f32.mrf.mxu3 }
 0x364   :  { %v2179_v22 = vpop.f32.mrf.mxu0 }
 0x365   :  { %v2194_v47 = vpop.f32.mrf.mxu1 }
 0x36a   :  { %v2153_v12 = vpop.f32.mrf.mxu2 }
 0x36b   :  { %v2168_v32 = vpop.f32.mrf.mxu3 }
 0x36c   :  { %v2181_v31 = vpop.f32.mrf.mxu0  ;;  %v11625_v32 = vld [vmem:[#allocation134_spill] sm:$0xff] }
 0x36d   :  { %v2180_v31 = vadd.f32 %v2179_v22, %v11625_v32 }
 0x36f   :  { %v2193_v56 = vadd.f32 %v2192_v8, %v2180_v31 }
 0x372   :  { %v2155_v6 = vpop.f32.mrf.mxu2 }
 0x37d   :  { %v2244_v19 = vpop.f32.mrf.mxu1 }
 0x383   :  { %v2218_v18 = vpop.f32.mrf.mxu3 }
 0x384   :  { %v2231_v50 = vpop.f32.mrf.mxu0 }
 0x385   :  { %v2232_v36 = vadd.f32 %v2231_v50, %v11624_v27  ;;  %v2246_v39 = vpop.f32.mrf.mxu1  ;;  %v6805_v50 = vpop.eup %6804 }
 0x386   :  { %v6807_v20 = vpop.eup %6806  ;;  %v2267_v22 = vmul.f32 0.5, %v6805_v50 }
 0x387   :  { %v2245_v10 = vadd.f32 %v2244_v19, %v2232_v36  ;;  %v2253_v19 = vmul.f32 0.5, %v2193_v56  ;;  %v2265_v27 = vmul.f32 0.5, %v6807_v20 }
 0x389   :  { %v2255_v47 = vmul.f32 0.5, %v2245_v10  ;;  %v2154_v10 = vadd.f32 %v2153_v12, %v11627_v44  ;;  %v2273_v31 = vadd.f32 0.5, %v2265_v27 }
 0x38a   :  { %v2205_v6 = vpop.f32.mrf.mxu2 }
 0x38b   :  { %6808 = vtanh.f32 %v2255_v47  ;;  %v2206_v62 = vadd.f32 %v2205_v6, %v11626_v9  ;;  %v2220_v60 = vpop.f32.mrf.mxu3  ;;  %v2167_v36 = vadd.f32 %v2166_v40, %v2154_v10 }
 0x38c   :  { %v2233_v7 = vpop.f32.mrf.mxu0  ;;  %6810 = vtanh.f32 %v2250_v33 }
 0x38d   :  { %v2219_v41 = vadd.f32 %v2218_v18, %v2206_v62  ;;  %6812 = vtanh.f32 %v2248_v29  ;;  %v2275_v18 = vadd.f32 0.5, %v2267_v22  ;;  %v2252_v33 = vmul.f32 0.5, %v2167_v36 }
 0x38f   :  { %v2254_v23 = vmul.f32 0.5, %v2219_v41  ;;  %v2285_v29 = vmul.f32 %v2275_v18, %v8587_v25  ;;  %v11628_v18 = vld [vmem:[#allocation132_spill] sm:$0xff] }
 0x391   :  { %v6809_v16 = vpop.eup %6808  ;;  %6814 = vtanh.f32 %v2254_v23 }
 0x392   :  { %v2271_v17 = vmul.f32 0.5, %v6809_v16  ;;  %v2207_v55 = vpop.f32.mrf.mxu2  ;;  %v6811_v39 = vpop.eup %6810  ;;  %6816 = vtanh.f32 %v2253_v19 }
 0x393   :  { %v6813_v47 = vpop.eup %6812  ;;  %v2266_v6 = vmul.f32 0.5, %v6811_v39  ;;  %6818 = vtanh.f32 %v2252_v33  ;;  %v11633_v33 = vld [vmem:[#allocation148_spill] sm:$0xff] }
 0x394   :  { %v2279_v3 = vadd.f32 0.5, %v2271_v17  ;;  %v2264_v62 = vmul.f32 0.5, %v6813_v47 }
 0x395   :  { %v2274_v41 = vadd.f32 0.5, %v2266_v6  ;;  %v11632_v6 = vld [vmem:[#allocation145_spill] sm:$0xff] }
 0x396   :  { %v2281_v8 = vmul.f32 2.0, %v2279_v3  ;;  %v2272_v23 = vadd.f32 0.5, %v2264_v62  ;;  %v11636_v62 = vld [vmem:[#allocation156_spill] sm:$0xff] }
 0x397   :  { %v6815_v32 = vpop.eup %6814  ;;  %v2284_v10 = vmul.f32 %v2274_v41, %v8591_v35  ;;  %v11641_v41 = vld [vmem:[#allocation160_spill] sm:$0xff] }
 0x398   :  { %v6590_v9 = vadd.f32 -1.0, %v2281_v8  ;;  %v2270_v12 = vmul.f32 0.5, %v6815_v32  ;;  %v6817_v7 = vpop.eup %6816  ;;  %v11629_v8 = vld [vmem:[#allocation117_spill] sm:$0xff]  ;;  %v11630_v32 = vld [vmem:[#allocation140_spill] sm:$0xff] }
 0x399   :  { %v2269_v44 = vmul.f32 0.5, %v6817_v7  ;;  %v6819_v22 = vpop.eup %6818  ;;  %v11640_v7 = vld [vmem:[#allocation159_spill] sm:$0xff] }
 0x39a   :  { %v2287_v56 = vmul.f32 %v6590_v9, %v2273_v31  ;;  %v2278_v60 = vadd.f32 0.5, %v2270_v12  ;;  %v2268_v55 = vmul.f32 0.5, %v6819_v22  ;;  %v11631_v31 = vld [vmem:[#allocation121_spill] sm:$0xff]  ;;  %v11634_v9 = vld [vmem:[#allocation115_spill] sm:$0xff] }
 0x39b   :  { %v2277_v25 = vadd.f32 0.5, %v2269_v44  ;;  %v11635_v12 = vld [vmem:[#allocation125_spill] sm:$0xff]  ;;  %v11645_v44 = vld [vmem:[#allocation168_spill] sm:$0xff]  ;;  %v11648_v22 = vld [vmem:[#allocation171_spill] sm:$0xff] }
 0x39c   :  { %v8754_v40 = vadd.f32 %v2287_v56, %v2285_v29  ;;  %v2280_v50 = vmul.f32 2.0, %v2278_v60  ;;  %v2276_v3 = vadd.f32 0.5, %v2268_v55  ;;  %v11637_v29 = vld [vmem:[#allocation157_spill] sm:$0xff]  ;;  %v11638_v56 = vld [vmem:[#allocation120_spill] sm:$0xff]  ;;  %v11639_v60 = vld [vmem:[#allocation131_spill] sm:$0xff] }
 0x39d   :  { %v11651_v55 = vld [vmem:[#allocation151_spill] sm:$0xff] }
 0x39e   :  { %6820 = vtanh.f32 %v8754_v40  ;;  %v6589_v20 = vadd.f32 -1.0, %v2280_v50  ;;  %v11642_v50 = vld [vmem:[#allocation122_spill] sm:$0xff] }
 0x3a0   :  { %v2286_v16 = vmul.f32 %v6589_v20, %v2272_v23  ;;  %v11643_v23 = vld [vmem:[#allocation137_spill] sm:$0xff]  ;;  %v11644_v20 = vld [vmem:[#allocation167_spill] sm:$0xff] }
 0x3a2   :  { %v8758_v19 = vadd.f32 %v2286_v16, %v2284_v10  ;;  %v11646_v10 = vld [vmem:[#allocation130_spill] sm:$0xff] }
 0x3a3   :  { %v11647_v16 = vld [vmem:[#allocation142_spill] sm:$0xff] }
 0x3a4   :  { %v6821_v17 = vpop.eup %6820  ;;  %6822 = vtanh.f32 %v8758_v19 }
 0x3a5   :  { %v2293_v27 = vmul.f32 %v6821_v17, %v2277_v25  ;;  %v11649_v25 = vld [vmem:[#allocation172_spill] sm:$0xff]  ;;  %v11650_v17 = vld [vmem:[#allocation135_spill] sm:$0xff] }
 0x3a7   :  { %6591 = vst [vmem:[%s10941_s5 + $0x2] sm:$0x3] %v2293_v27  ;;  %v8764_v36 = vpack.c.bf16 %v2293_v27, %v2293_v27  ;;  %v11652_v27 = vld [vmem:[#allocation177_spill] sm:$0xff] }
 0x3a9   :  { %2338 = vmatmul.bf16.vlgmr.msra.gmra.mxu3 %v8764_v36  ;;  %2364 = vmatmul.bf16.vlgmr.msrb.gmra.mxu1 %v8764_v36 }
 0x3aa   :  { %v6823_v35 = vpop.eup %6822  ;;  %2434 = vmatpush.bf16.msra.mxu3 %v11525_v63  ;;  %2460 = vmatpush.bf16.msrb.mxu1 %v11526_v53 }
 0x3ab   :  { %v2292_v39 = vmul.f32 %v6823_v35, %v2276_v3  ;;  %v11653_v3 = vld [vmem:[#allocation178_spill] sm:$0xff]  ;;  %v11654_v35 = vld [vmem:[#allocation141_spill] sm:$0xff] }
 0x3ad   :  { %v8770_v47 = vpack.c.bf16 %v2292_v39, %v2292_v39  ;;  %v11655_v39 = vld [vmem:[#allocation158_spill] sm:$0xff] }
 0x3ae   :  { %2435 = vmatpush.bf16.msra.mxu3 %v11527_v34  ;;  %2461 = vmatpush.bf16.msrb.mxu1 %v11528_v1 }
 0x3af   :  { %2325 = vmatmul.bf16.vlgmr.msrb.gmra.mxu2 %v8770_v47  ;;  %2351 = vmatmul.bf16.vlgmr.msra.gmra.mxu0 %v8770_v47 }
 0x3b0   :  { %2421 = vmatpush.bf16.msrb.mxu2 %v11529_v57  ;;  %2447 = vmatpush.bf16.msra.mxu0 %v11530_v58 }
 0x3b2   :  { %2436 = vmatpush.bf16.msra.mxu3 %v11531_v45  ;;  %2462 = vmatpush.bf16.msrb.mxu1 %v11532_v11 }
 0x3b4   :  { %2422 = vmatpush.bf16.msrb.mxu2 %v7933_v0  ;;  %2448 = vmatpush.bf16.msra.mxu0 %v7935_v49 }
 0x3b6   :  { %2437 = vmatpush.bf16.msra.mxu3 %v11533_v21  ;;  %2463 = vmatpush.bf16.msrb.mxu1 %v11534_v52 }
 0x3b8   :  { %2423 = vmatpush.bf16.msrb.mxu2 %v11535_v38  ;;  %2449 = vmatpush.bf16.msra.mxu0 %v11536_v13 }
 0x3b9   :  { %2390 = vmatmul.bf16.vlgmr.msrb.gmra.mxu3 %v8764_v36  ;;  %2416 = vmatmul.bf16.vlgmr.msra.gmra.mxu1 %v8764_v36 }
 0x3ba   :  { %2438 = vmatpush.bf16.msra.mxu3 %v11537_v54  ;;  %2464 = vmatpush.bf16.msrb.mxu1 %v11538_v37 }
 0x3bc   :  { %2424 = vmatpush.bf16.msrb.mxu2 %v7975_v2  ;;  %2450 = vmatpush.bf16.msra.mxu0 %v7977_v30 }
 0x3be   :  { %2439 = vmatpush.bf16.msra.mxu3 %v11539_v15  ;;  %2465 = vmatpush.bf16.msrb.mxu1 %v11540_v59 }
 0x3bf   :  { %2377 = vmatmul.bf16.vlgmr.msra.gmra.mxu2 %v8770_v47  ;;  %2403 = vmatmul.bf16.vlgmr.msrb.gmra.mxu0 %v8770_v47 }
 0x3c0   :  { %2425 = vmatpush.bf16.msrb.mxu2 %v11541_v4  ;;  %2451 = vmatpush.bf16.msra.mxu0 %v11542_v43 }
 0x3c2   :  { %2440 = vmatpush.bf16.msra.mxu3 %v11543_v24  ;;  %2466 = vmatpush.bf16.msrb.mxu1 %v11544_v46 }
 0x3c4   :  { %2426 = vmatpush.bf16.msrb.mxu2 %v11628_v18  ;;  %2452 = vmatpush.bf16.msra.mxu0 %v11546_v48 }
 0x3c6   :  { %2441 = vmatpush.bf16.msra.mxu3 %v11547_v14  ;;  %2467 = vmatpush.bf16.msrb.mxu1 %v11548_v26 }
 0x3c8   :  { %2427 = vmatpush.bf16.msrb.mxu2 %v11630_v32  ;;  %2453 = vmatpush.bf16.msra.mxu0 %v8052_v5 }
 0x3c9   :  { %2442 = vmatmul.bf16.vlgmr.msra.gmra.mxu3 %v8764_v36  ;;  %2468 = vmatmul.bf16.vlgmr.msrb.gmra.mxu1 %v8764_v36 }
 0x3ca   :  { %2486 = vmatpush.bf16.msrb.mxu3 %v11549_v51  ;;  %2512 = vmatpush.bf16.msra.mxu1 %v11629_v8 }
 0x3cc   :  { %2428 = vmatpush.bf16.msrb.mxu2 %v11632_v6  ;;  %2454 = vmatpush.bf16.msra.mxu0 %v8080_v42 }
 0x3ce   :  { %2487 = vmatpush.bf16.msrb.mxu3 %v11551_v61  ;;  %2513 = vmatpush.bf16.msra.mxu1 %v11631_v31 }
 0x3cf   :  { %2429 = vmatmul.bf16.vlgmr.msrb.gmra.mxu2 %v8770_v47  ;;  %2455 = vmatmul.bf16.vlgmr.msra.gmra.mxu0 %v8770_v47 }
 0x3d0   :  { %2473 = vmatpush.bf16.msra.mxu2 %v8086_v28  ;;  %2499 = vmatpush.bf16.msrb.mxu0 %v11633_v33 }
 0x3d2   :  { %2488 = vmatpush.bf16.msrb.mxu3 %v11634_v9  ;;  %2514 = vmatpush.bf16.msra.mxu1 %v11635_v12 }
 0x3d4   :  { %2474 = vmatpush.bf16.msra.mxu2 %v11636_v62  ;;  %2500 = vmatpush.bf16.msrb.mxu0 %v11637_v29 }
 0x3d6   :  { %2489 = vmatpush.bf16.msrb.mxu3 %v11638_v56  ;;  %2515 = vmatpush.bf16.msra.mxu1 %v11639_v60 }
 0x3d8   :  { %2475 = vmatpush.bf16.msra.mxu2 %v11640_v7  ;;  %2501 = vmatpush.bf16.msrb.mxu0 %v11641_v41 }
 0x3da   :  { %2490 = vmatpush.bf16.msrb.mxu3 %v11642_v50  ;;  %2516 = vmatpush.bf16.msra.mxu1 %v11643_v23  ;;  %v11725_v23 = vld [vmem:[#allocation144_spill] sm:$0xff] }
 0x3dc   :  { %2476 = vmatpush.bf16.msra.mxu2 %v11644_v20  ;;  %2502 = vmatpush.bf16.msrb.mxu0 %v11645_v44  ;;  %v11656_v44 = vld [vmem:[#allocation13_spill] sm:$0xff] }
 0x3de   :  { %2491 = vmatpush.bf16.msrb.mxu3 %v11646_v10  ;;  %2517 = vmatpush.bf16.msra.mxu1 %v11647_v16  ;;  %v11657_v10 = vld [vmem:[#allocation18_spill] sm:$0xff]  ;;  %v11658_v16 = vld [vmem:[#allocation183_spill] sm:$0xff] }
 0x3e0   :  { %2477 = vmatpush.bf16.msra.mxu2 %v11648_v22  ;;  %2503 = vmatpush.bf16.msrb.mxu0 %v11649_v25  ;;  %v11659_v22 = vld [vmem:[#allocation184_spill] sm:$0xff] }
 0x3e2   :  { %2492 = vmatpush.bf16.msrb.mxu3 %v11650_v17  ;;  %2518 = vmatpush.bf16.msra.mxu1 %v11651_v55  ;;  %v11660_v55 = vld [vmem:[#allocation14_spill] sm:$0xff] }
 0x3e4   :  { %2478 = vmatpush.bf16.msra.mxu2 %v11652_v27  ;;  %2504 = vmatpush.bf16.msrb.mxu0 %v11653_v3  ;;  %v11661_v27 = vld [vmem:[#allocation22_spill] sm:$0xff]  ;;  %v11662_v3 = vld [vmem:[#allocation189_spill] sm:$0xff] }
 0x3e6   :  { %2493 = vmatpush.bf16.msrb.mxu3 %v11654_v35  ;;  %2519 = vmatpush.bf16.msra.mxu1 %v11655_v39  ;;  %v11663_v35 = vld [vmem:[#allocation190_spill] sm:$0xff]  ;;  %v11664_v39 = vld [vmem:[#allocation15_spill] sm:$0xff] }
 0x3e8   :  { %2479 = vmatpush.bf16.msra.mxu2 %v11658_v16  ;;  %2505 = vmatpush.bf16.msrb.mxu0 %v11659_v22  ;;  %v11666_v22 = vld [vmem:[#allocation17_spill] sm:$0xff]  ;;  %v11667_v16 = vld [vmem:[#allocation26_spill] sm:$0xff] }
 0x3e9   :  { %2494 = vmatmul.bf16.vlgmr.msrb.gmra.mxu3 %v8764_v36  ;;  %2520 = vmatmul.bf16.vlgmr.msra.gmra.mxu1 %v8764_v36  ;;  %v11668_v36 = vld [vmem:[#allocation19_spill] sm:$0xff] }
 0x3ea   :  { %2607 = vmatpush.bf16.msra.mxu3 %v11656_v44  ;;  %2633 = vmatpush.bf16.msrb.mxu1 %v11657_v10  ;;  %v11665_v44 = vld [vmem:[#allocation16_spill] sm:$0xff]  ;;  %v11675_v10 = vld [vmem:[#allocation35_spill] sm:$0xff] }
 0x3ec   :  { %2480 = vmatpush.bf16.msra.mxu2 %v11662_v3  ;;  %2506 = vmatpush.bf16.msrb.mxu0 %v11663_v35  ;;  %v11671_v3 = vld [vmem:[#allocation31_spill] sm:$0xff] }
 0x3ed   :  { %v11672_v35 = vld [vmem:[#allocation23_spill] sm:$0xff] }
 0x3ee   :  { %2608 = vmatpush.bf16.msra.mxu3 %v11660_v55  ;;  %2634 = vmatpush.bf16.msrb.mxu1 %v11661_v27  ;;  %v11669_v55 = vld [vmem:[#allocation20_spill] sm:$0xff]  ;;  %v11670_v27 = vld [vmem:[#allocation21_spill] sm:$0xff] }
 0x3ef   :  { %2481 = vmatmul.bf16.vlgmr.msra.gmra.mxu2 %v8770_v47  ;;  %2507 = vmatmul.bf16.vlgmr.msrb.gmra.mxu0 %v8770_v47  ;;  %v11676_v47 = vld [vmem:[#allocation27_spill] sm:$0xff] }
 0x3f0   :  { %2594 = vmatpush.bf16.msrb.mxu2 %v11664_v39  ;;  %2620 = vmatpush.bf16.msra.mxu0 %v11665_v44  ;;  %v11673_v39 = vld [vmem:[#allocation24_spill] sm:$0xff]  ;;  %v11674_v44 = vld [vmem:[#allocation25_spill] sm:$0xff] }
 0x3f2   :  { %2609 = vmatpush.bf16.msra.mxu3 %v11666_v22  ;;  %2635 = vmatpush.bf16.msrb.mxu1 %v11667_v16  ;;  %v11677_v22 = vld [vmem:[#allocation28_spill] sm:$0xff]  ;;  %v11678_v16 = vld [vmem:[#allocation30_spill] sm:$0xff] }
 0x3f4   :  { %2595 = vmatpush.bf16.msrb.mxu2 %v11668_v36  ;;  %2621 = vmatpush.bf16.msra.mxu0 %v11669_v55  ;;  %v11679_v36 = vld [vmem:[#allocation39_spill] sm:$0xff]  ;;  %v11680_v55 = vld [vmem:[#allocation32_spill] sm:$0xff] }
 0x3f6   :  { %2610 = vmatpush.bf16.msra.mxu3 %v11670_v27  ;;  %2636 = vmatpush.bf16.msrb.mxu1 %v11671_v3  ;;  %v11681_v27 = vld [vmem:[#allocation33_spill] sm:$0xff]  ;;  %v11682_v3 = vld [vmem:[#allocation34_spill] sm:$0xff] }
 0x3f8   :  { %2596 = vmatpush.bf16.msrb.mxu2 %v11672_v35  ;;  %2622 = vmatpush.bf16.msra.mxu0 %v11673_v39  ;;  %v11683_v35 = vld [vmem:[#allocation47_spill] sm:$0xff]  ;;  %v11684_v39 = vld [vmem:[#allocation36_spill] sm:$0xff] }
 0x3fa   :  { %2611 = vmatpush.bf16.msra.mxu3 %v11674_v44  ;;  %2637 = vmatpush.bf16.msrb.mxu1 %v11675_v10  ;;  %v11685_v44 = vld [vmem:[#allocation37_spill] sm:$0xff]  ;;  %v11686_v10 = vld [vmem:[#allocation38_spill] sm:$0xff] }
 0x3fc   :  { %2597 = vmatpush.bf16.msrb.mxu2 %v11676_v47  ;;  %2623 = vmatpush.bf16.msra.mxu0 %v11677_v22  ;;  %v11687_v47 = vld [vmem:[#allocation53_spill] sm:$0xff]  ;;  %v11688_v22 = vld [vmem:[#allocation40_spill] sm:$0xff] }
 0x3fe   :  { %2612 = vmatpush.bf16.msra.mxu3 %v11678_v16  ;;  %2638 = vmatpush.bf16.msrb.mxu1 %v11679_v36  ;;  %v11689_v16 = vld [vmem:[#allocation57_spill] sm:$0xff] }
 0x3ff   :  { %v11690_v36 = vld [vmem:[#allocation41_spill] sm:$0xff] }
 0x400   :  { %2598 = vmatpush.bf16.msrb.mxu2 %v11680_v55  ;;  %2624 = vmatpush.bf16.msra.mxu0 %v11681_v27  ;;  %v11691_v55 = vld [vmem:[#allocation43_spill] sm:$0xff]  ;;  %v11692_v27 = vld [vmem:[#allocation48_spill] sm:$0xff] }
 0x402   :  { %2613 = vmatpush.bf16.msra.mxu3 %v11682_v3  ;;  %2639 = vmatpush.bf16.msrb.mxu1 %v11683_v35  ;;  %v11693_v3 = vld [vmem:[#allocation61_spill] sm:$0xff] }
 0x403   :  { %v11694_v35 = vld [vmem:[#allocation49_spill] sm:$0xff] }
 0x404   :  { %2599 = vmatpush.bf16.msrb.mxu2 %v11684_v39  ;;  %2625 = vmatpush.bf16.msra.mxu0 %v11685_v44  ;;  %v11695_v39 = vld [vmem:[#allocation50_spill] sm:$0xff]  ;;  %v11696_v44 = vld [vmem:[#allocation51_spill] sm:$0xff] }
 0x406   :  { %2614 = vmatpush.bf16.msra.mxu3 %v11686_v10  ;;  %2640 = vmatpush.bf16.msrb.mxu1 %v11687_v47  ;;  %v11697_v10 = vld [vmem:[#allocation52_spill] sm:$0xff]  ;;  %v11698_v47 = vld [vmem:[#allocation54_spill] sm:$0xff] }
 0x408   :  { %2600 = vmatpush.bf16.msrb.mxu2 %v11690_v36  ;;  %2626 = vmatpush.bf16.msra.mxu0 %v11691_v55  ;;  %v11701_v36 = vld [vmem:[#allocation59_spill] sm:$0xff]  ;;  %v11702_v55 = vld [vmem:[#allocation60_spill] sm:$0xff] }
 0x40a   :  { %2659 = vmatpush.bf16.msrb.mxu3 %v11688_v22  ;;  %2685 = vmatpush.bf16.msra.mxu1 %v11689_v16  ;;  %v11699_v22 = vld [vmem:[#allocation65_spill] sm:$0xff]  ;;  %v11700_v16 = vld [vmem:[#allocation58_spill] sm:$0xff] }
 0x40c   :  { %2601 = vmatpush.bf16.msrb.mxu2 %v11694_v35  ;;  %2627 = vmatpush.bf16.msra.mxu0 %v11695_v39  ;;  %v11705_v35 = vld [vmem:[#allocation63_spill] sm:$0xff]  ;;  %v11706_v39 = vld [vmem:[#allocation64_spill] sm:$0xff] }
 0x40e   :  { %2660 = vmatpush.bf16.msrb.mxu3 %v11692_v27  ;;  %2686 = vmatpush.bf16.msra.mxu1 %v11693_v3  ;;  %v11703_v27 = vld [vmem:[#allocation72_spill] sm:$0xff]  ;;  %v11704_v3 = vld [vmem:[#allocation62_spill] sm:$0xff] }
 0x410   :  { %2646 = vmatpush.bf16.msra.mxu2 %v11696_v44  ;;  %2672 = vmatpush.bf16.msrb.mxu0 %v11697_v10  ;;  %v11707_v44 = vld [vmem:[#allocation76_spill] sm:$0xff]  ;;  %v11708_v10 = vld [vmem:[#allocation69_spill] sm:$0xff] }
 0x412   :  { %2661 = vmatpush.bf16.msrb.mxu3 %v11698_v47  ;;  %2687 = vmatpush.bf16.msra.mxu1 %v11699_v22  ;;  %v11709_v47 = vld [vmem:[#allocation70_spill] sm:$0xff]  ;;  %v11710_v22 = vld [vmem:[#allocation71_spill] sm:$0xff] }
 0x414   :  { %2647 = vmatpush.bf16.msra.mxu2 %v11700_v16  ;;  %2673 = vmatpush.bf16.msrb.mxu0 %v11701_v36  ;;  %v11711_v16 = vld [vmem:[#allocation81_spill] sm:$0xff] }
 0x415   :  { %v11712_v36 = vld [vmem:[#allocation73_spill] sm:$0xff] }
 0x416   :  { %2662 = vmatpush.bf16.msrb.mxu3 %v11702_v55  ;;  %2688 = vmatpush.bf16.msra.mxu1 %v11703_v27  ;;  %v11713_v55 = vld [vmem:[#allocation74_spill] sm:$0xff]  ;;  %v11714_v27 = vld [vmem:[#allocation75_spill] sm:$0xff] }
 0x418   :  { %2648 = vmatpush.bf16.msra.mxu2 %v11704_v3  ;;  %2674 = vmatpush.bf16.msrb.mxu0 %v11705_v35  ;;  %v11715_v3 = vld [vmem:[#allocation87_spill] sm:$0xff]  ;;  %v11716_v35 = vld [vmem:[#allocation77_spill] sm:$0xff] }
 0x41a   :  { %2663 = vmatpush.bf16.msrb.mxu3 %v11706_v39  ;;  %2689 = vmatpush.bf16.msra.mxu1 %v11707_v44  ;;  %v11717_v39 = vld [vmem:[#allocation78_spill] sm:$0xff]  ;;  %v11718_v44 = vld [vmem:[#allocation79_spill] sm:$0xff] }
 0x41c   :  { %2649 = vmatpush.bf16.msra.mxu2 %v11708_v10  ;;  %2675 = vmatpush.bf16.msrb.mxu0 %v11709_v47  ;;  %v11719_v10 = vld [vmem:[#allocation91_spill] sm:$0xff] }
 0x41d   :  { %v11720_v47 = vld [vmem:[#allocation83_spill] sm:$0xff] }
 0x41e   :  { %2664 = vmatpush.bf16.msrb.mxu3 %v11710_v22  ;;  %2690 = vmatpush.bf16.msra.mxu1 %v11711_v16  ;;  %v11721_v22 = vld [vmem:[#allocation86_spill] sm:$0xff]  ;;  %v11722_v16 = vld [vmem:[#allocation89_spill] sm:$0xff] }
 0x420   :  { %2650 = vmatpush.bf16.msra.mxu2 %v11712_v36  ;;  %2676 = vmatpush.bf16.msrb.mxu0 %v11713_v55  ;;  %v11723_v36 = vld [vmem:[#allocation90_spill] sm:$0xff] }
 0x422   :  { %2665 = vmatpush.bf16.msrb.mxu3 %v11714_v27  ;;  %2691 = vmatpush.bf16.msra.mxu1 %v11715_v3  ;;  %v11724_v3 = vld [vmem:[#allocation143_spill] sm:$0xff] }
 0x424   :  { %2651 = vmatpush.bf16.msra.mxu2 %v11716_v35  ;;  %2677 = vmatpush.bf16.msrb.mxu0 %v11717_v39 }
 0x426   :  { %2666 = vmatpush.bf16.msrb.mxu3 %v11718_v44  ;;  %2692 = vmatpush.bf16.msra.mxu1 %v11719_v10  ;;  %v2365_v55 = vpop.f32.mrf.mxu1 }
 0x428   :  { %2652 = vmatpush.bf16.msra.mxu2 %v11720_v47  ;;  %2678 = vmatpush.bf16.msrb.mxu0 %v11721_v22 }
 0x42c   :  { %2653 = vmatpush.bf16.msra.mxu2 %v11722_v16  ;;  %2679 = vmatpush.bf16.msrb.mxu0 %v11723_v36  ;;  %v2339_v27 = vpop.f32.mrf.mxu3  ;;  %v2352_v17 = vpop.f32.mrf.mxu0 }
 0x42d   :  { %v2353_v25 = vadd.f32 %v2352_v17, %v11724_v3 }
 0x42e   :  { %v2367_v35 = vpop.f32.mrf.mxu1 }
 0x42f   :  { %v2366_v20 = vadd.f32 %v2365_v55, %v2353_v25 }
 0x431   :  { %v2526_v42 = vmul.f32 0.5, %v2366_v20 }
 0x432   :  { %v2326_v39 = vpop.f32.mrf.mxu2 }
 0x433   :  { %v2327_v44 = vadd.f32 %v2326_v39, %v11725_v23 }
 0x434   :  { %v2341_v50 = vpop.f32.mrf.mxu3  ;;  %v2354_v10 = vpop.f32.mrf.mxu0 }
 0x435   :  { %v2340_v41 = vadd.f32 %v2339_v27, %v2327_v44  ;;  %v11726_v50 = vld [vmem:[#allocation149_spill] sm:$0xff] }
 0x436   :  { %v2417_v47 = vpop.f32.mrf.mxu1 }
 0x43a   :  { %v2328_v7 = vpop.f32.mrf.mxu2 }
 0x43b   :  { %v11727_v7 = vld [vmem:[#allocation150_spill] sm:$0xff] }
 0x43c   :  { %v2391_v22 = vpop.f32.mrf.mxu3  ;;  %v2404_v60 = vpop.f32.mrf.mxu0 }
 0x43d   :  { %v2405_v10 = vadd.f32 %v2404_v60, %v11726_v50 }
 0x43e   :  { %v2419_v16 = vpop.f32.mrf.mxu1 }
 0x43f   :  { %v2418_v27 = vadd.f32 %v2417_v47, %v2405_v10  ;;  %v11730_v47 = vld [vmem:[#allocation155_spill] sm:$0xff] }
 0x441   :  { %v2528_v28 = vmul.f32 0.5, %v2418_v27 }
 0x442   :  { %v2378_v56 = vpop.f32.mrf.mxu2 }
 0x443   :  { %v2379_v39 = vadd.f32 %v2378_v56, %v11727_v7  ;;  %6824 = vtanh.f32 %v2528_v28  ;;  %v2525_v56 = vmul.f32 0.5, %v2340_v41  ;;  %v11731_v28 = vld [vmem:[#allocation153_spill] sm:$0xff] }
 0x444   :  { %v2393_v36 = vpop.f32.mrf.mxu3  ;;  %v2406_v29 = vpop.f32.mrf.mxu0  ;;  %6826 = vtanh.f32 %v2526_v42 }
 0x445   :  { %v11728_v36 = vld [vmem:[#allocation154_spill] sm:$0xff]  ;;  %v2392_v6 = vadd.f32 %v2391_v22, %v2379_v39 }
 0x446   :  { %v2469_v62 = vpop.f32.mrf.mxu1 }
 0x447   :  { %v2527_v60 = vmul.f32 0.5, %v2392_v6 }
 0x44a   :  { %v2380_v12 = vpop.f32.mrf.mxu2 }
 0x44c   :  { %v2443_v9 = vpop.f32.mrf.mxu3  ;;  %v2456_v17 = vpop.f32.mrf.mxu0 }
 0x44e   :  { %v2471_v3 = vpop.f32.mrf.mxu1 }
 0x452   :  { %v2430_v25 = vpop.f32.mrf.mxu2 }
 0x454   :  { %v2445_v55 = vpop.f32.mrf.mxu3  ;;  %v2458_v35 = vpop.f32.mrf.mxu0 }
 0x455   :  { %v11729_v55 = vld [vmem:[#allocation152_spill] sm:$0xff] }
 0x456   :  { %v2457_v35 = vadd.f32 %v2456_v17, %v11729_v55 }
 0x458   :  { %v2470_v61 = vadd.f32 %v2469_v62, %v2457_v35 }
 0x45a   :  { %v2432_v23 = vpop.f32.mrf.mxu2 }
 0x466   :  { %v2521_v44 = vpop.f32.mrf.mxu1 }
 0x46c   :  { %v2495_v33 = vpop.f32.mrf.mxu3  ;;  %v2508_v16 = vpop.f32.mrf.mxu0 }
 0x46d   :  { %v2509_v29 = vadd.f32 %v2508_v16, %v11728_v36  ;;  %v6825_v16 = vpop.eup %6824 }
 0x46e   :  { %v2523_v12 = vpop.f32.mrf.mxu1  ;;  %v6827_v22 = vpop.eup %6826  ;;  %v2544_v17 = vmul.f32 0.5, %v6825_v16 }
 0x46f   :  { %v2522_v31 = vadd.f32 %v2521_v44, %v2509_v29  ;;  %v2530_v44 = vmul.f32 0.5, %v2470_v61  ;;  %v2542_v36 = vmul.f32 0.5, %v6827_v22 }
 0x471   :  { %v2532_v3 = vmul.f32 0.5, %v2522_v31  ;;  %v2431_v31 = vadd.f32 %v2430_v25, %v11731_v28  ;;  %v2550_v35 = vadd.f32 0.5, %v2542_v36 }
 0x472   :  { %v2482_v23 = vpop.f32.mrf.mxu2 }
 0x473   :  { %6828 = vtanh.f32 %v2532_v3  ;;  %v2483_v50 = vadd.f32 %v2482_v23, %v11730_v47  ;;  %v2444_v29 = vadd.f32 %v2443_v9, %v2431_v31 }
 0x474   :  { %v2497_v10 = vpop.f32.mrf.mxu3  ;;  %v2510_v7 = vpop.f32.mrf.mxu0  ;;  %6830 = vtanh.f32 %v2527_v60 }
 0x475   :  { %v2496_v27 = vadd.f32 %v2495_v33, %v2483_v50  ;;  %6832 = vtanh.f32 %v2525_v56  ;;  %v2552_v33 = vadd.f32 0.5, %v2544_v17  ;;  %v2529_v60 = vmul.f32 0.5, %v2444_v29 }
 0x477   :  { %v2531_v20 = vmul.f32 0.5, %v2496_v27  ;;  %v2562_v56 = vmul.f32 %v2552_v33, %v8754_v40  ;;  %v11732_v33 = vld [vmem:[#allocation113_spill] sm:$0xff] }
 0x479   :  { %v6829_v42 = vpop.eup %6828  ;;  %6834 = vtanh.f32 %v2531_v20 }
 0x47a   :  { %v2548_v6 = vmul.f32 0.5, %v6829_v42  ;;  %v2484_v39 = vpop.f32.mrf.mxu2  ;;  %v6831_v12 = vpop.eup %6830  ;;  %6836 = vtanh.f32 %v2530_v44 }
 0x47b   :  { %v6833_v3 = vpop.eup %6832  ;;  %v2543_v23 = vmul.f32 0.5, %v6831_v12  ;;  %6838 = vtanh.f32 %v2529_v60  ;;  %v11737_v60 = vld [vmem:[#allocation148_spill] sm:$0xff] }
 0x47c   :  { %v2556_v41 = vadd.f32 0.5, %v2548_v6  ;;  %v2541_v50 = vmul.f32 0.5, %v6833_v3 }
 0x47d   :  { %v2551_v27 = vadd.f32 0.5, %v2543_v23  ;;  %v11736_v23 = vld [vmem:[#allocation147_spill] sm:$0xff] }
 0x47e   :  { %v2558_v62 = vmul.f32 2.0, %v2556_v41  ;;  %v2549_v20 = vadd.f32 0.5, %v2541_v50  ;;  %v11740_v50 = vld [vmem:[#allocation156_spill] sm:$0xff] }
 0x47f   :  { %v6835_v55 = vpop.eup %6834  ;;  %v2561_v31 = vmul.f32 %v2551_v27, %v8758_v19  ;;  %v11745_v27 = vld [vmem:[#allocation160_spill] sm:$0xff] }
 0x480   :  { %v6593_v47 = vadd.f32 -1.0, %v2558_v62  ;;  %v2547_v25 = vmul.f32 0.5, %v6835_v55  ;;  %v6837_v7 = vpop.eup %6836  ;;  %v11733_v62 = vld [vmem:[#allocation121_spill] sm:$0xff] }
 0x481   :  { %v2546_v28 = vmul.f32 0.5, %v6837_v7  ;;  %v6839_v17 = vpop.eup %6838  ;;  %v11734_v55 = vld [vmem:[#allocation145_spill] sm:$0xff]  ;;  %v11744_v7 = vld [vmem:[#allocation159_spill] sm:$0xff] }
 0x482   :  { %v2564_v61 = vmul.f32 %v6593_v47, %v2550_v35  ;;  %v2555_v10 = vadd.f32 0.5, %v2547_v25  ;;  %v2545_v39 = vmul.f32 0.5, %v6839_v17  ;;  %v11735_v35 = vld [vmem:[#allocation146_spill] sm:$0xff]  ;;  %v11738_v47 = vld [vmem:[#allocation115_spill] sm:$0xff]  ;;  %v11739_v25 = vld [vmem:[#allocation125_spill] sm:$0xff] }
 0x483   :  { %v2554_v40 = vadd.f32 0.5, %v2546_v28  ;;  %v11749_v28 = vld [vmem:[#allocation168_spill] sm:$0xff]  ;;  %v11752_v17 = vld [vmem:[#allocation171_spill] sm:$0xff] }
 0x484   :  { %v8921_v9 = vadd.f32 %v2564_v61, %v2562_v56  ;;  %v2557_v16 = vmul.f32 2.0, %v2555_v10  ;;  %v2553_v41 = vadd.f32 0.5, %v2545_v39  ;;  %v11741_v56 = vld [vmem:[#allocation157_spill] sm:$0xff]  ;;  %v11742_v61 = vld [vmem:[#allocation120_spill] sm:$0xff]  ;;  %v11743_v10 = vld [vmem:[#allocation131_spill] sm:$0xff] }
 0x485   :  { %v11755_v39 = vld [vmem:[#allocation151_spill] sm:$0xff] }
 0x486   :  { %6840 = vtanh.f32 %v8921_v9  ;;  %v6592_v22 = vadd.f32 -1.0, %v2557_v16  ;;  %v11746_v16 = vld [vmem:[#allocation122_spill] sm:$0xff] }
 0x488   :  { %v2563_v42 = vmul.f32 %v6592_v22, %v2549_v20  ;;  %v11747_v20 = vld [vmem:[#allocation137_spill] sm:$0xff]  ;;  %v11748_v22 = vld [vmem:[#allocation167_spill] sm:$0xff] }
 0x48a   :  { %v8925_v44 = vadd.f32 %v2563_v42, %v2561_v31  ;;  %v11750_v31 = vld [vmem:[#allocation130_spill] sm:$0xff] }
 0x48b   :  { %v11751_v42 = vld [vmem:[#allocation142_spill] sm:$0xff] }
 0x48c   :  { %v6841_v6 = vpop.eup %6840  ;;  %6842 = vtanh.f32 %v8925_v44 }
 0x48d   :  { %v2570_v36 = vmul.f32 %v6841_v6, %v2554_v40  ;;  %v11753_v40 = vld [vmem:[#allocation172_spill] sm:$0xff]  ;;  %v11754_v6 = vld [vmem:[#allocation135_spill] sm:$0xff] }
 0x48f   :  { %6594 = vst [vmem:[%s10941_s5 + $0x4] sm:$0x3] %v2570_v36  ;;  %v8931_v29 = vpack.c.bf16 %v2570_v36, %v2570_v36  ;;  %v11756_v36 = vld [vmem:[#allocation177_spill] sm:$0xff] }
 0x491   :  { %2615 = vmatmul.bf16.vlgmr.msra.gmra.mxu3 %v8931_v29  ;;  %2641 = vmatmul.bf16.vlgmr.msrb.gmra.mxu1 %v8931_v29 }
 0x492   :  { %v6843_v19 = vpop.eup %6842  ;;  %2711 = vmatpush.bf16.msra.mxu3 %v11525_v63  ;;  %2737 = vmatpush.bf16.msrb.mxu1 %v11526_v53 }
 0x493   :  { %v2569_v12 = vmul.f32 %v6843_v19, %v2553_v41  ;;  %v11757_v41 = vld [vmem:[#allocation178_spill] sm:$0xff]  ;;  %v11758_v19 = vld [vmem:[#allocation141_spill] sm:$0xff] }
 0x495   :  { %v8937_v3 = vpack.c.bf16 %v2569_v12, %v2569_v12  ;;  %v11759_v12 = vld [vmem:[#allocation158_spill] sm:$0xff] }
 0x496   :  { %2712 = vmatpush.bf16.msra.mxu3 %v11527_v34  ;;  %2738 = vmatpush.bf16.msrb.mxu1 %v11528_v1 }
 0x497   :  { %2602 = vmatmul.bf16.vlgmr.msrb.gmra.mxu2 %v8937_v3  ;;  %2628 = vmatmul.bf16.vlgmr.msra.gmra.mxu0 %v8937_v3 }
 0x498   :  { %2698 = vmatpush.bf16.msrb.mxu2 %v11529_v57  ;;  %2724 = vmatpush.bf16.msra.mxu0 %v11530_v58 }
 0x49a   :  { %2713 = vmatpush.bf16.msra.mxu3 %v11531_v45  ;;  %2739 = vmatpush.bf16.msrb.mxu1 %v11532_v11 }
 0x49c   :  { %2699 = vmatpush.bf16.msrb.mxu2 %v7933_v0  ;;  %2725 = vmatpush.bf16.msra.mxu0 %v7935_v49 }
 0x49e   :  { %2714 = vmatpush.bf16.msra.mxu3 %v11533_v21  ;;  %2740 = vmatpush.bf16.msrb.mxu1 %v11534_v52 }
 0x4a0   :  { %2700 = vmatpush.bf16.msrb.mxu2 %v11535_v38  ;;  %2726 = vmatpush.bf16.msra.mxu0 %v11536_v13 }
 0x4a1   :  { %2667 = vmatmul.bf16.vlgmr.msrb.gmra.mxu3 %v8931_v29  ;;  %2693 = vmatmul.bf16.vlgmr.msra.gmra.mxu1 %v8931_v29 }
 0x4a2   :  { %2715 = vmatpush.bf16.msra.mxu3 %v11537_v54  ;;  %2741 = vmatpush.bf16.msrb.mxu1 %v11538_v37 }
 0x4a4   :  { %2701 = vmatpush.bf16.msrb.mxu2 %v7975_v2  ;;  %2727 = vmatpush.bf16.msra.mxu0 %v7977_v30 }
 0x4a6   :  { %2716 = vmatpush.bf16.msra.mxu3 %v11539_v15  ;;  %2742 = vmatpush.bf16.msrb.mxu1 %v11540_v59 }
 0x4a7   :  { %2654 = vmatmul.bf16.vlgmr.msra.gmra.mxu2 %v8937_v3  ;;  %2680 = vmatmul.bf16.vlgmr.msrb.gmra.mxu0 %v8937_v3 }
 0x4a8   :  { %2702 = vmatpush.bf16.msrb.mxu2 %v11541_v4  ;;  %2728 = vmatpush.bf16.msra.mxu0 %v11542_v43 }
 0x4aa   :  { %2717 = vmatpush.bf16.msra.mxu3 %v11543_v24  ;;  %2743 = vmatpush.bf16.msrb.mxu1 %v11544_v46 }
 0x4ac   :  { %2703 = vmatpush.bf16.msrb.mxu2 %v11628_v18  ;;  %2729 = vmatpush.bf16.msra.mxu0 %v11546_v48 }
 0x4ae   :  { %2718 = vmatpush.bf16.msra.mxu3 %v11547_v14  ;;  %2744 = vmatpush.bf16.msrb.mxu1 %v11548_v26 }
 0x4b0   :  { %2704 = vmatpush.bf16.msrb.mxu2 %v11630_v32  ;;  %2730 = vmatpush.bf16.msra.mxu0 %v8052_v5 }
 0x4b1   :  { %2719 = vmatmul.bf16.vlgmr.msra.gmra.mxu3 %v8931_v29  ;;  %2745 = vmatmul.bf16.vlgmr.msrb.gmra.mxu1 %v8931_v29 }
 0x4b2   :  { %2763 = vmatpush.bf16.msrb.mxu3 %v11549_v51  ;;  %2789 = vmatpush.bf16.msra.mxu1 %v11629_v8 }
 0x4b4   :  { %2705 = vmatpush.bf16.msrb.mxu2 %v11734_v55  ;;  %2731 = vmatpush.bf16.msra.mxu0 %v11735_v35 }
 0x4b6   :  { %2764 = vmatpush.bf16.msrb.mxu3 %v11732_v33  ;;  %2790 = vmatpush.bf16.msra.mxu1 %v11733_v62 }
 0x4b7   :  { %2706 = vmatmul.bf16.vlgmr.msrb.gmra.mxu2 %v8937_v3  ;;  %2732 = vmatmul.bf16.vlgmr.msra.gmra.mxu0 %v8937_v3 }
 0x4b8   :  { %2750 = vmatpush.bf16.msra.mxu2 %v11736_v23  ;;  %2776 = vmatpush.bf16.msrb.mxu0 %v11737_v60 }
 0x4ba   :  { %2765 = vmatpush.bf16.msrb.mxu3 %v11738_v47  ;;  %2791 = vmatpush.bf16.msra.mxu1 %v11739_v25 }
 0x4bc   :  { %2751 = vmatpush.bf16.msra.mxu2 %v11740_v50  ;;  %2777 = vmatpush.bf16.msrb.mxu0 %v11741_v56 }
 0x4be   :  { %2766 = vmatpush.bf16.msrb.mxu3 %v11742_v61  ;;  %2792 = vmatpush.bf16.msra.mxu1 %v11743_v10 }
 0x4c0   :  { %2752 = vmatpush.bf16.msra.mxu2 %v11744_v7  ;;  %2778 = vmatpush.bf16.msrb.mxu0 %v11745_v27 }
 0x4c2   :  { %2767 = vmatpush.bf16.msrb.mxu3 %v11746_v16  ;;  %2793 = vmatpush.bf16.msra.mxu1 %v11747_v20  ;;  %v11829_v20 = vld [vmem:[#allocation162_spill] sm:$0xff] }
 0x4c4   :  { %2753 = vmatpush.bf16.msra.mxu2 %v11748_v22  ;;  %2779 = vmatpush.bf16.msrb.mxu0 %v11749_v28  ;;  %v11760_v28 = vld [vmem:[#allocation13_spill] sm:$0xff] }
 0x4c6   :  { %2768 = vmatpush.bf16.msrb.mxu3 %v11750_v31  ;;  %2794 = vmatpush.bf16.msra.mxu1 %v11751_v42  ;;  %v11761_v31 = vld [vmem:[#allocation18_spill] sm:$0xff]  ;;  %v11762_v42 = vld [vmem:[#allocation183_spill] sm:$0xff] }
 0x4c8   :  { %2754 = vmatpush.bf16.msra.mxu2 %v11752_v17  ;;  %2780 = vmatpush.bf16.msrb.mxu0 %v11753_v40  ;;  %v11763_v17 = vld [vmem:[#allocation184_spill] sm:$0xff] }
 0x4ca   :  { %2769 = vmatpush.bf16.msrb.mxu3 %v11754_v6  ;;  %2795 = vmatpush.bf16.msra.mxu1 %v11755_v39  ;;  %v11764_v39 = vld [vmem:[#allocation14_spill] sm:$0xff] }
 0x4cc   :  { %2755 = vmatpush.bf16.msra.mxu2 %v11756_v36  ;;  %2781 = vmatpush.bf16.msrb.mxu0 %v11757_v41  ;;  %v11765_v36 = vld [vmem:[#allocation22_spill] sm:$0xff]  ;;  %v11766_v41 = vld [vmem:[#allocation189_spill] sm:$0xff] }
 0x4ce   :  { %2770 = vmatpush.bf16.msrb.mxu3 %v11758_v19  ;;  %2796 = vmatpush.bf16.msra.mxu1 %v11759_v12  ;;  %v11767_v19 = vld [vmem:[#allocation190_spill] sm:$0xff]  ;;  %v11768_v12 = vld [vmem:[#allocation15_spill] sm:$0xff] }
 0x4d0   :  { %2756 = vmatpush.bf16.msra.mxu2 %v11762_v42  ;;  %2782 = vmatpush.bf16.msrb.mxu0 %v11763_v17  ;;  %v11770_v17 = vld [vmem:[#allocation17_spill] sm:$0xff]  ;;  %v11771_v42 = vld [vmem:[#allocation26_spill] sm:$0xff] }
 0x4d1   :  { %2771 = vmatmul.bf16.vlgmr.msrb.gmra.mxu3 %v8931_v29  ;;  %2797 = vmatmul.bf16.vlgmr.msra.gmra.mxu1 %v8931_v29  ;;  %v11772_v29 = vld [vmem:[#allocation19_spill] sm:$0xff] }
 0x4d2   :  { %2884 = vmatpush.bf16.msra.mxu3 %v11760_v28  ;;  %2910 = vmatpush.bf16.msrb.mxu1 %v11761_v31  ;;  %v11769_v28 = vld [vmem:[#allocation16_spill] sm:$0xff]  ;;  %v11779_v31 = vld [vmem:[#allocation35_spill] sm:$0xff] }
 0x4d4   :  { %2757 = vmatpush.bf16.msra.mxu2 %v11766_v41  ;;  %2783 = vmatpush.bf16.msrb.mxu0 %v11767_v19  ;;  %v11775_v41 = vld [vmem:[#allocation31_spill] sm:$0xff] }
 0x4d5   :  { %v11776_v19 = vld [vmem:[#allocation23_spill] sm:$0xff] }
 0x4d6   :  { %2885 = vmatpush.bf16.msra.mxu3 %v11764_v39  ;;  %2911 = vmatpush.bf16.msrb.mxu1 %v11765_v36  ;;  %v11773_v39 = vld [vmem:[#allocation20_spill] sm:$0xff]  ;;  %v11774_v36 = vld [vmem:[#allocation21_spill] sm:$0xff] }
 0x4d7   :  { %2758 = vmatmul.bf16.vlgmr.msra.gmra.mxu2 %v8937_v3  ;;  %2784 = vmatmul.bf16.vlgmr.msrb.gmra.mxu0 %v8937_v3  ;;  %v11780_v3 = vld [vmem:[#allocation27_spill] sm:$0xff] }
 0x4d8   :  { %2871 = vmatpush.bf16.msrb.mxu2 %v11768_v12  ;;  %2897 = vmatpush.bf16.msra.mxu0 %v11769_v28  ;;  %v11777_v12 = vld [vmem:[#allocation24_spill] sm:$0xff]  ;;  %v11778_v28 = vld [vmem:[#allocation25_spill] sm:$0xff] }
 0x4da   :  { %2886 = vmatpush.bf16.msra.mxu3 %v11770_v17  ;;  %2912 = vmatpush.bf16.msrb.mxu1 %v11771_v42  ;;  %v11781_v17 = vld [vmem:[#allocation28_spill] sm:$0xff]  ;;  %v11782_v42 = vld [vmem:[#allocation30_spill] sm:$0xff] }
 0x4dc   :  { %2872 = vmatpush.bf16.msrb.mxu2 %v11772_v29  ;;  %2898 = vmatpush.bf16.msra.mxu0 %v11773_v39  ;;  %v11783_v29 = vld [vmem:[#allocation39_spill] sm:$0xff]  ;;  %v11784_v39 = vld [vmem:[#allocation32_spill] sm:$0xff] }
 0x4de   :  { %2887 = vmatpush.bf16.msra.mxu3 %v11774_v36  ;;  %2913 = vmatpush.bf16.msrb.mxu1 %v11775_v41  ;;  %v11785_v36 = vld [vmem:[#allocation33_spill] sm:$0xff]  ;;  %v11786_v41 = vld [vmem:[#allocation34_spill] sm:$0xff] }
 0x4e0   :  { %2873 = vmatpush.bf16.msrb.mxu2 %v11776_v19  ;;  %2899 = vmatpush.bf16.msra.mxu0 %v11777_v12  ;;  %v11787_v19 = vld [vmem:[#allocation47_spill] sm:$0xff]  ;;  %v11788_v12 = vld [vmem:[#allocation36_spill] sm:$0xff] }
 0x4e2   :  { %2888 = vmatpush.bf16.msra.mxu3 %v11778_v28  ;;  %2914 = vmatpush.bf16.msrb.mxu1 %v11779_v31  ;;  %v11789_v28 = vld [vmem:[#allocation37_spill] sm:$0xff]  ;;  %v11790_v31 = vld [vmem:[#allocation38_spill] sm:$0xff] }
 0x4e4   :  { %2874 = vmatpush.bf16.msrb.mxu2 %v11780_v3  ;;  %2900 = vmatpush.bf16.msra.mxu0 %v11781_v17  ;;  %v11791_v3 = vld [vmem:[#allocation53_spill] sm:$0xff]  ;;  %v11792_v17 = vld [vmem:[#allocation40_spill] sm:$0xff] }
 0x4e6   :  { %2889 = vmatpush.bf16.msra.mxu3 %v11782_v42  ;;  %2915 = vmatpush.bf16.msrb.mxu1 %v11783_v29  ;;  %v11793_v42 = vld [vmem:[#allocation57_spill] sm:$0xff] }
 0x4e7   :  { %v11794_v29 = vld [vmem:[#allocation41_spill] sm:$0xff] }
 0x4e8   :  { %2875 = vmatpush.bf16.msrb.mxu2 %v11784_v39  ;;  %2901 = vmatpush.bf16.msra.mxu0 %v11785_v36  ;;  %v11795_v39 = vld [vmem:[#allocation43_spill] sm:$0xff]  ;;  %v11796_v36 = vld [vmem:[#allocation48_spill] sm:$0xff] }
 0x4ea   :  { %2890 = vmatpush.bf16.msra.mxu3 %v11786_v41  ;;  %2916 = vmatpush.bf16.msrb.mxu1 %v11787_v19  ;;  %v11797_v41 = vld [vmem:[#allocation61_spill] sm:$0xff] }
 0x4eb   :  { %v11798_v19 = vld [vmem:[#allocation49_spill] sm:$0xff] }
 0x4ec   :  { %2876 = vmatpush.bf16.msrb.mxu2 %v11788_v12  ;;  %2902 = vmatpush.bf16.msra.mxu0 %v11789_v28  ;;  %v11799_v12 = vld [vmem:[#allocation50_spill] sm:$0xff]  ;;  %v11800_v28 = vld [vmem:[#allocation51_spill] sm:$0xff] }
 0x4ee   :  { %2891 = vmatpush.bf16.msra.mxu3 %v11790_v31  ;;  %2917 = vmatpush.bf16.msrb.mxu1 %v11791_v3  ;;  %v11801_v31 = vld [vmem:[#allocation52_spill] sm:$0xff]  ;;  %v11802_v3 = vld [vmem:[#allocation54_spill] sm:$0xff] }
 0x4f0   :  { %2877 = vmatpush.bf16.msrb.mxu2 %v11794_v29  ;;  %2903 = vmatpush.bf16.msra.mxu0 %v11795_v39  ;;  %v11805_v29 = vld [vmem:[#allocation59_spill] sm:$0xff]  ;;  %v11806_v39 = vld [vmem:[#allocation60_spill] sm:$0xff] }
 0x4f2   :  { %2936 = vmatpush.bf16.msrb.mxu3 %v11792_v17  ;;  %2962 = vmatpush.bf16.msra.mxu1 %v11793_v42  ;;  %v11803_v17 = vld [vmem:[#allocation65_spill] sm:$0xff]  ;;  %v11804_v42 = vld [vmem:[#allocation58_spill] sm:$0xff] }
 0x4f4   :  { %2878 = vmatpush.bf16.msrb.mxu2 %v11798_v19  ;;  %2904 = vmatpush.bf16.msra.mxu0 %v11799_v12  ;;  %v11809_v19 = vld [vmem:[#allocation63_spill] sm:$0xff]  ;;  %v11810_v12 = vld [vmem:[#allocation64_spill] sm:$0xff] }
 0x4f6   :  { %2937 = vmatpush.bf16.msrb.mxu3 %v11796_v36  ;;  %2963 = vmatpush.bf16.msra.mxu1 %v11797_v41  ;;  %v11807_v36 = vld [vmem:[#allocation72_spill] sm:$0xff]  ;;  %v11808_v41 = vld [vmem:[#allocation62_spill] sm:$0xff] }
 0x4f8   :  { %2923 = vmatpush.bf16.msra.mxu2 %v11800_v28  ;;  %2949 = vmatpush.bf16.msrb.mxu0 %v11801_v31  ;;  %v11811_v28 = vld [vmem:[#allocation76_spill] sm:$0xff]  ;;  %v11812_v31 = vld [vmem:[#allocation69_spill] sm:$0xff] }
 0x4fa   :  { %2938 = vmatpush.bf16.msrb.mxu3 %v11802_v3  ;;  %2964 = vmatpush.bf16.msra.mxu1 %v11803_v17  ;;  %v11813_v3 = vld [vmem:[#allocation70_spill] sm:$0xff]  ;;  %v11814_v17 = vld [vmem:[#allocation71_spill] sm:$0xff] }
 0x4fc   :  { %2924 = vmatpush.bf16.msra.mxu2 %v11804_v42  ;;  %2950 = vmatpush.bf16.msrb.mxu0 %v11805_v29  ;;  %v11815_v42 = vld [vmem:[#allocation81_spill] sm:$0xff] }
 0x4fd   :  { %v11816_v29 = vld [vmem:[#allocation73_spill] sm:$0xff] }
 0x4fe   :  { %2939 = vmatpush.bf16.msrb.mxu3 %v11806_v39  ;;  %2965 = vmatpush.bf16.msra.mxu1 %v11807_v36  ;;  %v11817_v39 = vld [vmem:[#allocation74_spill] sm:$0xff]  ;;  %v11818_v36 = vld [vmem:[#allocation75_spill] sm:$0xff] }
 0x500   :  { %2925 = vmatpush.bf16.msra.mxu2 %v11808_v41  ;;  %2951 = vmatpush.bf16.msrb.mxu0 %v11809_v19  ;;  %v11819_v41 = vld [vmem:[#allocation87_spill] sm:$0xff]  ;;  %v11820_v19 = vld [vmem:[#allocation77_spill] sm:$0xff] }
 0x502   :  { %2940 = vmatpush.bf16.msrb.mxu3 %v11810_v12  ;;  %2966 = vmatpush.bf16.msra.mxu1 %v11811_v28  ;;  %v11821_v12 = vld [vmem:[#allocation78_spill] sm:$0xff]  ;;  %v11822_v28 = vld [vmem:[#allocation79_spill] sm:$0xff] }
 0x504   :  { %2926 = vmatpush.bf16.msra.mxu2 %v11812_v31  ;;  %2952 = vmatpush.bf16.msrb.mxu0 %v11813_v3  ;;  %v11823_v31 = vld [vmem:[#allocation91_spill] sm:$0xff] }
 0x505   :  { %v11824_v3 = vld [vmem:[#allocation83_spill] sm:$0xff] }
 0x506   :  { %2941 = vmatpush.bf16.msrb.mxu3 %v11814_v17  ;;  %2967 = vmatpush.bf16.msra.mxu1 %v11815_v42  ;;  %v11825_v17 = vld [vmem:[#allocation86_spill] sm:$0xff]  ;;  %v11826_v42 = vld [vmem:[#allocation89_spill] sm:$0xff] }
 0x508   :  { %2927 = vmatpush.bf16.msra.mxu2 %v11816_v29  ;;  %2953 = vmatpush.bf16.msrb.mxu0 %v11817_v39  ;;  %v11827_v29 = vld [vmem:[#allocation90_spill] sm:$0xff] }
 0x50a   :  { %2942 = vmatpush.bf16.msrb.mxu3 %v11818_v36  ;;  %2968 = vmatpush.bf16.msra.mxu1 %v11819_v41  ;;  %v11828_v41 = vld [vmem:[#allocation161_spill] sm:$0xff] }
 0x50c   :  { %2928 = vmatpush.bf16.msra.mxu2 %v11820_v19  ;;  %2954 = vmatpush.bf16.msrb.mxu0 %v11821_v12 }
 0x50e   :  { %2943 = vmatpush.bf16.msrb.mxu3 %v11822_v28  ;;  %2969 = vmatpush.bf16.msra.mxu1 %v11823_v31  ;;  %v2642_v39 = vpop.f32.mrf.mxu1 }
 0x510   :  { %2929 = vmatpush.bf16.msra.mxu2 %v11824_v3  ;;  %2955 = vmatpush.bf16.msrb.mxu0 %v11825_v17 }
 0x514   :  { %2930 = vmatpush.bf16.msra.mxu2 %v11826_v42  ;;  %2956 = vmatpush.bf16.msrb.mxu0 %v11827_v29  ;;  %v2616_v36 = vpop.f32.mrf.mxu3  ;;  %v2629_v6 = vpop.f32.mrf.mxu0 }
 0x515   :  { %v2630_v40 = vadd.f32 %v2629_v6, %v11828_v41 }
 0x516   :  { %v2644_v19 = vpop.f32.mrf.mxu1 }
 0x517   :  { %v2643_v22 = vadd.f32 %v2642_v39, %v2630_v40 }
 0x519   :  { %v2803_v35 = vmul.f32 0.5, %v2643_v22 }
 0x51a   :  { %v2603_v12 = vpop.f32.mrf.mxu2 }
 0x51b   :  { %v2604_v28 = vadd.f32 %v2603_v12, %v11829_v20 }
 0x51c   :  { %v2618_v16 = vpop.f32.mrf.mxu3  ;;  %v2631_v31 = vpop.f32.mrf.mxu0 }
 0x51d   :  { %v2617_v27 = vadd.f32 %v2616_v36, %v2604_v28  ;;  %v11830_v16 = vld [vmem:[#allocation163_spill] sm:$0xff] }
 0x51e   :  { %v2694_v3 = vpop.f32.mrf.mxu1 }
 0x522   :  { %v2605_v7 = vpop.f32.mrf.mxu2 }
 0x523   :  { %v11831_v7 = vld [vmem:[#allocation164_spill] sm:$0xff] }
 0x524   :  { %v2668_v17 = vpop.f32.mrf.mxu3  ;;  %v2681_v10 = vpop.f32.mrf.mxu0 }
 0x525   :  { %v2682_v31 = vadd.f32 %v2681_v10, %v11830_v16 }
 0x526   :  { %v2696_v42 = vpop.f32.mrf.mxu1 }
 0x527   :  { %v2695_v36 = vadd.f32 %v2694_v3, %v2682_v31  ;;  %v11834_v3 = vld [vmem:[#allocation170_spill] sm:$0xff] }
 0x529   :  { %v2805_v23 = vmul.f32 0.5, %v2695_v36 }
 0x52a   :  { %v2655_v61 = vpop.f32.mrf.mxu2 }
 0x52b   :  { %v2656_v12 = vadd.f32 %v2655_v61, %v11831_v7  ;;  %6844 = vtanh.f32 %v2805_v23  ;;  %v2802_v61 = vmul.f32 0.5, %v2617_v27  ;;  %v11835_v23 = vld [vmem:[#allocation166_spill] sm:$0xff] }
 0x52c   :  { %v2670_v29 = vpop.f32.mrf.mxu3  ;;  %v2683_v56 = vpop.f32.mrf.mxu0  ;;  %6846 = vtanh.f32 %v2803_v35 }
 0x52d   :  { %v11832_v29 = vld [vmem:[#allocation169_spill] sm:$0xff]  ;;  %v2669_v55 = vadd.f32 %v2668_v17, %v2656_v12 }
 0x52e   :  { %v2746_v50 = vpop.f32.mrf.mxu1 }
 0x52f   :  { %v2804_v10 = vmul.f32 0.5, %v2669_v55 }
 0x532   :  { %v2657_v25 = vpop.f32.mrf.mxu2 }
 0x534   :  { %v2720_v47 = vpop.f32.mrf.mxu3  ;;  %v2733_v6 = vpop.f32.mrf.mxu0 }
 0x536   :  { %v2748_v41 = vpop.f32.mrf.mxu1 }
 0x53a   :  { %v2707_v40 = vpop.f32.mrf.mxu2 }
 0x53c   :  { %v2722_v39 = vpop.f32.mrf.mxu3  ;;  %v2735_v19 = vpop.f32.mrf.mxu0 }
 0x53d   :  { %v11833_v39 = vld [vmem:[#allocation165_spill] sm:$0xff] }
 0x53e   :  { %v2734_v19 = vadd.f32 %v2733_v6, %v11833_v39 }
 0x540   :  { %v2747_v33 = vadd.f32 %v2746_v50, %v2734_v19 }
 0x542   :  { %v2709_v20 = vpop.f32.mrf.mxu2 }
 0x54e   :  { %v2798_v28 = vpop.f32.mrf.mxu1 }
 0x554   :  { %v2772_v60 = vpop.f32.mrf.mxu3  ;;  %v2785_v42 = vpop.f32.mrf.mxu0 }
 0x555   :  { %v2786_v56 = vadd.f32 %v2785_v42, %v11832_v29  ;;  %v6845_v42 = vpop.eup %6844 }
 0x556   :  { %v2800_v25 = vpop.f32.mrf.mxu1  ;;  %v6847_v17 = vpop.eup %6846  ;;  %v2821_v6 = vmul.f32 0.5, %v6845_v42 }
 0x557   :  { %v2799_v62 = vadd.f32 %v2798_v28, %v2786_v56  ;;  %v2807_v28 = vmul.f32 0.5, %v2747_v33  ;;  %v2819_v29 = vmul.f32 0.5, %v6847_v17 }
 0x559   :  { %v2809_v41 = vmul.f32 0.5, %v2799_v62  ;;  %v2708_v62 = vadd.f32 %v2707_v40, %v11835_v23  ;;  %v2827_v19 = vadd.f32 0.5, %v2819_v29 }
 0x55a   :  { %v2759_v20 = vpop.f32.mrf.mxu2 }
 0x55b   :  { %6848 = vtanh.f32 %v2809_v41  ;;  %v2760_v16 = vadd.f32 %v2759_v20, %v11834_v3  ;;  %v2721_v56 = vadd.f32 %v2720_v47, %v2708_v62 }
 0x55c   :  { %v2774_v31 = vpop.f32.mrf.mxu3  ;;  %v2787_v7 = vpop.f32.mrf.mxu0  ;;  %6850 = vtanh.f32 %v2804_v10 }
 0x55d   :  { %v2773_v36 = vadd.f32 %v2772_v60, %v2760_v16  ;;  %6852 = vtanh.f32 %v2802_v61  ;;  %v2829_v60 = vadd.f32 0.5, %v2821_v6  ;;  %v2806_v10 = vmul.f32 0.5, %v2721_v56 }
 0x55f   :  { %v2808_v22 = vmul.f32 0.5, %v2773_v36  ;;  %v2839_v61 = vmul.f32 %v2829_v60, %v8921_v9  ;;  %v11836_v60 = vld [vmem:[#allocation113_spill] sm:$0xff] }
 0x561   :  { %v6849_v35 = vpop.eup %6848  ;;  %6854 = vtanh.f32 %v2808_v22 }
 0x562   :  { %v2825_v55 = vmul.f32 0.5, %v6849_v35  ;;  %v2761_v12 = vpop.f32.mrf.mxu2  ;;  %v6851_v25 = vpop.eup %6850  ;;  %6856 = vtanh.f32 %v2807_v28 }
 0x563   :  { %v6853_v41 = vpop.eup %6852  ;;  %v2820_v20 = vmul.f32 0.5, %v6851_v25  ;;  %6858 = vtanh.f32 %v2806_v10  ;;  %v11841_v10 = vld [vmem:[#allocation148_spill] sm:$0xff] }
 0x564   :  { %v2833_v27 = vadd.f32 0.5, %v2825_v55  ;;  %v2818_v16 = vmul.f32 0.5, %v6853_v41 }
 0x565   :  { %v2828_v36 = vadd.f32 0.5, %v2820_v20  ;;  %v11840_v20 = vld [vmem:[#allocation147_spill] sm:$0xff] }
 0x566   :  { %v2835_v50 = vmul.f32 2.0, %v2833_v27  ;;  %v2826_v22 = vadd.f32 0.5, %v2818_v16  ;;  %v11844_v16 = vld [vmem:[#allocation156_spill] sm:$0xff] }
 0x567   :  { %v6855_v39 = vpop.eup %6854  ;;  %v2838_v62 = vmul.f32 %v2828_v36, %v8925_v44  ;;  %v11849_v36 = vld [vmem:[#allocation160_spill] sm:$0xff] }
 0x568   :  { %v6596_v3 = vadd.f32 -1.0, %v2835_v50  ;;  %v2824_v40 = vmul.f32 0.5, %v6855_v39  ;;  %v6857_v7 = vpop.eup %6856  ;;  %v11837_v50 = vld [vmem:[#allocation121_spill] sm:$0xff] }
 0x569   :  { %v2823_v23 = vmul.f32 0.5, %v6857_v7  ;;  %v6859_v6 = vpop.eup %6858  ;;  %v11838_v39 = vld [vmem:[#allocation145_spill] sm:$0xff]  ;;  %v11848_v7 = vld [vmem:[#allocation159_spill] sm:$0xff] }
 0x56a   :  { %v2841_v33 = vmul.f32 %v6596_v3, %v2827_v19  ;;  %v2832_v31 = vadd.f32 0.5, %v2824_v40  ;;  %v2822_v12 = vmul.f32 0.5, %v6859_v6  ;;  %v11839_v19 = vld [vmem:[#allocation146_spill] sm:$0xff]  ;;  %v11842_v3 = vld [vmem:[#allocation115_spill] sm:$0xff]  ;;  %v11843_v40 = vld [vmem:[#allocation125_spill] sm:$0xff] }
 0x56b   :  { %v2831_v9 = vadd.f32 0.5, %v2823_v23  ;;  %v11853_v23 = vld [vmem:[#allocation168_spill] sm:$0xff]  ;;  %v11856_v6 = vld [vmem:[#allocation171_spill] sm:$0xff] }
 0x56c   :  { %v9088_v47 = vadd.f32 %v2841_v33, %v2839_v61  ;;  %v2834_v42 = vmul.f32 2.0, %v2832_v31  ;;  %v2830_v27 = vadd.f32 0.5, %v2822_v12  ;;  %v11845_v61 = vld [vmem:[#allocation157_spill] sm:$0xff]  ;;  %v11846_v33 = vld [vmem:[#allocation120_spill] sm:$0xff]  ;;  %v11847_v31 = vld [vmem:[#allocation131_spill] sm:$0xff] }
 0x56d   :  { %v11859_v12 = vld [vmem:[#allocation151_spill] sm:$0xff] }
 0x56e   :  { %6860 = vtanh.f32 %v9088_v47  ;;  %v6595_v17 = vadd.f32 -1.0, %v2834_v42  ;;  %v11850_v42 = vld [vmem:[#allocation122_spill] sm:$0xff] }
 0x570   :  { %v2840_v35 = vmul.f32 %v6595_v17, %v2826_v22  ;;  %v11851_v22 = vld [vmem:[#allocation137_spill] sm:$0xff]  ;;  %v11852_v17 = vld [vmem:[#allocation167_spill] sm:$0xff] }
 0x572   :  { %v9092_v28 = vadd.f32 %v2840_v35, %v2838_v62  ;;  %v11854_v62 = vld [vmem:[#allocation130_spill] sm:$0xff] }
 0x573   :  { %v11855_v35 = vld [vmem:[#allocation142_spill] sm:$0xff] }
 0x574   :  { %v6861_v55 = vpop.eup %6860  ;;  %6862 = vtanh.f32 %v9092_v28 }
 0x575   :  { %v2847_v29 = vmul.f32 %v6861_v55, %v2831_v9  ;;  %v11857_v9 = vld [vmem:[#allocation172_spill] sm:$0xff]  ;;  %v11858_v55 = vld [vmem:[#allocation135_spill] sm:$0xff] }
 0x577   :  { %6597 = vst [vmem:[%s10941_s5 + $0x6] sm:$0x3] %v2847_v29  ;;  %v9098_v56 = vpack.c.bf16 %v2847_v29, %v2847_v29  ;;  %v11860_v29 = vld [vmem:[#allocation177_spill] sm:$0xff] }
 0x579   :  { %2892 = vmatmul.bf16.vlgmr.msra.gmra.mxu3 %v9098_v56  ;;  %2918 = vmatmul.bf16.vlgmr.msrb.gmra.mxu1 %v9098_v56 }
 0x57a   :  { %v6863_v44 = vpop.eup %6862  ;;  %2988 = vmatpush.bf16.msra.mxu3 %v11525_v63  ;;  %3014 = vmatpush.bf16.msrb.mxu1 %v11526_v53 }
 0x57b   :  { %v2846_v25 = vmul.f32 %v6863_v44, %v2830_v27  ;;  %v11861_v27 = vld [vmem:[#allocation178_spill] sm:$0xff]  ;;  %v11862_v44 = vld [vmem:[#allocation141_spill] sm:$0xff] }
 0x57d   :  { %v9104_v41 = vpack.c.bf16 %v2846_v25, %v2846_v25  ;;  %v11863_v25 = vld [vmem:[#allocation158_spill] sm:$0xff] }
 0x57e   :  { %2989 = vmatpush.bf16.msra.mxu3 %v11527_v34  ;;  %3015 = vmatpush.bf16.msrb.mxu1 %v11528_v1 }
 0x57f   :  { %2879 = vmatmul.bf16.vlgmr.msrb.gmra.mxu2 %v9104_v41  ;;  %2905 = vmatmul.bf16.vlgmr.msra.gmra.mxu0 %v9104_v41 }
 0x580   :  { %2975 = vmatpush.bf16.msrb.mxu2 %v11529_v57  ;;  %3001 = vmatpush.bf16.msra.mxu0 %v11530_v58 }
 0x582   :  { %2990 = vmatpush.bf16.msra.mxu3 %v11531_v45  ;;  %3016 = vmatpush.bf16.msrb.mxu1 %v11532_v11 }
 0x584   :  { %2976 = vmatpush.bf16.msrb.mxu2 %v7933_v0  ;;  %3002 = vmatpush.bf16.msra.mxu0 %v7935_v49 }
 0x586   :  { %2991 = vmatpush.bf16.msra.mxu3 %v11533_v21  ;;  %3017 = vmatpush.bf16.msrb.mxu1 %v11534_v52 }
 0x588   :  { %2977 = vmatpush.bf16.msrb.mxu2 %v11535_v38  ;;  %3003 = vmatpush.bf16.msra.mxu0 %v11536_v13 }
 0x589   :  { %2944 = vmatmul.bf16.vlgmr.msrb.gmra.mxu3 %v9098_v56  ;;  %2970 = vmatmul.bf16.vlgmr.msra.gmra.mxu1 %v9098_v56 }
 0x58a   :  { %2992 = vmatpush.bf16.msra.mxu3 %v11537_v54  ;;  %3018 = vmatpush.bf16.msrb.mxu1 %v11538_v37 }
 0x58c   :  { %2978 = vmatpush.bf16.msrb.mxu2 %v7975_v2  ;;  %3004 = vmatpush.bf16.msra.mxu0 %v7977_v30 }
 0x58e   :  { %2993 = vmatpush.bf16.msra.mxu3 %v11539_v15  ;;  %3019 = vmatpush.bf16.msrb.mxu1 %v11540_v59 }
 0x58f   :  { %2931 = vmatmul.bf16.vlgmr.msra.gmra.mxu2 %v9104_v41  ;;  %2957 = vmatmul.bf16.vlgmr.msrb.gmra.mxu0 %v9104_v41 }
 0x590   :  { %2979 = vmatpush.bf16.msrb.mxu2 %v11541_v4  ;;  %3005 = vmatpush.bf16.msra.mxu0 %v11542_v43 }
 0x592   :  { %2994 = vmatpush.bf16.msra.mxu3 %v11543_v24  ;;  %3020 = vmatpush.bf16.msrb.mxu1 %v11544_v46 }
 0x594   :  { %2980 = vmatpush.bf16.msrb.mxu2 %v11628_v18  ;;  %3006 = vmatpush.bf16.msra.mxu0 %v11546_v48 }
 0x596   :  { %2995 = vmatpush.bf16.msra.mxu3 %v11547_v14  ;;  %3021 = vmatpush.bf16.msrb.mxu1 %v11548_v26 }
 0x598   :  { %2981 = vmatpush.bf16.msrb.mxu2 %v11630_v32  ;;  %3007 = vmatpush.bf16.msra.mxu0 %v8052_v5 }
 0x599   :  { %2996 = vmatmul.bf16.vlgmr.msra.gmra.mxu3 %v9098_v56  ;;  %3022 = vmatmul.bf16.vlgmr.msrb.gmra.mxu1 %v9098_v56 }
 0x59a   :  { %3040 = vmatpush.bf16.msrb.mxu3 %v11549_v51  ;;  %3066 = vmatpush.bf16.msra.mxu1 %v11629_v8 }
 0x59c   :  { %2982 = vmatpush.bf16.msrb.mxu2 %v11838_v39  ;;  %3008 = vmatpush.bf16.msra.mxu0 %v11839_v19 }
 0x59e   :  { %3041 = vmatpush.bf16.msrb.mxu3 %v11836_v60  ;;  %3067 = vmatpush.bf16.msra.mxu1 %v11837_v50 }
 0x59f   :  { %2983 = vmatmul.bf16.vlgmr.msrb.gmra.mxu2 %v9104_v41  ;;  %3009 = vmatmul.bf16.vlgmr.msra.gmra.mxu0 %v9104_v41 }
 0x5a0   :  { %3027 = vmatpush.bf16.msra.mxu2 %v11840_v20  ;;  %3053 = vmatpush.bf16.msrb.mxu0 %v11841_v10 }
 0x5a2   :  { %3042 = vmatpush.bf16.msrb.mxu3 %v11842_v3  ;;  %3068 = vmatpush.bf16.msra.mxu1 %v11843_v40 }
 0x5a4   :  { %3028 = vmatpush.bf16.msra.mxu2 %v11844_v16  ;;  %3054 = vmatpush.bf16.msrb.mxu0 %v11845_v61 }
 0x5a6   :  { %3043 = vmatpush.bf16.msrb.mxu3 %v11846_v33  ;;  %3069 = vmatpush.bf16.msra.mxu1 %v11847_v31 }
 0x5a8   :  { %3029 = vmatpush.bf16.msra.mxu2 %v11848_v7  ;;  %3055 = vmatpush.bf16.msrb.mxu0 %v11849_v36 }
 0x5aa   :  { %3044 = vmatpush.bf16.msrb.mxu3 %v11850_v42  ;;  %3070 = vmatpush.bf16.msra.mxu1 %v11851_v22  ;;  %v11933_v22 = vld [vmem:[#allocation174_spill] sm:$0xff] }
 0x5ac   :  { %3030 = vmatpush.bf16.msra.mxu2 %v11852_v17  ;;  %3056 = vmatpush.bf16.msrb.mxu0 %v11853_v23  ;;  %v11864_v23 = vld [vmem:[#allocation13_spill] sm:$0xff] }
 0x5ae   :  { %3045 = vmatpush.bf16.msrb.mxu3 %v11854_v62  ;;  %3071 = vmatpush.bf16.msra.mxu1 %v11855_v35  ;;  %v11865_v62 = vld [vmem:[#allocation18_spill] sm:$0xff]  ;;  %v11866_v35 = vld [vmem:[#allocation183_spill] sm:$0xff] }
 0x5b0   :  { %3031 = vmatpush.bf16.msra.mxu2 %v11856_v6  ;;  %3057 = vmatpush.bf16.msrb.mxu0 %v11857_v9  ;;  %v11867_v6 = vld [vmem:[#allocation184_spill] sm:$0xff] }
 0x5b2   :  { %3046 = vmatpush.bf16.msrb.mxu3 %v11858_v55  ;;  %3072 = vmatpush.bf16.msra.mxu1 %v11859_v12  ;;  %v11868_v12 = vld [vmem:[#allocation14_spill] sm:$0xff] }
 0x5b4   :  { %3032 = vmatpush.bf16.msra.mxu2 %v11860_v29  ;;  %3058 = vmatpush.bf16.msrb.mxu0 %v11861_v27  ;;  %v11869_v29 = vld [vmem:[#allocation22_spill] sm:$0xff]  ;;  %v11870_v27 = vld [vmem:[#allocation189_spill] sm:$0xff] }
 0x5b6   :  { %3047 = vmatpush.bf16.msrb.mxu3 %v11862_v44  ;;  %3073 = vmatpush.bf16.msra.mxu1 %v11863_v25  ;;  %v11871_v44 = vld [vmem:[#allocation190_spill] sm:$0xff]  ;;  %v11872_v25 = vld [vmem:[#allocation15_spill] sm:$0xff] }
 0x5b8   :  { %3033 = vmatpush.bf16.msra.mxu2 %v11866_v35  ;;  %3059 = vmatpush.bf16.msrb.mxu0 %v11867_v6  ;;  %v11874_v6 = vld [vmem:[#allocation17_spill] sm:$0xff]  ;;  %v11875_v35 = vld [vmem:[#allocation26_spill] sm:$0xff] }
 0x5b9   :  { %3048 = vmatmul.bf16.vlgmr.msrb.gmra.mxu3 %v9098_v56  ;;  %3074 = vmatmul.bf16.vlgmr.msra.gmra.mxu1 %v9098_v56  ;;  %v11876_v56 = vld [vmem:[#allocation19_spill] sm:$0xff] }
 0x5ba   :  { %3161 = vmatpush.bf16.msra.mxu3 %v11864_v23  ;;  %3187 = vmatpush.bf16.msrb.mxu1 %v11865_v62  ;;  %v11873_v23 = vld [vmem:[#allocation16_spill] sm:$0xff]  ;;  %v11883_v62 = vld [vmem:[#allocation35_spill] sm:$0xff] }
 0x5bc   :  { %3034 = vmatpush.bf16.msra.mxu2 %v11870_v27  ;;  %3060 = vmatpush.bf16.msrb.mxu0 %v11871_v44  ;;  %v11879_v27 = vld [vmem:[#allocation31_spill] sm:$0xff] }
 0x5bd   :  { %v11880_v44 = vld [vmem:[#allocation23_spill] sm:$0xff] }
 0x5be   :  { %3162 = vmatpush.bf16.msra.mxu3 %v11868_v12  ;;  %3188 = vmatpush.bf16.msrb.mxu1 %v11869_v29  ;;  %v11877_v12 = vld [vmem:[#allocation20_spill] sm:$0xff]  ;;  %v11878_v29 = vld [vmem:[#allocation21_spill] sm:$0xff] }
 0x5bf   :  { %3035 = vmatmul.bf16.vlgmr.msra.gmra.mxu2 %v9104_v41  ;;  %3061 = vmatmul.bf16.vlgmr.msrb.gmra.mxu0 %v9104_v41  ;;  %v11884_v41 = vld [vmem:[#allocation27_spill] sm:$0xff] }
 0x5c0   :  { %3148 = vmatpush.bf16.msrb.mxu2 %v11872_v25  ;;  %3174 = vmatpush.bf16.msra.mxu0 %v11873_v23  ;;  %v11881_v25 = vld [vmem:[#allocation24_spill] sm:$0xff]  ;;  %v11882_v23 = vld [vmem:[#allocation25_spill] sm:$0xff] }
 0x5c2   :  { %3163 = vmatpush.bf16.msra.mxu3 %v11874_v6  ;;  %3189 = vmatpush.bf16.msrb.mxu1 %v11875_v35  ;;  %v11885_v6 = vld [vmem:[#allocation28_spill] sm:$0xff]  ;;  %v11886_v35 = vld [vmem:[#allocation30_spill] sm:$0xff] }
 0x5c4   :  { %3149 = vmatpush.bf16.msrb.mxu2 %v11876_v56  ;;  %3175 = vmatpush.bf16.msra.mxu0 %v11877_v12  ;;  %v11887_v56 = vld [vmem:[#allocation39_spill] sm:$0xff]  ;;  %v11888_v12 = vld [vmem:[#allocation32_spill] sm:$0xff] }
 0x5c6   :  { %3164 = vmatpush.bf16.msra.mxu3 %v11878_v29  ;;  %3190 = vmatpush.bf16.msrb.mxu1 %v11879_v27  ;;  %v11889_v29 = vld [vmem:[#allocation33_spill] sm:$0xff]  ;;  %v11890_v27 = vld [vmem:[#allocation34_spill] sm:$0xff] }
 0x5c8   :  { %3150 = vmatpush.bf16.msrb.mxu2 %v11880_v44  ;;  %3176 = vmatpush.bf16.msra.mxu0 %v11881_v25  ;;  %v11891_v44 = vld [vmem:[#allocation47_spill] sm:$0xff]  ;;  %v11892_v25 = vld [vmem:[#allocation36_spill] sm:$0xff] }
 0x5ca   :  { %3165 = vmatpush.bf16.msra.mxu3 %v11882_v23  ;;  %3191 = vmatpush.bf16.msrb.mxu1 %v11883_v62  ;;  %v11893_v23 = vld [vmem:[#allocation37_spill] sm:$0xff]  ;;  %v11894_v62 = vld [vmem:[#allocation38_spill] sm:$0xff] }
 0x5cc   :  { %3151 = vmatpush.bf16.msrb.mxu2 %v11884_v41  ;;  %3177 = vmatpush.bf16.msra.mxu0 %v11885_v6  ;;  %v11895_v41 = vld [vmem:[#allocation53_spill] sm:$0xff]  ;;  %v11896_v6 = vld [vmem:[#allocation40_spill] sm:$0xff] }
 0x5ce   :  { %3166 = vmatpush.bf16.msra.mxu3 %v11886_v35  ;;  %3192 = vmatpush.bf16.msrb.mxu1 %v11887_v56  ;;  %v11897_v35 = vld [vmem:[#allocation57_spill] sm:$0xff] }
 0x5cf   :  { %v11898_v56 = vld [vmem:[#allocation41_spill] sm:$0xff] }
 0x5d0   :  { %3152 = vmatpush.bf16.msrb.mxu2 %v11888_v12  ;;  %3178 = vmatpush.bf16.msra.mxu0 %v11889_v29  ;;  %v11899_v12 = vld [vmem:[#allocation43_spill] sm:$0xff]  ;;  %v11900_v29 = vld [vmem:[#allocation48_spill] sm:$0xff] }
 0x5d2   :  { %3167 = vmatpush.bf16.msra.mxu3 %v11890_v27  ;;  %3193 = vmatpush.bf16.msrb.mxu1 %v11891_v44  ;;  %v11901_v27 = vld [vmem:[#allocation61_spill] sm:$0xff] }
 0x5d3   :  { %v11902_v44 = vld [vmem:[#allocation49_spill] sm:$0xff] }
 0x5d4   :  { %3153 = vmatpush.bf16.msrb.mxu2 %v11892_v25  ;;  %3179 = vmatpush.bf16.msra.mxu0 %v11893_v23  ;;  %v11903_v25 = vld [vmem:[#allocation50_spill] sm:$0xff]  ;;  %v11904_v23 = vld [vmem:[#allocation51_spill] sm:$0xff] }
 0x5d6   :  { %3168 = vmatpush.bf16.msra.mxu3 %v11894_v62  ;;  %3194 = vmatpush.bf16.msrb.mxu1 %v11895_v41  ;;  %v11905_v62 = vld [vmem:[#allocation52_spill] sm:$0xff]  ;;  %v11906_v41 = vld [vmem:[#allocation54_spill] sm:$0xff] }
 0x5d8   :  { %3154 = vmatpush.bf16.msrb.mxu2 %v11898_v56  ;;  %3180 = vmatpush.bf16.msra.mxu0 %v11899_v12  ;;  %v11909_v56 = vld [vmem:[#allocation59_spill] sm:$0xff]  ;;  %v11910_v12 = vld [vmem:[#allocation60_spill] sm:$0xff] }
 0x5da   :  { %3213 = vmatpush.bf16.msrb.mxu3 %v11896_v6  ;;  %3239 = vmatpush.bf16.msra.mxu1 %v11897_v35  ;;  %v11907_v6 = vld [vmem:[#allocation65_spill] sm:$0xff]  ;;  %v11908_v35 = vld [vmem:[#allocation58_spill] sm:$0xff] }
 0x5dc   :  { %3155 = vmatpush.bf16.msrb.mxu2 %v11902_v44  ;;  %3181 = vmatpush.bf16.msra.mxu0 %v11903_v25  ;;  %v11913_v44 = vld [vmem:[#allocation63_spill] sm:$0xff]  ;;  %v11914_v25 = vld [vmem:[#allocation64_spill] sm:$0xff] }
 0x5de   :  { %3214 = vmatpush.bf16.msrb.mxu3 %v11900_v29  ;;  %3240 = vmatpush.bf16.msra.mxu1 %v11901_v27  ;;  %v11911_v29 = vld [vmem:[#allocation72_spill] sm:$0xff]  ;;  %v11912_v27 = vld [vmem:[#allocation62_spill] sm:$0xff] }
 0x5e0   :  { %3200 = vmatpush.bf16.msra.mxu2 %v11904_v23  ;;  %3226 = vmatpush.bf16.msrb.mxu0 %v11905_v62  ;;  %v11915_v23 = vld [vmem:[#allocation76_spill] sm:$0xff]  ;;  %v11916_v62 = vld [vmem:[#allocation69_spill] sm:$0xff] }
 0x5e2   :  { %3215 = vmatpush.bf16.msrb.mxu3 %v11906_v41  ;;  %3241 = vmatpush.bf16.msra.mxu1 %v11907_v6  ;;  %v11917_v41 = vld [vmem:[#allocation70_spill] sm:$0xff]  ;;  %v11918_v6 = vld [vmem:[#allocation71_spill] sm:$0xff] }
 0x5e4   :  { %3201 = vmatpush.bf16.msra.mxu2 %v11908_v35  ;;  %3227 = vmatpush.bf16.msrb.mxu0 %v11909_v56  ;;  %v11919_v35 = vld [vmem:[#allocation81_spill] sm:$0xff] }
 0x5e5   :  { %v11920_v56 = vld [vmem:[#allocation73_spill] sm:$0xff] }
 0x5e6   :  { %3216 = vmatpush.bf16.msrb.mxu3 %v11910_v12  ;;  %3242 = vmatpush.bf16.msra.mxu1 %v11911_v29  ;;  %v11921_v12 = vld [vmem:[#allocation74_spill] sm:$0xff]  ;;  %v11922_v29 = vld [vmem:[#allocation75_spill] sm:$0xff] }
 0x5e8   :  { %3202 = vmatpush.bf16.msra.mxu2 %v11912_v27  ;;  %3228 = vmatpush.bf16.msrb.mxu0 %v11913_v44  ;;  %v11923_v27 = vld [vmem:[#allocation87_spill] sm:$0xff]  ;;  %v11924_v44 = vld [vmem:[#allocation77_spill] sm:$0xff] }
 0x5ea   :  { %3217 = vmatpush.bf16.msrb.mxu3 %v11914_v25  ;;  %3243 = vmatpush.bf16.msra.mxu1 %v11915_v23  ;;  %v11925_v25 = vld [vmem:[#allocation78_spill] sm:$0xff]  ;;  %v11926_v23 = vld [vmem:[#allocation79_spill] sm:$0xff] }
 0x5ec   :  { %3203 = vmatpush.bf16.msra.mxu2 %v11916_v62  ;;  %3229 = vmatpush.bf16.msrb.mxu0 %v11917_v41  ;;  %v11927_v62 = vld [vmem:[#allocation91_spill] sm:$0xff] }
 0x5ed   :  { %v11928_v41 = vld [vmem:[#allocation83_spill] sm:$0xff] }
 0x5ee   :  { %3218 = vmatpush.bf16.msrb.mxu3 %v11918_v6  ;;  %3244 = vmatpush.bf16.msra.mxu1 %v11919_v35  ;;  %v11929_v6 = vld [vmem:[#allocation86_spill] sm:$0xff]  ;;  %v11930_v35 = vld [vmem:[#allocation89_spill] sm:$0xff] }
 0x5f0   :  { %3204 = vmatpush.bf16.msra.mxu2 %v11920_v56  ;;  %3230 = vmatpush.bf16.msrb.mxu0 %v11921_v12  ;;  %v11931_v56 = vld [vmem:[#allocation90_spill] sm:$0xff] }
 0x5f2   :  { %3219 = vmatpush.bf16.msrb.mxu3 %v11922_v29  ;;  %3245 = vmatpush.bf16.msra.mxu1 %v11923_v27  ;;  %v11932_v27 = vld [vmem:[#allocation173_spill] sm:$0xff] }
 0x5f4   :  { %3205 = vmatpush.bf16.msra.mxu2 %v11924_v44  ;;  %3231 = vmatpush.bf16.msrb.mxu0 %v11925_v25 }
 0x5f6   :  { %3220 = vmatpush.bf16.msrb.mxu3 %v11926_v23  ;;  %3246 = vmatpush.bf16.msra.mxu1 %v11927_v62  ;;  %v2919_v12 = vpop.f32.mrf.mxu1 }
 0x5f8   :  { %3206 = vmatpush.bf16.msra.mxu2 %v11928_v41  ;;  %3232 = vmatpush.bf16.msrb.mxu0 %v11929_v6 }
 0x5fc   :  { %3207 = vmatpush.bf16.msra.mxu2 %v11930_v35  ;;  %3233 = vmatpush.bf16.msrb.mxu0 %v11931_v56  ;;  %v2893_v29 = vpop.f32.mrf.mxu3  ;;  %v2906_v55 = vpop.f32.mrf.mxu0 }
 0x5fd   :  { %v2907_v9 = vadd.f32 %v2906_v55, %v11932_v27 }
 0x5fe   :  { %v2921_v44 = vpop.f32.mrf.mxu1 }
 0x5ff   :  { %v2920_v17 = vadd.f32 %v2919_v12, %v2907_v9 }
 0x601   :  { %v3080_v19 = vmul.f32 0.5, %v2920_v17 }
 0x602   :  { %v2880_v25 = vpop.f32.mrf.mxu2 }
 0x603   :  { %v2881_v23 = vadd.f32 %v2880_v25, %v11933_v22 }
 0x604   :  { %v2895_v42 = vpop.f32.mrf.mxu3  ;;  %v2908_v62 = vpop.f32.mrf.mxu0 }
 0x605   :  { %v2894_v36 = vadd.f32 %v2893_v29, %v2881_v23  ;;  %v11934_v42 = vld [vmem:[#allocation175_spill] sm:$0xff] }
 0x606   :  { %v2971_v41 = vpop.f32.mrf.mxu1 }
 0x60a   :  { %v2882_v7 = vpop.f32.mrf.mxu2 }
 0x60b   :  { %v11935_v7 = vld [vmem:[#allocation176_spill] sm:$0xff] }
 0x60c   :  { %v2945_v6 = vpop.f32.mrf.mxu3  ;;  %v2958_v31 = vpop.f32.mrf.mxu0 }
 0x60d   :  { %v2959_v62 = vadd.f32 %v2958_v31, %v11934_v42 }
 0x60e   :  { %v2973_v35 = vpop.f32.mrf.mxu1 }
 0x60f   :  { %v2972_v29 = vadd.f32 %v2971_v41, %v2959_v62  ;;  %v11938_v41 = vld [vmem:[#allocation182_spill] sm:$0xff] }
 0x611   :  { %v3082_v20 = vmul.f32 0.5, %v2972_v29 }
 0x612   :  { %v2932_v33 = vpop.f32.mrf.mxu2 }
 0x613   :  { %v2933_v25 = vadd.f32 %v2932_v33, %v11935_v7  ;;  %6864 = vtanh.f32 %v3082_v20  ;;  %v3079_v33 = vmul.f32 0.5, %v2894_v36  ;;  %v11939_v20 = vld [vmem:[#allocation180_spill] sm:$0xff] }
 0x614   :  { %v2947_v56 = vpop.f32.mrf.mxu3  ;;  %v2960_v61 = vpop.f32.mrf.mxu0  ;;  %6866 = vtanh.f32 %v3080_v19 }
 0x615   :  { %v11936_v56 = vld [vmem:[#allocation181_spill] sm:$0xff]  ;;  %v2946_v39 = vadd.f32 %v2945_v6, %v2933_v25 }
 0x616   :  { %v3023_v16 = vpop.f32.mrf.mxu1 }
 0x617   :  { %v3081_v31 = vmul.f32 0.5, %v2946_v39 }
 0x61a   :  { %v2934_v40 = vpop.f32.mrf.mxu2 }
 0x61c   :  { %v2997_v3 = vpop.f32.mrf.mxu3  ;;  %v3010_v55 = vpop.f32.mrf.mxu0 }
 0x61e   :  { %v3025_v27 = vpop.f32.mrf.mxu1 }
 0x622   :  { %v2984_v9 = vpop.f32.mrf.mxu2 }
 0x624   :  { %v2999_v12 = vpop.f32.mrf.mxu3  ;;  %v3012_v44 = vpop.f32.mrf.mxu0 }
 0x625   :  { %v11937_v12 = vld [vmem:[#allocation179_spill] sm:$0xff] }
 0x626   :  { %v3011_v44 = vadd.f32 %v3010_v55, %v11937_v12 }
 0x628   :  { %v3024_v60 = vadd.f32 %v3023_v16, %v3011_v44 }
 0x62a   :  { %v2986_v22 = vpop.f32.mrf.mxu2 }
 0x636   :  { %v3075_v23 = vpop.f32.mrf.mxu1 }
 0x63c   :  { %v3049_v10 = vpop.f32.mrf.mxu3  ;;  %v3062_v35 = vpop.f32.mrf.mxu0 }
 0x63d   :  { %v3063_v61 = vadd.f32 %v3062_v35, %v11936_v56  ;;  %v6865_v35 = vpop.eup %6864 }
 0x63e   :  { %v3077_v40 = vpop.f32.mrf.mxu1  ;;  %v6867_v6 = vpop.eup %6866  ;;  %v3098_v55 = vmul.f32 0.5, %v6865_v35 }
 0x63f   :  { %v3076_v50 = vadd.f32 %v3075_v23, %v3063_v61  ;;  %v3084_v23 = vmul.f32 0.5, %v3024_v60  ;;  %v3096_v56 = vmul.f32 0.5, %v6867_v6 }
 0x641   :  { %v3086_v27 = vmul.f32 0.5, %v3076_v50  ;;  %v2985_v50 = vadd.f32 %v2984_v9, %v11939_v20  ;;  %v3104_v44 = vadd.f32 0.5, %v3096_v56 }
 0x642   :  { %v3036_v22 = vpop.f32.mrf.mxu2 }
 0x643   :  { %6868 = vtanh.f32 %v3086_v27  ;;  %v3037_v42 = vadd.f32 %v3036_v22, %v11938_v41  ;;  %v2998_v61 = vadd.f32 %v2997_v3, %v2985_v50 }
 0x644   :  { %v3051_v62 = vpop.f32.mrf.mxu3  ;;  %v3064_v7 = vpop.f32.mrf.mxu0  ;;  %6870 = vtanh.f32 %v3081_v31 }
 0x645   :  { %v3050_v29 = vadd.f32 %v3049_v10, %v3037_v42  ;;  %6872 = vtanh.f32 %v3079_v33  ;;  %v3106_v10 = vadd.f32 0.5, %v3098_v55  ;;  %v3083_v31 = vmul.f32 0.5, %v2998_v61 }
 0x647   :  { %v3085_v17 = vmul.f32 0.5, %v3050_v29  ;;  %v3116_v33 = vmul.f32 %v3106_v10, %v9088_v47  ;;  %v11940_v10 = vld [vmem:[#allocation113_spill] sm:$0xff] }
 0x649   :  { %v6869_v19 = vpop.eup %6868  ;;  %6874 = vtanh.f32 %v3085_v17 }
 0x64a   :  { %v3102_v39 = vmul.f32 0.5, %v6869_v19  ;;  %v3038_v25 = vpop.f32.mrf.mxu2  ;;  %v6871_v40 = vpop.eup %6870  ;;  %6876 = vtanh.f32 %v3084_v23 }
 0x64b   :  { %v6873_v27 = vpop.eup %6872  ;;  %v3097_v22 = vmul.f32 0.5, %v6871_v40  ;;  %6878 = vtanh.f32 %v3083_v31  ;;  %v11945_v31 = vld [vmem:[#allocation148_spill] sm:$0xff] }
 0x64c   :  { %v3110_v36 = vadd.f32 0.5, %v3102_v39  ;;  %v3095_v42 = vmul.f32 0.5, %v6873_v27 }
 0x64d   :  { %v3105_v29 = vadd.f32 0.5, %v3097_v22  ;;  %v11944_v22 = vld [vmem:[#allocation147_spill] sm:$0xff] }
 0x64e   :  { %v3112_v16 = vmul.f32 2.0, %v3110_v36  ;;  %v3103_v17 = vadd.f32 0.5, %v3095_v42  ;;  %v11948_v42 = vld [vmem:[#allocation156_spill] sm:$0xff] }
 0x64f   :  { %v6875_v12 = vpop.eup %6874  ;;  %v3115_v50 = vmul.f32 %v3105_v29, %v9092_v28  ;;  %v11953_v29 = vld [vmem:[#allocation160_spill] sm:$0xff] }
 0x650   :  { %v6599_v41 = vadd.f32 -1.0, %v3112_v16  ;;  %v3101_v9 = vmul.f32 0.5, %v6875_v12  ;;  %v6877_v7 = vpop.eup %6876  ;;  %v11941_v16 = vld [vmem:[#allocation121_spill] sm:$0xff] }
 0x651   :  { %v3100_v20 = vmul.f32 0.5, %v6877_v7  ;;  %v6879_v55 = vpop.eup %6878  ;;  %v11942_v12 = vld [vmem:[#allocation145_spill] sm:$0xff]  ;;  %v11952_v7 = vld [vmem:[#allocation159_spill] sm:$0xff] }
 0x652   :  { %v3118_v60 = vmul.f32 %v6599_v41, %v3104_v44  ;;  %v3109_v62 = vadd.f32 0.5, %v3101_v9  ;;  %v3099_v25 = vmul.f32 0.5, %v6879_v55  ;;  %v11943_v44 = vld [vmem:[#allocation146_spill] sm:$0xff]  ;;  %v11946_v41 = vld [vmem:[#allocation115_spill] sm:$0xff]  ;;  %v11947_v9 = vld [vmem:[#allocation125_spill] sm:$0xff] }
 0x653   :  { %v3108_v47 = vadd.f32 0.5, %v3100_v20  ;;  %v11957_v20 = vld [vmem:[#allocation168_spill] sm:$0xff]  ;;  %v11960_v55 = vld [vmem:[#allocation171_spill] sm:$0xff] }
 0x654   :  { %v9255_v3 = vadd.f32 %v3118_v60, %v3116_v33  ;;  %v3111_v35 = vmul.f32 2.0, %v3109_v62  ;;  %v3107_v36 = vadd.f32 0.5, %v3099_v25  ;;  %v11949_v33 = vld [vmem:[#allocation157_spill] sm:$0xff]  ;;  %v11950_v60 = vld [vmem:[#allocation120_spill] sm:$0xff]  ;;  %v11951_v62 = vld [vmem:[#allocation131_spill] sm:$0xff] }
 0x655   :  { %v11963_v25 = vld [vmem:[#allocation151_spill] sm:$0xff] }
 0x656   :  { %6880 = vtanh.f32 %v9255_v3  ;;  %v6598_v6 = vadd.f32 -1.0, %v3111_v35  ;;  %v11954_v35 = vld [vmem:[#allocation122_spill] sm:$0xff] }
 0x658   :  { %v3117_v19 = vmul.f32 %v6598_v6, %v3103_v17  ;;  %v11955_v17 = vld [vmem:[#allocation137_spill] sm:$0xff]  ;;  %v11956_v6 = vld [vmem:[#allocation167_spill] sm:$0xff] }
 0x65a   :  { %v9259_v23 = vadd.f32 %v3117_v19, %v3115_v50  ;;  %v11958_v50 = vld [vmem:[#allocation130_spill] sm:$0xff] }
 0x65b   :  { %v11959_v19 = vld [vmem:[#allocation142_spill] sm:$0xff] }
 0x65c   :  { %v6881_v39 = vpop.eup %6880  ;;  %6882 = vtanh.f32 %v9259_v23 }
 0x65d   :  { %v3124_v56 = vmul.f32 %v6881_v39, %v3108_v47  ;;  %v11961_v47 = vld [vmem:[#allocation172_spill] sm:$0xff]  ;;  %v11962_v39 = vld [vmem:[#allocation135_spill] sm:$0xff] }
 0x65f   :  { %6600 = vst [vmem:[%s10941_s5 + $0x8] sm:$0x3] %v3124_v56  ;;  %v9265_v61 = vpack.c.bf16 %v3124_v56, %v3124_v56  ;;  %v11964_v56 = vld [vmem:[#allocation177_spill] sm:$0xff] }
 0x661   :  { %3169 = vmatmul.bf16.vlgmr.msra.gmra.mxu3 %v9265_v61  ;;  %3195 = vmatmul.bf16.vlgmr.msrb.gmra.mxu1 %v9265_v61 }
 0x662   :  { %v6883_v28 = vpop.eup %6882  ;;  %3265 = vmatpush.bf16.msra.mxu3 %v11525_v63  ;;  %3291 = vmatpush.bf16.msrb.mxu1 %v11526_v53 }
 0x663   :  { %v3123_v40 = vmul.f32 %v6883_v28, %v3107_v36  ;;  %v11965_v36 = vld [vmem:[#allocation178_spill] sm:$0xff]  ;;  %v11966_v28 = vld [vmem:[#allocation141_spill] sm:$0xff] }
 0x665   :  { %v9271_v27 = vpack.c.bf16 %v3123_v40, %v3123_v40  ;;  %v11967_v40 = vld [vmem:[#allocation158_spill] sm:$0xff] }
 0x666   :  { %3266 = vmatpush.bf16.msra.mxu3 %v11527_v34  ;;  %3292 = vmatpush.bf16.msrb.mxu1 %v11528_v1 }
 0x667   :  { %3156 = vmatmul.bf16.vlgmr.msrb.gmra.mxu2 %v9271_v27  ;;  %3182 = vmatmul.bf16.vlgmr.msra.gmra.mxu0 %v9271_v27 }
 0x668   :  { %3252 = vmatpush.bf16.msrb.mxu2 %v11529_v57  ;;  %3278 = vmatpush.bf16.msra.mxu0 %v11530_v58 }
 0x66a   :  { %3267 = vmatpush.bf16.msra.mxu3 %v11531_v45  ;;  %3293 = vmatpush.bf16.msrb.mxu1 %v11532_v11 }
 0x66c   :  { %3253 = vmatpush.bf16.msrb.mxu2 %v7933_v0  ;;  %3279 = vmatpush.bf16.msra.mxu0 %v7935_v49 }
 0x66e   :  { %3268 = vmatpush.bf16.msra.mxu3 %v11533_v21  ;;  %3294 = vmatpush.bf16.msrb.mxu1 %v11534_v52 }
 0x670   :  { %3254 = vmatpush.bf16.msrb.mxu2 %v11535_v38  ;;  %3280 = vmatpush.bf16.msra.mxu0 %v11536_v13 }
 0x671   :  { %3221 = vmatmul.bf16.vlgmr.msrb.gmra.mxu3 %v9265_v61  ;;  %3247 = vmatmul.bf16.vlgmr.msra.gmra.mxu1 %v9265_v61 }
 0x672   :  { %3269 = vmatpush.bf16.msra.mxu3 %v11537_v54  ;;  %3295 = vmatpush.bf16.msrb.mxu1 %v11538_v37 }
 0x674   :  { %3255 = vmatpush.bf16.msrb.mxu2 %v7975_v2  ;;  %3281 = vmatpush.bf16.msra.mxu0 %v7977_v30 }
 0x676   :  { %3270 = vmatpush.bf16.msra.mxu3 %v11539_v15  ;;  %3296 = vmatpush.bf16.msrb.mxu1 %v11540_v59 }
 0x677   :  { %3208 = vmatmul.bf16.vlgmr.msra.gmra.mxu2 %v9271_v27  ;;  %3234 = vmatmul.bf16.vlgmr.msrb.gmra.mxu0 %v9271_v27 }
 0x678   :  { %3256 = vmatpush.bf16.msrb.mxu2 %v11541_v4  ;;  %3282 = vmatpush.bf16.msra.mxu0 %v11542_v43 }
 0x67a   :  { %3271 = vmatpush.bf16.msra.mxu3 %v11543_v24  ;;  %3297 = vmatpush.bf16.msrb.mxu1 %v11544_v46 }
 0x67c   :  { %3257 = vmatpush.bf16.msrb.mxu2 %v11628_v18  ;;  %3283 = vmatpush.bf16.msra.mxu0 %v11546_v48 }
 0x67e   :  { %3272 = vmatpush.bf16.msra.mxu3 %v11547_v14  ;;  %3298 = vmatpush.bf16.msrb.mxu1 %v11548_v26 }
 0x680   :  { %3258 = vmatpush.bf16.msrb.mxu2 %v11630_v32  ;;  %3284 = vmatpush.bf16.msra.mxu0 %v8052_v5 }
 0x681   :  { %3273 = vmatmul.bf16.vlgmr.msra.gmra.mxu3 %v9265_v61  ;;  %3299 = vmatmul.bf16.vlgmr.msrb.gmra.mxu1 %v9265_v61 }
 0x682   :  { %3317 = vmatpush.bf16.msrb.mxu3 %v11549_v51  ;;  %3343 = vmatpush.bf16.msra.mxu1 %v11629_v8 }
 0x684   :  { %3259 = vmatpush.bf16.msrb.mxu2 %v11942_v12  ;;  %3285 = vmatpush.bf16.msra.mxu0 %v11943_v44 }
 0x686   :  { %3318 = vmatpush.bf16.msrb.mxu3 %v11940_v10  ;;  %3344 = vmatpush.bf16.msra.mxu1 %v11941_v16 }
 0x687   :  { %3260 = vmatmul.bf16.vlgmr.msrb.gmra.mxu2 %v9271_v27  ;;  %3286 = vmatmul.bf16.vlgmr.msra.gmra.mxu0 %v9271_v27 }
 0x688   :  { %3304 = vmatpush.bf16.msra.mxu2 %v11944_v22  ;;  %3330 = vmatpush.bf16.msrb.mxu0 %v11945_v31 }
 0x68a   :  { %3319 = vmatpush.bf16.msrb.mxu3 %v11946_v41  ;;  %3345 = vmatpush.bf16.msra.mxu1 %v11947_v9 }
 0x68c   :  { %3305 = vmatpush.bf16.msra.mxu2 %v11948_v42  ;;  %3331 = vmatpush.bf16.msrb.mxu0 %v11949_v33 }
 0x68e   :  { %3320 = vmatpush.bf16.msrb.mxu3 %v11950_v60  ;;  %3346 = vmatpush.bf16.msra.mxu1 %v11951_v62 }
 0x690   :  { %3306 = vmatpush.bf16.msra.mxu2 %v11952_v7  ;;  %3332 = vmatpush.bf16.msrb.mxu0 %v11953_v29 }
 0x692   :  { %3321 = vmatpush.bf16.msrb.mxu3 %v11954_v35  ;;  %3347 = vmatpush.bf16.msra.mxu1 %v11955_v17  ;;  %v12037_v17 = vld [vmem:[#allocation186_spill] sm:$0xff] }
 0x694   :  { %3307 = vmatpush.bf16.msra.mxu2 %v11956_v6  ;;  %3333 = vmatpush.bf16.msrb.mxu0 %v11957_v20  ;;  %v11968_v20 = vld [vmem:[#allocation13_spill] sm:$0xff] }
 0x696   :  { %3322 = vmatpush.bf16.msrb.mxu3 %v11958_v50  ;;  %3348 = vmatpush.bf16.msra.mxu1 %v11959_v19  ;;  %v11969_v50 = vld [vmem:[#allocation18_spill] sm:$0xff]  ;;  %v11970_v19 = vld [vmem:[#allocation183_spill] sm:$0xff] }
 0x698   :  { %3308 = vmatpush.bf16.msra.mxu2 %v11960_v55  ;;  %3334 = vmatpush.bf16.msrb.mxu0 %v11961_v47  ;;  %v11971_v55 = vld [vmem:[#allocation184_spill] sm:$0xff] }
 0x69a   :  { %3323 = vmatpush.bf16.msrb.mxu3 %v11962_v39  ;;  %3349 = vmatpush.bf16.msra.mxu1 %v11963_v25  ;;  %v11972_v25 = vld [vmem:[#allocation14_spill] sm:$0xff] }
 0x69c   :  { %3309 = vmatpush.bf16.msra.mxu2 %v11964_v56  ;;  %3335 = vmatpush.bf16.msrb.mxu0 %v11965_v36  ;;  %v11973_v56 = vld [vmem:[#allocation22_spill] sm:$0xff]  ;;  %v11974_v36 = vld [vmem:[#allocation189_spill] sm:$0xff] }
 0x69e   :  { %3324 = vmatpush.bf16.msrb.mxu3 %v11966_v28  ;;  %3350 = vmatpush.bf16.msra.mxu1 %v11967_v40  ;;  %v11975_v28 = vld [vmem:[#allocation190_spill] sm:$0xff]  ;;  %v11976_v40 = vld [vmem:[#allocation15_spill] sm:$0xff] }
 0x6a0   :  { %3310 = vmatpush.bf16.msra.mxu2 %v11970_v19  ;;  %3336 = vmatpush.bf16.msrb.mxu0 %v11971_v55  ;;  %v11978_v55 = vld [vmem:[#allocation17_spill] sm:$0xff]  ;;  %v11979_v19 = vld [vmem:[#allocation26_spill] sm:$0xff] }
 0x6a1   :  { %3325 = vmatmul.bf16.vlgmr.msrb.gmra.mxu3 %v9265_v61  ;;  %3351 = vmatmul.bf16.vlgmr.msra.gmra.mxu1 %v9265_v61  ;;  %v11980_v61 = vld [vmem:[#allocation19_spill] sm:$0xff] }
 0x6a2   :  { %3438 = vmatpush.bf16.msra.mxu3 %v11968_v20  ;;  %3464 = vmatpush.bf16.msrb.mxu1 %v11969_v50  ;;  %v11977_v20 = vld [vmem:[#allocation16_spill] sm:$0xff]  ;;  %v11987_v50 = vld [vmem:[#allocation35_spill] sm:$0xff] }
 0x6a4   :  { %3311 = vmatpush.bf16.msra.mxu2 %v11974_v36  ;;  %3337 = vmatpush.bf16.msrb.mxu0 %v11975_v28  ;;  %v11983_v36 = vld [vmem:[#allocation31_spill] sm:$0xff] }
 0x6a5   :  { %v11984_v28 = vld [vmem:[#allocation23_spill] sm:$0xff] }
 0x6a6   :  { %3439 = vmatpush.bf16.msra.mxu3 %v11972_v25  ;;  %3465 = vmatpush.bf16.msrb.mxu1 %v11973_v56  ;;  %v11981_v25 = vld [vmem:[#allocation20_spill] sm:$0xff]  ;;  %v11982_v56 = vld [vmem:[#allocation21_spill] sm:$0xff] }
 0x6a7   :  { %3312 = vmatmul.bf16.vlgmr.msra.gmra.mxu2 %v9271_v27  ;;  %3338 = vmatmul.bf16.vlgmr.msrb.gmra.mxu0 %v9271_v27  ;;  %v11988_v27 = vld [vmem:[#allocation27_spill] sm:$0xff] }
 0x6a8   :  { %3425 = vmatpush.bf16.msrb.mxu2 %v11976_v40  ;;  %3451 = vmatpush.bf16.msra.mxu0 %v11977_v20  ;;  %v11985_v40 = vld [vmem:[#allocation24_spill] sm:$0xff]  ;;  %v11986_v20 = vld [vmem:[#allocation25_spill] sm:$0xff] }
 0x6aa   :  { %3440 = vmatpush.bf16.msra.mxu3 %v11978_v55  ;;  %3466 = vmatpush.bf16.msrb.mxu1 %v11979_v19  ;;  %v11989_v55 = vld [vmem:[#allocation28_spill] sm:$0xff]  ;;  %v11990_v19 = vld [vmem:[#allocation30_spill] sm:$0xff] }
 0x6ac   :  { %3426 = vmatpush.bf16.msrb.mxu2 %v11980_v61  ;;  %3452 = vmatpush.bf16.msra.mxu0 %v11981_v25  ;;  %v11991_v61 = vld [vmem:[#allocation39_spill] sm:$0xff]  ;;  %v11992_v25 = vld [vmem:[#allocation32_spill] sm:$0xff] }
 0x6ae   :  { %3441 = vmatpush.bf16.msra.mxu3 %v11982_v56  ;;  %3467 = vmatpush.bf16.msrb.mxu1 %v11983_v36  ;;  %v11993_v56 = vld [vmem:[#allocation33_spill] sm:$0xff]  ;;  %v11994_v36 = vld [vmem:[#allocation34_spill] sm:$0xff] }
 0x6b0   :  { %3427 = vmatpush.bf16.msrb.mxu2 %v11984_v28  ;;  %3453 = vmatpush.bf16.msra.mxu0 %v11985_v40  ;;  %v11995_v28 = vld [vmem:[#allocation47_spill] sm:$0xff]  ;;  %v11996_v40 = vld [vmem:[#allocation36_spill] sm:$0xff] }
 0x6b2   :  { %3442 = vmatpush.bf16.msra.mxu3 %v11986_v20  ;;  %3468 = vmatpush.bf16.msrb.mxu1 %v11987_v50  ;;  %v11997_v20 = vld [vmem:[#allocation37_spill] sm:$0xff]  ;;  %v11998_v50 = vld [vmem:[#allocation38_spill] sm:$0xff] }
 0x6b4   :  { %3428 = vmatpush.bf16.msrb.mxu2 %v11988_v27  ;;  %3454 = vmatpush.bf16.msra.mxu0 %v11989_v55  ;;  %v11999_v27 = vld [vmem:[#allocation53_spill] sm:$0xff]  ;;  %v12000_v55 = vld [vmem:[#allocation40_spill] sm:$0xff] }
 0x6b6   :  { %3443 = vmatpush.bf16.msra.mxu3 %v11990_v19  ;;  %3469 = vmatpush.bf16.msrb.mxu1 %v11991_v61  ;;  %v12001_v19 = vld [vmem:[#allocation57_spill] sm:$0xff] }
 0x6b7   :  { %v12002_v61 = vld [vmem:[#allocation41_spill] sm:$0xff] }
 0x6b8   :  { %3429 = vmatpush.bf16.msrb.mxu2 %v11992_v25  ;;  %3455 = vmatpush.bf16.msra.mxu0 %v11993_v56  ;;  %v12003_v25 = vld [vmem:[#allocation43_spill] sm:$0xff]  ;;  %v12004_v56 = vld [vmem:[#allocation48_spill] sm:$0xff] }
 0x6ba   :  { %3444 = vmatpush.bf16.msra.mxu3 %v11994_v36  ;;  %3470 = vmatpush.bf16.msrb.mxu1 %v11995_v28  ;;  %v12005_v36 = vld [vmem:[#allocation61_spill] sm:$0xff] }
 0x6bb   :  { %v12006_v28 = vld [vmem:[#allocation49_spill] sm:$0xff] }
 0x6bc   :  { %3430 = vmatpush.bf16.msrb.mxu2 %v11996_v40  ;;  %3456 = vmatpush.bf16.msra.mxu0 %v11997_v20  ;;  %v12007_v40 = vld [vmem:[#allocation50_spill] sm:$0xff]  ;;  %v12008_v20 = vld [vmem:[#allocation51_spill] sm:$0xff] }
 0x6be   :  { %3445 = vmatpush.bf16.msra.mxu3 %v11998_v50  ;;  %3471 = vmatpush.bf16.msrb.mxu1 %v11999_v27  ;;  %v12009_v50 = vld [vmem:[#allocation52_spill] sm:$0xff]  ;;  %v12010_v27 = vld [vmem:[#allocation54_spill] sm:$0xff] }
 0x6c0   :  { %3431 = vmatpush.bf16.msrb.mxu2 %v12002_v61  ;;  %3457 = vmatpush.bf16.msra.mxu0 %v12003_v25  ;;  %v12013_v61 = vld [vmem:[#allocation59_spill] sm:$0xff]  ;;  %v12014_v25 = vld [vmem:[#allocation60_spill] sm:$0xff] }
 0x6c2   :  { %3490 = vmatpush.bf16.msrb.mxu3 %v12000_v55  ;;  %3516 = vmatpush.bf16.msra.mxu1 %v12001_v19  ;;  %v12011_v55 = vld [vmem:[#allocation65_spill] sm:$0xff]  ;;  %v12012_v19 = vld [vmem:[#allocation58_spill] sm:$0xff] }
 0x6c4   :  { %3432 = vmatpush.bf16.msrb.mxu2 %v12006_v28  ;;  %3458 = vmatpush.bf16.msra.mxu0 %v12007_v40  ;;  %v12017_v28 = vld [vmem:[#allocation63_spill] sm:$0xff]  ;;  %v12018_v40 = vld [vmem:[#allocation64_spill] sm:$0xff] }
 0x6c6   :  { %3491 = vmatpush.bf16.msrb.mxu3 %v12004_v56  ;;  %3517 = vmatpush.bf16.msra.mxu1 %v12005_v36  ;;  %v12015_v56 = vld [vmem:[#allocation72_spill] sm:$0xff]  ;;  %v12016_v36 = vld [vmem:[#allocation62_spill] sm:$0xff] }
 0x6c8   :  { %3477 = vmatpush.bf16.msra.mxu2 %v12008_v20  ;;  %3503 = vmatpush.bf16.msrb.mxu0 %v12009_v50  ;;  %v12019_v20 = vld [vmem:[#allocation76_spill] sm:$0xff]  ;;  %v12020_v50 = vld [vmem:[#allocation69_spill] sm:$0xff] }
 0x6ca   :  { %3492 = vmatpush.bf16.msrb.mxu3 %v12010_v27  ;;  %3518 = vmatpush.bf16.msra.mxu1 %v12011_v55  ;;  %v12021_v27 = vld [vmem:[#allocation70_spill] sm:$0xff]  ;;  %v12022_v55 = vld [vmem:[#allocation71_spill] sm:$0xff] }
 0x6cc   :  { %3478 = vmatpush.bf16.msra.mxu2 %v12012_v19  ;;  %3504 = vmatpush.bf16.msrb.mxu0 %v12013_v61  ;;  %v12023_v19 = vld [vmem:[#allocation81_spill] sm:$0xff] }
 0x6cd   :  { %v12024_v61 = vld [vmem:[#allocation73_spill] sm:$0xff] }
 0x6ce   :  { %3493 = vmatpush.bf16.msrb.mxu3 %v12014_v25  ;;  %3519 = vmatpush.bf16.msra.mxu1 %v12015_v56  ;;  %v12025_v25 = vld [vmem:[#allocation74_spill] sm:$0xff]  ;;  %v12026_v56 = vld [vmem:[#allocation75_spill] sm:$0xff] }
 0x6d0   :  { %3479 = vmatpush.bf16.msra.mxu2 %v12016_v36  ;;  %3505 = vmatpush.bf16.msrb.mxu0 %v12017_v28  ;;  %v12027_v36 = vld [vmem:[#allocation87_spill] sm:$0xff]  ;;  %v12028_v28 = vld [vmem:[#allocation77_spill] sm:$0xff] }
 0x6d2   :  { %3494 = vmatpush.bf16.msrb.mxu3 %v12018_v40  ;;  %3520 = vmatpush.bf16.msra.mxu1 %v12019_v20  ;;  %v12029_v40 = vld [vmem:[#allocation78_spill] sm:$0xff]  ;;  %v12030_v20 = vld [vmem:[#allocation79_spill] sm:$0xff] }
 0x6d4   :  { %3480 = vmatpush.bf16.msra.mxu2 %v12020_v50  ;;  %3506 = vmatpush.bf16.msrb.mxu0 %v12021_v27  ;;  %v12031_v50 = vld [vmem:[#allocation91_spill] sm:$0xff] }
 0x6d5   :  { %v12032_v27 = vld [vmem:[#allocation83_spill] sm:$0xff] }
 0x6d6   :  { %3495 = vmatpush.bf16.msrb.mxu3 %v12022_v55  ;;  %3521 = vmatpush.bf16.msra.mxu1 %v12023_v19  ;;  %v12033_v55 = vld [vmem:[#allocation86_spill] sm:$0xff]  ;;  %v12034_v19 = vld [vmem:[#allocation89_spill] sm:$0xff] }
 0x6d8   :  { %3481 = vmatpush.bf16.msra.mxu2 %v12024_v61  ;;  %3507 = vmatpush.bf16.msrb.mxu0 %v12025_v25  ;;  %v12035_v61 = vld [vmem:[#allocation90_spill] sm:$0xff] }
 0x6da   :  { %3496 = vmatpush.bf16.msrb.mxu3 %v12026_v56  ;;  %3522 = vmatpush.bf16.msra.mxu1 %v12027_v36  ;;  %v12036_v36 = vld [vmem:[#allocation185_spill] sm:$0xff] }
 0x6dc   :  { %3482 = vmatpush.bf16.msra.mxu2 %v12028_v28  ;;  %3508 = vmatpush.bf16.msrb.mxu0 %v12029_v40 }
 0x6de   :  { %3497 = vmatpush.bf16.msrb.mxu3 %v12030_v20  ;;  %3523 = vmatpush.bf16.msra.mxu1 %v12031_v50  ;;  %v3196_v25 = vpop.f32.mrf.mxu1 }
 0x6e0   :  { %3483 = vmatpush.bf16.msra.mxu2 %v12032_v27  ;;  %3509 = vmatpush.bf16.msrb.mxu0 %v12033_v55 }
 0x6e4   :  { %3484 = vmatpush.bf16.msra.mxu2 %v12034_v19  ;;  %3510 = vmatpush.bf16.msrb.mxu0 %v12035_v61  ;;  %v3170_v56 = vpop.f32.mrf.mxu3  ;;  %v3183_v39 = vpop.f32.mrf.mxu0 }
 0x6e5   :  { %v3184_v47 = vadd.f32 %v3183_v39, %v12036_v36 }
 0x6e6   :  { %v3198_v28 = vpop.f32.mrf.mxu1 }
 0x6e7   :  { %v3197_v6 = vadd.f32 %v3196_v25, %v3184_v47 }
 0x6e9   :  { %v3357_v44 = vmul.f32 0.5, %v3197_v6 }
 0x6ea   :  { %v3157_v40 = vpop.f32.mrf.mxu2 }
 0x6eb   :  { %v3158_v20 = vadd.f32 %v3157_v40, %v12037_v17 }
 0x6ec   :  { %v3172_v35 = vpop.f32.mrf.mxu3  ;;  %v3185_v50 = vpop.f32.mrf.mxu0 }
 0x6ed   :  { %v3171_v29 = vadd.f32 %v3170_v56, %v3158_v20  ;;  %v12038_v35 = vld [vmem:[#allocation187_spill] sm:$0xff] }
 0x6ee   :  { %v3248_v27 = vpop.f32.mrf.mxu1 }
 0x6f2   :  { %v3159_v7 = vpop.f32.mrf.mxu2 }
 0x6f3   :  { %v12039_v7 = vld [vmem:[#allocation188_spill] sm:$0xff] }
 0x6f4   :  { %v3222_v55 = vpop.f32.mrf.mxu3  ;;  %v3235_v62 = vpop.f32.mrf.mxu0 }
 0x6f5   :  { %v3236_v50 = vadd.f32 %v3235_v62, %v12038_v35 }
 0x6f6   :  { %v3250_v19 = vpop.f32.mrf.mxu1 }
 0x6f7   :  { %v3249_v56 = vadd.f32 %v3248_v27, %v3236_v50  ;;  %v12042_v27 = vld [vmem:[#allocation11_spill] sm:$0xff] }
 0x6f9   :  { %v3359_v22 = vmul.f32 0.5, %v3249_v56 }
 0x6fa   :  { %v3209_v60 = vpop.f32.mrf.mxu2 }
 0x6fb   :  { %v3210_v40 = vadd.f32 %v3209_v60, %v12039_v7  ;;  %6884 = vtanh.f32 %v3359_v22  ;;  %v3356_v60 = vmul.f32 0.5, %v3171_v29  ;;  %v12043_v22 = vld [vmem:[#allocation192_spill] sm:$0xff] }
 0x6fc   :  { %v3224_v61 = vpop.f32.mrf.mxu3  ;;  %v3237_v33 = vpop.f32.mrf.mxu0  ;;  %6886 = vtanh.f32 %v3357_v44 }
 0x6fd   :  { %v12040_v61 = vld [vmem:[#allocation9_spill] sm:$0xff]  ;;  %v3223_v12 = vadd.f32 %v3222_v55, %v3210_v40 }
 0x6fe   :  { %v3300_v42 = vpop.f32.mrf.mxu1 }
 0x6ff   :  { %v3358_v62 = vmul.f32 0.5, %v3223_v12 }
 0x702   :  { %v3211_v9 = vpop.f32.mrf.mxu2 }
 0x704   :  { %v3274_v41 = vpop.f32.mrf.mxu3  ;;  %v3287_v39 = vpop.f32.mrf.mxu0 }
 0x706   :  { %v3302_v36 = vpop.f32.mrf.mxu1 }
 0x70a   :  { %v3261_v47 = vpop.f32.mrf.mxu2 }
 0x70c   :  { %v3276_v25 = vpop.f32.mrf.mxu3  ;;  %v3289_v28 = vpop.f32.mrf.mxu0 }
 0x70d   :  { %v12041_v25 = vld [vmem:[#allocation191_spill] sm:$0xff] }
 0x70e   :  { %v3288_v28 = vadd.f32 %v3287_v39, %v12041_v25 }
 0x710   :  { %v3301_v10 = vadd.f32 %v3300_v42, %v3288_v28 }
 0x712   :  { %v3263_v17 = vpop.f32.mrf.mxu2 }
 0x71e   :  { %v3352_v20 = vpop.f32.mrf.mxu1 }
 0x724   :  { %v3326_v31 = vpop.f32.mrf.mxu3  ;;  %v3339_v19 = vpop.f32.mrf.mxu0 }
 0x725   :  { %v3340_v33 = vadd.f32 %v3339_v19, %v12040_v61  ;;  %v6885_v19 = vpop.eup %6884 }
 0x726   :  { %v3354_v9 = vpop.f32.mrf.mxu1  ;;  %v6887_v55 = vpop.eup %6886  ;;  %v3375_v39 = vmul.f32 0.5, %v6885_v19 }
 0x727   :  { %v3353_v16 = vadd.f32 %v3352_v20, %v3340_v33  ;;  %v3361_v20 = vmul.f32 0.5, %v3301_v10  ;;  %v3373_v61 = vmul.f32 0.5, %v6887_v55 }
 0x729   :  { %v3363_v36 = vmul.f32 0.5, %v3353_v16  ;;  %v3262_v16 = vadd.f32 %v3261_v47, %v12043_v22  ;;  %v3381_v28 = vadd.f32 0.5, %v3373_v61 }
 0x72a   :  { %v3313_v17 = vpop.f32.mrf.mxu2 }
 0x72b   :  { %6888 = vtanh.f32 %v3363_v36  ;;  %v3314_v35 = vadd.f32 %v3313_v17, %v12042_v27  ;;  %v3275_v33 = vadd.f32 %v3274_v41, %v3262_v16 }
 0x72c   :  { %v3328_v50 = vpop.f32.mrf.mxu3  ;;  %v3341_v7 = vpop.f32.mrf.mxu0  ;;  %6890 = vtanh.f32 %v3358_v62 }
 0x72d   :  { %v3327_v56 = vadd.f32 %v3326_v31, %v3314_v35  ;;  %6892 = vtanh.f32 %v3356_v60  ;;  %v3383_v31 = vadd.f32 0.5, %v3375_v39  ;;  %v3360_v62 = vmul.f32 0.5, %v3275_v33 }
 0x72f   :  { %v3362_v6 = vmul.f32 0.5, %v3327_v56  ;;  %v3393_v60 = vmul.f32 %v3383_v31, %v9255_v3  ;;  %v12044_v31 = vld [vmem:[#allocation113_spill] sm:$0xff] }
 0x731   :  { %v6889_v44 = vpop.eup %6888  ;;  %6894 = vtanh.f32 %v3362_v6 }
 0x732   :  { %v3379_v12 = vmul.f32 0.5, %v6889_v44  ;;  %v3315_v40 = vpop.f32.mrf.mxu2  ;;  %v6891_v9 = vpop.eup %6890  ;;  %6896 = vtanh.f32 %v3361_v20 }
 0x733   :  { %v6893_v36 = vpop.eup %6892  ;;  %v3374_v17 = vmul.f32 0.5, %v6891_v9  ;;  %6898 = vtanh.f32 %v3360_v62  ;;  %v12049_v62 = vld [vmem:[#allocation148_spill] sm:$0xff] }
 0x734   :  { %v3387_v29 = vadd.f32 0.5, %v3379_v12  ;;  %v3372_v35 = vmul.f32 0.5, %v6893_v36 }
 0x735   :  { %v3382_v56 = vadd.f32 0.5, %v3374_v17  ;;  %v12048_v17 = vld [vmem:[#allocation147_spill] sm:$0xff] }
 0x736   :  { %v3389_v42 = vmul.f32 2.0, %v3387_v29  ;;  %v3380_v6 = vadd.f32 0.5, %v3372_v35  ;;  %v12052_v35 = vld [vmem:[#allocation156_spill] sm:$0xff] }
 0x737   :  { %v6895_v25 = vpop.eup %6894  ;;  %v3392_v16 = vmul.f32 %v3382_v56, %v9259_v23  ;;  %v12057_v56 = vld [vmem:[#allocation160_spill] sm:$0xff] }
 0x738   :  { %v6602_v27 = vadd.f32 -1.0, %v3389_v42  ;;  %v3378_v47 = vmul.f32 0.5, %v6895_v25  ;;  %v6897_v7 = vpop.eup %6896  ;;  %v12045_v42 = vld [vmem:[#allocation121_spill] sm:$0xff] }
 0x739   :  { %v3377_v22 = vmul.f32 0.5, %v6897_v7  ;;  %v6899_v39 = vpop.eup %6898  ;;  %v12046_v25 = vld [vmem:[#allocation145_spill] sm:$0xff]  ;;  %v12056_v7 = vld [vmem:[#allocation159_spill] sm:$0xff] }
 0x73a   :  { %v3395_v10 = vmul.f32 %v6602_v27, %v3381_v28  ;;  %v3386_v50 = vadd.f32 0.5, %v3378_v47  ;;  %v3376_v40 = vmul.f32 0.5, %v6899_v39  ;;  %v12047_v28 = vld [vmem:[#allocation146_spill] sm:$0xff]  ;;  %v12050_v27 = vld [vmem:[#allocation115_spill] sm:$0xff]  ;;  %v12051_v47 = vld [vmem:[#allocation125_spill] sm:$0xff] }
 0x73b   :  { %v3385_v3 = vadd.f32 0.5, %v3377_v22  ;;  %v12061_v22 = vld [vmem:[#allocation168_spill] sm:$0xff]  ;;  %v12064_v39 = vld [vmem:[#allocation171_spill] sm:$0xff] }
 0x73c   :  { %v9422_v41 = vadd.f32 %v3395_v10, %v3393_v60  ;;  %v3388_v19 = vmul.f32 2.0, %v3386_v50  ;;  %v3384_v29 = vadd.f32 0.5, %v3376_v40  ;;  %v12053_v60 = vld [vmem:[#allocation157_spill] sm:$0xff]  ;;  %v12054_v10 = vld [vmem:[#allocation120_spill] sm:$0xff]  ;;  %v12055_v50 = vld [vmem:[#allocation131_spill] sm:$0xff] }
 0x73d   :  { %v12067_v40 = vld [vmem:[#allocation151_spill] sm:$0xff] }
 0x73e   :  { %6900 = vtanh.f32 %v9422_v41  ;;  %v6601_v55 = vadd.f32 -1.0, %v3388_v19  ;;  %v12058_v19 = vld [vmem:[#allocation122_spill] sm:$0xff] }
 0x740   :  { %v3394_v44 = vmul.f32 %v6601_v55, %v3380_v6  ;;  %v12059_v6 = vld [vmem:[#allocation137_spill] sm:$0xff]  ;;  %v12060_v55 = vld [vmem:[#allocation167_spill] sm:$0xff] }
 0x742   :  { %v9426_v20 = vadd.f32 %v3394_v44, %v3392_v16  ;;  %v12062_v16 = vld [vmem:[#allocation130_spill] sm:$0xff] }
 0x743   :  { %v12063_v44 = vld [vmem:[#allocation142_spill] sm:$0xff] }
 0x744   :  { %v6901_v12 = vpop.eup %6900  ;;  %6902 = vtanh.f32 %v9426_v20 }
 0x745   :  { %v3401_v61 = vmul.f32 %v6901_v12, %v3385_v3  ;;  %v12065_v3 = vld [vmem:[#allocation172_spill] sm:$0xff]  ;;  %v12066_v12 = vld [vmem:[#allocation135_spill] sm:$0xff] }
 0x747   :  { %6603 = vst [vmem:[%s10941_s5 + $0xa] sm:$0x3] %v3401_v61  ;;  %v9432_v33 = vpack.c.bf16 %v3401_v61, %v3401_v61  ;;  %v12068_v61 = vld [vmem:[#allocation177_spill] sm:$0xff] }
 0x749   :  { %3446 = vmatmul.bf16.vlgmr.msra.gmra.mxu3 %v9432_v33  ;;  %3472 = vmatmul.bf16.vlgmr.msrb.gmra.mxu1 %v9432_v33 }
 0x74a   :  { %v6903_v23 = vpop.eup %6902  ;;  %3542 = vmatpush.bf16.msra.mxu3 %v11525_v63  ;;  %3568 = vmatpush.bf16.msrb.mxu1 %v11526_v53 }
 0x74b   :  { %v3400_v9 = vmul.f32 %v6903_v23, %v3384_v29  ;;  %v12069_v29 = vld [vmem:[#allocation178_spill] sm:$0xff]  ;;  %v12070_v23 = vld [vmem:[#allocation141_spill] sm:$0xff] }
 0x74d   :  { %v9438_v36 = vpack.c.bf16 %v3400_v9, %v3400_v9  ;;  %v12071_v9 = vld [vmem:[#allocation158_spill] sm:$0xff] }
 0x74e   :  { %3543 = vmatpush.bf16.msra.mxu3 %v11527_v34  ;;  %3569 = vmatpush.bf16.msrb.mxu1 %v11528_v1 }
 0x74f   :  { %3433 = vmatmul.bf16.vlgmr.msrb.gmra.mxu2 %v9438_v36  ;;  %3459 = vmatmul.bf16.vlgmr.msra.gmra.mxu0 %v9438_v36 }
 0x750   :  { %3529 = vmatpush.bf16.msrb.mxu2 %v11529_v57  ;;  %3555 = vmatpush.bf16.msra.mxu0 %v11530_v58 }
 0x752   :  { %3544 = vmatpush.bf16.msra.mxu3 %v11531_v45  ;;  %3570 = vmatpush.bf16.msrb.mxu1 %v11532_v11 }
 0x754   :  { %3530 = vmatpush.bf16.msrb.mxu2 %v7933_v0  ;;  %3556 = vmatpush.bf16.msra.mxu0 %v7935_v49 }
 0x756   :  { %3545 = vmatpush.bf16.msra.mxu3 %v11533_v21  ;;  %3571 = vmatpush.bf16.msrb.mxu1 %v11534_v52 }
 0x758   :  { %3531 = vmatpush.bf16.msrb.mxu2 %v11535_v38  ;;  %3557 = vmatpush.bf16.msra.mxu0 %v11536_v13 }
 0x759   :  { %3498 = vmatmul.bf16.vlgmr.msrb.gmra.mxu3 %v9432_v33  ;;  %3524 = vmatmul.bf16.vlgmr.msra.gmra.mxu1 %v9432_v33 }
 0x75a   :  { %3546 = vmatpush.bf16.msra.mxu3 %v11537_v54  ;;  %3572 = vmatpush.bf16.msrb.mxu1 %v11538_v37 }
 0x75c   :  { %3532 = vmatpush.bf16.msrb.mxu2 %v7975_v2  ;;  %3558 = vmatpush.bf16.msra.mxu0 %v7977_v30 }
 0x75e   :  { %3547 = vmatpush.bf16.msra.mxu3 %v11539_v15  ;;  %3573 = vmatpush.bf16.msrb.mxu1 %v11540_v59 }
 0x75f   :  { %3485 = vmatmul.bf16.vlgmr.msra.gmra.mxu2 %v9438_v36  ;;  %3511 = vmatmul.bf16.vlgmr.msrb.gmra.mxu0 %v9438_v36 }
 0x760   :  { %3533 = vmatpush.bf16.msrb.mxu2 %v11541_v4  ;;  %3559 = vmatpush.bf16.msra.mxu0 %v11542_v43 }
 0x762   :  { %3548 = vmatpush.bf16.msra.mxu3 %v11543_v24  ;;  %3574 = vmatpush.bf16.msrb.mxu1 %v11544_v46 }
 0x764   :  { %3534 = vmatpush.bf16.msrb.mxu2 %v11628_v18  ;;  %3560 = vmatpush.bf16.msra.mxu0 %v11546_v48 }
 0x766   :  { %3549 = vmatpush.bf16.msra.mxu3 %v11547_v14  ;;  %3575 = vmatpush.bf16.msrb.mxu1 %v11548_v26 }
 0x768   :  { %3535 = vmatpush.bf16.msrb.mxu2 %v11630_v32  ;;  %3561 = vmatpush.bf16.msra.mxu0 %v8052_v5 }
 0x769   :  { %3550 = vmatmul.bf16.vlgmr.msra.gmra.mxu3 %v9432_v33  ;;  %3576 = vmatmul.bf16.vlgmr.msrb.gmra.mxu1 %v9432_v33 }
 0x76a   :  { %3594 = vmatpush.bf16.msrb.mxu3 %v11549_v51  ;;  %3620 = vmatpush.bf16.msra.mxu1 %v11629_v8 }
 0x76c   :  { %3536 = vmatpush.bf16.msrb.mxu2 %v12046_v25  ;;  %3562 = vmatpush.bf16.msra.mxu0 %v12047_v28 }
 0x76e   :  { %3595 = vmatpush.bf16.msrb.mxu3 %v12044_v31  ;;  %3621 = vmatpush.bf16.msra.mxu1 %v12045_v42 }
 0x76f   :  { %3537 = vmatmul.bf16.vlgmr.msrb.gmra.mxu2 %v9438_v36  ;;  %3563 = vmatmul.bf16.vlgmr.msra.gmra.mxu0 %v9438_v36 }
 0x770   :  { %3581 = vmatpush.bf16.msra.mxu2 %v12048_v17  ;;  %3607 = vmatpush.bf16.msrb.mxu0 %v12049_v62 }
 0x772   :  { %3596 = vmatpush.bf16.msrb.mxu3 %v12050_v27  ;;  %3622 = vmatpush.bf16.msra.mxu1 %v12051_v47 }
 0x774   :  { %3582 = vmatpush.bf16.msra.mxu2 %v12052_v35  ;;  %3608 = vmatpush.bf16.msrb.mxu0 %v12053_v60 }
 0x776   :  { %3597 = vmatpush.bf16.msrb.mxu3 %v12054_v10  ;;  %3623 = vmatpush.bf16.msra.mxu1 %v12055_v50 }
 0x778   :  { %3583 = vmatpush.bf16.msra.mxu2 %v12056_v7  ;;  %3609 = vmatpush.bf16.msrb.mxu0 %v12057_v56 }
 0x77a   :  { %3598 = vmatpush.bf16.msrb.mxu3 %v12058_v19  ;;  %3624 = vmatpush.bf16.msra.mxu1 %v12059_v6  ;;  %v12141_v6 = vld [vmem:[#allocation10_spill] sm:$0xff] }
 0x77c   :  { %3584 = vmatpush.bf16.msra.mxu2 %v12060_v55  ;;  %3610 = vmatpush.bf16.msrb.mxu0 %v12061_v22  ;;  %v12072_v22 = vld [vmem:[#allocation13_spill] sm:$0xff] }
 0x77e   :  { %3599 = vmatpush.bf16.msrb.mxu3 %v12062_v16  ;;  %3625 = vmatpush.bf16.msra.mxu1 %v12063_v44  ;;  %v12073_v16 = vld [vmem:[#allocation18_spill] sm:$0xff]  ;;  %v12074_v44 = vld [vmem:[#allocation183_spill] sm:$0xff] }
 0x780   :  { %3585 = vmatpush.bf16.msra.mxu2 %v12064_v39  ;;  %3611 = vmatpush.bf16.msrb.mxu0 %v12065_v3  ;;  %v12075_v39 = vld [vmem:[#allocation184_spill] sm:$0xff] }
 0x782   :  { %3600 = vmatpush.bf16.msrb.mxu3 %v12066_v12  ;;  %3626 = vmatpush.bf16.msra.mxu1 %v12067_v40  ;;  %v12076_v40 = vld [vmem:[#allocation14_spill] sm:$0xff] }
 0x784   :  { %3586 = vmatpush.bf16.msra.mxu2 %v12068_v61  ;;  %3612 = vmatpush.bf16.msrb.mxu0 %v12069_v29  ;;  %v12077_v61 = vld [vmem:[#allocation22_spill] sm:$0xff]  ;;  %v12078_v29 = vld [vmem:[#allocation189_spill] sm:$0xff] }
 0x786   :  { %3601 = vmatpush.bf16.msrb.mxu3 %v12070_v23  ;;  %3627 = vmatpush.bf16.msra.mxu1 %v12071_v9  ;;  %v12079_v23 = vld [vmem:[#allocation190_spill] sm:$0xff]  ;;  %v12080_v9 = vld [vmem:[#allocation15_spill] sm:$0xff] }
 0x788   :  { %3587 = vmatpush.bf16.msra.mxu2 %v12074_v44  ;;  %3613 = vmatpush.bf16.msrb.mxu0 %v12075_v39  ;;  %v12082_v39 = vld [vmem:[#allocation17_spill] sm:$0xff]  ;;  %v12083_v44 = vld [vmem:[#allocation26_spill] sm:$0xff] }
 0x789   :  { %3602 = vmatmul.bf16.vlgmr.msrb.gmra.mxu3 %v9432_v33  ;;  %3628 = vmatmul.bf16.vlgmr.msra.gmra.mxu1 %v9432_v33  ;;  %v12084_v33 = vld [vmem:[#allocation19_spill] sm:$0xff] }
 0x78a   :  { %3715 = vmatpush.bf16.msra.mxu3 %v12072_v22  ;;  %3741 = vmatpush.bf16.msrb.mxu1 %v12073_v16  ;;  %v12081_v22 = vld [vmem:[#allocation16_spill] sm:$0xff]  ;;  %v12091_v16 = vld [vmem:[#allocation35_spill] sm:$0xff] }
 0x78c   :  { %3588 = vmatpush.bf16.msra.mxu2 %v12078_v29  ;;  %3614 = vmatpush.bf16.msrb.mxu0 %v12079_v23  ;;  %v12087_v29 = vld [vmem:[#allocation31_spill] sm:$0xff] }
 0x78d   :  { %v12088_v23 = vld [vmem:[#allocation23_spill] sm:$0xff] }
 0x78e   :  { %3716 = vmatpush.bf16.msra.mxu3 %v12076_v40  ;;  %3742 = vmatpush.bf16.msrb.mxu1 %v12077_v61  ;;  %v12085_v40 = vld [vmem:[#allocation20_spill] sm:$0xff]  ;;  %v12086_v61 = vld [vmem:[#allocation21_spill] sm:$0xff] }
 0x78f   :  { %3589 = vmatmul.bf16.vlgmr.msra.gmra.mxu2 %v9438_v36  ;;  %3615 = vmatmul.bf16.vlgmr.msrb.gmra.mxu0 %v9438_v36  ;;  %v12092_v36 = vld [vmem:[#allocation27_spill] sm:$0xff] }
 0x790   :  { %3702 = vmatpush.bf16.msrb.mxu2 %v12080_v9  ;;  %3728 = vmatpush.bf16.msra.mxu0 %v12081_v22  ;;  %v12089_v9 = vld [vmem:[#allocation24_spill] sm:$0xff]  ;;  %v12090_v22 = vld [vmem:[#allocation25_spill] sm:$0xff] }
 0x792   :  { %3717 = vmatpush.bf16.msra.mxu3 %v12082_v39  ;;  %3743 = vmatpush.bf16.msrb.mxu1 %v12083_v44  ;;  %v12093_v39 = vld [vmem:[#allocation28_spill] sm:$0xff]  ;;  %v12094_v44 = vld [vmem:[#allocation30_spill] sm:$0xff] }
 0x794   :  { %3703 = vmatpush.bf16.msrb.mxu2 %v12084_v33  ;;  %3729 = vmatpush.bf16.msra.mxu0 %v12085_v40  ;;  %v12095_v33 = vld [vmem:[#allocation39_spill] sm:$0xff]  ;;  %v12096_v40 = vld [vmem:[#allocation32_spill] sm:$0xff] }
 0x796   :  { %3718 = vmatpush.bf16.msra.mxu3 %v12086_v61  ;;  %3744 = vmatpush.bf16.msrb.mxu1 %v12087_v29  ;;  %v12097_v61 = vld [vmem:[#allocation33_spill] sm:$0xff]  ;;  %v12098_v29 = vld [vmem:[#allocation34_spill] sm:$0xff] }
 0x798   :  { %3704 = vmatpush.bf16.msrb.mxu2 %v12088_v23  ;;  %3730 = vmatpush.bf16.msra.mxu0 %v12089_v9  ;;  %v12099_v23 = vld [vmem:[#allocation47_spill] sm:$0xff]  ;;  %v12100_v9 = vld [vmem:[#allocation36_spill] sm:$0xff] }
 0x79a   :  { %3719 = vmatpush.bf16.msra.mxu3 %v12090_v22  ;;  %3745 = vmatpush.bf16.msrb.mxu1 %v12091_v16  ;;  %v12101_v22 = vld [vmem:[#allocation37_spill] sm:$0xff]  ;;  %v12102_v16 = vld [vmem:[#allocation38_spill] sm:$0xff] }
 0x79c   :  { %3705 = vmatpush.bf16.msrb.mxu2 %v12092_v36  ;;  %3731 = vmatpush.bf16.msra.mxu0 %v12093_v39  ;;  %v12103_v36 = vld [vmem:[#allocation53_spill] sm:$0xff]  ;;  %v12104_v39 = vld [vmem:[#allocation40_spill] sm:$0xff] }
 0x79e   :  { %3720 = vmatpush.bf16.msra.mxu3 %v12094_v44  ;;  %3746 = vmatpush.bf16.msrb.mxu1 %v12095_v33  ;;  %v12105_v44 = vld [vmem:[#allocation57_spill] sm:$0xff] }
 0x79f   :  { %v12106_v33 = vld [vmem:[#allocation41_spill] sm:$0xff] }
 0x7a0   :  { %3706 = vmatpush.bf16.msrb.mxu2 %v12096_v40  ;;  %3732 = vmatpush.bf16.msra.mxu0 %v12097_v61  ;;  %v12107_v40 = vld [vmem:[#allocation43_spill] sm:$0xff]  ;;  %v12108_v61 = vld [vmem:[#allocation48_spill] sm:$0xff] }
 0x7a2   :  { %3721 = vmatpush.bf16.msra.mxu3 %v12098_v29  ;;  %3747 = vmatpush.bf16.msrb.mxu1 %v12099_v23  ;;  %v12109_v29 = vld [vmem:[#allocation61_spill] sm:$0xff] }
 0x7a3   :  { %v12110_v23 = vld [vmem:[#allocation49_spill] sm:$0xff] }
 0x7a4   :  { %3707 = vmatpush.bf16.msrb.mxu2 %v12100_v9  ;;  %3733 = vmatpush.bf16.msra.mxu0 %v12101_v22  ;;  %v12111_v9 = vld [vmem:[#allocation50_spill] sm:$0xff]  ;;  %v12112_v22 = vld [vmem:[#allocation51_spill] sm:$0xff] }
 0x7a6   :  { %3722 = vmatpush.bf16.msra.mxu3 %v12102_v16  ;;  %3748 = vmatpush.bf16.msrb.mxu1 %v12103_v36  ;;  %v12113_v16 = vld [vmem:[#allocation52_spill] sm:$0xff]  ;;  %v12114_v36 = vld [vmem:[#allocation54_spill] sm:$0xff] }
 0x7a8   :  { %3708 = vmatpush.bf16.msrb.mxu2 %v12106_v33  ;;  %3734 = vmatpush.bf16.msra.mxu0 %v12107_v40  ;;  %v12117_v33 = vld [vmem:[#allocation59_spill] sm:$0xff]  ;;  %v12118_v40 = vld [vmem:[#allocation60_spill] sm:$0xff] }
 0x7aa   :  { %3767 = vmatpush.bf16.msrb.mxu3 %v12104_v39  ;;  %3793 = vmatpush.bf16.msra.mxu1 %v12105_v44  ;;  %v12115_v39 = vld [vmem:[#allocation65_spill] sm:$0xff]  ;;  %v12116_v44 = vld [vmem:[#allocation58_spill] sm:$0xff] }
 0x7ac   :  { %3709 = vmatpush.bf16.msrb.mxu2 %v12110_v23  ;;  %3735 = vmatpush.bf16.msra.mxu0 %v12111_v9  ;;  %v12121_v23 = vld [vmem:[#allocation63_spill] sm:$0xff]  ;;  %v12122_v9 = vld [vmem:[#allocation64_spill] sm:$0xff] }
 0x7ae   :  { %3768 = vmatpush.bf16.msrb.mxu3 %v12108_v61  ;;  %3794 = vmatpush.bf16.msra.mxu1 %v12109_v29  ;;  %v12119_v61 = vld [vmem:[#allocation72_spill] sm:$0xff]  ;;  %v12120_v29 = vld [vmem:[#allocation62_spill] sm:$0xff] }
 0x7b0   :  { %3754 = vmatpush.bf16.msra.mxu2 %v12112_v22  ;;  %3780 = vmatpush.bf16.msrb.mxu0 %v12113_v16  ;;  %v12123_v22 = vld [vmem:[#allocation76_spill] sm:$0xff]  ;;  %v12124_v16 = vld [vmem:[#allocation69_spill] sm:$0xff] }
 0x7b2   :  { %3769 = vmatpush.bf16.msrb.mxu3 %v12114_v36  ;;  %3795 = vmatpush.bf16.msra.mxu1 %v12115_v39  ;;  %v12125_v36 = vld [vmem:[#allocation70_spill] sm:$0xff]  ;;  %v12126_v39 = vld [vmem:[#allocation71_spill] sm:$0xff] }
 0x7b4   :  { %3755 = vmatpush.bf16.msra.mxu2 %v12116_v44  ;;  %3781 = vmatpush.bf16.msrb.mxu0 %v12117_v33  ;;  %v12127_v44 = vld [vmem:[#allocation81_spill] sm:$0xff] }
 0x7b5   :  { %v12128_v33 = vld [vmem:[#allocation73_spill] sm:$0xff] }
 0x7b6   :  { %3770 = vmatpush.bf16.msrb.mxu3 %v12118_v40  ;;  %3796 = vmatpush.bf16.msra.mxu1 %v12119_v61  ;;  %v12129_v40 = vld [vmem:[#allocation74_spill] sm:$0xff]  ;;  %v12130_v61 = vld [vmem:[#allocation75_spill] sm:$0xff] }
 0x7b8   :  { %3756 = vmatpush.bf16.msra.mxu2 %v12120_v29  ;;  %3782 = vmatpush.bf16.msrb.mxu0 %v12121_v23  ;;  %v12131_v29 = vld [vmem:[#allocation87_spill] sm:$0xff]  ;;  %v12132_v23 = vld [vmem:[#allocation77_spill] sm:$0xff] }
 0x7ba   :  { %3771 = vmatpush.bf16.msrb.mxu3 %v12122_v9  ;;  %3797 = vmatpush.bf16.msra.mxu1 %v12123_v22  ;;  %v12133_v9 = vld [vmem:[#allocation78_spill] sm:$0xff]  ;;  %v12134_v22 = vld [vmem:[#allocation79_spill] sm:$0xff] }
 0x7bc   :  { %3757 = vmatpush.bf16.msra.mxu2 %v12124_v16  ;;  %3783 = vmatpush.bf16.msrb.mxu0 %v12125_v36  ;;  %v12135_v16 = vld [vmem:[#allocation91_spill] sm:$0xff] }
 0x7bd   :  { %v12136_v36 = vld [vmem:[#allocation83_spill] sm:$0xff] }
 0x7be   :  { %3772 = vmatpush.bf16.msrb.mxu3 %v12126_v39  ;;  %3798 = vmatpush.bf16.msra.mxu1 %v12127_v44  ;;  %v12137_v39 = vld [vmem:[#allocation86_spill] sm:$0xff]  ;;  %v12138_v44 = vld [vmem:[#allocation89_spill] sm:$0xff] }
 0x7c0   :  { %3758 = vmatpush.bf16.msra.mxu2 %v12128_v33  ;;  %3784 = vmatpush.bf16.msrb.mxu0 %v12129_v40  ;;  %v12139_v33 = vld [vmem:[#allocation90_spill] sm:$0xff] }
 0x7c2   :  { %3773 = vmatpush.bf16.msrb.mxu3 %v12130_v61  ;;  %3799 = vmatpush.bf16.msra.mxu1 %v12131_v29  ;;  %v12140_v29 = vld [vmem:[#allocation12_spill] sm:$0xff] }
 0x7c4   :  { %3759 = vmatpush.bf16.msra.mxu2 %v12132_v23  ;;  %3785 = vmatpush.bf16.msrb.mxu0 %v12133_v9 }
 0x7c6   :  { %3774 = vmatpush.bf16.msrb.mxu3 %v12134_v22  ;;  %3800 = vmatpush.bf16.msra.mxu1 %v12135_v16  ;;  %v3473_v40 = vpop.f32.mrf.mxu1 }
 0x7c8   :  { %3760 = vmatpush.bf16.msra.mxu2 %v12136_v36  ;;  %3786 = vmatpush.bf16.msrb.mxu0 %v12137_v39 }
 0x7cc   :  { %3761 = vmatpush.bf16.msra.mxu2 %v12138_v44  ;;  %3787 = vmatpush.bf16.msrb.mxu0 %v12139_v33  ;;  %v3447_v61 = vpop.f32.mrf.mxu3  ;;  %v3460_v12 = vpop.f32.mrf.mxu0 }
 0x7cd   :  { %v3461_v3 = vadd.f32 %v3460_v12, %v12140_v29 }
 0x7ce   :  { %v3475_v23 = vpop.f32.mrf.mxu1 }
 0x7cf   :  { %v3474_v55 = vadd.f32 %v3473_v40, %v3461_v3 }
 0x7d1   :  { %v3634_v28 = vmul.f32 0.5, %v3474_v55 }
 0x7d2   :  { %v3434_v9 = vpop.f32.mrf.mxu2 }
 0x7d3   :  { %v3435_v22 = vadd.f32 %v3434_v9, %v12141_v6 }
 0x7d4   :  { %v3449_v19 = vpop.f32.mrf.mxu3  ;;  %v3462_v16 = vpop.f32.mrf.mxu0 }
 0x7d5   :  { %v3448_v56 = vadd.f32 %v3447_v61, %v3435_v22  ;;  %v12142_v19 = vld [vmem:[#allocation193_spill] sm:$0xff] }
 0x7d6   :  { %v3525_v36 = vpop.f32.mrf.mxu1 }
 0x7da   :  { %v3436_v7 = vpop.f32.mrf.mxu2 }
 0x7db   :  { %v12143_v7 = vld [vmem:[#allocation194_spill] sm:$0xff] }
 0x7dc   :  { %v3499_v39 = vpop.f32.mrf.mxu3  ;;  %v3512_v50 = vpop.f32.mrf.mxu0 }
 0x7dd   :  { %v3513_v16 = vadd.f32 %v3512_v50, %v12142_v19 }
 0x7de   :  { %v3527_v44 = vpop.f32.mrf.mxu1 }
 0x7df   :  { %v3526_v61 = vadd.f32 %v3525_v36, %v3513_v16  ;;  %v12146_v36 = vld [vmem:[#allocation198_spill] sm:$0xff] }
 0x7e1   :  { %v3636_v17 = vmul.f32 0.5, %v3526_v61 }
 0x7e2   :  { %v3486_v10 = vpop.f32.mrf.mxu2 }
 0x7e3   :  { %v3487_v9 = vadd.f32 %v3486_v10, %v12143_v7  ;;  %6904 = vtanh.f32 %v3636_v17  ;;  %v3633_v10 = vmul.f32 0.5, %v3448_v56  ;;  %v12147_v17 = vld [vmem:[#allocation196_spill] sm:$0xff] }
 0x7e4   :  { %v3501_v33 = vpop.f32.mrf.mxu3  ;;  %v3514_v60 = vpop.f32.mrf.mxu0  ;;  %6906 = vtanh.f32 %v3634_v28 }
 0x7e5   :  { %v12144_v33 = vld [vmem:[#allocation197_spill] sm:$0xff]  ;;  %v3500_v25 = vadd.f32 %v3499_v39, %v3487_v9 }
 0x7e6   :  { %v3577_v35 = vpop.f32.mrf.mxu1 }
 0x7e7   :  { %v3635_v50 = vmul.f32 0.5, %v3500_v25 }
 0x7ea   :  { %v3488_v47 = vpop.f32.mrf.mxu2 }
 0x7ec   :  { %v3551_v27 = vpop.f32.mrf.mxu3  ;;  %v3564_v12 = vpop.f32.mrf.mxu0 }
 0x7ee   :  { %v3579_v29 = vpop.f32.mrf.mxu1 }
 0x7f2   :  { %v3538_v3 = vpop.f32.mrf.mxu2 }
 0x7f4   :  { %v3553_v40 = vpop.f32.mrf.mxu3  ;;  %v3566_v23 = vpop.f32.mrf.mxu0 }
 0x7f5   :  { %v12145_v40 = vld [vmem:[#allocation195_spill] sm:$0xff] }
 0x7f6   :  { %v3565_v23 = vadd.f32 %v3564_v12, %v12145_v40 }
 0x7f8   :  { %v3578_v31 = vadd.f32 %v3577_v35, %v3565_v23 }
 0x7fa   :  { %v3540_v6 = vpop.f32.mrf.mxu2 }
 0x806   :  { %v3629_v22 = vpop.f32.mrf.mxu1 }
 0x80c   :  { %v3603_v62 = vpop.f32.mrf.mxu3  ;;  %v3616_v44 = vpop.f32.mrf.mxu0 }
 0x80d   :  { %v3617_v60 = vadd.f32 %v3616_v44, %v12144_v33  ;;  %v6905_v44 = vpop.eup %6904 }
 0x80e   :  { %v3631_v47 = vpop.f32.mrf.mxu1  ;;  %v6907_v39 = vpop.eup %6906  ;;  %v3652_v12 = vmul.f32 0.5, %v6905_v44 }
 0x80f   :  { %v3630_v42 = vadd.f32 %v3629_v22, %v3617_v60  ;;  %v3638_v22 = vmul.f32 0.5, %v3578_v31  ;;  %v3650_v33 = vmul.f32 0.5, %v6907_v39 }
 0x811   :  { %v3640_v29 = vmul.f32 0.5, %v3630_v42  ;;  %v3539_v42 = vadd.f32 %v3538_v3, %v12147_v17  ;;  %v3658_v23 = vadd.f32 0.5, %v3650_v33 }
 0x812   :  { %v3590_v6 = vpop.f32.mrf.mxu2 }
 0x813   :  { %6908 = vtanh.f32 %v3640_v29  ;;  %v3591_v19 = vadd.f32 %v3590_v6, %v12146_v36  ;;  %v3552_v60 = vadd.f32 %v3551_v27, %v3539_v42 }
 0x814   :  { %v3605_v16 = vpop.f32.mrf.mxu3  ;;  %v3618_v7 = vpop.f32.mrf.mxu0  ;;  %6910 = vtanh.f32 %v3635_v50 }
 0x815   :  { %v3604_v61 = vadd.f32 %v3603_v62, %v3591_v19  ;;  %6912 = vtanh.f32 %v3633_v10  ;;  %v3660_v62 = vadd.f32 0.5, %v3652_v12  ;;  %v3637_v50 = vmul.f32 0.5, %v3552_v60 }
 0x817   :  { %v3639_v55 = vmul.f32 0.5, %v3604_v61  ;;  %v3670_v10 = vmul.f32 %v3660_v62, %v9422_v41  ;;  %v12148_v62 = vld [vmem:[#allocation113_spill] sm:$0xff] }
 0x819   :  { %v6909_v28 = vpop.eup %6908  ;;  %6914 = vtanh.f32 %v3639_v55 }
 0x81a   :  { %v3656_v25 = vmul.f32 0.5, %v6909_v28  ;;  %v3592_v9 = vpop.f32.mrf.mxu2  ;;  %v6911_v47 = vpop.eup %6910  ;;  %6916 = vtanh.f32 %v3638_v22 }
 0x81b   :  { %v6913_v29 = vpop.eup %6912  ;;  %v3651_v6 = vmul.f32 0.5, %v6911_v47  ;;  %6918 = vtanh.f32 %v3637_v50  ;;  %v12153_v50 = vld [vmem:[#allocation148_spill] sm:$0xff] }
 0x81c   :  { %v3664_v56 = vadd.f32 0.5, %v3656_v25  ;;  %v3649_v19 = vmul.f32 0.5, %v6913_v29 }
 0x81d   :  { %v3659_v61 = vadd.f32 0.5, %v3651_v6  ;;  %v12152_v6 = vld [vmem:[#allocation147_spill] sm:$0xff] }
 0x81e   :  { %v3666_v35 = vmul.f32 2.0, %v3664_v56  ;;  %v3657_v55 = vadd.f32 0.5, %v3649_v19  ;;  %v12156_v19 = vld [vmem:[#allocation156_spill] sm:$0xff] }
 0x81f   :  { %v6915_v40 = vpop.eup %6914  ;;  %v3669_v42 = vmul.f32 %v3659_v61, %v9426_v20  ;;  %v12161_v61 = vld [vmem:[#allocation160_spill] sm:$0xff] }
 0x820   :  { %v6605_v36 = vadd.f32 -1.0, %v3666_v35  ;;  %v3655_v3 = vmul.f32 0.5, %v6915_v40  ;;  %v6917_v7 = vpop.eup %6916  ;;  %v12149_v35 = vld [vmem:[#allocation121_spill] sm:$0xff] }
 0x821   :  { %v3654_v17 = vmul.f32 0.5, %v6917_v7  ;;  %v6919_v12 = vpop.eup %6918  ;;  %v12150_v40 = vld [vmem:[#allocation145_spill] sm:$0xff]  ;;  %v12160_v7 = vld [vmem:[#allocation159_spill] sm:$0xff] }
 0x822   :  { %v3672_v31 = vmul.f32 %v6605_v36, %v3658_v23  ;;  %v3663_v16 = vadd.f32 0.5, %v3655_v3  ;;  %v3653_v9 = vmul.f32 0.5, %v6919_v12  ;;  %v12151_v23 = vld [vmem:[#allocation146_spill] sm:$0xff]  ;;  %v12154_v36 = vld [vmem:[#allocation115_spill] sm:$0xff]  ;;  %v12155_v3 = vld [vmem:[#allocation125_spill] sm:$0xff] }
 0x823   :  { %v3662_v41 = vadd.f32 0.5, %v3654_v17  ;;  %v12165_v17 = vld [vmem:[#allocation168_spill] sm:$0xff]  ;;  %v12168_v12 = vld [vmem:[#allocation171_spill] sm:$0xff] }
 0x824   :  { %v9589_v27 = vadd.f32 %v3672_v31, %v3670_v10  ;;  %v3665_v44 = vmul.f32 2.0, %v3663_v16  ;;  %v3661_v56 = vadd.f32 0.5, %v3653_v9  ;;  %v12157_v10 = vld [vmem:[#allocation157_spill] sm:$0xff]  ;;  %v12158_v31 = vld [vmem:[#allocation120_spill] sm:$0xff]  ;;  %v12159_v16 = vld [vmem:[#allocation131_spill] sm:$0xff] }
 0x825   :  { %v12171_v9 = vld [vmem:[#allocation151_spill] sm:$0xff] }
 0x826   :  { %6920 = vtanh.f32 %v9589_v27  ;;  %v6604_v39 = vadd.f32 -1.0, %v3665_v44  ;;  %v12162_v44 = vld [vmem:[#allocation122_spill] sm:$0xff] }
 0x828   :  { %v3671_v28 = vmul.f32 %v6604_v39, %v3657_v55  ;;  %v12163_v55 = vld [vmem:[#allocation137_spill] sm:$0xff]  ;;  %v12164_v39 = vld [vmem:[#allocation167_spill] sm:$0xff] }
 0x82a   :  { %v9593_v22 = vadd.f32 %v3671_v28, %v3669_v42  ;;  %v12166_v42 = vld [vmem:[#allocation130_spill] sm:$0xff] }
 0x82b   :  { %v12167_v28 = vld [vmem:[#allocation142_spill] sm:$0xff] }
 0x82c   :  { %v6921_v25 = vpop.eup %6920  ;;  %6922 = vtanh.f32 %v9593_v22 }
 0x82d   :  { %v3678_v33 = vmul.f32 %v6921_v25, %v3662_v41  ;;  %v12169_v41 = vld [vmem:[#allocation172_spill] sm:$0xff]  ;;  %v12170_v25 = vld [vmem:[#allocation135_spill] sm:$0xff] }
 0x82f   :  { %6606 = vst [vmem:[%s10941_s5 + $0xc] sm:$0x3] %v3678_v33  ;;  %v9599_v60 = vpack.c.bf16 %v3678_v33, %v3678_v33  ;;  %v12172_v33 = vld [vmem:[#allocation177_spill] sm:$0xff] }
 0x831   :  { %3723 = vmatmul.bf16.vlgmr.msra.gmra.mxu3 %v9599_v60  ;;  %3749 = vmatmul.bf16.vlgmr.msrb.gmra.mxu1 %v9599_v60 }
 0x832   :  { %v6923_v20 = vpop.eup %6922  ;;  %3819 = vmatpush.bf16.msra.mxu3 %v11525_v63  ;;  %3845 = vmatpush.bf16.msrb.mxu1 %v11526_v53 }
 0x833   :  { %v3677_v47 = vmul.f32 %v6923_v20, %v3661_v56  ;;  %v12173_v56 = vld [vmem:[#allocation178_spill] sm:$0xff]  ;;  %v12174_v20 = vld [vmem:[#allocation141_spill] sm:$0xff] }
 0x835   :  { %v9605_v29 = vpack.c.bf16 %v3677_v47, %v3677_v47  ;;  %v12175_v47 = vld [vmem:[#allocation158_spill] sm:$0xff] }
 0x836   :  { %3820 = vmatpush.bf16.msra.mxu3 %v11527_v34  ;;  %3846 = vmatpush.bf16.msrb.mxu1 %v11528_v1 }
 0x837   :  { %3710 = vmatmul.bf16.vlgmr.msrb.gmra.mxu2 %v9605_v29  ;;  %3736 = vmatmul.bf16.vlgmr.msra.gmra.mxu0 %v9605_v29 }
 0x838   :  { %3806 = vmatpush.bf16.msrb.mxu2 %v11529_v57  ;;  %3832 = vmatpush.bf16.msra.mxu0 %v11530_v58 }
 0x83a   :  { %3821 = vmatpush.bf16.msra.mxu3 %v11531_v45  ;;  %3847 = vmatpush.bf16.msrb.mxu1 %v11532_v11 }
 0x83c   :  { %3807 = vmatpush.bf16.msrb.mxu2 %v7933_v0  ;;  %3833 = vmatpush.bf16.msra.mxu0 %v7935_v49 }
 0x83e   :  { %3822 = vmatpush.bf16.msra.mxu3 %v11533_v21  ;;  %3848 = vmatpush.bf16.msrb.mxu1 %v11534_v52 }
 0x840   :  { %3808 = vmatpush.bf16.msrb.mxu2 %v11535_v38  ;;  %3834 = vmatpush.bf16.msra.mxu0 %v11536_v13 }
 0x841   :  { %3775 = vmatmul.bf16.vlgmr.msrb.gmra.mxu3 %v9599_v60  ;;  %3801 = vmatmul.bf16.vlgmr.msra.gmra.mxu1 %v9599_v60 }
 0x842   :  { %3823 = vmatpush.bf16.msra.mxu3 %v11537_v54  ;;  %3849 = vmatpush.bf16.msrb.mxu1 %v11538_v37 }
 0x844   :  { %3809 = vmatpush.bf16.msrb.mxu2 %v7975_v2  ;;  %3835 = vmatpush.bf16.msra.mxu0 %v7977_v30 }
 0x846   :  { %3824 = vmatpush.bf16.msra.mxu3 %v11539_v15  ;;  %3850 = vmatpush.bf16.msrb.mxu1 %v11540_v59 }
 0x847   :  { %3762 = vmatmul.bf16.vlgmr.msra.gmra.mxu2 %v9605_v29  ;;  %3788 = vmatmul.bf16.vlgmr.msrb.gmra.mxu0 %v9605_v29 }
 0x848   :  { %3810 = vmatpush.bf16.msrb.mxu2 %v11541_v4  ;;  %3836 = vmatpush.bf16.msra.mxu0 %v11542_v43 }
 0x84a   :  { %3825 = vmatpush.bf16.msra.mxu3 %v11543_v24  ;;  %3851 = vmatpush.bf16.msrb.mxu1 %v11544_v46 }
 0x84c   :  { %3811 = vmatpush.bf16.msrb.mxu2 %v11628_v18  ;;  %3837 = vmatpush.bf16.msra.mxu0 %v11546_v48 }
 0x84e   :  { %3826 = vmatpush.bf16.msra.mxu3 %v11547_v14  ;;  %3852 = vmatpush.bf16.msrb.mxu1 %v11548_v26 }
 0x850   :  { %3812 = vmatpush.bf16.msrb.mxu2 %v11630_v32  ;;  %3838 = vmatpush.bf16.msra.mxu0 %v8052_v5 }
 0x851   :  { %3827 = vmatmul.bf16.vlgmr.msra.gmra.mxu3 %v9599_v60  ;;  %3853 = vmatmul.bf16.vlgmr.msrb.gmra.mxu1 %v9599_v60 }
 0x852   :  { %3871 = vmatpush.bf16.msrb.mxu3 %v11549_v51  ;;  %3897 = vmatpush.bf16.msra.mxu1 %v11629_v8 }
 0x854   :  { %3813 = vmatpush.bf16.msrb.mxu2 %v12150_v40  ;;  %3839 = vmatpush.bf16.msra.mxu0 %v12151_v23 }
 0x856   :  { %3872 = vmatpush.bf16.msrb.mxu3 %v12148_v62  ;;  %3898 = vmatpush.bf16.msra.mxu1 %v12149_v35 }
 0x857   :  { %3814 = vmatmul.bf16.vlgmr.msrb.gmra.mxu2 %v9605_v29  ;;  %3840 = vmatmul.bf16.vlgmr.msra.gmra.mxu0 %v9605_v29 }
 0x858   :  { %3858 = vmatpush.bf16.msra.mxu2 %v12152_v6  ;;  %3884 = vmatpush.bf16.msrb.mxu0 %v12153_v50 }
 0x85a   :  { %3873 = vmatpush.bf16.msrb.mxu3 %v12154_v36  ;;  %3899 = vmatpush.bf16.msra.mxu1 %v12155_v3 }
 0x85c   :  { %3859 = vmatpush.bf16.msra.mxu2 %v12156_v19  ;;  %3885 = vmatpush.bf16.msrb.mxu0 %v12157_v10 }
 0x85e   :  { %3874 = vmatpush.bf16.msrb.mxu3 %v12158_v31  ;;  %3900 = vmatpush.bf16.msra.mxu1 %v12159_v16 }
 0x860   :  { %3860 = vmatpush.bf16.msra.mxu2 %v12160_v7  ;;  %3886 = vmatpush.bf16.msrb.mxu0 %v12161_v61 }
 0x862   :  { %3875 = vmatpush.bf16.msrb.mxu3 %v12162_v44  ;;  %3901 = vmatpush.bf16.msra.mxu1 %v12163_v55  ;;  %v12245_v55 = vld [vmem:[#allocation200_spill] sm:$0xff] }
 0x864   :  { %3861 = vmatpush.bf16.msra.mxu2 %v12164_v39  ;;  %3887 = vmatpush.bf16.msrb.mxu0 %v12165_v17  ;;  %v12176_v17 = vld [vmem:[#allocation13_spill] sm:$0xff] }
 0x866   :  { %3876 = vmatpush.bf16.msrb.mxu3 %v12166_v42  ;;  %3902 = vmatpush.bf16.msra.mxu1 %v12167_v28  ;;  %v12177_v42 = vld [vmem:[#allocation18_spill] sm:$0xff]  ;;  %v12178_v28 = vld [vmem:[#allocation183_spill] sm:$0xff] }
 0x868   :  { %3862 = vmatpush.bf16.msra.mxu2 %v12168_v12  ;;  %3888 = vmatpush.bf16.msrb.mxu0 %v12169_v41  ;;  %v12179_v12 = vld [vmem:[#allocation184_spill] sm:$0xff] }
 0x86a   :  { %3877 = vmatpush.bf16.msrb.mxu3 %v12170_v25  ;;  %3903 = vmatpush.bf16.msra.mxu1 %v12171_v9  ;;  %v12180_v9 = vld [vmem:[#allocation14_spill] sm:$0xff] }
 0x86c   :  { %3863 = vmatpush.bf16.msra.mxu2 %v12172_v33  ;;  %3889 = vmatpush.bf16.msrb.mxu0 %v12173_v56  ;;  %v12181_v33 = vld [vmem:[#allocation22_spill] sm:$0xff]  ;;  %v12182_v56 = vld [vmem:[#allocation189_spill] sm:$0xff] }
 0x86e   :  { %3878 = vmatpush.bf16.msrb.mxu3 %v12174_v20  ;;  %3904 = vmatpush.bf16.msra.mxu1 %v12175_v47  ;;  %v12183_v20 = vld [vmem:[#allocation190_spill] sm:$0xff]  ;;  %v12184_v47 = vld [vmem:[#allocation15_spill] sm:$0xff] }
 0x870   :  { %3864 = vmatpush.bf16.msra.mxu2 %v12178_v28  ;;  %3890 = vmatpush.bf16.msrb.mxu0 %v12179_v12  ;;  %v12186_v12 = vld [vmem:[#allocation17_spill] sm:$0xff]  ;;  %v12187_v28 = vld [vmem:[#allocation26_spill] sm:$0xff] }
 0x871   :  { %3879 = vmatmul.bf16.vlgmr.msrb.gmra.mxu3 %v9599_v60  ;;  %3905 = vmatmul.bf16.vlgmr.msra.gmra.mxu1 %v9599_v60  ;;  %v12188_v60 = vld [vmem:[#allocation19_spill] sm:$0xff] }
 0x872   :  { %3992 = vmatpush.bf16.msra.mxu3 %v12176_v17  ;;  %4018 = vmatpush.bf16.msrb.mxu1 %v12177_v42  ;;  %v12185_v17 = vld [vmem:[#allocation16_spill] sm:$0xff]  ;;  %v12195_v42 = vld [vmem:[#allocation35_spill] sm:$0xff] }
 0x874   :  { %3865 = vmatpush.bf16.msra.mxu2 %v12182_v56  ;;  %3891 = vmatpush.bf16.msrb.mxu0 %v12183_v20  ;;  %v12191_v56 = vld [vmem:[#allocation31_spill] sm:$0xff] }
 0x875   :  { %v12192_v20 = vld [vmem:[#allocation23_spill] sm:$0xff] }
 0x876   :  { %3993 = vmatpush.bf16.msra.mxu3 %v12180_v9  ;;  %4019 = vmatpush.bf16.msrb.mxu1 %v12181_v33  ;;  %v12189_v9 = vld [vmem:[#allocation20_spill] sm:$0xff]  ;;  %v12190_v33 = vld [vmem:[#allocation21_spill] sm:$0xff] }
 0x877   :  { %3866 = vmatmul.bf16.vlgmr.msra.gmra.mxu2 %v9605_v29  ;;  %3892 = vmatmul.bf16.vlgmr.msrb.gmra.mxu0 %v9605_v29  ;;  %v12196_v29 = vld [vmem:[#allocation27_spill] sm:$0xff] }
 0x878   :  { %3979 = vmatpush.bf16.msrb.mxu2 %v12184_v47  ;;  %4005 = vmatpush.bf16.msra.mxu0 %v12185_v17  ;;  %v12193_v47 = vld [vmem:[#allocation24_spill] sm:$0xff]  ;;  %v12194_v17 = vld [vmem:[#allocation25_spill] sm:$0xff] }
 0x87a   :  { %3994 = vmatpush.bf16.msra.mxu3 %v12186_v12  ;;  %4020 = vmatpush.bf16.msrb.mxu1 %v12187_v28  ;;  %v12197_v12 = vld [vmem:[#allocation28_spill] sm:$0xff]  ;;  %v12198_v28 = vld [vmem:[#allocation30_spill] sm:$0xff] }
 0x87c   :  { %3980 = vmatpush.bf16.msrb.mxu2 %v12188_v60  ;;  %4006 = vmatpush.bf16.msra.mxu0 %v12189_v9  ;;  %v12199_v60 = vld [vmem:[#allocation39_spill] sm:$0xff]  ;;  %v12200_v9 = vld [vmem:[#allocation32_spill] sm:$0xff] }
 0x87e   :  { %3995 = vmatpush.bf16.msra.mxu3 %v12190_v33  ;;  %4021 = vmatpush.bf16.msrb.mxu1 %v12191_v56  ;;  %v12201_v33 = vld [vmem:[#allocation33_spill] sm:$0xff]  ;;  %v12202_v56 = vld [vmem:[#allocation34_spill] sm:$0xff] }
 0x880   :  { %3981 = vmatpush.bf16.msrb.mxu2 %v12192_v20  ;;  %4007 = vmatpush.bf16.msra.mxu0 %v12193_v47  ;;  %v12203_v20 = vld [vmem:[#allocation47_spill] sm:$0xff]  ;;  %v12204_v47 = vld [vmem:[#allocation36_spill] sm:$0xff] }
 0x882   :  { %3996 = vmatpush.bf16.msra.mxu3 %v12194_v17  ;;  %4022 = vmatpush.bf16.msrb.mxu1 %v12195_v42  ;;  %v12205_v17 = vld [vmem:[#allocation37_spill] sm:$0xff]  ;;  %v12206_v42 = vld [vmem:[#allocation38_spill] sm:$0xff] }
 0x884   :  { %3982 = vmatpush.bf16.msrb.mxu2 %v12196_v29  ;;  %4008 = vmatpush.bf16.msra.mxu0 %v12197_v12  ;;  %v12207_v29 = vld [vmem:[#allocation53_spill] sm:$0xff]  ;;  %v12208_v12 = vld [vmem:[#allocation40_spill] sm:$0xff] }
 0x886   :  { %3997 = vmatpush.bf16.msra.mxu3 %v12198_v28  ;;  %4023 = vmatpush.bf16.msrb.mxu1 %v12199_v60  ;;  %v12209_v28 = vld [vmem:[#allocation57_spill] sm:$0xff] }
 0x887   :  { %v12210_v60 = vld [vmem:[#allocation41_spill] sm:$0xff] }
 0x888   :  { %3983 = vmatpush.bf16.msrb.mxu2 %v12200_v9  ;;  %4009 = vmatpush.bf16.msra.mxu0 %v12201_v33  ;;  %v12211_v9 = vld [vmem:[#allocation43_spill] sm:$0xff]  ;;  %v12212_v33 = vld [vmem:[#allocation48_spill] sm:$0xff] }
 0x88a   :  { %3998 = vmatpush.bf16.msra.mxu3 %v12202_v56  ;;  %4024 = vmatpush.bf16.msrb.mxu1 %v12203_v20  ;;  %v12213_v56 = vld [vmem:[#allocation61_spill] sm:$0xff] }
 0x88b   :  { %v12214_v20 = vld [vmem:[#allocation49_spill] sm:$0xff] }
 0x88c   :  { %3984 = vmatpush.bf16.msrb.mxu2 %v12204_v47  ;;  %4010 = vmatpush.bf16.msra.mxu0 %v12205_v17  ;;  %v12215_v47 = vld [vmem:[#allocation50_spill] sm:$0xff]  ;;  %v12216_v17 = vld [vmem:[#allocation51_spill] sm:$0xff] }
 0x88e   :  { %3999 = vmatpush.bf16.msra.mxu3 %v12206_v42  ;;  %4025 = vmatpush.bf16.msrb.mxu1 %v12207_v29  ;;  %v12217_v42 = vld [vmem:[#allocation52_spill] sm:$0xff]  ;;  %v12218_v29 = vld [vmem:[#allocation54_spill] sm:$0xff] }
 0x890   :  { %3985 = vmatpush.bf16.msrb.mxu2 %v12210_v60  ;;  %4011 = vmatpush.bf16.msra.mxu0 %v12211_v9  ;;  %v12221_v60 = vld [vmem:[#allocation59_spill] sm:$0xff]  ;;  %v12222_v9 = vld [vmem:[#allocation60_spill] sm:$0xff] }
 0x892   :  { %4044 = vmatpush.bf16.msrb.mxu3 %v12208_v12  ;;  %4070 = vmatpush.bf16.msra.mxu1 %v12209_v28  ;;  %v12219_v12 = vld [vmem:[#allocation65_spill] sm:$0xff]  ;;  %v12220_v28 = vld [vmem:[#allocation58_spill] sm:$0xff] }
 0x894   :  { %3986 = vmatpush.bf16.msrb.mxu2 %v12214_v20  ;;  %4012 = vmatpush.bf16.msra.mxu0 %v12215_v47  ;;  %v12225_v20 = vld [vmem:[#allocation63_spill] sm:$0xff]  ;;  %v12226_v47 = vld [vmem:[#allocation64_spill] sm:$0xff] }
 0x896   :  { %4045 = vmatpush.bf16.msrb.mxu3 %v12212_v33  ;;  %4071 = vmatpush.bf16.msra.mxu1 %v12213_v56  ;;  %v12223_v33 = vld [vmem:[#allocation72_spill] sm:$0xff]  ;;  %v12224_v56 = vld [vmem:[#allocation62_spill] sm:$0xff] }
 0x898   :  { %4031 = vmatpush.bf16.msra.mxu2 %v12216_v17  ;;  %4057 = vmatpush.bf16.msrb.mxu0 %v12217_v42  ;;  %v12227_v17 = vld [vmem:[#allocation76_spill] sm:$0xff]  ;;  %v12228_v42 = vld [vmem:[#allocation69_spill] sm:$0xff] }
 0x89a   :  { %4046 = vmatpush.bf16.msrb.mxu3 %v12218_v29  ;;  %4072 = vmatpush.bf16.msra.mxu1 %v12219_v12  ;;  %v12229_v29 = vld [vmem:[#allocation70_spill] sm:$0xff]  ;;  %v12230_v12 = vld [vmem:[#allocation71_spill] sm:$0xff] }
 0x89c   :  { %4032 = vmatpush.bf16.msra.mxu2 %v12220_v28  ;;  %4058 = vmatpush.bf16.msrb.mxu0 %v12221_v60  ;;  %v12231_v28 = vld [vmem:[#allocation81_spill] sm:$0xff] }
 0x89d   :  { %v12232_v60 = vld [vmem:[#allocation73_spill] sm:$0xff] }
 0x89e   :  { %4047 = vmatpush.bf16.msrb.mxu3 %v12222_v9  ;;  %4073 = vmatpush.bf16.msra.mxu1 %v12223_v33  ;;  %v12233_v9 = vld [vmem:[#allocation74_spill] sm:$0xff]  ;;  %v12234_v33 = vld [vmem:[#allocation75_spill] sm:$0xff] }
 0x8a0   :  { %4033 = vmatpush.bf16.msra.mxu2 %v12224_v56  ;;  %4059 = vmatpush.bf16.msrb.mxu0 %v12225_v20  ;;  %v12235_v56 = vld [vmem:[#allocation87_spill] sm:$0xff]  ;;  %v12236_v20 = vld [vmem:[#allocation77_spill] sm:$0xff] }
 0x8a2   :  { %4048 = vmatpush.bf16.msrb.mxu3 %v12226_v47  ;;  %4074 = vmatpush.bf16.msra.mxu1 %v12227_v17  ;;  %v12237_v47 = vld [vmem:[#allocation78_spill] sm:$0xff]  ;;  %v12238_v17 = vld [vmem:[#allocation79_spill] sm:$0xff] }
 0x8a4   :  { %4034 = vmatpush.bf16.msra.mxu2 %v12228_v42  ;;  %4060 = vmatpush.bf16.msrb.mxu0 %v12229_v29  ;;  %v12239_v42 = vld [vmem:[#allocation91_spill] sm:$0xff] }
 0x8a5   :  { %v12240_v29 = vld [vmem:[#allocation83_spill] sm:$0xff] }
 0x8a6   :  { %4049 = vmatpush.bf16.msrb.mxu3 %v12230_v12  ;;  %4075 = vmatpush.bf16.msra.mxu1 %v12231_v28  ;;  %v12241_v12 = vld [vmem:[#allocation86_spill] sm:$0xff]  ;;  %v12242_v28 = vld [vmem:[#allocation89_spill] sm:$0xff] }
 0x8a8   :  { %4035 = vmatpush.bf16.msra.mxu2 %v12232_v60  ;;  %4061 = vmatpush.bf16.msrb.mxu0 %v12233_v9  ;;  %v12243_v60 = vld [vmem:[#allocation90_spill] sm:$0xff] }
 0x8aa   :  { %4050 = vmatpush.bf16.msrb.mxu3 %v12234_v33  ;;  %4076 = vmatpush.bf16.msra.mxu1 %v12235_v56  ;;  %v12244_v56 = vld [vmem:[#allocation199_spill] sm:$0xff] }
 0x8ac   :  { %4036 = vmatpush.bf16.msra.mxu2 %v12236_v20  ;;  %4062 = vmatpush.bf16.msrb.mxu0 %v12237_v47 }
 0x8ae   :  { %4051 = vmatpush.bf16.msrb.mxu3 %v12238_v17  ;;  %4077 = vmatpush.bf16.msra.mxu1 %v12239_v42  ;;  %v3750_v9 = vpop.f32.mrf.mxu1 }
 0x8b0   :  { %4037 = vmatpush.bf16.msra.mxu2 %v12240_v29  ;;  %4063 = vmatpush.bf16.msrb.mxu0 %v12241_v12 }
 0x8b4   :  { %4038 = vmatpush.bf16.msra.mxu2 %v12242_v28  ;;  %4064 = vmatpush.bf16.msrb.mxu0 %v12243_v60  ;;  %v3724_v33 = vpop.f32.mrf.mxu3  ;;  %v3737_v25 = vpop.f32.mrf.mxu0 }
 0x8b5   :  { %v3738_v41 = vadd.f32 %v3737_v25, %v12244_v56 }
 0x8b6   :  { %v3752_v20 = vpop.f32.mrf.mxu1 }
 0x8b7   :  { %v3751_v39 = vadd.f32 %v3750_v9, %v3738_v41 }
 0x8b9   :  { %v3911_v23 = vmul.f32 0.5, %v3751_v39 }
 0x8ba   :  { %v3711_v47 = vpop.f32.mrf.mxu2 }
 0x8bb   :  { %v3712_v17 = vadd.f32 %v3711_v47, %v12245_v55 }
 0x8bc   :  { %v3726_v44 = vpop.f32.mrf.mxu3  ;;  %v3739_v42 = vpop.f32.mrf.mxu0 }
 0x8bd   :  { %v3725_v61 = vadd.f32 %v3724_v33, %v3712_v17  ;;  %v12246_v44 = vld [vmem:[#allocation201_spill] sm:$0xff] }
 0x8be   :  { %v3802_v29 = vpop.f32.mrf.mxu1 }
 0x8c2   :  { %v3713_v7 = vpop.f32.mrf.mxu2 }
 0x8c3   :  { %v12247_v7 = vld [vmem:[#allocation202_spill] sm:$0xff] }
 0x8c4   :  { %v3776_v12 = vpop.f32.mrf.mxu3  ;;  %v3789_v16 = vpop.f32.mrf.mxu0 }
 0x8c5   :  { %v3790_v42 = vadd.f32 %v3789_v16, %v12246_v44 }
 0x8c6   :  { %v3804_v28 = vpop.f32.mrf.mxu1 }
 0x8c7   :  { %v3803_v33 = vadd.f32 %v3802_v29, %v3790_v42  ;;  %v12250_v29 = vld [vmem:[#allocation206_spill] sm:$0xff] }
 0x8c9   :  { %v3913_v6 = vmul.f32 0.5, %v3803_v33 }
 0x8ca   :  { %v3763_v31 = vpop.f32.mrf.mxu2 }
 0x8cb   :  { %v3764_v47 = vadd.f32 %v3763_v31, %v12247_v7  ;;  %6924 = vtanh.f32 %v3913_v6  ;;  %v3910_v31 = vmul.f32 0.5, %v3725_v61  ;;  %v12251_v6 = vld [vmem:[#allocation204_spill] sm:$0xff] }
 0x8cc   :  { %v3778_v60 = vpop.f32.mrf.mxu3  ;;  %v3791_v10 = vpop.f32.mrf.mxu0  ;;  %6926 = vtanh.f32 %v3911_v23 }
 0x8cd   :  { %v12248_v60 = vld [vmem:[#allocation205_spill] sm:$0xff]  ;;  %v3777_v40 = vadd.f32 %v3776_v12, %v3764_v47 }
 0x8ce   :  { %v3854_v19 = vpop.f32.mrf.mxu1 }
 0x8cf   :  { %v3912_v16 = vmul.f32 0.5, %v3777_v40 }
 0x8d2   :  { %v3765_v3 = vpop.f32.mrf.mxu2 }
 0x8d4   :  { %v3828_v36 = vpop.f32.mrf.mxu3  ;;  %v3841_v25 = vpop.f32.mrf.mxu0 }
 0x8d6   :  { %v3856_v56 = vpop.f32.mrf.mxu1 }
 0x8da   :  { %v3815_v41 = vpop.f32.mrf.mxu2 }
 0x8dc   :  { %v3830_v9 = vpop.f32.mrf.mxu3  ;;  %v3843_v20 = vpop.f32.mrf.mxu0 }
 0x8dd   :  { %v12249_v9 = vld [vmem:[#allocation203_spill] sm:$0xff] }
 0x8de   :  { %v3842_v20 = vadd.f32 %v3841_v25, %v12249_v9 }
 0x8e0   :  { %v3855_v62 = vadd.f32 %v3854_v19, %v3842_v20 }
 0x8e2   :  { %v3817_v55 = vpop.f32.mrf.mxu2 }
 0x8ee   :  { %v3906_v17 = vpop.f32.mrf.mxu1 }
 0x8f4   :  { %v3880_v50 = vpop.f32.mrf.mxu3  ;;  %v3893_v28 = vpop.f32.mrf.mxu0 }
 0x8f5   :  { %v3894_v10 = vadd.f32 %v3893_v28, %v12248_v60  ;;  %v6925_v28 = vpop.eup %6924 }
 0x8f6   :  { %v3908_v3 = vpop.f32.mrf.mxu1  ;;  %v6927_v12 = vpop.eup %6926  ;;  %v3929_v25 = vmul.f32 0.5, %v6925_v28 }
 0x8f7   :  { %v3907_v35 = vadd.f32 %v3906_v17, %v3894_v10  ;;  %v3915_v17 = vmul.f32 0.5, %v3855_v62  ;;  %v3927_v60 = vmul.f32 0.5, %v6927_v12 }
 0x8f9   :  { %v3917_v56 = vmul.f32 0.5, %v3907_v35  ;;  %v3816_v35 = vadd.f32 %v3815_v41, %v12251_v6  ;;  %v3935_v20 = vadd.f32 0.5, %v3927_v60 }
 0x8fa   :  { %v3867_v55 = vpop.f32.mrf.mxu2 }
 0x8fb   :  { %6928 = vtanh.f32 %v3917_v56  ;;  %v3868_v44 = vadd.f32 %v3867_v55, %v12250_v29  ;;  %v3829_v10 = vadd.f32 %v3828_v36, %v3816_v35 }
 0x8fc   :  { %v3882_v42 = vpop.f32.mrf.mxu3  ;;  %v3895_v7 = vpop.f32.mrf.mxu0  ;;  %6930 = vtanh.f32 %v3912_v16 }
 0x8fd   :  { %v3881_v33 = vadd.f32 %v3880_v50, %v3868_v44  ;;  %6932 = vtanh.f32 %v3910_v31  ;;  %v3937_v50 = vadd.f32 0.5, %v3929_v25  ;;  %v3914_v16 = vmul.f32 0.5, %v3829_v10 }
 0x8ff   :  { %v3916_v39 = vmul.f32 0.5, %v3881_v33  ;;  %v3947_v31 = vmul.f32 %v3937_v50, %v9589_v27  ;;  %v12252_v50 = vld [vmem:[#allocation113_spill] sm:$0xff] }
 0x901   :  { %v6929_v23 = vpop.eup %6928  ;;  %6934 = vtanh.f32 %v3916_v39 }
 0x902   :  { %v3933_v40 = vmul.f32 0.5, %v6929_v23  ;;  %v3869_v47 = vpop.f32.mrf.mxu2  ;;  %v6931_v3 = vpop.eup %6930  ;;  %6936 = vtanh.f32 %v3915_v17 }
 0x903   :  { %v6933_v56 = vpop.eup %6932  ;;  %v3928_v55 = vmul.f32 0.5, %v6931_v3  ;;  %6938 = vtanh.f32 %v3914_v16  ;;  %v12257_v16 = vld [vmem:[#allocation148_spill] sm:$0xff] }
 0x904   :  { %v3941_v61 = vadd.f32 0.5, %v3933_v40  ;;  %v3926_v44 = vmul.f32 0.5, %v6933_v56 }
 0x905   :  { %v3936_v33 = vadd.f32 0.5, %v3928_v55  ;;  %v12256_v55 = vld [vmem:[#allocation147_spill] sm:$0xff] }
 0x906   :  { %v3943_v19 = vmul.f32 2.0, %v3941_v61  ;;  %v3934_v39 = vadd.f32 0.5, %v3926_v44  ;;  %v12260_v44 = vld [vmem:[#allocation156_spill] sm:$0xff] }
 0x907   :  { %v6935_v9 = vpop.eup %6934  ;;  %v3946_v35 = vmul.f32 %v3936_v33, %v9593_v22  ;;  %v12265_v33 = vld [vmem:[#allocation160_spill] sm:$0xff] }
 0x908   :  { %v6608_v29 = vadd.f32 -1.0, %v3943_v19  ;;  %v3932_v41 = vmul.f32 0.5, %v6935_v9  ;;  %v6937_v7 = vpop.eup %6936  ;;  %v12253_v19 = vld [vmem:[#allocation121_spill] sm:$0xff] }
 0x909   :  { %v3931_v6 = vmul.f32 0.5, %v6937_v7  ;;  %v6939_v25 = vpop.eup %6938  ;;  %v12254_v9 = vld [vmem:[#allocation145_spill] sm:$0xff]  ;;  %v12264_v7 = vld [vmem:[#allocation159_spill] sm:$0xff] }
 0x90a   :  { %v3949_v62 = vmul.f32 %v6608_v29, %v3935_v20  ;;  %v3940_v42 = vadd.f32 0.5, %v3932_v41  ;;  %v3930_v47 = vmul.f32 0.5, %v6939_v25  ;;  %v12255_v20 = vld [vmem:[#allocation146_spill] sm:$0xff]  ;;  %v12258_v29 = vld [vmem:[#allocation115_spill] sm:$0xff]  ;;  %v12259_v41 = vld [vmem:[#allocation125_spill] sm:$0xff] }
 0x90b   :  { %v3939_v27 = vadd.f32 0.5, %v3931_v6  ;;  %v12269_v6 = vld [vmem:[#allocation168_spill] sm:$0xff]  ;;  %v12272_v25 = vld [vmem:[#allocation171_spill] sm:$0xff] }
 0x90c   :  { %v9756_v36 = vadd.f32 %v3949_v62, %v3947_v31  ;;  %v3942_v28 = vmul.f32 2.0, %v3940_v42  ;;  %v3938_v61 = vadd.f32 0.5, %v3930_v47  ;;  %v12261_v31 = vld [vmem:[#allocation157_spill] sm:$0xff]  ;;  %v12262_v62 = vld [vmem:[#allocation120_spill] sm:$0xff]  ;;  %v12263_v42 = vld [vmem:[#allocation131_spill] sm:$0xff] }
 0x90d   :  { %v12275_v47 = vld [vmem:[#allocation151_spill] sm:$0xff] }
 0x90e   :  { %6940 = vtanh.f32 %v9756_v36  ;;  %v6607_v12 = vadd.f32 -1.0, %v3942_v28  ;;  %v12266_v28 = vld [vmem:[#allocation122_spill] sm:$0xff] }
 0x910   :  { %v3948_v23 = vmul.f32 %v6607_v12, %v3934_v39  ;;  %v12267_v39 = vld [vmem:[#allocation137_spill] sm:$0xff]  ;;  %v12268_v12 = vld [vmem:[#allocation167_spill] sm:$0xff] }
 0x912   :  { %v9760_v17 = vadd.f32 %v3948_v23, %v3946_v35  ;;  %v12270_v35 = vld [vmem:[#allocation130_spill] sm:$0xff] }
 0x913   :  { %v12271_v23 = vld [vmem:[#allocation142_spill] sm:$0xff] }
 0x914   :  { %v6941_v40 = vpop.eup %6940  ;;  %6942 = vtanh.f32 %v9760_v17 }
 0x915   :  { %v3955_v60 = vmul.f32 %v6941_v40, %v3939_v27  ;;  %v12273_v27 = vld [vmem:[#allocation172_spill] sm:$0xff]  ;;  %v12274_v40 = vld [vmem:[#allocation135_spill] sm:$0xff] }
 0x917   :  { %6609 = vst [vmem:[%s10941_s5 + $0xe] sm:$0x3] %v3955_v60  ;;  %v9766_v10 = vpack.c.bf16 %v3955_v60, %v3955_v60  ;;  %v12276_v60 = vld [vmem:[#allocation177_spill] sm:$0xff] }
 0x919   :  { %4000 = vmatmul.bf16.vlgmr.msra.gmra.mxu3 %v9766_v10  ;;  %4026 = vmatmul.bf16.vlgmr.msrb.gmra.mxu1 %v9766_v10 }
 0x91a   :  { %v6943_v22 = vpop.eup %6942  ;;  %4096 = vmatpush.bf16.msra.mxu3 %v11525_v63  ;;  %4122 = vmatpush.bf16.msrb.mxu1 %v11526_v53 }
 0x91b   :  { %v3954_v3 = vmul.f32 %v6943_v22, %v3938_v61  ;;  %v12277_v61 = vld [vmem:[#allocation178_spill] sm:$0xff]  ;;  %v12278_v22 = vld [vmem:[#allocation141_spill] sm:$0xff] }
 0x91d   :  { %v9772_v56 = vpack.c.bf16 %v3954_v3, %v3954_v3  ;;  %v12279_v3 = vld [vmem:[#allocation158_spill] sm:$0xff] }
 0x91e   :  { %4097 = vmatpush.bf16.msra.mxu3 %v11527_v34  ;;  %4123 = vmatpush.bf16.msrb.mxu1 %v11528_v1 }
 0x91f   :  { %3987 = vmatmul.bf16.vlgmr.msrb.gmra.mxu2 %v9772_v56  ;;  %4013 = vmatmul.bf16.vlgmr.msra.gmra.mxu0 %v9772_v56 }
 0x920   :  { %4083 = vmatpush.bf16.msrb.mxu2 %v11529_v57  ;;  %4109 = vmatpush.bf16.msra.mxu0 %v11530_v58 }
 0x922   :  { %4098 = vmatpush.bf16.msra.mxu3 %v11531_v45  ;;  %4124 = vmatpush.bf16.msrb.mxu1 %v11532_v11 }
 0x924   :  { %4084 = vmatpush.bf16.msrb.mxu2 %v7933_v0  ;;  %4110 = vmatpush.bf16.msra.mxu0 %v7935_v49 }
 0x926   :  { %4099 = vmatpush.bf16.msra.mxu3 %v11533_v21  ;;  %4125 = vmatpush.bf16.msrb.mxu1 %v11534_v52 }
 0x928   :  { %4085 = vmatpush.bf16.msrb.mxu2 %v11535_v38  ;;  %4111 = vmatpush.bf16.msra.mxu0 %v11536_v13 }
 0x929   :  { %4052 = vmatmul.bf16.vlgmr.msrb.gmra.mxu3 %v9766_v10  ;;  %4078 = vmatmul.bf16.vlgmr.msra.gmra.mxu1 %v9766_v10 }
 0x92a   :  { %4100 = vmatpush.bf16.msra.mxu3 %v11537_v54  ;;  %4126 = vmatpush.bf16.msrb.mxu1 %v11538_v37 }
 0x92c   :  { %4086 = vmatpush.bf16.msrb.mxu2 %v7975_v2  ;;  %4112 = vmatpush.bf16.msra.mxu0 %v7977_v30 }
 0x92e   :  { %4101 = vmatpush.bf16.msra.mxu3 %v11539_v15  ;;  %4127 = vmatpush.bf16.msrb.mxu1 %v11540_v59 }
 0x92f   :  { %4039 = vmatmul.bf16.vlgmr.msra.gmra.mxu2 %v9772_v56  ;;  %4065 = vmatmul.bf16.vlgmr.msrb.gmra.mxu0 %v9772_v56 }
 0x930   :  { %4087 = vmatpush.bf16.msrb.mxu2 %v11541_v4  ;;  %4113 = vmatpush.bf16.msra.mxu0 %v11542_v43 }
 0x932   :  { %4102 = vmatpush.bf16.msra.mxu3 %v11543_v24  ;;  %4128 = vmatpush.bf16.msrb.mxu1 %v11544_v46 }
 0x934   :  { %4088 = vmatpush.bf16.msrb.mxu2 %v11628_v18  ;;  %4114 = vmatpush.bf16.msra.mxu0 %v11546_v48 }
 0x936   :  { %4103 = vmatpush.bf16.msra.mxu3 %v11547_v14  ;;  %4129 = vmatpush.bf16.msrb.mxu1 %v11548_v26 }
 0x938   :  { %4089 = vmatpush.bf16.msrb.mxu2 %v11630_v32  ;;  %4115 = vmatpush.bf16.msra.mxu0 %v8052_v5 }
 0x939   :  { %4104 = vmatmul.bf16.vlgmr.msra.gmra.mxu3 %v9766_v10  ;;  %4130 = vmatmul.bf16.vlgmr.msrb.gmra.mxu1 %v9766_v10 }
 0x93a   :  { %4148 = vmatpush.bf16.msrb.mxu3 %v11549_v51  ;;  %4174 = vmatpush.bf16.msra.mxu1 %v11629_v8 }
 0x93c   :  { %4090 = vmatpush.bf16.msrb.mxu2 %v12254_v9  ;;  %4116 = vmatpush.bf16.msra.mxu0 %v12255_v20 }
 0x93e   :  { %4149 = vmatpush.bf16.msrb.mxu3 %v12252_v50  ;;  %4175 = vmatpush.bf16.msra.mxu1 %v12253_v19 }
 0x93f   :  { %4091 = vmatmul.bf16.vlgmr.msrb.gmra.mxu2 %v9772_v56  ;;  %4117 = vmatmul.bf16.vlgmr.msra.gmra.mxu0 %v9772_v56 }
 0x940   :  { %4135 = vmatpush.bf16.msra.mxu2 %v12256_v55  ;;  %4161 = vmatpush.bf16.msrb.mxu0 %v12257_v16 }
 0x942   :  { %4150 = vmatpush.bf16.msrb.mxu3 %v12258_v29  ;;  %4176 = vmatpush.bf16.msra.mxu1 %v12259_v41 }
 0x944   :  { %4136 = vmatpush.bf16.msra.mxu2 %v12260_v44  ;;  %4162 = vmatpush.bf16.msrb.mxu0 %v12261_v31 }
 0x946   :  { %4151 = vmatpush.bf16.msrb.mxu3 %v12262_v62  ;;  %4177 = vmatpush.bf16.msra.mxu1 %v12263_v42 }
 0x948   :  { %4137 = vmatpush.bf16.msra.mxu2 %v12264_v7  ;;  %4163 = vmatpush.bf16.msrb.mxu0 %v12265_v33 }
 0x94a   :  { %4152 = vmatpush.bf16.msrb.mxu3 %v12266_v28  ;;  %4178 = vmatpush.bf16.msra.mxu1 %v12267_v39  ;;  %v12349_v39 = vld [vmem:[#allocation207_spill] sm:$0xff] }
 0x94c   :  { %4138 = vmatpush.bf16.msra.mxu2 %v12268_v12  ;;  %4164 = vmatpush.bf16.msrb.mxu0 %v12269_v6  ;;  %v12280_v6 = vld [vmem:[#allocation13_spill] sm:$0xff] }
 0x94e   :  { %4153 = vmatpush.bf16.msrb.mxu3 %v12270_v35  ;;  %4179 = vmatpush.bf16.msra.mxu1 %v12271_v23  ;;  %v12281_v35 = vld [vmem:[#allocation18_spill] sm:$0xff]  ;;  %v12282_v23 = vld [vmem:[#allocation183_spill] sm:$0xff] }
 0x950   :  { %4139 = vmatpush.bf16.msra.mxu2 %v12272_v25  ;;  %4165 = vmatpush.bf16.msrb.mxu0 %v12273_v27  ;;  %v12283_v25 = vld [vmem:[#allocation184_spill] sm:$0xff] }
 0x952   :  { %4154 = vmatpush.bf16.msrb.mxu3 %v12274_v40  ;;  %4180 = vmatpush.bf16.msra.mxu1 %v12275_v47  ;;  %v12284_v47 = vld [vmem:[#allocation14_spill] sm:$0xff] }
 0x954   :  { %4140 = vmatpush.bf16.msra.mxu2 %v12276_v60  ;;  %4166 = vmatpush.bf16.msrb.mxu0 %v12277_v61  ;;  %v12285_v60 = vld [vmem:[#allocation22_spill] sm:$0xff]  ;;  %v12286_v61 = vld [vmem:[#allocation189_spill] sm:$0xff] }
 0x956   :  { %4155 = vmatpush.bf16.msrb.mxu3 %v12278_v22  ;;  %4181 = vmatpush.bf16.msra.mxu1 %v12279_v3  ;;  %v12287_v22 = vld [vmem:[#allocation190_spill] sm:$0xff]  ;;  %v12288_v3 = vld [vmem:[#allocation15_spill] sm:$0xff] }
 0x958   :  { %4141 = vmatpush.bf16.msra.mxu2 %v12282_v23  ;;  %4167 = vmatpush.bf16.msrb.mxu0 %v12283_v25  ;;  %v12290_v25 = vld [vmem:[#allocation17_spill] sm:$0xff]  ;;  %v12291_v23 = vld [vmem:[#allocation26_spill] sm:$0xff] }
 0x959   :  { %4156 = vmatmul.bf16.vlgmr.msrb.gmra.mxu3 %v9766_v10  ;;  %4182 = vmatmul.bf16.vlgmr.msra.gmra.mxu1 %v9766_v10  ;;  %v12292_v10 = vld [vmem:[#allocation19_spill] sm:$0xff] }
 0x95a   :  { %4269 = vmatpush.bf16.msra.mxu3 %v12280_v6  ;;  %4295 = vmatpush.bf16.msrb.mxu1 %v12281_v35  ;;  %v12289_v6 = vld [vmem:[#allocation16_spill] sm:$0xff]  ;;  %v12299_v35 = vld [vmem:[#allocation35_spill] sm:$0xff] }
 0x95c   :  { %4142 = vmatpush.bf16.msra.mxu2 %v12286_v61  ;;  %4168 = vmatpush.bf16.msrb.mxu0 %v12287_v22  ;;  %v12295_v61 = vld [vmem:[#allocation31_spill] sm:$0xff] }
 0x95d   :  { %v12296_v22 = vld [vmem:[#allocation23_spill] sm:$0xff] }
 0x95e   :  { %4270 = vmatpush.bf16.msra.mxu3 %v12284_v47  ;;  %4296 = vmatpush.bf16.msrb.mxu1 %v12285_v60  ;;  %v12293_v47 = vld [vmem:[#allocation20_spill] sm:$0xff]  ;;  %v12294_v60 = vld [vmem:[#allocation21_spill] sm:$0xff] }
 0x95f   :  { %4143 = vmatmul.bf16.vlgmr.msra.gmra.mxu2 %v9772_v56  ;;  %4169 = vmatmul.bf16.vlgmr.msrb.gmra.mxu0 %v9772_v56  ;;  %v12300_v56 = vld [vmem:[#allocation27_spill] sm:$0xff] }
 0x960   :  { %4256 = vmatpush.bf16.msrb.mxu2 %v12288_v3  ;;  %4282 = vmatpush.bf16.msra.mxu0 %v12289_v6  ;;  %v12297_v3 = vld [vmem:[#allocation24_spill] sm:$0xff]  ;;  %v12298_v6 = vld [vmem:[#allocation25_spill] sm:$0xff] }
 0x962   :  { %4271 = vmatpush.bf16.msra.mxu3 %v12290_v25  ;;  %4297 = vmatpush.bf16.msrb.mxu1 %v12291_v23  ;;  %v12301_v25 = vld [vmem:[#allocation28_spill] sm:$0xff]  ;;  %v12302_v23 = vld [vmem:[#allocation30_spill] sm:$0xff] }
 0x964   :  { %4257 = vmatpush.bf16.msrb.mxu2 %v12292_v10  ;;  %4283 = vmatpush.bf16.msra.mxu0 %v12293_v47  ;;  %v12303_v10 = vld [vmem:[#allocation39_spill] sm:$0xff]  ;;  %v12304_v47 = vld [vmem:[#allocation32_spill] sm:$0xff] }
 0x966   :  { %4272 = vmatpush.bf16.msra.mxu3 %v12294_v60  ;;  %4298 = vmatpush.bf16.msrb.mxu1 %v12295_v61  ;;  %v12305_v60 = vld [vmem:[#allocation33_spill] sm:$0xff]  ;;  %v12306_v61 = vld [vmem:[#allocation34_spill] sm:$0xff] }
 0x968   :  { %4258 = vmatpush.bf16.msrb.mxu2 %v12296_v22  ;;  %4284 = vmatpush.bf16.msra.mxu0 %v12297_v3  ;;  %v12307_v22 = vld [vmem:[#allocation47_spill] sm:$0xff]  ;;  %v12308_v3 = vld [vmem:[#allocation36_spill] sm:$0xff] }
 0x96a   :  { %4273 = vmatpush.bf16.msra.mxu3 %v12298_v6  ;;  %4299 = vmatpush.bf16.msrb.mxu1 %v12299_v35  ;;  %v12309_v6 = vld [vmem:[#allocation37_spill] sm:$0xff]  ;;  %v12310_v35 = vld [vmem:[#allocation38_spill] sm:$0xff] }
 0x96c   :  { %4259 = vmatpush.bf16.msrb.mxu2 %v12300_v56  ;;  %4285 = vmatpush.bf16.msra.mxu0 %v12301_v25  ;;  %v12311_v56 = vld [vmem:[#allocation53_spill] sm:$0xff]  ;;  %v12312_v25 = vld [vmem:[#allocation40_spill] sm:$0xff] }
 0x96e   :  { %4274 = vmatpush.bf16.msra.mxu3 %v12302_v23  ;;  %4300 = vmatpush.bf16.msrb.mxu1 %v12303_v10  ;;  %v12313_v23 = vld [vmem:[#allocation57_spill] sm:$0xff] }
 0x96f   :  { %v12314_v10 = vld [vmem:[#allocation41_spill] sm:$0xff] }
 0x970   :  { %4260 = vmatpush.bf16.msrb.mxu2 %v12304_v47  ;;  %4286 = vmatpush.bf16.msra.mxu0 %v12305_v60  ;;  %v12315_v47 = vld [vmem:[#allocation43_spill] sm:$0xff]  ;;  %v12316_v60 = vld [vmem:[#allocation48_spill] sm:$0xff] }
 0x972   :  { %4275 = vmatpush.bf16.msra.mxu3 %v12306_v61  ;;  %4301 = vmatpush.bf16.msrb.mxu1 %v12307_v22  ;;  %v12317_v61 = vld [vmem:[#allocation61_spill] sm:$0xff] }
 0x973   :  { %v12318_v22 = vld [vmem:[#allocation49_spill] sm:$0xff] }
 0x974   :  { %4261 = vmatpush.bf16.msrb.mxu2 %v12308_v3  ;;  %4287 = vmatpush.bf16.msra.mxu0 %v12309_v6  ;;  %v12319_v3 = vld [vmem:[#allocation50_spill] sm:$0xff]  ;;  %v12320_v6 = vld [vmem:[#allocation51_spill] sm:$0xff] }
 0x976   :  { %4276 = vmatpush.bf16.msra.mxu3 %v12310_v35  ;;  %4302 = vmatpush.bf16.msrb.mxu1 %v12311_v56  ;;  %v12321_v35 = vld [vmem:[#allocation52_spill] sm:$0xff]  ;;  %v12322_v56 = vld [vmem:[#allocation54_spill] sm:$0xff] }
 0x978   :  { %4262 = vmatpush.bf16.msrb.mxu2 %v12314_v10  ;;  %4288 = vmatpush.bf16.msra.mxu0 %v12315_v47  ;;  %v12325_v10 = vld [vmem:[#allocation59_spill] sm:$0xff]  ;;  %v12326_v47 = vld [vmem:[#allocation60_spill] sm:$0xff] }
 0x97a   :  { %4321 = vmatpush.bf16.msrb.mxu3 %v12312_v25  ;;  %4347 = vmatpush.bf16.msra.mxu1 %v12313_v23  ;;  %v12323_v25 = vld [vmem:[#allocation65_spill] sm:$0xff]  ;;  %v12324_v23 = vld [vmem:[#allocation58_spill] sm:$0xff] }
 0x97c   :  { %4263 = vmatpush.bf16.msrb.mxu2 %v12318_v22  ;;  %4289 = vmatpush.bf16.msra.mxu0 %v12319_v3  ;;  %v12329_v22 = vld [vmem:[#allocation63_spill] sm:$0xff]  ;;  %v12330_v3 = vld [vmem:[#allocation64_spill] sm:$0xff] }
 0x97e   :  { %4322 = vmatpush.bf16.msrb.mxu3 %v12316_v60  ;;  %4348 = vmatpush.bf16.msra.mxu1 %v12317_v61  ;;  %v12327_v60 = vld [vmem:[#allocation72_spill] sm:$0xff]  ;;  %v12328_v61 = vld [vmem:[#allocation62_spill] sm:$0xff] }
 0x980   :  { %4308 = vmatpush.bf16.msra.mxu2 %v12320_v6  ;;  %4334 = vmatpush.bf16.msrb.mxu0 %v12321_v35  ;;  %v12331_v6 = vld [vmem:[#allocation76_spill] sm:$0xff]  ;;  %v12332_v35 = vld [vmem:[#allocation69_spill] sm:$0xff] }
 0x982   :  { %4323 = vmatpush.bf16.msrb.mxu3 %v12322_v56  ;;  %4349 = vmatpush.bf16.msra.mxu1 %v12323_v25  ;;  %v12333_v56 = vld [vmem:[#allocation70_spill] sm:$0xff]  ;;  %v12334_v25 = vld [vmem:[#allocation71_spill] sm:$0xff] }
 0x984   :  { %4309 = vmatpush.bf16.msra.mxu2 %v12324_v23  ;;  %4335 = vmatpush.bf16.msrb.mxu0 %v12325_v10  ;;  %v12335_v23 = vld [vmem:[#allocation81_spill] sm:$0xff] }
 0x985   :  { %v12336_v10 = vld [vmem:[#allocation73_spill] sm:$0xff] }
 0x986   :  { %4324 = vmatpush.bf16.msrb.mxu3 %v12326_v47  ;;  %4350 = vmatpush.bf16.msra.mxu1 %v12327_v60  ;;  %v12337_v47 = vld [vmem:[#allocation74_spill] sm:$0xff]  ;;  %v12338_v60 = vld [vmem:[#allocation75_spill] sm:$0xff] }
 0x988   :  { %4310 = vmatpush.bf16.msra.mxu2 %v12328_v61  ;;  %4336 = vmatpush.bf16.msrb.mxu0 %v12329_v22  ;;  %v12339_v61 = vld [vmem:[#allocation87_spill] sm:$0xff]  ;;  %v12340_v22 = vld [vmem:[#allocation77_spill] sm:$0xff] }
 0x98a   :  { %4325 = vmatpush.bf16.msrb.mxu3 %v12330_v3  ;;  %4351 = vmatpush.bf16.msra.mxu1 %v12331_v6  ;;  %v12341_v3 = vld [vmem:[#allocation78_spill] sm:$0xff]  ;;  %v12342_v6 = vld [vmem:[#allocation79_spill] sm:$0xff] }
 0x98c   :  { %4311 = vmatpush.bf16.msra.mxu2 %v12332_v35  ;;  %4337 = vmatpush.bf16.msrb.mxu0 %v12333_v56  ;;  %v12343_v35 = vld [vmem:[#allocation91_spill] sm:$0xff] }
 0x98d   :  { %v12344_v56 = vld [vmem:[#allocation83_spill] sm:$0xff] }
 0x98e   :  { %4326 = vmatpush.bf16.msrb.mxu3 %v12334_v25  ;;  %4352 = vmatpush.bf16.msra.mxu1 %v12335_v23  ;;  %v12345_v25 = vld [vmem:[#allocation86_spill] sm:$0xff]  ;;  %v12346_v23 = vld [vmem:[#allocation89_spill] sm:$0xff] }
 0x990   :  { %4312 = vmatpush.bf16.msra.mxu2 %v12336_v10  ;;  %4338 = vmatpush.bf16.msrb.mxu0 %v12337_v47  ;;  %v12347_v10 = vld [vmem:[#allocation90_spill] sm:$0xff] }
 0x992   :  { %4327 = vmatpush.bf16.msrb.mxu3 %v12338_v60  ;;  %4353 = vmatpush.bf16.msra.mxu1 %v12339_v61  ;;  %v12348_v61 = vld [vmem:[#allocation66_spill] sm:$0xff] }
 0x994   :  { %4313 = vmatpush.bf16.msra.mxu2 %v12340_v22  ;;  %4339 = vmatpush.bf16.msrb.mxu0 %v12341_v3 }
 0x996   :  { %4328 = vmatpush.bf16.msrb.mxu3 %v12342_v6  ;;  %4354 = vmatpush.bf16.msra.mxu1 %v12343_v35  ;;  %v4027_v47 = vpop.f32.mrf.mxu1 }
 0x998   :  { %4314 = vmatpush.bf16.msra.mxu2 %v12344_v56  ;;  %4340 = vmatpush.bf16.msrb.mxu0 %v12345_v25 }
 0x99c   :  { %4315 = vmatpush.bf16.msra.mxu2 %v12346_v23  ;;  %4341 = vmatpush.bf16.msrb.mxu0 %v12347_v10  ;;  %v4001_v60 = vpop.f32.mrf.mxu3  ;;  %v4014_v40 = vpop.f32.mrf.mxu0 }
 0x99d   :  { %v4015_v27 = vadd.f32 %v4014_v40, %v12348_v61 }
 0x99e   :  { %v4029_v22 = vpop.f32.mrf.mxu1 }
 0x99f   :  { %v4028_v12 = vadd.f32 %v4027_v47, %v4015_v27 }
 0x9a1   :  { %v4188_v20 = vmul.f32 0.5, %v4028_v12 }
 0x9a2   :  { %v3988_v3 = vpop.f32.mrf.mxu2 }
 0x9a3   :  { %v3989_v6 = vadd.f32 %v3988_v3, %v12349_v39 }
 0x9a4   :  { %v4003_v28 = vpop.f32.mrf.mxu3  ;;  %v4016_v35 = vpop.f32.mrf.mxu0 }
 0x9a5   :  { %v4002_v33 = vadd.f32 %v4001_v60, %v3989_v6  ;;  %v12350_v28 = vld [vmem:[#allocation208_spill] sm:$0xff] }
 0x9a6   :  { %v4079_v56 = vpop.f32.mrf.mxu1 }
 0x9aa   :  { %v3990_v7 = vpop.f32.mrf.mxu2 }
 0x9ab   :  { %v12351_v7 = vld [vmem:[#allocation209_spill] sm:$0xff] }
 0x9ac   :  { %v4053_v25 = vpop.f32.mrf.mxu3  ;;  %v4066_v42 = vpop.f32.mrf.mxu0 }
 0x9ad   :  { %v4067_v35 = vadd.f32 %v4066_v42, %v12350_v28 }
 0x9ae   :  { %v4081_v23 = vpop.f32.mrf.mxu1 }
 0x9af   :  { %v4080_v60 = vadd.f32 %v4079_v56, %v4067_v35  ;;  %v12354_v56 = vld [vmem:[#allocation213_spill] sm:$0xff] }
 0x9b1   :  { %v4190_v55 = vmul.f32 0.5, %v4080_v60 }
 0x9b2   :  { %v4040_v62 = vpop.f32.mrf.mxu2 }
 0x9b3   :  { %v4041_v3 = vadd.f32 %v4040_v62, %v12351_v7  ;;  %6944 = vtanh.f32 %v4190_v55  ;;  %v4187_v62 = vmul.f32 0.5, %v4002_v33  ;;  %v12355_v55 = vld [vmem:[#allocation211_spill] sm:$0xff] }
 0x9b4   :  { %v4055_v10 = vpop.f32.mrf.mxu3  ;;  %v4068_v31 = vpop.f32.mrf.mxu0  ;;  %6946 = vtanh.f32 %v4188_v20 }
 0x9b5   :  { %v12352_v10 = vld [vmem:[#allocation212_spill] sm:$0xff]  ;;  %v4054_v9 = vadd.f32 %v4053_v25, %v4041_v3 }
 0x9b6   :  { %v4131_v44 = vpop.f32.mrf.mxu1 }
 0x9b7   :  { %v4189_v42 = vmul.f32 0.5, %v4054_v9 }
 0x9ba   :  { %v4042_v41 = vpop.f32.mrf.mxu2 }
 0x9bc   :  { %v4105_v29 = vpop.f32.mrf.mxu3  ;;  %v4118_v40 = vpop.f32.mrf.mxu0 }
 0x9be   :  { %v4133_v61 = vpop.f32.mrf.mxu1 }
 0x9c2   :  { %v4092_v27 = vpop.f32.mrf.mxu2 }
 0x9c4   :  { %v4107_v47 = vpop.f32.mrf.mxu3  ;;  %v4120_v22 = vpop.f32.mrf.mxu0 }
 0x9c5   :  { %v12353_v47 = vld [vmem:[#allocation210_spill] sm:$0xff] }
 0x9c6   :  { %v4119_v22 = vadd.f32 %v4118_v40, %v12353_v47 }
 0x9c8   :  { %v4132_v50 = vadd.f32 %v4131_v44, %v4119_v22 }
 0x9ca   :  { %v4094_v39 = vpop.f32.mrf.mxu2 }
 0x9d6   :  { %v4183_v6 = vpop.f32.mrf.mxu1 }
 0x9dc   :  { %v4157_v16 = vpop.f32.mrf.mxu3  ;;  %v4170_v23 = vpop.f32.mrf.mxu0 }
 0x9dd   :  { %v4171_v31 = vadd.f32 %v4170_v23, %v12352_v10  ;;  %v6945_v23 = vpop.eup %6944 }
 0x9de   :  { %v4185_v41 = vpop.f32.mrf.mxu1  ;;  %v6947_v25 = vpop.eup %6946  ;;  %v4206_v40 = vmul.f32 0.5, %v6945_v23 }
 0x9df   :  { %v4184_v19 = vadd.f32 %v4183_v6, %v4171_v31  ;;  %v4192_v6 = vmul.f32 0.5, %v4132_v50  ;;  %v4204_v10 = vmul.f32 0.5, %v6947_v25 }
 0x9e1   :  { %v4194_v61 = vmul.f32 0.5, %v4184_v19  ;;  %v4093_v19 = vadd.f32 %v4092_v27, %v12355_v55  ;;  %v4212_v22 = vadd.f32 0.5, %v4204_v10 }
 0x9e2   :  { %v4144_v39 = vpop.f32.mrf.mxu2 }
 0x9e3   :  { %6948 = vtanh.f32 %v4194_v61  ;;  %v4145_v28 = vadd.f32 %v4144_v39, %v12354_v56  ;;  %v4106_v31 = vadd.f32 %v4105_v29, %v4093_v19 }
 0x9e4   :  { %v4159_v35 = vpop.f32.mrf.mxu3  ;;  %v4172_v7 = vpop.f32.mrf.mxu0  ;;  %6950 = vtanh.f32 %v4189_v42 }
 0x9e5   :  { %v4158_v60 = vadd.f32 %v4157_v16, %v4145_v28  ;;  %6952 = vtanh.f32 %v4187_v62  ;;  %v4214_v16 = vadd.f32 0.5, %v4206_v40  ;;  %v4191_v42 = vmul.f32 0.5, %v4106_v31 }
 0x9e7   :  { %v4193_v12 = vmul.f32 0.5, %v4158_v60  ;;  %v4224_v62 = vmul.f32 %v4214_v16, %v9756_v36  ;;  %v12356_v16 = vld [vmem:[#allocation113_spill] sm:$0xff] }
 0x9e9   :  { %v6949_v20 = vpop.eup %6948  ;;  %6954 = vtanh.f32 %v4193_v12 }
 0x9ea   :  { %v4210_v9 = vmul.f32 0.5, %v6949_v20  ;;  %v4146_v3 = vpop.f32.mrf.mxu2  ;;  %v6951_v41 = vpop.eup %6950  ;;  %6956 = vtanh.f32 %v4192_v6 }
 0x9eb   :  { %v6953_v61 = vpop.eup %6952  ;;  %v4205_v39 = vmul.f32 0.5, %v6951_v41  ;;  %6958 = vtanh.f32 %v4191_v42  ;;  %v12361_v42 = vld [vmem:[#allocation148_spill] sm:$0xff] }
 0x9ec   :  { %v4218_v33 = vadd.f32 0.5, %v4210_v9  ;;  %v4203_v28 = vmul.f32 0.5, %v6953_v61 }
 0x9ed   :  { %v4213_v60 = vadd.f32 0.5, %v4205_v39  ;;  %v12360_v39 = vld [vmem:[#allocation147_spill] sm:$0xff] }
 0x9ee   :  { %v4220_v44 = vmul.f32 2.0, %v4218_v33  ;;  %v4211_v12 = vadd.f32 0.5, %v4203_v28  ;;  %v12364_v28 = vld [vmem:[#allocation156_spill] sm:$0xff] }
 0x9ef   :  { %v6955_v47 = vpop.eup %6954  ;;  %v4223_v19 = vmul.f32 %v4213_v60, %v9760_v17  ;;  %v12369_v60 = vld [vmem:[#allocation160_spill] sm:$0xff] }
 0x9f0   :  { %v6611_v56 = vadd.f32 -1.0, %v4220_v44  ;;  %v4209_v27 = vmul.f32 0.5, %v6955_v47  ;;  %v6957_v7 = vpop.eup %6956  ;;  %v12357_v44 = vld [vmem:[#allocation121_spill] sm:$0xff] }
 0x9f1   :  { %v4208_v55 = vmul.f32 0.5, %v6957_v7  ;;  %v6959_v40 = vpop.eup %6958  ;;  %v12358_v47 = vld [vmem:[#allocation145_spill] sm:$0xff]  ;;  %v12368_v7 = vld [vmem:[#allocation159_spill] sm:$0xff] }
 0x9f2   :  { %v4226_v50 = vmul.f32 %v6611_v56, %v4212_v22  ;;  %v4217_v35 = vadd.f32 0.5, %v4209_v27  ;;  %v4207_v3 = vmul.f32 0.5, %v6959_v40  ;;  %v12359_v22 = vld [vmem:[#allocation146_spill] sm:$0xff]  ;;  %v12362_v56 = vld [vmem:[#allocation115_spill] sm:$0xff]  ;;  %v12363_v27 = vld [vmem:[#allocation125_spill] sm:$0xff] }
 0x9f3   :  { %v4216_v36 = vadd.f32 0.5, %v4208_v55  ;;  %v12373_v55 = vld [vmem:[#allocation168_spill] sm:$0xff]  ;;  %v12376_v40 = vld [vmem:[#allocation171_spill] sm:$0xff] }
 0x9f4   :  { %v9923_v29 = vadd.f32 %v4226_v50, %v4224_v62  ;;  %v4219_v23 = vmul.f32 2.0, %v4217_v35  ;;  %v4215_v33 = vadd.f32 0.5, %v4207_v3  ;;  %v12365_v62 = vld [vmem:[#allocation157_spill] sm:$0xff]  ;;  %v12366_v50 = vld [vmem:[#allocation120_spill] sm:$0xff]  ;;  %v12367_v35 = vld [vmem:[#allocation131_spill] sm:$0xff] }
 0x9f5   :  { %v12379_v3 = vld [vmem:[#allocation151_spill] sm:$0xff] }
 0x9f6   :  { %6960 = vtanh.f32 %v9923_v29  ;;  %v6610_v25 = vadd.f32 -1.0, %v4219_v23  ;;  %v12370_v23 = vld [vmem:[#allocation122_spill] sm:$0xff] }
 0x9f8   :  { %v4225_v20 = vmul.f32 %v6610_v25, %v4211_v12  ;;  %v12371_v12 = vld [vmem:[#allocation137_spill] sm:$0xff]  ;;  %v12372_v25 = vld [vmem:[#allocation167_spill] sm:$0xff] }
 0x9fa   :  { %v9927_v6 = vadd.f32 %v4225_v20, %v4223_v19  ;;  %v12374_v19 = vld [vmem:[#allocation130_spill] sm:$0xff] }
 0x9fb   :  { %v12375_v20 = vld [vmem:[#allocation142_spill] sm:$0xff] }
 0x9fc   :  { %v6961_v9 = vpop.eup %6960  ;;  %6962 = vtanh.f32 %v9927_v6 }
 0x9fd   :  { %v4232_v10 = vmul.f32 %v6961_v9, %v4216_v36  ;;  %v12377_v36 = vld [vmem:[#allocation172_spill] sm:$0xff]  ;;  %v12378_v9 = vld [vmem:[#allocation135_spill] sm:$0xff] }
 0x9ff   :  { %6612 = vst [vmem:[%s10941_s5 + $0x10] sm:$0x3] %v4232_v10  ;;  %v9933_v31 = vpack.c.bf16 %v4232_v10, %v4232_v10  ;;  %v12380_v10 = vld [vmem:[#allocation177_spill] sm:$0xff] }
 0xa01   :  { %4277 = vmatmul.bf16.vlgmr.msra.gmra.mxu3 %v9933_v31  ;;  %4303 = vmatmul.bf16.vlgmr.msrb.gmra.mxu1 %v9933_v31 }
 0xa02   :  { %v6963_v17 = vpop.eup %6962  ;;  %4373 = vmatpush.bf16.msra.mxu3 %v11525_v63  ;;  %4399 = vmatpush.bf16.msrb.mxu1 %v11526_v53 }
 0xa03   :  { %v4231_v41 = vmul.f32 %v6963_v17, %v4215_v33  ;;  %v12381_v33 = vld [vmem:[#allocation178_spill] sm:$0xff]  ;;  %v12382_v17 = vld [vmem:[#allocation141_spill] sm:$0xff] }
 0xa05   :  { %v9939_v61 = vpack.c.bf16 %v4231_v41, %v4231_v41  ;;  %v12383_v41 = vld [vmem:[#allocation158_spill] sm:$0xff] }
 0xa06   :  { %4374 = vmatpush.bf16.msra.mxu3 %v11527_v34  ;;  %4400 = vmatpush.bf16.msrb.mxu1 %v11528_v1 }
 0xa07   :  { %4264 = vmatmul.bf16.vlgmr.msrb.gmra.mxu2 %v9939_v61  ;;  %4290 = vmatmul.bf16.vlgmr.msra.gmra.mxu0 %v9939_v61 }
 0xa08   :  { %4360 = vmatpush.bf16.msrb.mxu2 %v11529_v57  ;;  %4386 = vmatpush.bf16.msra.mxu0 %v11530_v58 }
 0xa0a   :  { %4375 = vmatpush.bf16.msra.mxu3 %v11531_v45  ;;  %4401 = vmatpush.bf16.msrb.mxu1 %v11532_v11 }
 0xa0c   :  { %4361 = vmatpush.bf16.msrb.mxu2 %v7933_v0  ;;  %4387 = vmatpush.bf16.msra.mxu0 %v7935_v49 }
 0xa0e   :  { %4376 = vmatpush.bf16.msra.mxu3 %v11533_v21  ;;  %4402 = vmatpush.bf16.msrb.mxu1 %v11534_v52 }
 0xa10   :  { %4362 = vmatpush.bf16.msrb.mxu2 %v11535_v38  ;;  %4388 = vmatpush.bf16.msra.mxu0 %v11536_v13 }
 0xa11   :  { %4329 = vmatmul.bf16.vlgmr.msrb.gmra.mxu3 %v9933_v31  ;;  %4355 = vmatmul.bf16.vlgmr.msra.gmra.mxu1 %v9933_v31 }
 0xa12   :  { %4377 = vmatpush.bf16.msra.mxu3 %v11537_v54  ;;  %4403 = vmatpush.bf16.msrb.mxu1 %v11538_v37 }
 0xa14   :  { %4363 = vmatpush.bf16.msrb.mxu2 %v7975_v2  ;;  %4389 = vmatpush.bf16.msra.mxu0 %v7977_v30 }
 0xa16   :  { %4378 = vmatpush.bf16.msra.mxu3 %v11539_v15  ;;  %4404 = vmatpush.bf16.msrb.mxu1 %v11540_v59 }
 0xa17   :  { %4316 = vmatmul.bf16.vlgmr.msra.gmra.mxu2 %v9939_v61  ;;  %4342 = vmatmul.bf16.vlgmr.msrb.gmra.mxu0 %v9939_v61 }
 0xa18   :  { %4364 = vmatpush.bf16.msrb.mxu2 %v11541_v4  ;;  %4390 = vmatpush.bf16.msra.mxu0 %v11542_v43 }
 0xa1a   :  { %4379 = vmatpush.bf16.msra.mxu3 %v11543_v24  ;;  %4405 = vmatpush.bf16.msrb.mxu1 %v11544_v46 }
 0xa1c   :  { %4365 = vmatpush.bf16.msrb.mxu2 %v11628_v18  ;;  %4391 = vmatpush.bf16.msra.mxu0 %v11546_v48 }
 0xa1e   :  { %4380 = vmatpush.bf16.msra.mxu3 %v11547_v14  ;;  %4406 = vmatpush.bf16.msrb.mxu1 %v11548_v26 }
 0xa20   :  { %4366 = vmatpush.bf16.msrb.mxu2 %v11630_v32  ;;  %4392 = vmatpush.bf16.msra.mxu0 %v8052_v5 }
 0xa21   :  { %4381 = vmatmul.bf16.vlgmr.msra.gmra.mxu3 %v9933_v31  ;;  %4407 = vmatmul.bf16.vlgmr.msrb.gmra.mxu1 %v9933_v31 }
 0xa22   :  { %4425 = vmatpush.bf16.msrb.mxu3 %v11549_v51  ;;  %4451 = vmatpush.bf16.msra.mxu1 %v11629_v8 }
 0xa24   :  { %4367 = vmatpush.bf16.msrb.mxu2 %v12358_v47  ;;  %4393 = vmatpush.bf16.msra.mxu0 %v12359_v22 }
 0xa26   :  { %4426 = vmatpush.bf16.msrb.mxu3 %v12356_v16  ;;  %4452 = vmatpush.bf16.msra.mxu1 %v12357_v44 }
 0xa27   :  { %4368 = vmatmul.bf16.vlgmr.msrb.gmra.mxu2 %v9939_v61  ;;  %4394 = vmatmul.bf16.vlgmr.msra.gmra.mxu0 %v9939_v61 }
 0xa28   :  { %4412 = vmatpush.bf16.msra.mxu2 %v12360_v39  ;;  %4438 = vmatpush.bf16.msrb.mxu0 %v12361_v42 }
 0xa2a   :  { %4427 = vmatpush.bf16.msrb.mxu3 %v12362_v56  ;;  %4453 = vmatpush.bf16.msra.mxu1 %v12363_v27 }
 0xa2c   :  { %4413 = vmatpush.bf16.msra.mxu2 %v12364_v28  ;;  %4439 = vmatpush.bf16.msrb.mxu0 %v12365_v62 }
 0xa2e   :  { %4428 = vmatpush.bf16.msrb.mxu3 %v12366_v50  ;;  %4454 = vmatpush.bf16.msra.mxu1 %v12367_v35 }
 0xa30   :  { %4414 = vmatpush.bf16.msra.mxu2 %v12368_v7  ;;  %4440 = vmatpush.bf16.msrb.mxu0 %v12369_v60 }
 0xa32   :  { %4429 = vmatpush.bf16.msrb.mxu3 %v12370_v23  ;;  %4455 = vmatpush.bf16.msra.mxu1 %v12371_v12  ;;  %v12453_v12 = vld [vmem:[#allocation68_spill] sm:$0xff] }
 0xa34   :  { %4415 = vmatpush.bf16.msra.mxu2 %v12372_v25  ;;  %4441 = vmatpush.bf16.msrb.mxu0 %v12373_v55  ;;  %v12384_v55 = vld [vmem:[#allocation13_spill] sm:$0xff] }
 0xa36   :  { %4430 = vmatpush.bf16.msrb.mxu3 %v12374_v19  ;;  %4456 = vmatpush.bf16.msra.mxu1 %v12375_v20  ;;  %v12385_v19 = vld [vmem:[#allocation18_spill] sm:$0xff]  ;;  %v12386_v20 = vld [vmem:[#allocation183_spill] sm:$0xff] }
 0xa38   :  { %4416 = vmatpush.bf16.msra.mxu2 %v12376_v40  ;;  %4442 = vmatpush.bf16.msrb.mxu0 %v12377_v36  ;;  %v12387_v40 = vld [vmem:[#allocation184_spill] sm:$0xff] }
 0xa3a   :  { %4431 = vmatpush.bf16.msrb.mxu3 %v12378_v9  ;;  %4457 = vmatpush.bf16.msra.mxu1 %v12379_v3  ;;  %v12388_v3 = vld [vmem:[#allocation14_spill] sm:$0xff] }
 0xa3c   :  { %4417 = vmatpush.bf16.msra.mxu2 %v12380_v10  ;;  %4443 = vmatpush.bf16.msrb.mxu0 %v12381_v33  ;;  %v12389_v10 = vld [vmem:[#allocation22_spill] sm:$0xff]  ;;  %v12390_v33 = vld [vmem:[#allocation189_spill] sm:$0xff] }
 0xa3e   :  { %4432 = vmatpush.bf16.msrb.mxu3 %v12382_v17  ;;  %4458 = vmatpush.bf16.msra.mxu1 %v12383_v41  ;;  %v12391_v17 = vld [vmem:[#allocation190_spill] sm:$0xff]  ;;  %v12392_v41 = vld [vmem:[#allocation15_spill] sm:$0xff] }
 0xa40   :  { %4418 = vmatpush.bf16.msra.mxu2 %v12386_v20  ;;  %4444 = vmatpush.bf16.msrb.mxu0 %v12387_v40  ;;  %v12394_v40 = vld [vmem:[#allocation17_spill] sm:$0xff]  ;;  %v12395_v20 = vld [vmem:[#allocation26_spill] sm:$0xff] }
 0xa41   :  { %4433 = vmatmul.bf16.vlgmr.msrb.gmra.mxu3 %v9933_v31  ;;  %4459 = vmatmul.bf16.vlgmr.msra.gmra.mxu1 %v9933_v31  ;;  %v12396_v31 = vld [vmem:[#allocation19_spill] sm:$0xff] }
 0xa42   :  { %4546 = vmatpush.bf16.msra.mxu3 %v12384_v55  ;;  %4572 = vmatpush.bf16.msrb.mxu1 %v12385_v19  ;;  %v12393_v55 = vld [vmem:[#allocation16_spill] sm:$0xff]  ;;  %v12403_v19 = vld [vmem:[#allocation35_spill] sm:$0xff] }
 0xa44   :  { %4419 = vmatpush.bf16.msra.mxu2 %v12390_v33  ;;  %4445 = vmatpush.bf16.msrb.mxu0 %v12391_v17  ;;  %v12399_v33 = vld [vmem:[#allocation31_spill] sm:$0xff] }
 0xa45   :  { %v12400_v17 = vld [vmem:[#allocation23_spill] sm:$0xff] }
 0xa46   :  { %4547 = vmatpush.bf16.msra.mxu3 %v12388_v3  ;;  %4573 = vmatpush.bf16.msrb.mxu1 %v12389_v10  ;;  %v12397_v3 = vld [vmem:[#allocation20_spill] sm:$0xff]  ;;  %v12398_v10 = vld [vmem:[#allocation21_spill] sm:$0xff] }
 0xa47   :  { %4420 = vmatmul.bf16.vlgmr.msra.gmra.mxu2 %v9939_v61  ;;  %4446 = vmatmul.bf16.vlgmr.msrb.gmra.mxu0 %v9939_v61  ;;  %v12404_v61 = vld [vmem:[#allocation27_spill] sm:$0xff] }
 0xa48   :  { %4533 = vmatpush.bf16.msrb.mxu2 %v12392_v41  ;;  %4559 = vmatpush.bf16.msra.mxu0 %v12393_v55  ;;  %v12401_v41 = vld [vmem:[#allocation24_spill] sm:$0xff]  ;;  %v12402_v55 = vld [vmem:[#allocation25_spill] sm:$0xff] }
 0xa4a   :  { %4548 = vmatpush.bf16.msra.mxu3 %v12394_v40  ;;  %4574 = vmatpush.bf16.msrb.mxu1 %v12395_v20  ;;  %v12405_v40 = vld [vmem:[#allocation28_spill] sm:$0xff]  ;;  %v12406_v20 = vld [vmem:[#allocation30_spill] sm:$0xff] }
 0xa4c   :  { %4534 = vmatpush.bf16.msrb.mxu2 %v12396_v31  ;;  %4560 = vmatpush.bf16.msra.mxu0 %v12397_v3  ;;  %v12407_v31 = vld [vmem:[#allocation39_spill] sm:$0xff]  ;;  %v12408_v3 = vld [vmem:[#allocation32_spill] sm:$0xff] }
 0xa4e   :  { %4549 = vmatpush.bf16.msra.mxu3 %v12398_v10  ;;  %4575 = vmatpush.bf16.msrb.mxu1 %v12399_v33  ;;  %v12409_v10 = vld [vmem:[#allocation33_spill] sm:$0xff]  ;;  %v12410_v33 = vld [vmem:[#allocation34_spill] sm:$0xff] }
 0xa50   :  { %4535 = vmatpush.bf16.msrb.mxu2 %v12400_v17  ;;  %4561 = vmatpush.bf16.msra.mxu0 %v12401_v41  ;;  %v12411_v17 = vld [vmem:[#allocation47_spill] sm:$0xff]  ;;  %v12412_v41 = vld [vmem:[#allocation36_spill] sm:$0xff] }
 0xa52   :  { %4550 = vmatpush.bf16.msra.mxu3 %v12402_v55  ;;  %4576 = vmatpush.bf16.msrb.mxu1 %v12403_v19  ;;  %v12413_v55 = vld [vmem:[#allocation37_spill] sm:$0xff]  ;;  %v12414_v19 = vld [vmem:[#allocation38_spill] sm:$0xff] }
 0xa54   :  { %4536 = vmatpush.bf16.msrb.mxu2 %v12404_v61  ;;  %4562 = vmatpush.bf16.msra.mxu0 %v12405_v40  ;;  %v12415_v61 = vld [vmem:[#allocation53_spill] sm:$0xff]  ;;  %v12416_v40 = vld [vmem:[#allocation40_spill] sm:$0xff] }
 0xa56   :  { %4551 = vmatpush.bf16.msra.mxu3 %v12406_v20  ;;  %4577 = vmatpush.bf16.msrb.mxu1 %v12407_v31  ;;  %v12417_v20 = vld [vmem:[#allocation57_spill] sm:$0xff] }
 0xa57   :  { %v12418_v31 = vld [vmem:[#allocation41_spill] sm:$0xff] }
 0xa58   :  { %4537 = vmatpush.bf16.msrb.mxu2 %v12408_v3  ;;  %4563 = vmatpush.bf16.msra.mxu0 %v12409_v10  ;;  %v12419_v3 = vld [vmem:[#allocation43_spill] sm:$0xff]  ;;  %v12420_v10 = vld [vmem:[#allocation48_spill] sm:$0xff] }
 0xa5a   :  { %4552 = vmatpush.bf16.msra.mxu3 %v12410_v33  ;;  %4578 = vmatpush.bf16.msrb.mxu1 %v12411_v17  ;;  %v12421_v33 = vld [vmem:[#allocation61_spill] sm:$0xff] }
 0xa5b   :  { %v12422_v17 = vld [vmem:[#allocation49_spill] sm:$0xff] }
 0xa5c   :  { %4538 = vmatpush.bf16.msrb.mxu2 %v12412_v41  ;;  %4564 = vmatpush.bf16.msra.mxu0 %v12413_v55  ;;  %v12423_v41 = vld [vmem:[#allocation50_spill] sm:$0xff]  ;;  %v12424_v55 = vld [vmem:[#allocation51_spill] sm:$0xff] }
 0xa5e   :  { %4553 = vmatpush.bf16.msra.mxu3 %v12414_v19  ;;  %4579 = vmatpush.bf16.msrb.mxu1 %v12415_v61  ;;  %v12425_v19 = vld [vmem:[#allocation52_spill] sm:$0xff]  ;;  %v12426_v61 = vld [vmem:[#allocation54_spill] sm:$0xff] }
 0xa60   :  { %4539 = vmatpush.bf16.msrb.mxu2 %v12418_v31  ;;  %4565 = vmatpush.bf16.msra.mxu0 %v12419_v3  ;;  %v12429_v31 = vld [vmem:[#allocation59_spill] sm:$0xff]  ;;  %v12430_v3 = vld [vmem:[#allocation60_spill] sm:$0xff] }
 0xa62   :  { %4598 = vmatpush.bf16.msrb.mxu3 %v12416_v40  ;;  %4624 = vmatpush.bf16.msra.mxu1 %v12417_v20  ;;  %v12427_v40 = vld [vmem:[#allocation65_spill] sm:$0xff]  ;;  %v12428_v20 = vld [vmem:[#allocation58_spill] sm:$0xff] }
 0xa64   :  { %4540 = vmatpush.bf16.msrb.mxu2 %v12422_v17  ;;  %4566 = vmatpush.bf16.msra.mxu0 %v12423_v41  ;;  %v12433_v17 = vld [vmem:[#allocation63_spill] sm:$0xff]  ;;  %v12434_v41 = vld [vmem:[#allocation64_spill] sm:$0xff] }
 0xa66   :  { %4599 = vmatpush.bf16.msrb.mxu3 %v12420_v10  ;;  %4625 = vmatpush.bf16.msra.mxu1 %v12421_v33  ;;  %v12431_v10 = vld [vmem:[#allocation72_spill] sm:$0xff]  ;;  %v12432_v33 = vld [vmem:[#allocation62_spill] sm:$0xff] }
 0xa68   :  { %4585 = vmatpush.bf16.msra.mxu2 %v12424_v55  ;;  %4611 = vmatpush.bf16.msrb.mxu0 %v12425_v19  ;;  %v12435_v55 = vld [vmem:[#allocation76_spill] sm:$0xff]  ;;  %v12436_v19 = vld [vmem:[#allocation69_spill] sm:$0xff] }
 0xa6a   :  { %4600 = vmatpush.bf16.msrb.mxu3 %v12426_v61  ;;  %4626 = vmatpush.bf16.msra.mxu1 %v12427_v40  ;;  %v12437_v61 = vld [vmem:[#allocation70_spill] sm:$0xff]  ;;  %v12438_v40 = vld [vmem:[#allocation71_spill] sm:$0xff] }
 0xa6c   :  { %4586 = vmatpush.bf16.msra.mxu2 %v12428_v20  ;;  %4612 = vmatpush.bf16.msrb.mxu0 %v12429_v31  ;;  %v12439_v20 = vld [vmem:[#allocation81_spill] sm:$0xff] }
 0xa6d   :  { %v12440_v31 = vld [vmem:[#allocation73_spill] sm:$0xff] }
 0xa6e   :  { %4601 = vmatpush.bf16.msrb.mxu3 %v12430_v3  ;;  %4627 = vmatpush.bf16.msra.mxu1 %v12431_v10  ;;  %v12441_v3 = vld [vmem:[#allocation74_spill] sm:$0xff]  ;;  %v12442_v10 = vld [vmem:[#allocation75_spill] sm:$0xff] }
 0xa70   :  { %4587 = vmatpush.bf16.msra.mxu2 %v12432_v33  ;;  %4613 = vmatpush.bf16.msrb.mxu0 %v12433_v17  ;;  %v12443_v33 = vld [vmem:[#allocation87_spill] sm:$0xff]  ;;  %v12444_v17 = vld [vmem:[#allocation77_spill] sm:$0xff] }
 0xa72   :  { %4602 = vmatpush.bf16.msrb.mxu3 %v12434_v41  ;;  %4628 = vmatpush.bf16.msra.mxu1 %v12435_v55  ;;  %v12445_v41 = vld [vmem:[#allocation78_spill] sm:$0xff]  ;;  %v12446_v55 = vld [vmem:[#allocation79_spill] sm:$0xff] }
 0xa74   :  { %4588 = vmatpush.bf16.msra.mxu2 %v12436_v19  ;;  %4614 = vmatpush.bf16.msrb.mxu0 %v12437_v61  ;;  %v12447_v19 = vld [vmem:[#allocation91_spill] sm:$0xff] }
 0xa75   :  { %v12448_v61 = vld [vmem:[#allocation83_spill] sm:$0xff] }
 0xa76   :  { %4603 = vmatpush.bf16.msrb.mxu3 %v12438_v40  ;;  %4629 = vmatpush.bf16.msra.mxu1 %v12439_v20  ;;  %v12449_v40 = vld [vmem:[#allocation86_spill] sm:$0xff]  ;;  %v12450_v20 = vld [vmem:[#allocation89_spill] sm:$0xff] }
 0xa78   :  { %4589 = vmatpush.bf16.msra.mxu2 %v12440_v31  ;;  %4615 = vmatpush.bf16.msrb.mxu0 %v12441_v3  ;;  %v12451_v31 = vld [vmem:[#allocation90_spill] sm:$0xff] }
 0xa7a   :  { %4604 = vmatpush.bf16.msrb.mxu3 %v12442_v10  ;;  %4630 = vmatpush.bf16.msra.mxu1 %v12443_v33  ;;  %v12452_v33 = vld [vmem:[#allocation42_spill] sm:$0xff] }
 0xa7c   :  { %4590 = vmatpush.bf16.msra.mxu2 %v12444_v17  ;;  %4616 = vmatpush.bf16.msrb.mxu0 %v12445_v41 }
 0xa7e   :  { %4605 = vmatpush.bf16.msrb.mxu3 %v12446_v55  ;;  %4631 = vmatpush.bf16.msra.mxu1 %v12447_v19  ;;  %v4304_v3 = vpop.f32.mrf.mxu1 }
 0xa80   :  { %4591 = vmatpush.bf16.msra.mxu2 %v12448_v61  ;;  %4617 = vmatpush.bf16.msrb.mxu0 %v12449_v40 }
 0xa84   :  { %4592 = vmatpush.bf16.msra.mxu2 %v12450_v20  ;;  %4618 = vmatpush.bf16.msrb.mxu0 %v12451_v31  ;;  %v4278_v10 = vpop.f32.mrf.mxu3  ;;  %v4291_v9 = vpop.f32.mrf.mxu0 }
 0xa85   :  { %v4292_v36 = vadd.f32 %v4291_v9, %v12452_v33 }
 0xa86   :  { %v4306_v17 = vpop.f32.mrf.mxu1 }
 0xa87   :  { %v4305_v25 = vadd.f32 %v4304_v3, %v4292_v36 }
 0xa89   :  { %v4465_v22 = vmul.f32 0.5, %v4305_v25 }
 0xa8a   :  { %v4265_v41 = vpop.f32.mrf.mxu2 }
 0xa8b   :  { %v4266_v55 = vadd.f32 %v4265_v41, %v12453_v12 }
 0xa8c   :  { %v4280_v23 = vpop.f32.mrf.mxu3  ;;  %v4293_v19 = vpop.f32.mrf.mxu0 }
 0xa8d   :  { %v4279_v60 = vadd.f32 %v4278_v10, %v4266_v55  ;;  %v12454_v23 = vld [vmem:[#allocation67_spill] sm:$0xff] }
 0xa8e   :  { %v4356_v61 = vpop.f32.mrf.mxu1 }
 0xa92   :  { %v4267_v7 = vpop.f32.mrf.mxu2 }
 0xa93   :  { %v12455_v7 = vld [vmem:[#allocation46_spill] sm:$0xff] }
 0xa94   :  { %v4330_v40 = vpop.f32.mrf.mxu3  ;;  %v4343_v35 = vpop.f32.mrf.mxu0 }
 0xa95   :  { %v4344_v19 = vadd.f32 %v4343_v35, %v12454_v23 }
 0xa96   :  { %v4358_v20 = vpop.f32.mrf.mxu1 }
 0xa97   :  { %v4357_v10 = vadd.f32 %v4356_v61, %v4344_v19  ;;  %v12458_v61 = vld [vmem:[#allocation84_spill] sm:$0xff] }
 0xa99   :  { %v4467_v39 = vmul.f32 0.5, %v4357_v10 }
 0xa9a   :  { %v4317_v50 = vpop.f32.mrf.mxu2 }
 0xa9b   :  { %v4318_v41 = vadd.f32 %v4317_v50, %v12455_v7  ;;  %6964 = vtanh.f32 %v4467_v39  ;;  %v4464_v50 = vmul.f32 0.5, %v4279_v60  ;;  %v12459_v39 = vld [vmem:[#allocation45_spill] sm:$0xff] }
 0xa9c   :  { %v4332_v31 = vpop.f32.mrf.mxu3  ;;  %v4345_v62 = vpop.f32.mrf.mxu0  ;;  %6966 = vtanh.f32 %v4465_v22 }
 0xa9d   :  { %v12456_v31 = vld [vmem:[#allocation56_spill] sm:$0xff]  ;;  %v4331_v47 = vadd.f32 %v4330_v40, %v4318_v41 }
 0xa9e   :  { %v4408_v28 = vpop.f32.mrf.mxu1 }
 0xa9f   :  { %v4466_v35 = vmul.f32 0.5, %v4331_v47 }
 0xaa2   :  { %v4319_v27 = vpop.f32.mrf.mxu2 }
 0xaa4   :  { %v4382_v56 = vpop.f32.mrf.mxu3  ;;  %v4395_v9 = vpop.f32.mrf.mxu0 }
 0xaa6   :  { %v4410_v33 = vpop.f32.mrf.mxu1 }
 0xaaa   :  { %v4369_v36 = vpop.f32.mrf.mxu2 }
 0xaac   :  { %v4384_v3 = vpop.f32.mrf.mxu3  ;;  %v4397_v17 = vpop.f32.mrf.mxu0 }
 0xaad   :  { %v12457_v3 = vld [vmem:[#allocation55_spill] sm:$0xff] }
 0xaae   :  { %v4396_v17 = vadd.f32 %v4395_v9, %v12457_v3 }
 0xab0   :  { %v4409_v16 = vadd.f32 %v4408_v28, %v4396_v17 }
 0xab2   :  { %v4371_v12 = vpop.f32.mrf.mxu2 }
 0xabe   :  { %v4460_v55 = vpop.f32.mrf.mxu1 }
 0xac4   :  { %v4434_v42 = vpop.f32.mrf.mxu3  ;;  %v4447_v20 = vpop.f32.mrf.mxu0 }
 0xac5   :  { %v4448_v62 = vadd.f32 %v4447_v20, %v12456_v31  ;;  %v6965_v20 = vpop.eup %6964 }
 0xac6   :  { %v4462_v27 = vpop.f32.mrf.mxu1  ;;  %v6967_v40 = vpop.eup %6966  ;;  %v4483_v9 = vmul.f32 0.5, %v6965_v20 }
 0xac7   :  { %v4461_v44 = vadd.f32 %v4460_v55, %v4448_v62  ;;  %v4469_v55 = vmul.f32 0.5, %v4409_v16  ;;  %v4481_v31 = vmul.f32 0.5, %v6967_v40 }
 0xac9   :  { %v4471_v33 = vmul.f32 0.5, %v4461_v44  ;;  %v4370_v44 = vadd.f32 %v4369_v36, %v12459_v39  ;;  %v4489_v17 = vadd.f32 0.5, %v4481_v31 }
 0xaca   :  { %v4421_v12 = vpop.f32.mrf.mxu2 }
 0xacb   :  { %6968 = vtanh.f32 %v4471_v33  ;;  %v4422_v23 = vadd.f32 %v4421_v12, %v12458_v61  ;;  %v4383_v62 = vadd.f32 %v4382_v56, %v4370_v44 }
 0xacc   :  { %v4436_v19 = vpop.f32.mrf.mxu3  ;;  %v4449_v7 = vpop.f32.mrf.mxu0  ;;  %6970 = vtanh.f32 %v4466_v35 }
 0xacd   :  { %v4435_v10 = vadd.f32 %v4434_v42, %v4422_v23  ;;  %6972 = vtanh.f32 %v4464_v50  ;;  %v4491_v42 = vadd.f32 0.5, %v4483_v9  ;;  %v4468_v35 = vmul.f32 0.5, %v4383_v62 }
 0xacf   :  { %v4470_v25 = vmul.f32 0.5, %v4435_v10  ;;  %v4501_v50 = vmul.f32 %v4491_v42, %v9923_v29  ;;  %v12460_v42 = vld [vmem:[#allocation113_spill] sm:$0xff] }
 0xad1   :  { %v6969_v22 = vpop.eup %6968  ;;  %6974 = vtanh.f32 %v4470_v25 }
 0xad2   :  { %v4487_v47 = vmul.f32 0.5, %v6969_v22  ;;  %v4423_v41 = vpop.f32.mrf.mxu2  ;;  %v6971_v27 = vpop.eup %6970  ;;  %6976 = vtanh.f32 %v4469_v55 }
 0xad3   :  { %v6973_v33 = vpop.eup %6972  ;;  %v4482_v12 = vmul.f32 0.5, %v6971_v27  ;;  %6978 = vtanh.f32 %v4468_v35  ;;  %v12465_v35 = vld [vmem:[#allocation148_spill] sm:$0xff] }
 0xad4   :  { %v4495_v60 = vadd.f32 0.5, %v4487_v47  ;;  %v4480_v23 = vmul.f32 0.5, %v6973_v33 }
 0xad5   :  { %v4490_v10 = vadd.f32 0.5, %v4482_v12  ;;  %v12464_v12 = vld [vmem:[#allocation147_spill] sm:$0xff] }
 0xad6   :  { %v4497_v28 = vmul.f32 2.0, %v4495_v60  ;;  %v4488_v25 = vadd.f32 0.5, %v4480_v23  ;;  %v12468_v23 = vld [vmem:[#allocation156_spill] sm:$0xff] }
 0xad7   :  { %v6975_v3 = vpop.eup %6974  ;;  %v4500_v44 = vmul.f32 %v4490_v10, %v9927_v6  ;;  %v12473_v10 = vld [vmem:[#allocation160_spill] sm:$0xff] }
 0xad8   :  { %v6614_v61 = vadd.f32 -1.0, %v4497_v28  ;;  %v4486_v36 = vmul.f32 0.5, %v6975_v3  ;;  %v6977_v7 = vpop.eup %6976  ;;  %v12461_v28 = vld [vmem:[#allocation121_spill] sm:$0xff] }
 0xad9   :  { %v4485_v39 = vmul.f32 0.5, %v6977_v7  ;;  %v6979_v9 = vpop.eup %6978  ;;  %v12462_v3 = vld [vmem:[#allocation145_spill] sm:$0xff]  ;;  %v12472_v7 = vld [vmem:[#allocation159_spill] sm:$0xff] }
 0xada   :  { %v4503_v16 = vmul.f32 %v6614_v61, %v4489_v17  ;;  %v4494_v19 = vadd.f32 0.5, %v4486_v36  ;;  %v4484_v41 = vmul.f32 0.5, %v6979_v9  ;;  %v12463_v17 = vld [vmem:[#allocation146_spill] sm:$0xff]  ;;  %v12466_v61 = vld [vmem:[#allocation115_spill] sm:$0xff]  ;;  %v12467_v36 = vld [vmem:[#allocation125_spill] sm:$0xff] }
 0xadb   :  { %v4493_v29 = vadd.f32 0.5, %v4485_v39  ;;  %v12477_v39 = vld [vmem:[#allocation168_spill] sm:$0xff]  ;;  %v12480_v9 = vld [vmem:[#allocation171_spill] sm:$0xff] }
 0xadc   :  { %v10090_v56 = vadd.f32 %v4503_v16, %v4501_v50  ;;  %v4496_v20 = vmul.f32 2.0, %v4494_v19  ;;  %v4492_v60 = vadd.f32 0.5, %v4484_v41  ;;  %v12469_v50 = vld [vmem:[#allocation157_spill] sm:$0xff]  ;;  %v12470_v16 = vld [vmem:[#allocation120_spill] sm:$0xff]  ;;  %v12471_v19 = vld [vmem:[#allocation131_spill] sm:$0xff] }
 0xadd   :  { %v12483_v41 = vld [vmem:[#allocation151_spill] sm:$0xff] }
 0xade   :  { %6980 = vtanh.f32 %v10090_v56  ;;  %v6613_v40 = vadd.f32 -1.0, %v4496_v20  ;;  %v12474_v20 = vld [vmem:[#allocation122_spill] sm:$0xff] }
 0xae0   :  { %v4502_v22 = vmul.f32 %v6613_v40, %v4488_v25  ;;  %v12475_v25 = vld [vmem:[#allocation137_spill] sm:$0xff]  ;;  %v12476_v40 = vld [vmem:[#allocation167_spill] sm:$0xff] }
 0xae2   :  { %v10094_v55 = vadd.f32 %v4502_v22, %v4500_v44  ;;  %v12478_v44 = vld [vmem:[#allocation130_spill] sm:$0xff] }
 0xae3   :  { %v12479_v22 = vld [vmem:[#allocation142_spill] sm:$0xff] }
 0xae4   :  { %v6981_v47 = vpop.eup %6980  ;;  %6982 = vtanh.f32 %v10094_v55 }
 0xae5   :  { %v4509_v31 = vmul.f32 %v6981_v47, %v4493_v29  ;;  %v12481_v29 = vld [vmem:[#allocation172_spill] sm:$0xff]  ;;  %v12482_v47 = vld [vmem:[#allocation135_spill] sm:$0xff] }
 0xae7   :  { %6615 = vst [vmem:[%s10941_s5 + $0x12] sm:$0x3] %v4509_v31  ;;  %v10100_v62 = vpack.c.bf16 %v4509_v31, %v4509_v31  ;;  %v12484_v31 = vld [vmem:[#allocation177_spill] sm:$0xff] }
 0xae9   :  { %4554 = vmatmul.bf16.vlgmr.msra.gmra.mxu3 %v10100_v62  ;;  %4580 = vmatmul.bf16.vlgmr.msrb.gmra.mxu1 %v10100_v62 }
 0xaea   :  { %v6983_v6 = vpop.eup %6982  ;;  %4650 = vmatpush.bf16.msra.mxu3 %v11525_v63  ;;  %4676 = vmatpush.bf16.msrb.mxu1 %v11526_v53 }
 0xaeb   :  { %v4508_v27 = vmul.f32 %v6983_v6, %v4492_v60  ;;  %v12485_v60 = vld [vmem:[#allocation178_spill] sm:$0xff]  ;;  %v12486_v6 = vld [vmem:[#allocation141_spill] sm:$0xff] }
 0xaed   :  { %v10106_v33 = vpack.c.bf16 %v4508_v27, %v4508_v27  ;;  %v12487_v27 = vld [vmem:[#allocation158_spill] sm:$0xff] }
 0xaee   :  { %4651 = vmatpush.bf16.msra.mxu3 %v11527_v34  ;;  %4677 = vmatpush.bf16.msrb.mxu1 %v11528_v1 }
 0xaef   :  { %4541 = vmatmul.bf16.vlgmr.msrb.gmra.mxu2 %v10106_v33  ;;  %4567 = vmatmul.bf16.vlgmr.msra.gmra.mxu0 %v10106_v33 }
 0xaf0   :  { %4637 = vmatpush.bf16.msrb.mxu2 %v11529_v57  ;;  %4663 = vmatpush.bf16.msra.mxu0 %v11530_v58 }
 0xaf2   :  { %4652 = vmatpush.bf16.msra.mxu3 %v11531_v45  ;;  %4678 = vmatpush.bf16.msrb.mxu1 %v11532_v11 }
 0xaf4   :  { %4638 = vmatpush.bf16.msrb.mxu2 %v7933_v0  ;;  %4664 = vmatpush.bf16.msra.mxu0 %v7935_v49 }
 0xaf6   :  { %4653 = vmatpush.bf16.msra.mxu3 %v11533_v21  ;;  %4679 = vmatpush.bf16.msrb.mxu1 %v11534_v52 }
 0xaf8   :  { %4639 = vmatpush.bf16.msrb.mxu2 %v11535_v38  ;;  %4665 = vmatpush.bf16.msra.mxu0 %v11536_v13 }
 0xaf9   :  { %4606 = vmatmul.bf16.vlgmr.msrb.gmra.mxu3 %v10100_v62  ;;  %4632 = vmatmul.bf16.vlgmr.msra.gmra.mxu1 %v10100_v62 }
 0xafa   :  { %4654 = vmatpush.bf16.msra.mxu3 %v11537_v54  ;;  %4680 = vmatpush.bf16.msrb.mxu1 %v11538_v37 }
 0xafc   :  { %4640 = vmatpush.bf16.msrb.mxu2 %v7975_v2  ;;  %4666 = vmatpush.bf16.msra.mxu0 %v7977_v30 }
 0xafe   :  { %4655 = vmatpush.bf16.msra.mxu3 %v11539_v15  ;;  %4681 = vmatpush.bf16.msrb.mxu1 %v11540_v59 }
 0xaff   :  { %4593 = vmatmul.bf16.vlgmr.msra.gmra.mxu2 %v10106_v33  ;;  %4619 = vmatmul.bf16.vlgmr.msrb.gmra.mxu0 %v10106_v33 }
 0xb00   :  { %4641 = vmatpush.bf16.msrb.mxu2 %v11541_v4  ;;  %4667 = vmatpush.bf16.msra.mxu0 %v11542_v43 }
 0xb02   :  { %4656 = vmatpush.bf16.msra.mxu3 %v11543_v24  ;;  %4682 = vmatpush.bf16.msrb.mxu1 %v11544_v46 }
 0xb04   :  { %4642 = vmatpush.bf16.msrb.mxu2 %v11628_v18  ;;  %4668 = vmatpush.bf16.msra.mxu0 %v11546_v48 }
 0xb06   :  { %4657 = vmatpush.bf16.msra.mxu3 %v11547_v14  ;;  %4683 = vmatpush.bf16.msrb.mxu1 %v11548_v26 }
 0xb08   :  { %4643 = vmatpush.bf16.msrb.mxu2 %v11630_v32  ;;  %4669 = vmatpush.bf16.msra.mxu0 %v8052_v5 }
 0xb09   :  { %4658 = vmatmul.bf16.vlgmr.msra.gmra.mxu3 %v10100_v62  ;;  %4684 = vmatmul.bf16.vlgmr.msrb.gmra.mxu1 %v10100_v62 }
 0xb0a   :  { %4702 = vmatpush.bf16.msrb.mxu3 %v11549_v51  ;;  %4728 = vmatpush.bf16.msra.mxu1 %v11629_v8 }
 0xb0c   :  { %4644 = vmatpush.bf16.msrb.mxu2 %v12462_v3  ;;  %4670 = vmatpush.bf16.msra.mxu0 %v12463_v17 }
 0xb0e   :  { %4703 = vmatpush.bf16.msrb.mxu3 %v12460_v42  ;;  %4729 = vmatpush.bf16.msra.mxu1 %v12461_v28 }
 0xb0f   :  { %4645 = vmatmul.bf16.vlgmr.msrb.gmra.mxu2 %v10106_v33  ;;  %4671 = vmatmul.bf16.vlgmr.msra.gmra.mxu0 %v10106_v33 }
 0xb10   :  { %4689 = vmatpush.bf16.msra.mxu2 %v12464_v12  ;;  %4715 = vmatpush.bf16.msrb.mxu0 %v12465_v35 }
 0xb12   :  { %4704 = vmatpush.bf16.msrb.mxu3 %v12466_v61  ;;  %4730 = vmatpush.bf16.msra.mxu1 %v12467_v36 }
 0xb14   :  { %4690 = vmatpush.bf16.msra.mxu2 %v12468_v23  ;;  %4716 = vmatpush.bf16.msrb.mxu0 %v12469_v50 }
 0xb16   :  { %4705 = vmatpush.bf16.msrb.mxu3 %v12470_v16  ;;  %4731 = vmatpush.bf16.msra.mxu1 %v12471_v19 }
 0xb18   :  { %4691 = vmatpush.bf16.msra.mxu2 %v12472_v7  ;;  %4717 = vmatpush.bf16.msrb.mxu0 %v12473_v10 }
 0xb1a   :  { %4706 = vmatpush.bf16.msrb.mxu3 %v12474_v20  ;;  %4732 = vmatpush.bf16.msra.mxu1 %v12475_v25  ;;  %v12557_v25 = vld [vmem:[#allocation44_spill] sm:$0xff] }
 0xb1c   :  { %4692 = vmatpush.bf16.msra.mxu2 %v12476_v40  ;;  %4718 = vmatpush.bf16.msrb.mxu0 %v12477_v39  ;;  %v12488_v39 = vld [vmem:[#allocation13_spill] sm:$0xff] }
 0xb1e   :  { %4707 = vmatpush.bf16.msrb.mxu3 %v12478_v44  ;;  %4733 = vmatpush.bf16.msra.mxu1 %v12479_v22  ;;  %v12489_v44 = vld [vmem:[#allocation18_spill] sm:$0xff]  ;;  %v12490_v22 = vld [vmem:[#allocation183_spill] sm:$0xff] }
 0xb20   :  { %4693 = vmatpush.bf16.msra.mxu2 %v12480_v9  ;;  %4719 = vmatpush.bf16.msrb.mxu0 %v12481_v29  ;;  %v12491_v9 = vld [vmem:[#allocation184_spill] sm:$0xff] }
 0xb22   :  { %4708 = vmatpush.bf16.msrb.mxu3 %v12482_v47  ;;  %4734 = vmatpush.bf16.msra.mxu1 %v12483_v41  ;;  %v12492_v41 = vld [vmem:[#allocation14_spill] sm:$0xff] }
 0xb24   :  { %4694 = vmatpush.bf16.msra.mxu2 %v12484_v31  ;;  %4720 = vmatpush.bf16.msrb.mxu0 %v12485_v60  ;;  %v12493_v31 = vld [vmem:[#allocation22_spill] sm:$0xff]  ;;  %v12494_v60 = vld [vmem:[#allocation189_spill] sm:$0xff] }
 0xb26   :  { %4709 = vmatpush.bf16.msrb.mxu3 %v12486_v6  ;;  %4735 = vmatpush.bf16.msra.mxu1 %v12487_v27  ;;  %v12495_v6 = vld [vmem:[#allocation190_spill] sm:$0xff]  ;;  %v12496_v27 = vld [vmem:[#allocation15_spill] sm:$0xff] }
 0xb28   :  { %4695 = vmatpush.bf16.msra.mxu2 %v12490_v22  ;;  %4721 = vmatpush.bf16.msrb.mxu0 %v12491_v9  ;;  %v12498_v9 = vld [vmem:[#allocation17_spill] sm:$0xff]  ;;  %v12499_v22 = vld [vmem:[#allocation26_spill] sm:$0xff] }
 0xb29   :  { %4710 = vmatmul.bf16.vlgmr.msrb.gmra.mxu3 %v10100_v62  ;;  %4736 = vmatmul.bf16.vlgmr.msra.gmra.mxu1 %v10100_v62  ;;  %v12500_v62 = vld [vmem:[#allocation19_spill] sm:$0xff] }
 0xb2a   :  { %4823 = vmatpush.bf16.msra.mxu3 %v12488_v39  ;;  %4849 = vmatpush.bf16.msrb.mxu1 %v12489_v44  ;;  %v12497_v39 = vld [vmem:[#allocation16_spill] sm:$0xff]  ;;  %v12507_v44 = vld [vmem:[#allocation35_spill] sm:$0xff] }
 0xb2c   :  { %4696 = vmatpush.bf16.msra.mxu2 %v12494_v60  ;;  %4722 = vmatpush.bf16.msrb.mxu0 %v12495_v6  ;;  %v12503_v60 = vld [vmem:[#allocation31_spill] sm:$0xff] }
 0xb2d   :  { %v12504_v6 = vld [vmem:[#allocation23_spill] sm:$0xff] }
 0xb2e   :  { %4824 = vmatpush.bf16.msra.mxu3 %v12492_v41  ;;  %4850 = vmatpush.bf16.msrb.mxu1 %v12493_v31  ;;  %v12501_v41 = vld [vmem:[#allocation20_spill] sm:$0xff]  ;;  %v12502_v31 = vld [vmem:[#allocation21_spill] sm:$0xff] }
 0xb2f   :  { %4697 = vmatmul.bf16.vlgmr.msra.gmra.mxu2 %v10106_v33  ;;  %4723 = vmatmul.bf16.vlgmr.msrb.gmra.mxu0 %v10106_v33  ;;  %v12508_v33 = vld [vmem:[#allocation27_spill] sm:$0xff] }
 0xb30   :  { %4810 = vmatpush.bf16.msrb.mxu2 %v12496_v27  ;;  %4836 = vmatpush.bf16.msra.mxu0 %v12497_v39  ;;  %v12505_v27 = vld [vmem:[#allocation24_spill] sm:$0xff]  ;;  %v12506_v39 = vld [vmem:[#allocation25_spill] sm:$0xff] }
 0xb32   :  { %4825 = vmatpush.bf16.msra.mxu3 %v12498_v9  ;;  %4851 = vmatpush.bf16.msrb.mxu1 %v12499_v22  ;;  %v12509_v9 = vld [vmem:[#allocation28_spill] sm:$0xff]  ;;  %v12510_v22 = vld [vmem:[#allocation30_spill] sm:$0xff] }
 0xb34   :  { %4811 = vmatpush.bf16.msrb.mxu2 %v12500_v62  ;;  %4837 = vmatpush.bf16.msra.mxu0 %v12501_v41  ;;  %v12511_v62 = vld [vmem:[#allocation39_spill] sm:$0xff]  ;;  %v12512_v41 = vld [vmem:[#allocation32_spill] sm:$0xff] }
 0xb36   :  { %4826 = vmatpush.bf16.msra.mxu3 %v12502_v31  ;;  %4852 = vmatpush.bf16.msrb.mxu1 %v12503_v60  ;;  %v12513_v31 = vld [vmem:[#allocation33_spill] sm:$0xff]  ;;  %v12514_v60 = vld [vmem:[#allocation34_spill] sm:$0xff] }
 0xb38   :  { %4812 = vmatpush.bf16.msrb.mxu2 %v12504_v6  ;;  %4838 = vmatpush.bf16.msra.mxu0 %v12505_v27  ;;  %v12515_v6 = vld [vmem:[#allocation47_spill] sm:$0xff]  ;;  %v12516_v27 = vld [vmem:[#allocation36_spill] sm:$0xff] }
 0xb3a   :  { %4827 = vmatpush.bf16.msra.mxu3 %v12506_v39  ;;  %4853 = vmatpush.bf16.msrb.mxu1 %v12507_v44  ;;  %v12517_v39 = vld [vmem:[#allocation37_spill] sm:$0xff]  ;;  %v12518_v44 = vld [vmem:[#allocation38_spill] sm:$0xff] }
 0xb3c   :  { %4813 = vmatpush.bf16.msrb.mxu2 %v12508_v33  ;;  %4839 = vmatpush.bf16.msra.mxu0 %v12509_v9  ;;  %v12519_v33 = vld [vmem:[#allocation53_spill] sm:$0xff]  ;;  %v12520_v9 = vld [vmem:[#allocation40_spill] sm:$0xff] }
 0xb3e   :  { %4828 = vmatpush.bf16.msra.mxu3 %v12510_v22  ;;  %4854 = vmatpush.bf16.msrb.mxu1 %v12511_v62  ;;  %v12521_v22 = vld [vmem:[#allocation57_spill] sm:$0xff] }
 0xb3f   :  { %v12522_v62 = vld [vmem:[#allocation41_spill] sm:$0xff] }
 0xb40   :  { %4814 = vmatpush.bf16.msrb.mxu2 %v12512_v41  ;;  %4840 = vmatpush.bf16.msra.mxu0 %v12513_v31  ;;  %v12523_v41 = vld [vmem:[#allocation43_spill] sm:$0xff]  ;;  %v12524_v31 = vld [vmem:[#allocation48_spill] sm:$0xff] }
 0xb42   :  { %4829 = vmatpush.bf16.msra.mxu3 %v12514_v60  ;;  %4855 = vmatpush.bf16.msrb.mxu1 %v12515_v6  ;;  %v12525_v60 = vld [vmem:[#allocation61_spill] sm:$0xff] }
 0xb43   :  { %v12526_v6 = vld [vmem:[#allocation49_spill] sm:$0xff] }
 0xb44   :  { %4815 = vmatpush.bf16.msrb.mxu2 %v12516_v27  ;;  %4841 = vmatpush.bf16.msra.mxu0 %v12517_v39  ;;  %v12527_v27 = vld [vmem:[#allocation50_spill] sm:$0xff]  ;;  %v12528_v39 = vld [vmem:[#allocation51_spill] sm:$0xff] }
 0xb46   :  { %4830 = vmatpush.bf16.msra.mxu3 %v12518_v44  ;;  %4856 = vmatpush.bf16.msrb.mxu1 %v12519_v33  ;;  %v12529_v44 = vld [vmem:[#allocation52_spill] sm:$0xff]  ;;  %v12530_v33 = vld [vmem:[#allocation54_spill] sm:$0xff] }
 0xb48   :  { %4816 = vmatpush.bf16.msrb.mxu2 %v12522_v62  ;;  %4842 = vmatpush.bf16.msra.mxu0 %v12523_v41  ;;  %v12533_v62 = vld [vmem:[#allocation59_spill] sm:$0xff]  ;;  %v12534_v41 = vld [vmem:[#allocation60_spill] sm:$0xff] }
 0xb4a   :  { %4875 = vmatpush.bf16.msrb.mxu3 %v12520_v9  ;;  %4901 = vmatpush.bf16.msra.mxu1 %v12521_v22  ;;  %v12531_v9 = vld [vmem:[#allocation65_spill] sm:$0xff]  ;;  %v12532_v22 = vld [vmem:[#allocation58_spill] sm:$0xff] }
 0xb4c   :  { %4817 = vmatpush.bf16.msrb.mxu2 %v12526_v6  ;;  %4843 = vmatpush.bf16.msra.mxu0 %v12527_v27  ;;  %v12537_v6 = vld [vmem:[#allocation63_spill] sm:$0xff]  ;;  %v12538_v27 = vld [vmem:[#allocation64_spill] sm:$0xff] }
 0xb4e   :  { %4876 = vmatpush.bf16.msrb.mxu3 %v12524_v31  ;;  %4902 = vmatpush.bf16.msra.mxu1 %v12525_v60  ;;  %v12535_v31 = vld [vmem:[#allocation72_spill] sm:$0xff]  ;;  %v12536_v60 = vld [vmem:[#allocation62_spill] sm:$0xff] }
 0xb50   :  { %4862 = vmatpush.bf16.msra.mxu2 %v12528_v39  ;;  %4888 = vmatpush.bf16.msrb.mxu0 %v12529_v44  ;;  %v12539_v39 = vld [vmem:[#allocation76_spill] sm:$0xff]  ;;  %v12540_v44 = vld [vmem:[#allocation69_spill] sm:$0xff] }
 0xb52   :  { %4877 = vmatpush.bf16.msrb.mxu3 %v12530_v33  ;;  %4903 = vmatpush.bf16.msra.mxu1 %v12531_v9  ;;  %v12541_v33 = vld [vmem:[#allocation70_spill] sm:$0xff]  ;;  %v12542_v9 = vld [vmem:[#allocation71_spill] sm:$0xff] }
 0xb54   :  { %4863 = vmatpush.bf16.msra.mxu2 %v12532_v22  ;;  %4889 = vmatpush.bf16.msrb.mxu0 %v12533_v62  ;;  %v12543_v22 = vld [vmem:[#allocation81_spill] sm:$0xff] }
 0xb55   :  { %v12544_v62 = vld [vmem:[#allocation73_spill] sm:$0xff] }
 0xb56   :  { %4878 = vmatpush.bf16.msrb.mxu3 %v12534_v41  ;;  %4904 = vmatpush.bf16.msra.mxu1 %v12535_v31  ;;  %v12545_v41 = vld [vmem:[#allocation74_spill] sm:$0xff]  ;;  %v12546_v31 = vld [vmem:[#allocation75_spill] sm:$0xff] }
 0xb58   :  { %4864 = vmatpush.bf16.msra.mxu2 %v12536_v60  ;;  %4890 = vmatpush.bf16.msrb.mxu0 %v12537_v6  ;;  %v12547_v60 = vld [vmem:[#allocation87_spill] sm:$0xff]  ;;  %v12548_v6 = vld [vmem:[#allocation77_spill] sm:$0xff] }
 0xb5a   :  { %4879 = vmatpush.bf16.msrb.mxu3 %v12538_v27  ;;  %4905 = vmatpush.bf16.msra.mxu1 %v12539_v39  ;;  %v12549_v27 = vld [vmem:[#allocation78_spill] sm:$0xff]  ;;  %v12550_v39 = vld [vmem:[#allocation79_spill] sm:$0xff] }
 0xb5c   :  { %4865 = vmatpush.bf16.msra.mxu2 %v12540_v44  ;;  %4891 = vmatpush.bf16.msrb.mxu0 %v12541_v33  ;;  %v12551_v44 = vld [vmem:[#allocation91_spill] sm:$0xff] }
 0xb5d   :  { %v12552_v33 = vld [vmem:[#allocation83_spill] sm:$0xff] }
 0xb5e   :  { %4880 = vmatpush.bf16.msrb.mxu3 %v12542_v9  ;;  %4906 = vmatpush.bf16.msra.mxu1 %v12543_v22  ;;  %v12553_v9 = vld [vmem:[#allocation86_spill] sm:$0xff]  ;;  %v12554_v22 = vld [vmem:[#allocation89_spill] sm:$0xff] }
 0xb60   :  { %4866 = vmatpush.bf16.msra.mxu2 %v12544_v62  ;;  %4892 = vmatpush.bf16.msrb.mxu0 %v12545_v41  ;;  %v12555_v62 = vld [vmem:[#allocation90_spill] sm:$0xff] }
 0xb62   :  { %4881 = vmatpush.bf16.msrb.mxu3 %v12546_v31  ;;  %4907 = vmatpush.bf16.msra.mxu1 %v12547_v60  ;;  %v12556_v60 = vld [vmem:[#allocation85_spill] sm:$0xff] }
 0xb64   :  { %4867 = vmatpush.bf16.msra.mxu2 %v12548_v6  ;;  %4893 = vmatpush.bf16.msrb.mxu0 %v12549_v27 }
 0xb66   :  { %4882 = vmatpush.bf16.msrb.mxu3 %v12550_v39  ;;  %4908 = vmatpush.bf16.msra.mxu1 %v12551_v44  ;;  %v4581_v41 = vpop.f32.mrf.mxu1 }
 0xb68   :  { %4868 = vmatpush.bf16.msra.mxu2 %v12552_v33  ;;  %4894 = vmatpush.bf16.msrb.mxu0 %v12553_v9 }
 0xb6c   :  { %4869 = vmatpush.bf16.msra.mxu2 %v12554_v22  ;;  %4895 = vmatpush.bf16.msrb.mxu0 %v12555_v62  ;;  %v4555_v31 = vpop.f32.mrf.mxu3  ;;  %v4568_v47 = vpop.f32.mrf.mxu0 }
 0xb6d   :  { %v4569_v29 = vadd.f32 %v4568_v47, %v12556_v60 }
 0xb6e   :  { %v4583_v6 = vpop.f32.mrf.mxu1 }
 0xb6f   :  { %v4582_v40 = vadd.f32 %v4581_v41, %v4569_v29 }
 0xb71   :  { %v4742_v17 = vmul.f32 0.5, %v4582_v40 }
 0xb72   :  { %v4542_v27 = vpop.f32.mrf.mxu2 }
 0xb73   :  { %v4543_v39 = vadd.f32 %v4542_v27, %v12557_v25 }
 0xb74   :  { %v4557_v20 = vpop.f32.mrf.mxu3  ;;  %v4570_v44 = vpop.f32.mrf.mxu0 }
 0xb75   :  { %v4556_v10 = vadd.f32 %v4555_v31, %v4543_v39  ;;  %v12558_v20 = vld [vmem:[#allocation29_spill] sm:$0xff] }
 0xb76   :  { %v4633_v33 = vpop.f32.mrf.mxu1 }
 0xb7a   :  { %v4544_v7 = vpop.f32.mrf.mxu2 }
 0xb7b   :  { %v12559_v7 = vld [vmem:[#allocation80_spill] sm:$0xff] }
 0xb7c   :  { %v4607_v9 = vpop.f32.mrf.mxu3  ;;  %v4620_v19 = vpop.f32.mrf.mxu0 }
 0xb7d   :  { %v4621_v44 = vadd.f32 %v4620_v19, %v12558_v20 }
 0xb7e   :  { %v4635_v22 = vpop.f32.mrf.mxu1 }
 0xb7f   :  { %v4634_v31 = vadd.f32 %v4633_v33, %v4621_v44  ;;  %v12562_v33 = vld [vmem:[#allocation217_spill] sm:$0xff] }
 0xb81   :  { %v4744_v12 = vmul.f32 0.5, %v4634_v31 }
 0xb82   :  { %v4594_v16 = vpop.f32.mrf.mxu2 }
 0xb83   :  { %v4595_v27 = vadd.f32 %v4594_v16, %v12559_v7  ;;  %6984 = vtanh.f32 %v4744_v12  ;;  %v4741_v16 = vmul.f32 0.5, %v4556_v10  ;;  %v12563_v12 = vld [vmem:[#allocation215_spill] sm:$0xff] }
 0xb84   :  { %v4609_v62 = vpop.f32.mrf.mxu3  ;;  %v4622_v50 = vpop.f32.mrf.mxu0  ;;  %6986 = vtanh.f32 %v4742_v17 }
 0xb85   :  { %v12560_v62 = vld [vmem:[#allocation216_spill] sm:$0xff]  ;;  %v4608_v3 = vadd.f32 %v4607_v9, %v4595_v27 }
 0xb86   :  { %v4685_v23 = vpop.f32.mrf.mxu1 }
 0xb87   :  { %v4743_v19 = vmul.f32 0.5, %v4608_v3 }
 0xb8a   :  { %v4596_v36 = vpop.f32.mrf.mxu2 }
 0xb8c   :  { %v4659_v61 = vpop.f32.mrf.mxu3  ;;  %v4672_v47 = vpop.f32.mrf.mxu0 }
 0xb8e   :  { %v4687_v60 = vpop.f32.mrf.mxu1 }
 0xb92   :  { %v4646_v29 = vpop.f32.mrf.mxu2 }
 0xb94   :  { %v4661_v41 = vpop.f32.mrf.mxu3  ;;  %v4674_v6 = vpop.f32.mrf.mxu0 }
 0xb95   :  { %v12561_v41 = vld [vmem:[#allocation214_spill] sm:$0xff] }
 0xb96   :  { %v4673_v6 = vadd.f32 %v4672_v47, %v12561_v41 }
 0xb98   :  { %v4686_v42 = vadd.f32 %v4685_v23, %v4673_v6 }
 0xb9a   :  { %v4648_v25 = vpop.f32.mrf.mxu2 }
 0xba6   :  { %v4737_v39 = vpop.f32.mrf.mxu1 }
 0xbac   :  { %v4711_v35 = vpop.f32.mrf.mxu3  ;;  %v4724_v22 = vpop.f32.mrf.mxu0 }
 0xbad   :  { %v4725_v50 = vadd.f32 %v4724_v22, %v12560_v62  ;;  %v6985_v22 = vpop.eup %6984 }
 0xbae   :  { %v4739_v36 = vpop.f32.mrf.mxu1  ;;  %v6987_v9 = vpop.eup %6986  ;;  %v4760_v47 = vmul.f32 0.5, %v6985_v22 }
 0xbaf   :  { %v4738_v28 = vadd.f32 %v4737_v39, %v4725_v50  ;;  %v4746_v39 = vmul.f32 0.5, %v4686_v42  ;;  %v4758_v62 = vmul.f32 0.5, %v6987_v9 }
 0xbb1   :  { %v4748_v60 = vmul.f32 0.5, %v4738_v28  ;;  %v4647_v28 = vadd.f32 %v4646_v29, %v12563_v12  ;;  %v4766_v6 = vadd.f32 0.5, %v4758_v62 }
 0xbb2   :  { %v4698_v25 = vpop.f32.mrf.mxu2 }
 0xbb3   :  { %6988 = vtanh.f32 %v4748_v60  ;;  %v4699_v20 = vadd.f32 %v4698_v25, %v12562_v33  ;;  %v4660_v50 = vadd.f32 %v4659_v61, %v4647_v28 }
 0xbb4   :  { %v4713_v44 = vpop.f32.mrf.mxu3  ;;  %v4726_v7 = vpop.f32.mrf.mxu0  ;;  %6990 = vtanh.f32 %v4743_v19 }
 0xbb5   :  { %v4712_v31 = vadd.f32 %v4711_v35, %v4699_v20  ;;  %6992 = vtanh.f32 %v4741_v16  ;;  %v4768_v35 = vadd.f32 0.5, %v4760_v47  ;;  %v4745_v19 = vmul.f32 0.5, %v4660_v50 }
 0xbb7   :  { %v4747_v40 = vmul.f32 0.5, %v4712_v31  ;;  %v4778_v16 = vmul.f32 %v4768_v35, %v10090_v56  ;;  %v12564_v35 = vld [vmem:[#allocation113_spill] sm:$0xff] }
 0xbb9   :  { %v6989_v17 = vpop.eup %6988  ;;  %6994 = vtanh.f32 %v4747_v40 }
 0xbba   :  { %v4764_v3 = vmul.f32 0.5, %v6989_v17  ;;  %v4700_v27 = vpop.f32.mrf.mxu2  ;;  %v6991_v36 = vpop.eup %6990  ;;  %6996 = vtanh.f32 %v4746_v39 }
 0xbbb   :  { %v6993_v60 = vpop.eup %6992  ;;  %v4759_v25 = vmul.f32 0.5, %v6991_v36  ;;  %6998 = vtanh.f32 %v4745_v19  ;;  %v12569_v19 = vld [vmem:[#allocation148_spill] sm:$0xff] }
 0xbbc   :  { %v4772_v10 = vadd.f32 0.5, %v4764_v3  ;;  %v4757_v20 = vmul.f32 0.5, %v6993_v60 }
 0xbbd   :  { %v4767_v31 = vadd.f32 0.5, %v4759_v25  ;;  %v12568_v25 = vld [vmem:[#allocation147_spill] sm:$0xff] }
 0xbbe   :  { %v4774_v23 = vmul.f32 2.0, %v4772_v10  ;;  %v4765_v40 = vadd.f32 0.5, %v4757_v20  ;;  %v12572_v20 = vld [vmem:[#allocation156_spill] sm:$0xff] }
 0xbbf   :  { %v6995_v41 = vpop.eup %6994  ;;  %v4777_v28 = vmul.f32 %v4767_v31, %v10094_v55  ;;  %v12577_v31 = vld [vmem:[#allocation160_spill] sm:$0xff] }
 0xbc0   :  { %v6617_v33 = vadd.f32 -1.0, %v4774_v23  ;;  %v4763_v29 = vmul.f32 0.5, %v6995_v41  ;;  %v6997_v7 = vpop.eup %6996  ;;  %v12565_v23 = vld [vmem:[#allocation121_spill] sm:$0xff] }
 0xbc1   :  { %v4762_v12 = vmul.f32 0.5, %v6997_v7  ;;  %v6999_v47 = vpop.eup %6998  ;;  %v12566_v41 = vld [vmem:[#allocation145_spill] sm:$0xff]  ;;  %v12576_v7 = vld [vmem:[#allocation159_spill] sm:$0xff] }
 0xbc2   :  { %v4780_v42 = vmul.f32 %v6617_v33, %v4766_v6  ;;  %v4771_v44 = vadd.f32 0.5, %v4763_v29  ;;  %v4761_v27 = vmul.f32 0.5, %v6999_v47  ;;  %v12567_v6 = vld [vmem:[#allocation146_spill] sm:$0xff]  ;;  %v12570_v33 = vld [vmem:[#allocation115_spill] sm:$0xff]  ;;  %v12571_v29 = vld [vmem:[#allocation125_spill] sm:$0xff] }
 0xbc3   :  { %v4770_v56 = vadd.f32 0.5, %v4762_v12  ;;  %v12581_v12 = vld [vmem:[#allocation168_spill] sm:$0xff]  ;;  %v12584_v47 = vld [vmem:[#allocation171_spill] sm:$0xff] }
 0xbc4   :  { %v10257_v61 = vadd.f32 %v4780_v42, %v4778_v16  ;;  %v4773_v22 = vmul.f32 2.0, %v4771_v44  ;;  %v4769_v10 = vadd.f32 0.5, %v4761_v27  ;;  %v12573_v16 = vld [vmem:[#allocation157_spill] sm:$0xff]  ;;  %v12574_v42 = vld [vmem:[#allocation120_spill] sm:$0xff]  ;;  %v12575_v44 = vld [vmem:[#allocation131_spill] sm:$0xff] }
 0xbc5   :  { %v12587_v27 = vld [vmem:[#allocation151_spill] sm:$0xff] }
 0xbc6   :  { %7000 = vtanh.f32 %v10257_v61  ;;  %v6616_v9 = vadd.f32 -1.0, %v4773_v22  ;;  %v12578_v22 = vld [vmem:[#allocation122_spill] sm:$0xff] }
 0xbc8   :  { %v4779_v17 = vmul.f32 %v6616_v9, %v4765_v40  ;;  %v12579_v40 = vld [vmem:[#allocation137_spill] sm:$0xff]  ;;  %v12580_v9 = vld [vmem:[#allocation167_spill] sm:$0xff] }
 0xbca   :  { %v10261_v39 = vadd.f32 %v4779_v17, %v4777_v28  ;;  %v12582_v28 = vld [vmem:[#allocation130_spill] sm:$0xff] }
 0xbcb   :  { %v12583_v17 = vld [vmem:[#allocation142_spill] sm:$0xff] }
 0xbcc   :  { %v7001_v3 = vpop.eup %7000  ;;  %7002 = vtanh.f32 %v10261_v39 }
 0xbcd   :  { %v4786_v62 = vmul.f32 %v7001_v3, %v4770_v56  ;;  %v12585_v56 = vld [vmem:[#allocation172_spill] sm:$0xff]  ;;  %v12586_v3 = vld [vmem:[#allocation135_spill] sm:$0xff] }
 0xbcf   :  { %6618 = vst [vmem:[%s10941_s5 + $0x14] sm:$0x3] %v4786_v62  ;;  %v10267_v50 = vpack.c.bf16 %v4786_v62, %v4786_v62  ;;  %v12588_v62 = vld [vmem:[#allocation177_spill] sm:$0xff] }
 0xbd1   :  { %4831 = vmatmul.bf16.vlgmr.msra.gmra.mxu3 %v10267_v50  ;;  %4857 = vmatmul.bf16.vlgmr.msrb.gmra.mxu1 %v10267_v50 }
 0xbd2   :  { %v7003_v55 = vpop.eup %7002  ;;  %4927 = vmatpush.bf16.msra.mxu3 %v11525_v63  ;;  %4953 = vmatpush.bf16.msrb.mxu1 %v11526_v53 }
 0xbd3   :  { %v4785_v36 = vmul.f32 %v7003_v55, %v4769_v10  ;;  %v12589_v10 = vld [vmem:[#allocation178_spill] sm:$0xff]  ;;  %v12590_v55 = vld [vmem:[#allocation141_spill] sm:$0xff] }
 0xbd5   :  { %v10273_v60 = vpack.c.bf16 %v4785_v36, %v4785_v36  ;;  %v12591_v36 = vld [vmem:[#allocation158_spill] sm:$0xff] }
 0xbd6   :  { %4928 = vmatpush.bf16.msra.mxu3 %v11527_v34  ;;  %4954 = vmatpush.bf16.msrb.mxu1 %v11528_v1 }
 0xbd7   :  { %4818 = vmatmul.bf16.vlgmr.msrb.gmra.mxu2 %v10273_v60  ;;  %4844 = vmatmul.bf16.vlgmr.msra.gmra.mxu0 %v10273_v60 }
 0xbd8   :  { %4914 = vmatpush.bf16.msrb.mxu2 %v11529_v57  ;;  %4940 = vmatpush.bf16.msra.mxu0 %v11530_v58 }
 0xbda   :  { %4929 = vmatpush.bf16.msra.mxu3 %v11531_v45  ;;  %4955 = vmatpush.bf16.msrb.mxu1 %v11532_v11 }
 0xbdc   :  { %4915 = vmatpush.bf16.msrb.mxu2 %v7933_v0  ;;  %4941 = vmatpush.bf16.msra.mxu0 %v7935_v49 }
 0xbde   :  { %4930 = vmatpush.bf16.msra.mxu3 %v11533_v21  ;;  %4956 = vmatpush.bf16.msrb.mxu1 %v11534_v52 }
 0xbe0   :  { %4916 = vmatpush.bf16.msrb.mxu2 %v11535_v38  ;;  %4942 = vmatpush.bf16.msra.mxu0 %v11536_v13 }
 0xbe1   :  { %4883 = vmatmul.bf16.vlgmr.msrb.gmra.mxu3 %v10267_v50  ;;  %4909 = vmatmul.bf16.vlgmr.msra.gmra.mxu1 %v10267_v50 }
 0xbe2   :  { %4931 = vmatpush.bf16.msra.mxu3 %v11537_v54  ;;  %4957 = vmatpush.bf16.msrb.mxu1 %v11538_v37 }
 0xbe4   :  { %4917 = vmatpush.bf16.msrb.mxu2 %v7975_v2  ;;  %4943 = vmatpush.bf16.msra.mxu0 %v7977_v30 }
 0xbe6   :  { %4932 = vmatpush.bf16.msra.mxu3 %v11539_v15  ;;  %4958 = vmatpush.bf16.msrb.mxu1 %v11540_v59 }
 0xbe7   :  { %4870 = vmatmul.bf16.vlgmr.msra.gmra.mxu2 %v10273_v60  ;;  %4896 = vmatmul.bf16.vlgmr.msrb.gmra.mxu0 %v10273_v60 }
 0xbe8   :  { %4918 = vmatpush.bf16.msrb.mxu2 %v11541_v4  ;;  %4944 = vmatpush.bf16.msra.mxu0 %v11542_v43 }
 0xbea   :  { %4933 = vmatpush.bf16.msra.mxu3 %v11543_v24  ;;  %4959 = vmatpush.bf16.msrb.mxu1 %v11544_v46 }
 0xbec   :  { %4919 = vmatpush.bf16.msrb.mxu2 %v11628_v18  ;;  %4945 = vmatpush.bf16.msra.mxu0 %v11546_v48 }
 0xbee   :  { %4934 = vmatpush.bf16.msra.mxu3 %v11547_v14  ;;  %4960 = vmatpush.bf16.msrb.mxu1 %v11548_v26 }
 0xbf0   :  { %4920 = vmatpush.bf16.msrb.mxu2 %v11630_v32  ;;  %4946 = vmatpush.bf16.msra.mxu0 %v8052_v5 }
 0xbf1   :  { %4935 = vmatmul.bf16.vlgmr.msra.gmra.mxu3 %v10267_v50  ;;  %4961 = vmatmul.bf16.vlgmr.msrb.gmra.mxu1 %v10267_v50 }
 0xbf2   :  { %4979 = vmatpush.bf16.msrb.mxu3 %v11549_v51  ;;  %5005 = vmatpush.bf16.msra.mxu1 %v11629_v8 }
 0xbf4   :  { %4921 = vmatpush.bf16.msrb.mxu2 %v12566_v41  ;;  %4947 = vmatpush.bf16.msra.mxu0 %v12567_v6 }
 0xbf6   :  { %4980 = vmatpush.bf16.msrb.mxu3 %v12564_v35  ;;  %5006 = vmatpush.bf16.msra.mxu1 %v12565_v23 }
 0xbf7   :  { %4922 = vmatmul.bf16.vlgmr.msrb.gmra.mxu2 %v10273_v60  ;;  %4948 = vmatmul.bf16.vlgmr.msra.gmra.mxu0 %v10273_v60 }
 0xbf8   :  { %4966 = vmatpush.bf16.msra.mxu2 %v12568_v25  ;;  %4992 = vmatpush.bf16.msrb.mxu0 %v12569_v19 }
 0xbfa   :  { %4981 = vmatpush.bf16.msrb.mxu3 %v12570_v33  ;;  %5007 = vmatpush.bf16.msra.mxu1 %v12571_v29 }
 0xbfc   :  { %4967 = vmatpush.bf16.msra.mxu2 %v12572_v20  ;;  %4993 = vmatpush.bf16.msrb.mxu0 %v12573_v16 }
 0xbfe   :  { %4982 = vmatpush.bf16.msrb.mxu3 %v12574_v42  ;;  %5008 = vmatpush.bf16.msra.mxu1 %v12575_v44 }
 0xc00   :  { %4968 = vmatpush.bf16.msra.mxu2 %v12576_v7  ;;  %4994 = vmatpush.bf16.msrb.mxu0 %v12577_v31 }
 0xc02   :  { %4983 = vmatpush.bf16.msrb.mxu3 %v12578_v22  ;;  %5009 = vmatpush.bf16.msra.mxu1 %v12579_v40  ;;  %v12661_v40 = vld [vmem:[#allocation219_spill] sm:$0xff] }
 0xc04   :  { %4969 = vmatpush.bf16.msra.mxu2 %v12580_v9  ;;  %4995 = vmatpush.bf16.msrb.mxu0 %v12581_v12  ;;  %v12592_v12 = vld [vmem:[#allocation13_spill] sm:$0xff] }
 0xc06   :  { %4984 = vmatpush.bf16.msrb.mxu3 %v12582_v28  ;;  %5010 = vmatpush.bf16.msra.mxu1 %v12583_v17  ;;  %v12593_v28 = vld [vmem:[#allocation18_spill] sm:$0xff]  ;;  %v12594_v17 = vld [vmem:[#allocation183_spill] sm:$0xff] }
 0xc08   :  { %4970 = vmatpush.bf16.msra.mxu2 %v12584_v47  ;;  %4996 = vmatpush.bf16.msrb.mxu0 %v12585_v56  ;;  %v12595_v47 = vld [vmem:[#allocation184_spill] sm:$0xff] }
 0xc0a   :  { %4985 = vmatpush.bf16.msrb.mxu3 %v12586_v3  ;;  %5011 = vmatpush.bf16.msra.mxu1 %v12587_v27  ;;  %v12596_v27 = vld [vmem:[#allocation14_spill] sm:$0xff] }
 0xc0c   :  { %4971 = vmatpush.bf16.msra.mxu2 %v12588_v62  ;;  %4997 = vmatpush.bf16.msrb.mxu0 %v12589_v10  ;;  %v12597_v62 = vld [vmem:[#allocation22_spill] sm:$0xff]  ;;  %v12598_v10 = vld [vmem:[#allocation189_spill] sm:$0xff] }
 0xc0e   :  { %4986 = vmatpush.bf16.msrb.mxu3 %v12590_v55  ;;  %5012 = vmatpush.bf16.msra.mxu1 %v12591_v36  ;;  %v12599_v55 = vld [vmem:[#allocation190_spill] sm:$0xff]  ;;  %v12600_v36 = vld [vmem:[#allocation15_spill] sm:$0xff] }
 0xc10   :  { %4972 = vmatpush.bf16.msra.mxu2 %v12594_v17  ;;  %4998 = vmatpush.bf16.msrb.mxu0 %v12595_v47  ;;  %v12602_v47 = vld [vmem:[#allocation17_spill] sm:$0xff]  ;;  %v12603_v17 = vld [vmem:[#allocation26_spill] sm:$0xff] }
 0xc11   :  { %4987 = vmatmul.bf16.vlgmr.msrb.gmra.mxu3 %v10267_v50  ;;  %5013 = vmatmul.bf16.vlgmr.msra.gmra.mxu1 %v10267_v50  ;;  %v12604_v50 = vld [vmem:[#allocation19_spill] sm:$0xff] }
 0xc12   :  { %5100 = vmatpush.bf16.msra.mxu3 %v12592_v12  ;;  %5126 = vmatpush.bf16.msrb.mxu1 %v12593_v28  ;;  %v12601_v12 = vld [vmem:[#allocation16_spill] sm:$0xff]  ;;  %v12611_v28 = vld [vmem:[#allocation35_spill] sm:$0xff] }
 0xc14   :  { %4973 = vmatpush.bf16.msra.mxu2 %v12598_v10  ;;  %4999 = vmatpush.bf16.msrb.mxu0 %v12599_v55  ;;  %v12607_v10 = vld [vmem:[#allocation31_spill] sm:$0xff] }
 0xc15   :  { %v12608_v55 = vld [vmem:[#allocation23_spill] sm:$0xff] }
 0xc16   :  { %5101 = vmatpush.bf16.msra.mxu3 %v12596_v27  ;;  %5127 = vmatpush.bf16.msrb.mxu1 %v12597_v62  ;;  %v12605_v27 = vld [vmem:[#allocation20_spill] sm:$0xff]  ;;  %v12606_v62 = vld [vmem:[#allocation21_spill] sm:$0xff] }
 0xc17   :  { %4974 = vmatmul.bf16.vlgmr.msra.gmra.mxu2 %v10273_v60  ;;  %5000 = vmatmul.bf16.vlgmr.msrb.gmra.mxu0 %v10273_v60  ;;  %v12612_v60 = vld [vmem:[#allocation27_spill] sm:$0xff] }
 0xc18   :  { %5087 = vmatpush.bf16.msrb.mxu2 %v12600_v36  ;;  %5113 = vmatpush.bf16.msra.mxu0 %v12601_v12  ;;  %v12609_v36 = vld [vmem:[#allocation24_spill] sm:$0xff]  ;;  %v12610_v12 = vld [vmem:[#allocation25_spill] sm:$0xff] }
 0xc1a   :  { %5102 = vmatpush.bf16.msra.mxu3 %v12602_v47  ;;  %5128 = vmatpush.bf16.msrb.mxu1 %v12603_v17  ;;  %v12613_v47 = vld [vmem:[#allocation28_spill] sm:$0xff]  ;;  %v12614_v17 = vld [vmem:[#allocation30_spill] sm:$0xff] }
 0xc1c   :  { %5088 = vmatpush.bf16.msrb.mxu2 %v12604_v50  ;;  %5114 = vmatpush.bf16.msra.mxu0 %v12605_v27  ;;  %v12615_v50 = vld [vmem:[#allocation39_spill] sm:$0xff]  ;;  %v12616_v27 = vld [vmem:[#allocation32_spill] sm:$0xff] }
 0xc1e   :  { %5103 = vmatpush.bf16.msra.mxu3 %v12606_v62  ;;  %5129 = vmatpush.bf16.msrb.mxu1 %v12607_v10  ;;  %v12617_v62 = vld [vmem:[#allocation33_spill] sm:$0xff]  ;;  %v12618_v10 = vld [vmem:[#allocation34_spill] sm:$0xff] }
 0xc20   :  { %5089 = vmatpush.bf16.msrb.mxu2 %v12608_v55  ;;  %5115 = vmatpush.bf16.msra.mxu0 %v12609_v36  ;;  %v12619_v55 = vld [vmem:[#allocation47_spill] sm:$0xff]  ;;  %v12620_v36 = vld [vmem:[#allocation36_spill] sm:$0xff] }
 0xc22   :  { %5104 = vmatpush.bf16.msra.mxu3 %v12610_v12  ;;  %5130 = vmatpush.bf16.msrb.mxu1 %v12611_v28  ;;  %v12621_v12 = vld [vmem:[#allocation37_spill] sm:$0xff]  ;;  %v12622_v28 = vld [vmem:[#allocation38_spill] sm:$0xff] }
 0xc24   :  { %5090 = vmatpush.bf16.msrb.mxu2 %v12612_v60  ;;  %5116 = vmatpush.bf16.msra.mxu0 %v12613_v47  ;;  %v12623_v60 = vld [vmem:[#allocation53_spill] sm:$0xff]  ;;  %v12624_v47 = vld [vmem:[#allocation40_spill] sm:$0xff] }
 0xc26   :  { %5105 = vmatpush.bf16.msra.mxu3 %v12614_v17  ;;  %5131 = vmatpush.bf16.msrb.mxu1 %v12615_v50  ;;  %v12625_v17 = vld [vmem:[#allocation57_spill] sm:$0xff] }
 0xc27   :  { %v12626_v50 = vld [vmem:[#allocation41_spill] sm:$0xff] }
 0xc28   :  { %5091 = vmatpush.bf16.msrb.mxu2 %v12616_v27  ;;  %5117 = vmatpush.bf16.msra.mxu0 %v12617_v62  ;;  %v12627_v27 = vld [vmem:[#allocation43_spill] sm:$0xff]  ;;  %v12628_v62 = vld [vmem:[#allocation48_spill] sm:$0xff] }
 0xc2a   :  { %5106 = vmatpush.bf16.msra.mxu3 %v12618_v10  ;;  %5132 = vmatpush.bf16.msrb.mxu1 %v12619_v55  ;;  %v12629_v10 = vld [vmem:[#allocation61_spill] sm:$0xff] }
 0xc2b   :  { %v12630_v55 = vld [vmem:[#allocation49_spill] sm:$0xff] }
 0xc2c   :  { %5092 = vmatpush.bf16.msrb.mxu2 %v12620_v36  ;;  %5118 = vmatpush.bf16.msra.mxu0 %v12621_v12  ;;  %v12631_v36 = vld [vmem:[#allocation50_spill] sm:$0xff]  ;;  %v12632_v12 = vld [vmem:[#allocation51_spill] sm:$0xff] }
 0xc2e   :  { %5107 = vmatpush.bf16.msra.mxu3 %v12622_v28  ;;  %5133 = vmatpush.bf16.msrb.mxu1 %v12623_v60  ;;  %v12633_v28 = vld [vmem:[#allocation52_spill] sm:$0xff]  ;;  %v12634_v60 = vld [vmem:[#allocation54_spill] sm:$0xff] }
 0xc30   :  { %5093 = vmatpush.bf16.msrb.mxu2 %v12626_v50  ;;  %5119 = vmatpush.bf16.msra.mxu0 %v12627_v27  ;;  %v12637_v50 = vld [vmem:[#allocation59_spill] sm:$0xff]  ;;  %v12638_v27 = vld [vmem:[#allocation60_spill] sm:$0xff] }
 0xc32   :  { %5152 = vmatpush.bf16.msrb.mxu3 %v12624_v47  ;;  %5178 = vmatpush.bf16.msra.mxu1 %v12625_v17  ;;  %v12635_v47 = vld [vmem:[#allocation65_spill] sm:$0xff]  ;;  %v12636_v17 = vld [vmem:[#allocation58_spill] sm:$0xff] }
 0xc34   :  { %5094 = vmatpush.bf16.msrb.mxu2 %v12630_v55  ;;  %5120 = vmatpush.bf16.msra.mxu0 %v12631_v36  ;;  %v12641_v55 = vld [vmem:[#allocation63_spill] sm:$0xff]  ;;  %v12642_v36 = vld [vmem:[#allocation64_spill] sm:$0xff] }
 0xc36   :  { %5153 = vmatpush.bf16.msrb.mxu3 %v12628_v62  ;;  %5179 = vmatpush.bf16.msra.mxu1 %v12629_v10  ;;  %v12639_v62 = vld [vmem:[#allocation72_spill] sm:$0xff]  ;;  %v12640_v10 = vld [vmem:[#allocation62_spill] sm:$0xff] }
 0xc38   :  { %5139 = vmatpush.bf16.msra.mxu2 %v12632_v12  ;;  %5165 = vmatpush.bf16.msrb.mxu0 %v12633_v28  ;;  %v12643_v12 = vld [vmem:[#allocation76_spill] sm:$0xff]  ;;  %v12644_v28 = vld [vmem:[#allocation69_spill] sm:$0xff] }
 0xc3a   :  { %5154 = vmatpush.bf16.msrb.mxu3 %v12634_v60  ;;  %5180 = vmatpush.bf16.msra.mxu1 %v12635_v47  ;;  %v12645_v60 = vld [vmem:[#allocation70_spill] sm:$0xff]  ;;  %v12646_v47 = vld [vmem:[#allocation71_spill] sm:$0xff] }
 0xc3c   :  { %5140 = vmatpush.bf16.msra.mxu2 %v12636_v17  ;;  %5166 = vmatpush.bf16.msrb.mxu0 %v12637_v50  ;;  %v12647_v17 = vld [vmem:[#allocation81_spill] sm:$0xff] }
 0xc3d   :  { %v12648_v50 = vld [vmem:[#allocation73_spill] sm:$0xff] }
 0xc3e   :  { %5155 = vmatpush.bf16.msrb.mxu3 %v12638_v27  ;;  %5181 = vmatpush.bf16.msra.mxu1 %v12639_v62  ;;  %v12649_v27 = vld [vmem:[#allocation74_spill] sm:$0xff]  ;;  %v12650_v62 = vld [vmem:[#allocation75_spill] sm:$0xff] }
 0xc40   :  { %5141 = vmatpush.bf16.msra.mxu2 %v12640_v10  ;;  %5167 = vmatpush.bf16.msrb.mxu0 %v12641_v55  ;;  %v12651_v10 = vld [vmem:[#allocation87_spill] sm:$0xff]  ;;  %v12652_v55 = vld [vmem:[#allocation77_spill] sm:$0xff] }
 0xc42   :  { %5156 = vmatpush.bf16.msrb.mxu3 %v12642_v36  ;;  %5182 = vmatpush.bf16.msra.mxu1 %v12643_v12  ;;  %v12653_v36 = vld [vmem:[#allocation78_spill] sm:$0xff]  ;;  %v12654_v12 = vld [vmem:[#allocation79_spill] sm:$0xff] }
 0xc44   :  { %5142 = vmatpush.bf16.msra.mxu2 %v12644_v28  ;;  %5168 = vmatpush.bf16.msrb.mxu0 %v12645_v60  ;;  %v12655_v28 = vld [vmem:[#allocation91_spill] sm:$0xff] }
 0xc45   :  { %v12656_v60 = vld [vmem:[#allocation83_spill] sm:$0xff] }
 0xc46   :  { %5157 = vmatpush.bf16.msrb.mxu3 %v12646_v47  ;;  %5183 = vmatpush.bf16.msra.mxu1 %v12647_v17  ;;  %v12657_v47 = vld [vmem:[#allocation86_spill] sm:$0xff]  ;;  %v12658_v17 = vld [vmem:[#allocation89_spill] sm:$0xff] }
 0xc48   :  { %5143 = vmatpush.bf16.msra.mxu2 %v12648_v50  ;;  %5169 = vmatpush.bf16.msrb.mxu0 %v12649_v27  ;;  %v12659_v50 = vld [vmem:[#allocation90_spill] sm:$0xff] }
 0xc4a   :  { %5158 = vmatpush.bf16.msrb.mxu3 %v12650_v62  ;;  %5184 = vmatpush.bf16.msra.mxu1 %v12651_v10  ;;  %v12660_v10 = vld [vmem:[#allocation218_spill] sm:$0xff] }
 0xc4c   :  { %5144 = vmatpush.bf16.msra.mxu2 %v12652_v55  ;;  %5170 = vmatpush.bf16.msrb.mxu0 %v12653_v36 }
 0xc4e   :  { %5159 = vmatpush.bf16.msrb.mxu3 %v12654_v12  ;;  %5185 = vmatpush.bf16.msra.mxu1 %v12655_v28  ;;  %v4858_v27 = vpop.f32.mrf.mxu1 }
 0xc50   :  { %5145 = vmatpush.bf16.msra.mxu2 %v12656_v60  ;;  %5171 = vmatpush.bf16.msrb.mxu0 %v12657_v47 }
 0xc54   :  { %5146 = vmatpush.bf16.msra.mxu2 %v12658_v17  ;;  %5172 = vmatpush.bf16.msrb.mxu0 %v12659_v50  ;;  %v4832_v62 = vpop.f32.mrf.mxu3  ;;  %v4845_v3 = vpop.f32.mrf.mxu0 }
 0xc55   :  { %v4846_v56 = vadd.f32 %v4845_v3, %v12660_v10 }
 0xc56   :  { %v4860_v55 = vpop.f32.mrf.mxu1 }
 0xc57   :  { %v4859_v9 = vadd.f32 %v4858_v27, %v4846_v56 }
 0xc59   :  { %v5019_v6 = vmul.f32 0.5, %v4859_v9 }
 0xc5a   :  { %v4819_v36 = vpop.f32.mrf.mxu2 }
 0xc5b   :  { %v4820_v12 = vadd.f32 %v4819_v36, %v12661_v40 }
 0xc5c   :  { %v4834_v22 = vpop.f32.mrf.mxu3  ;;  %v4847_v28 = vpop.f32.mrf.mxu0 }
 0xc5d   :  { %v4833_v31 = vadd.f32 %v4832_v62, %v4820_v12  ;;  %v12662_v22 = vld [vmem:[#allocation220_spill] sm:$0xff] }
 0xc5e   :  { %v4910_v60 = vpop.f32.mrf.mxu1 }
 0xc62   :  { %v4821_v7 = vpop.f32.mrf.mxu2 }
 0xc63   :  { %v12663_v7 = vld [vmem:[#allocation221_spill] sm:$0xff] }
 0xc64   :  { %v4884_v47 = vpop.f32.mrf.mxu3  ;;  %v4897_v44 = vpop.f32.mrf.mxu0 }
 0xc65   :  { %v4898_v28 = vadd.f32 %v4897_v44, %v12662_v22 }
 0xc66   :  { %v4912_v17 = vpop.f32.mrf.mxu1 }
 0xc67   :  { %v4911_v62 = vadd.f32 %v4910_v60, %v4898_v28  ;;  %v12666_v60 = vld [vmem:[#allocation225_spill] sm:$0xff] }
 0xc69   :  { %v5021_v25 = vmul.f32 0.5, %v4911_v62 }
 0xc6a   :  { %v4871_v42 = vpop.f32.mrf.mxu2 }
 0xc6b   :  { %v4872_v36 = vadd.f32 %v4871_v42, %v12663_v7  ;;  %7004 = vtanh.f32 %v5021_v25  ;;  %v5018_v42 = vmul.f32 0.5, %v4833_v31  ;;  %v12667_v25 = vld [vmem:[#allocation223_spill] sm:$0xff] }
 0xc6c   :  { %v4886_v50 = vpop.f32.mrf.mxu3  ;;  %v4899_v16 = vpop.f32.mrf.mxu0  ;;  %7006 = vtanh.f32 %v5019_v6 }
 0xc6d   :  { %v12664_v50 = vld [vmem:[#allocation224_spill] sm:$0xff]  ;;  %v4885_v41 = vadd.f32 %v4884_v47, %v4872_v36 }
 0xc6e   :  { %v4962_v20 = vpop.f32.mrf.mxu1 }
 0xc6f   :  { %v5020_v44 = vmul.f32 0.5, %v4885_v41 }
 0xc72   :  { %v4873_v29 = vpop.f32.mrf.mxu2 }
 0xc74   :  { %v4936_v33 = vpop.f32.mrf.mxu3  ;;  %v4949_v3 = vpop.f32.mrf.mxu0 }
 0xc76   :  { %v4964_v10 = vpop.f32.mrf.mxu1 }
 0xc7a   :  { %v4923_v56 = vpop.f32.mrf.mxu2 }
 0xc7c   :  { %v4938_v27 = vpop.f32.mrf.mxu3  ;;  %v4951_v55 = vpop.f32.mrf.mxu0 }
 0xc7d   :  { %v12665_v27 = vld [vmem:[#allocation222_spill] sm:$0xff] }
 0xc7e   :  { %v4950_v55 = vadd.f32 %v4949_v3, %v12665_v27 }
 0xc80   :  { %v4963_v35 = vadd.f32 %v4962_v20, %v4950_v55 }
 0xc82   :  { %v4925_v40 = vpop.f32.mrf.mxu2 }
 0xc8e   :  { %v5014_v12 = vpop.f32.mrf.mxu1 }
 0xc94   :  { %v4988_v19 = vpop.f32.mrf.mxu3  ;;  %v5001_v17 = vpop.f32.mrf.mxu0 }
 0xc95   :  { %v5002_v16 = vadd.f32 %v5001_v17, %v12664_v50  ;;  %v7005_v17 = vpop.eup %7004 }
 0xc96   :  { %v5016_v29 = vpop.f32.mrf.mxu1  ;;  %v7007_v47 = vpop.eup %7006  ;;  %v5037_v3 = vmul.f32 0.5, %v7005_v17 }
 0xc97   :  { %v5015_v23 = vadd.f32 %v5014_v12, %v5002_v16  ;;  %v5023_v12 = vmul.f32 0.5, %v4963_v35  ;;  %v5035_v50 = vmul.f32 0.5, %v7007_v47 }
 0xc99   :  { %v5025_v10 = vmul.f32 0.5, %v5015_v23  ;;  %v4924_v23 = vadd.f32 %v4923_v56, %v12667_v25  ;;  %v5043_v55 = vadd.f32 0.5, %v5035_v50 }
 0xc9a   :  { %v4975_v40 = vpop.f32.mrf.mxu2 }
 0xc9b   :  { %7008 = vtanh.f32 %v5025_v10  ;;  %v4976_v22 = vadd.f32 %v4975_v40, %v12666_v60  ;;  %v4937_v16 = vadd.f32 %v4936_v33, %v4924_v23 }
 0xc9c   :  { %v4990_v28 = vpop.f32.mrf.mxu3  ;;  %v5003_v7 = vpop.f32.mrf.mxu0  ;;  %7010 = vtanh.f32 %v5020_v44 }
 0xc9d   :  { %v4989_v62 = vadd.f32 %v4988_v19, %v4976_v22  ;;  %7012 = vtanh.f32 %v5018_v42  ;;  %v5045_v19 = vadd.f32 0.5, %v5037_v3  ;;  %v5022_v44 = vmul.f32 0.5, %v4937_v16 }
 0xc9f   :  { %v5024_v9 = vmul.f32 0.5, %v4989_v62  ;;  %v5055_v42 = vmul.f32 %v5045_v19, %v10257_v61  ;;  %v12668_v19 = vld [vmem:[#allocation113_spill] sm:$0xff] }
 0xca1   :  { %v7009_v6 = vpop.eup %7008  ;;  %7014 = vtanh.f32 %v5024_v9 }
 0xca2   :  { %v5041_v41 = vmul.f32 0.5, %v7009_v6  ;;  %v4977_v36 = vpop.f32.mrf.mxu2  ;;  %v7011_v29 = vpop.eup %7010  ;;  %7016 = vtanh.f32 %v5023_v12 }
 0xca3   :  { %v7013_v10 = vpop.eup %7012  ;;  %v5036_v40 = vmul.f32 0.5, %v7011_v29  ;;  %7018 = vtanh.f32 %v5022_v44  ;;  %v12673_v44 = vld [vmem:[#allocation148_spill] sm:$0xff] }
 0xca4   :  { %v5049_v31 = vadd.f32 0.5, %v5041_v41  ;;  %v5034_v22 = vmul.f32 0.5, %v7013_v10 }
 0xca5   :  { %v5044_v62 = vadd.f32 0.5, %v5036_v40  ;;  %v12672_v40 = vld [vmem:[#allocation147_spill] sm:$0xff] }
 0xca6   :  { %v5051_v20 = vmul.f32 2.0, %v5049_v31  ;;  %v5042_v9 = vadd.f32 0.5, %v5034_v22  ;;  %v12676_v22 = vld [vmem:[#allocation156_spill] sm:$0xff] }
 0xca7   :  { %v7015_v27 = vpop.eup %7014  ;;  %v5054_v23 = vmul.f32 %v5044_v62, %v10261_v39  ;;  %v12681_v62 = vld [vmem:[#allocation160_spill] sm:$0xff] }
 0xca8   :  { %v6620_v60 = vadd.f32 -1.0, %v5051_v20  ;;  %v5040_v56 = vmul.f32 0.5, %v7015_v27  ;;  %v7017_v7 = vpop.eup %7016  ;;  %v12669_v20 = vld [vmem:[#allocation121_spill] sm:$0xff] }
 0xca9   :  { %v5039_v25 = vmul.f32 0.5, %v7017_v7  ;;  %v7019_v3 = vpop.eup %7018  ;;  %v12670_v27 = vld [vmem:[#allocation145_spill] sm:$0xff]  ;;  %v12680_v7 = vld [vmem:[#allocation159_spill] sm:$0xff] }
 0xcaa   :  { %v5057_v35 = vmul.f32 %v6620_v60, %v5043_v55  ;;  %v5048_v28 = vadd.f32 0.5, %v5040_v56  ;;  %v5038_v36 = vmul.f32 0.5, %v7019_v3  ;;  %v12671_v55 = vld [vmem:[#allocation146_spill] sm:$0xff]  ;;  %v12674_v60 = vld [vmem:[#allocation115_spill] sm:$0xff]  ;;  %v12675_v56 = vld [vmem:[#allocation125_spill] sm:$0xff] }
 0xcab   :  { %v5047_v61 = vadd.f32 0.5, %v5039_v25  ;;  %v12685_v25 = vld [vmem:[#allocation168_spill] sm:$0xff]  ;;  %v12688_v3 = vld [vmem:[#allocation171_spill] sm:$0xff] }
 0xcac   :  { %v10424_v33 = vadd.f32 %v5057_v35, %v5055_v42  ;;  %v5050_v17 = vmul.f32 2.0, %v5048_v28  ;;  %v5046_v31 = vadd.f32 0.5, %v5038_v36  ;;  %v12677_v42 = vld [vmem:[#allocation157_spill] sm:$0xff]  ;;  %v12678_v35 = vld [vmem:[#allocation120_spill] sm:$0xff]  ;;  %v12679_v28 = vld [vmem:[#allocation131_spill] sm:$0xff] }
 0xcad   :  { %v12691_v36 = vld [vmem:[#allocation151_spill] sm:$0xff] }
 0xcae   :  { %7020 = vtanh.f32 %v10424_v33  ;;  %v6619_v47 = vadd.f32 -1.0, %v5050_v17  ;;  %v12682_v17 = vld [vmem:[#allocation122_spill] sm:$0xff] }
 0xcb0   :  { %v5056_v6 = vmul.f32 %v6619_v47, %v5042_v9  ;;  %v12683_v9 = vld [vmem:[#allocation137_spill] sm:$0xff]  ;;  %v12684_v47 = vld [vmem:[#allocation167_spill] sm:$0xff] }
 0xcb2   :  { %v10428_v12 = vadd.f32 %v5056_v6, %v5054_v23  ;;  %v12686_v23 = vld [vmem:[#allocation130_spill] sm:$0xff] }
 0xcb3   :  { %v12687_v6 = vld [vmem:[#allocation142_spill] sm:$0xff] }
 0xcb4   :  { %v7021_v41 = vpop.eup %7020  ;;  %7022 = vtanh.f32 %v10428_v12 }
 0xcb5   :  { %v5063_v50 = vmul.f32 %v7021_v41, %v5047_v61  ;;  %v12689_v61 = vld [vmem:[#allocation172_spill] sm:$0xff]  ;;  %v12690_v41 = vld [vmem:[#allocation135_spill] sm:$0xff] }
 0xcb7   :  { %6621 = vst [vmem:[%s10941_s5 + $0x16] sm:$0x3] %v5063_v50  ;;  %v10434_v16 = vpack.c.bf16 %v5063_v50, %v5063_v50  ;;  %v12692_v50 = vld [vmem:[#allocation177_spill] sm:$0xff] }
 0xcb9   :  { %5108 = vmatmul.bf16.vlgmr.msra.gmra.mxu3 %v10434_v16  ;;  %5134 = vmatmul.bf16.vlgmr.msrb.gmra.mxu1 %v10434_v16 }
 0xcba   :  { %v7023_v39 = vpop.eup %7022  ;;  %5204 = vmatpush.bf16.msra.mxu3 %v11525_v63  ;;  %5230 = vmatpush.bf16.msrb.mxu1 %v11526_v53 }
 0xcbb   :  { %v5062_v29 = vmul.f32 %v7023_v39, %v5046_v31  ;;  %v12693_v31 = vld [vmem:[#allocation178_spill] sm:$0xff]  ;;  %v12694_v39 = vld [vmem:[#allocation141_spill] sm:$0xff] }
 0xcbd   :  { %v10440_v10 = vpack.c.bf16 %v5062_v29, %v5062_v29  ;;  %v12695_v29 = vld [vmem:[#allocation158_spill] sm:$0xff] }
 0xcbe   :  { %5205 = vmatpush.bf16.msra.mxu3 %v11527_v34  ;;  %5231 = vmatpush.bf16.msrb.mxu1 %v11528_v1 }
 0xcbf   :  { %5095 = vmatmul.bf16.vlgmr.msrb.gmra.mxu2 %v10440_v10  ;;  %5121 = vmatmul.bf16.vlgmr.msra.gmra.mxu0 %v10440_v10 }
 0xcc0   :  { %5191 = vmatpush.bf16.msrb.mxu2 %v11529_v57  ;;  %5217 = vmatpush.bf16.msra.mxu0 %v11530_v58 }
 0xcc2   :  { %5206 = vmatpush.bf16.msra.mxu3 %v11531_v45  ;;  %5232 = vmatpush.bf16.msrb.mxu1 %v11532_v11 }
 0xcc4   :  { %5192 = vmatpush.bf16.msrb.mxu2 %v7933_v0  ;;  %5218 = vmatpush.bf16.msra.mxu0 %v7935_v49 }
 0xcc6   :  { %5207 = vmatpush.bf16.msra.mxu3 %v11533_v21  ;;  %5233 = vmatpush.bf16.msrb.mxu1 %v11534_v52 }
 0xcc8   :  { %5193 = vmatpush.bf16.msrb.mxu2 %v11535_v38  ;;  %5219 = vmatpush.bf16.msra.mxu0 %v11536_v13 }
 0xcc9   :  { %5160 = vmatmul.bf16.vlgmr.msrb.gmra.mxu3 %v10434_v16  ;;  %5186 = vmatmul.bf16.vlgmr.msra.gmra.mxu1 %v10434_v16 }
 0xcca   :  { %5208 = vmatpush.bf16.msra.mxu3 %v11537_v54  ;;  %5234 = vmatpush.bf16.msrb.mxu1 %v11538_v37 }
 0xccc   :  { %5194 = vmatpush.bf16.msrb.mxu2 %v7975_v2  ;;  %5220 = vmatpush.bf16.msra.mxu0 %v7977_v30 }
 0xcce   :  { %5209 = vmatpush.bf16.msra.mxu3 %v11539_v15  ;;  %5235 = vmatpush.bf16.msrb.mxu1 %v11540_v59 }
 0xccf   :  { %5147 = vmatmul.bf16.vlgmr.msra.gmra.mxu2 %v10440_v10  ;;  %5173 = vmatmul.bf16.vlgmr.msrb.gmra.mxu0 %v10440_v10 }
 0xcd0   :  { %5195 = vmatpush.bf16.msrb.mxu2 %v11541_v4  ;;  %5221 = vmatpush.bf16.msra.mxu0 %v11542_v43 }
 0xcd2   :  { %5210 = vmatpush.bf16.msra.mxu3 %v11543_v24  ;;  %5236 = vmatpush.bf16.msrb.mxu1 %v11544_v46 }
 0xcd4   :  { %5196 = vmatpush.bf16.msrb.mxu2 %v11628_v18  ;;  %5222 = vmatpush.bf16.msra.mxu0 %v11546_v48 }
 0xcd6   :  { %5211 = vmatpush.bf16.msra.mxu3 %v11547_v14  ;;  %5237 = vmatpush.bf16.msrb.mxu1 %v11548_v26 }
 0xcd8   :  { %5197 = vmatpush.bf16.msrb.mxu2 %v11630_v32  ;;  %5223 = vmatpush.bf16.msra.mxu0 %v8052_v5 }
 0xcd9   :  { %5212 = vmatmul.bf16.vlgmr.msra.gmra.mxu3 %v10434_v16  ;;  %5238 = vmatmul.bf16.vlgmr.msrb.gmra.mxu1 %v10434_v16 }
 0xcda   :  { %5256 = vmatpush.bf16.msrb.mxu3 %v11549_v51  ;;  %5282 = vmatpush.bf16.msra.mxu1 %v11629_v8 }
 0xcdc   :  { %5198 = vmatpush.bf16.msrb.mxu2 %v12670_v27  ;;  %5224 = vmatpush.bf16.msra.mxu0 %v12671_v55 }
 0xcde   :  { %5257 = vmatpush.bf16.msrb.mxu3 %v12668_v19  ;;  %5283 = vmatpush.bf16.msra.mxu1 %v12669_v20 }
 0xcdf   :  { %5199 = vmatmul.bf16.vlgmr.msrb.gmra.mxu2 %v10440_v10  ;;  %5225 = vmatmul.bf16.vlgmr.msra.gmra.mxu0 %v10440_v10 }
 0xce0   :  { %5243 = vmatpush.bf16.msra.mxu2 %v12672_v40  ;;  %5269 = vmatpush.bf16.msrb.mxu0 %v12673_v44 }
 0xce2   :  { %5258 = vmatpush.bf16.msrb.mxu3 %v12674_v60  ;;  %5284 = vmatpush.bf16.msra.mxu1 %v12675_v56 }
 0xce4   :  { %5244 = vmatpush.bf16.msra.mxu2 %v12676_v22  ;;  %5270 = vmatpush.bf16.msrb.mxu0 %v12677_v42 }
 0xce6   :  { %5259 = vmatpush.bf16.msrb.mxu3 %v12678_v35  ;;  %5285 = vmatpush.bf16.msra.mxu1 %v12679_v28 }
 0xce8   :  { %5245 = vmatpush.bf16.msra.mxu2 %v12680_v7  ;;  %5271 = vmatpush.bf16.msrb.mxu0 %v12681_v62 }
 0xcea   :  { %5260 = vmatpush.bf16.msrb.mxu3 %v12682_v17  ;;  %5286 = vmatpush.bf16.msra.mxu1 %v12683_v9  ;;  %v12765_v9 = vld [vmem:[#allocation227_spill] sm:$0xff] }
 0xcec   :  { %5246 = vmatpush.bf16.msra.mxu2 %v12684_v47  ;;  %5272 = vmatpush.bf16.msrb.mxu0 %v12685_v25  ;;  %v12696_v25 = vld [vmem:[#allocation13_spill] sm:$0xff] }
 0xcee   :  { %5261 = vmatpush.bf16.msrb.mxu3 %v12686_v23  ;;  %5287 = vmatpush.bf16.msra.mxu1 %v12687_v6  ;;  %v12697_v23 = vld [vmem:[#allocation18_spill] sm:$0xff]  ;;  %v12698_v6 = vld [vmem:[#allocation183_spill] sm:$0xff] }
 0xcf0   :  { %5247 = vmatpush.bf16.msra.mxu2 %v12688_v3  ;;  %5273 = vmatpush.bf16.msrb.mxu0 %v12689_v61  ;;  %v12699_v3 = vld [vmem:[#allocation184_spill] sm:$0xff] }
 0xcf2   :  { %5262 = vmatpush.bf16.msrb.mxu3 %v12690_v41  ;;  %5288 = vmatpush.bf16.msra.mxu1 %v12691_v36  ;;  %v12700_v36 = vld [vmem:[#allocation14_spill] sm:$0xff] }
 0xcf4   :  { %5248 = vmatpush.bf16.msra.mxu2 %v12692_v50  ;;  %5274 = vmatpush.bf16.msrb.mxu0 %v12693_v31  ;;  %v12701_v50 = vld [vmem:[#allocation22_spill] sm:$0xff]  ;;  %v12702_v31 = vld [vmem:[#allocation189_spill] sm:$0xff] }
 0xcf6   :  { %5263 = vmatpush.bf16.msrb.mxu3 %v12694_v39  ;;  %5289 = vmatpush.bf16.msra.mxu1 %v12695_v29  ;;  %v12703_v39 = vld [vmem:[#allocation190_spill] sm:$0xff]  ;;  %v12704_v29 = vld [vmem:[#allocation15_spill] sm:$0xff] }
 0xcf8   :  { %5249 = vmatpush.bf16.msra.mxu2 %v12698_v6  ;;  %5275 = vmatpush.bf16.msrb.mxu0 %v12699_v3  ;;  %v12706_v3 = vld [vmem:[#allocation17_spill] sm:$0xff]  ;;  %v12707_v6 = vld [vmem:[#allocation26_spill] sm:$0xff] }
 0xcf9   :  { %5264 = vmatmul.bf16.vlgmr.msrb.gmra.mxu3 %v10434_v16  ;;  %5290 = vmatmul.bf16.vlgmr.msra.gmra.mxu1 %v10434_v16  ;;  %v12708_v16 = vld [vmem:[#allocation19_spill] sm:$0xff] }
 0xcfa   :  { %5377 = vmatpush.bf16.msra.mxu3 %v12696_v25  ;;  %5403 = vmatpush.bf16.msrb.mxu1 %v12697_v23  ;;  %v12705_v25 = vld [vmem:[#allocation16_spill] sm:$0xff]  ;;  %v12715_v23 = vld [vmem:[#allocation35_spill] sm:$0xff] }
 0xcfc   :  { %5250 = vmatpush.bf16.msra.mxu2 %v12702_v31  ;;  %5276 = vmatpush.bf16.msrb.mxu0 %v12703_v39  ;;  %v12711_v31 = vld [vmem:[#allocation31_spill] sm:$0xff] }
 0xcfd   :  { %v12712_v39 = vld [vmem:[#allocation23_spill] sm:$0xff] }
 0xcfe   :  { %5378 = vmatpush.bf16.msra.mxu3 %v12700_v36  ;;  %5404 = vmatpush.bf16.msrb.mxu1 %v12701_v50  ;;  %v12709_v36 = vld [vmem:[#allocation20_spill] sm:$0xff]  ;;  %v12710_v50 = vld [vmem:[#allocation21_spill] sm:$0xff] }
 0xcff   :  { %5251 = vmatmul.bf16.vlgmr.msra.gmra.mxu2 %v10440_v10  ;;  %5277 = vmatmul.bf16.vlgmr.msrb.gmra.mxu0 %v10440_v10  ;;  %v12716_v10 = vld [vmem:[#allocation27_spill] sm:$0xff] }
 0xd00   :  { %5364 = vmatpush.bf16.msrb.mxu2 %v12704_v29  ;;  %5390 = vmatpush.bf16.msra.mxu0 %v12705_v25  ;;  %v12713_v29 = vld [vmem:[#allocation24_spill] sm:$0xff]  ;;  %v12714_v25 = vld [vmem:[#allocation25_spill] sm:$0xff] }
 0xd02   :  { %5379 = vmatpush.bf16.msra.mxu3 %v12706_v3  ;;  %5405 = vmatpush.bf16.msrb.mxu1 %v12707_v6  ;;  %v12717_v3 = vld [vmem:[#allocation28_spill] sm:$0xff]  ;;  %v12718_v6 = vld [vmem:[#allocation30_spill] sm:$0xff] }
 0xd04   :  { %5365 = vmatpush.bf16.msrb.mxu2 %v12708_v16  ;;  %5391 = vmatpush.bf16.msra.mxu0 %v12709_v36  ;;  %v12719_v16 = vld [vmem:[#allocation39_spill] sm:$0xff]  ;;  %v12720_v36 = vld [vmem:[#allocation32_spill] sm:$0xff] }
 0xd06   :  { %5380 = vmatpush.bf16.msra.mxu3 %v12710_v50  ;;  %5406 = vmatpush.bf16.msrb.mxu1 %v12711_v31  ;;  %v12721_v50 = vld [vmem:[#allocation33_spill] sm:$0xff]  ;;  %v12722_v31 = vld [vmem:[#allocation34_spill] sm:$0xff] }
 0xd08   :  { %5366 = vmatpush.bf16.msrb.mxu2 %v12712_v39  ;;  %5392 = vmatpush.bf16.msra.mxu0 %v12713_v29  ;;  %v12723_v39 = vld [vmem:[#allocation47_spill] sm:$0xff]  ;;  %v12724_v29 = vld [vmem:[#allocation36_spill] sm:$0xff] }
 0xd0a   :  { %5381 = vmatpush.bf16.msra.mxu3 %v12714_v25  ;;  %5407 = vmatpush.bf16.msrb.mxu1 %v12715_v23  ;;  %v12725_v25 = vld [vmem:[#allocation37_spill] sm:$0xff]  ;;  %v12726_v23 = vld [vmem:[#allocation38_spill] sm:$0xff] }
 0xd0c   :  { %5367 = vmatpush.bf16.msrb.mxu2 %v12716_v10  ;;  %5393 = vmatpush.bf16.msra.mxu0 %v12717_v3  ;;  %v12727_v10 = vld [vmem:[#allocation53_spill] sm:$0xff]  ;;  %v12728_v3 = vld [vmem:[#allocation40_spill] sm:$0xff] }
 0xd0e   :  { %5382 = vmatpush.bf16.msra.mxu3 %v12718_v6  ;;  %5408 = vmatpush.bf16.msrb.mxu1 %v12719_v16  ;;  %v12729_v6 = vld [vmem:[#allocation57_spill] sm:$0xff] }
 0xd0f   :  { %v12730_v16 = vld [vmem:[#allocation41_spill] sm:$0xff] }
 0xd10   :  { %5368 = vmatpush.bf16.msrb.mxu2 %v12720_v36  ;;  %5394 = vmatpush.bf16.msra.mxu0 %v12721_v50  ;;  %v12731_v36 = vld [vmem:[#allocation43_spill] sm:$0xff]  ;;  %v12732_v50 = vld [vmem:[#allocation48_spill] sm:$0xff] }
 0xd12   :  { %5383 = vmatpush.bf16.msra.mxu3 %v12722_v31  ;;  %5409 = vmatpush.bf16.msrb.mxu1 %v12723_v39  ;;  %v12733_v31 = vld [vmem:[#allocation61_spill] sm:$0xff] }
 0xd13   :  { %v12734_v39 = vld [vmem:[#allocation49_spill] sm:$0xff] }
 0xd14   :  { %5369 = vmatpush.bf16.msrb.mxu2 %v12724_v29  ;;  %5395 = vmatpush.bf16.msra.mxu0 %v12725_v25  ;;  %v12735_v29 = vld [vmem:[#allocation50_spill] sm:$0xff]  ;;  %v12736_v25 = vld [vmem:[#allocation51_spill] sm:$0xff] }
 0xd16   :  { %5384 = vmatpush.bf16.msra.mxu3 %v12726_v23  ;;  %5410 = vmatpush.bf16.msrb.mxu1 %v12727_v10  ;;  %v12737_v23 = vld [vmem:[#allocation52_spill] sm:$0xff]  ;;  %v12738_v10 = vld [vmem:[#allocation54_spill] sm:$0xff] }
 0xd18   :  { %5370 = vmatpush.bf16.msrb.mxu2 %v12730_v16  ;;  %5396 = vmatpush.bf16.msra.mxu0 %v12731_v36  ;;  %v12741_v16 = vld [vmem:[#allocation59_spill] sm:$0xff]  ;;  %v12742_v36 = vld [vmem:[#allocation60_spill] sm:$0xff] }
 0xd1a   :  { %5429 = vmatpush.bf16.msrb.mxu3 %v12728_v3  ;;  %5455 = vmatpush.bf16.msra.mxu1 %v12729_v6  ;;  %v12739_v3 = vld [vmem:[#allocation65_spill] sm:$0xff]  ;;  %v12740_v6 = vld [vmem:[#allocation58_spill] sm:$0xff] }
 0xd1c   :  { %5371 = vmatpush.bf16.msrb.mxu2 %v12734_v39  ;;  %5397 = vmatpush.bf16.msra.mxu0 %v12735_v29  ;;  %v12745_v39 = vld [vmem:[#allocation63_spill] sm:$0xff]  ;;  %v12746_v29 = vld [vmem:[#allocation64_spill] sm:$0xff] }
 0xd1e   :  { %5430 = vmatpush.bf16.msrb.mxu3 %v12732_v50  ;;  %5456 = vmatpush.bf16.msra.mxu1 %v12733_v31  ;;  %v12743_v50 = vld [vmem:[#allocation72_spill] sm:$0xff]  ;;  %v12744_v31 = vld [vmem:[#allocation62_spill] sm:$0xff] }
 0xd20   :  { %5416 = vmatpush.bf16.msra.mxu2 %v12736_v25  ;;  %5442 = vmatpush.bf16.msrb.mxu0 %v12737_v23  ;;  %v12747_v25 = vld [vmem:[#allocation76_spill] sm:$0xff]  ;;  %v12748_v23 = vld [vmem:[#allocation69_spill] sm:$0xff] }
 0xd22   :  { %5431 = vmatpush.bf16.msrb.mxu3 %v12738_v10  ;;  %5457 = vmatpush.bf16.msra.mxu1 %v12739_v3  ;;  %v12749_v10 = vld [vmem:[#allocation70_spill] sm:$0xff]  ;;  %v12750_v3 = vld [vmem:[#allocation71_spill] sm:$0xff] }
 0xd24   :  { %5417 = vmatpush.bf16.msra.mxu2 %v12740_v6  ;;  %5443 = vmatpush.bf16.msrb.mxu0 %v12741_v16  ;;  %v12751_v6 = vld [vmem:[#allocation81_spill] sm:$0xff] }
 0xd25   :  { %v12752_v16 = vld [vmem:[#allocation73_spill] sm:$0xff] }
 0xd26   :  { %5432 = vmatpush.bf16.msrb.mxu3 %v12742_v36  ;;  %5458 = vmatpush.bf16.msra.mxu1 %v12743_v50  ;;  %v12753_v36 = vld [vmem:[#allocation74_spill] sm:$0xff]  ;;  %v12754_v50 = vld [vmem:[#allocation75_spill] sm:$0xff] }
 0xd28   :  { %5418 = vmatpush.bf16.msra.mxu2 %v12744_v31  ;;  %5444 = vmatpush.bf16.msrb.mxu0 %v12745_v39  ;;  %v12755_v31 = vld [vmem:[#allocation87_spill] sm:$0xff]  ;;  %v12756_v39 = vld [vmem:[#allocation77_spill] sm:$0xff] }
 0xd2a   :  { %5433 = vmatpush.bf16.msrb.mxu3 %v12746_v29  ;;  %5459 = vmatpush.bf16.msra.mxu1 %v12747_v25  ;;  %v12757_v29 = vld [vmem:[#allocation78_spill] sm:$0xff]  ;;  %v12758_v25 = vld [vmem:[#allocation79_spill] sm:$0xff] }
 0xd2c   :  { %5419 = vmatpush.bf16.msra.mxu2 %v12748_v23  ;;  %5445 = vmatpush.bf16.msrb.mxu0 %v12749_v10  ;;  %v12759_v23 = vld [vmem:[#allocation91_spill] sm:$0xff] }
 0xd2d   :  { %v12760_v10 = vld [vmem:[#allocation83_spill] sm:$0xff] }
 0xd2e   :  { %5434 = vmatpush.bf16.msrb.mxu3 %v12750_v3  ;;  %5460 = vmatpush.bf16.msra.mxu1 %v12751_v6  ;;  %v12761_v3 = vld [vmem:[#allocation86_spill] sm:$0xff]  ;;  %v12762_v6 = vld [vmem:[#allocation89_spill] sm:$0xff] }
 0xd30   :  { %5420 = vmatpush.bf16.msra.mxu2 %v12752_v16  ;;  %5446 = vmatpush.bf16.msrb.mxu0 %v12753_v36  ;;  %v12763_v16 = vld [vmem:[#allocation90_spill] sm:$0xff] }
 0xd32   :  { %5435 = vmatpush.bf16.msrb.mxu3 %v12754_v50  ;;  %5461 = vmatpush.bf16.msra.mxu1 %v12755_v31  ;;  %v12764_v31 = vld [vmem:[#allocation226_spill] sm:$0xff] }
 0xd34   :  { %5421 = vmatpush.bf16.msra.mxu2 %v12756_v39  ;;  %5447 = vmatpush.bf16.msrb.mxu0 %v12757_v29 }
 0xd36   :  { %5436 = vmatpush.bf16.msrb.mxu3 %v12758_v25  ;;  %5462 = vmatpush.bf16.msra.mxu1 %v12759_v23  ;;  %v5135_v36 = vpop.f32.mrf.mxu1 }
 0xd38   :  { %5422 = vmatpush.bf16.msra.mxu2 %v12760_v10  ;;  %5448 = vmatpush.bf16.msrb.mxu0 %v12761_v3 }
 0xd3c   :  { %5423 = vmatpush.bf16.msra.mxu2 %v12762_v6  ;;  %5449 = vmatpush.bf16.msrb.mxu0 %v12763_v16  ;;  %v5109_v50 = vpop.f32.mrf.mxu3  ;;  %v5122_v41 = vpop.f32.mrf.mxu0 }
 0xd3d   :  { %v5123_v61 = vadd.f32 %v5122_v41, %v12764_v31 }
 0xd3e   :  { %v5137_v39 = vpop.f32.mrf.mxu1 }
 0xd3f   :  { %v5136_v47 = vadd.f32 %v5135_v36, %v5123_v61 }
 0xd41   :  { %v5296_v55 = vmul.f32 0.5, %v5136_v47 }
 0xd42   :  { %v5096_v29 = vpop.f32.mrf.mxu2 }
 0xd43   :  { %v5097_v25 = vadd.f32 %v5096_v29, %v12765_v9 }
 0xd44   :  { %v5111_v17 = vpop.f32.mrf.mxu3  ;;  %v5124_v23 = vpop.f32.mrf.mxu0 }
 0xd45   :  { %v5110_v62 = vadd.f32 %v5109_v50, %v5097_v25  ;;  %v12766_v17 = vld [vmem:[#allocation228_spill] sm:$0xff] }
 0xd46   :  { %v5187_v10 = vpop.f32.mrf.mxu1 }
 0xd4a   :  { %v5098_v7 = vpop.f32.mrf.mxu2 }
 0xd4b   :  { %v12767_v7 = vld [vmem:[#allocation229_spill] sm:$0xff] }
 0xd4c   :  { %v5161_v3 = vpop.f32.mrf.mxu3  ;;  %v5174_v28 = vpop.f32.mrf.mxu0 }
 0xd4d   :  { %v5175_v23 = vadd.f32 %v5174_v28, %v12766_v17 }
 0xd4e   :  { %v5189_v6 = vpop.f32.mrf.mxu1 }
 0xd4f   :  { %v5188_v50 = vadd.f32 %v5187_v10, %v5175_v23  ;;  %v12770_v10 = vld [vmem:[#allocation233_spill] sm:$0xff] }
 0xd51   :  { %v5298_v40 = vmul.f32 0.5, %v5188_v50 }
 0xd52   :  { %v5148_v35 = vpop.f32.mrf.mxu2 }
 0xd53   :  { %v5149_v29 = vadd.f32 %v5148_v35, %v12767_v7  ;;  %7024 = vtanh.f32 %v5298_v40  ;;  %v5295_v35 = vmul.f32 0.5, %v5110_v62  ;;  %v12771_v40 = vld [vmem:[#allocation231_spill] sm:$0xff] }
 0xd54   :  { %v5163_v16 = vpop.f32.mrf.mxu3  ;;  %v5176_v42 = vpop.f32.mrf.mxu0  ;;  %7026 = vtanh.f32 %v5296_v55 }
 0xd55   :  { %v12768_v16 = vld [vmem:[#allocation232_spill] sm:$0xff]  ;;  %v5162_v27 = vadd.f32 %v5161_v3, %v5149_v29 }
 0xd56   :  { %v5239_v22 = vpop.f32.mrf.mxu1 }
 0xd57   :  { %v5297_v28 = vmul.f32 0.5, %v5162_v27 }
 0xd5a   :  { %v5150_v56 = vpop.f32.mrf.mxu2 }
 0xd5c   :  { %v5213_v60 = vpop.f32.mrf.mxu3  ;;  %v5226_v41 = vpop.f32.mrf.mxu0 }
 0xd5e   :  { %v5241_v31 = vpop.f32.mrf.mxu1 }
 0xd62   :  { %v5200_v61 = vpop.f32.mrf.mxu2 }
 0xd64   :  { %v5215_v36 = vpop.f32.mrf.mxu3  ;;  %v5228_v39 = vpop.f32.mrf.mxu0 }
 0xd65   :  { %v12769_v36 = vld [vmem:[#allocation230_spill] sm:$0xff] }
 0xd66   :  { %v5227_v39 = vadd.f32 %v5226_v41, %v12769_v36 }
 0xd68   :  { %v5240_v19 = vadd.f32 %v5239_v22, %v5227_v39 }
 0xd6a   :  { %v5202_v9 = vpop.f32.mrf.mxu2 }
 0xd76   :  { %v5291_v25 = vpop.f32.mrf.mxu1 }
 0xd7c   :  { %v5265_v44 = vpop.f32.mrf.mxu3  ;;  %v5278_v6 = vpop.f32.mrf.mxu0 }
 0xd7d   :  { %v5279_v42 = vadd.f32 %v5278_v6, %v12768_v16  ;;  %v7025_v6 = vpop.eup %7024 }
 0xd7e   :  { %v5293_v56 = vpop.f32.mrf.mxu1  ;;  %v7027_v3 = vpop.eup %7026  ;;  %v5314_v41 = vmul.f32 0.5, %v7025_v6 }
 0xd7f   :  { %v5292_v20 = vadd.f32 %v5291_v25, %v5279_v42  ;;  %v5300_v25 = vmul.f32 0.5, %v5240_v19  ;;  %v5312_v16 = vmul.f32 0.5, %v7027_v3 }
 0xd81   :  { %v5302_v31 = vmul.f32 0.5, %v5292_v20  ;;  %v5201_v20 = vadd.f32 %v5200_v61, %v12771_v40  ;;  %v5320_v39 = vadd.f32 0.5, %v5312_v16 }
 0xd82   :  { %v5252_v9 = vpop.f32.mrf.mxu2 }
 0xd83   :  { %7028 = vtanh.f32 %v5302_v31  ;;  %v5253_v17 = vadd.f32 %v5252_v9, %v12770_v10  ;;  %v5214_v42 = vadd.f32 %v5213_v60, %v5201_v20 }
 0xd84   :  { %v5267_v23 = vpop.f32.mrf.mxu3  ;;  %v5280_v7 = vpop.f32.mrf.mxu0  ;;  %7030 = vtanh.f32 %v5297_v28 }
 0xd85   :  { %v5266_v50 = vadd.f32 %v5265_v44, %v5253_v17  ;;  %7032 = vtanh.f32 %v5295_v35  ;;  %v5322_v44 = vadd.f32 0.5, %v5314_v41  ;;  %v5299_v28 = vmul.f32 0.5, %v5214_v42 }
 0xd87   :  { %v5301_v47 = vmul.f32 0.5, %v5266_v50  ;;  %v5332_v35 = vmul.f32 %v5322_v44, %v10424_v33  ;;  %v12772_v44 = vld [vmem:[#allocation113_spill] sm:$0xff] }
 0xd89   :  { %v7029_v55 = vpop.eup %7028  ;;  %7034 = vtanh.f32 %v5301_v47 }
 0xd8a   :  { %v5318_v27 = vmul.f32 0.5, %v7029_v55  ;;  %v5254_v29 = vpop.f32.mrf.mxu2  ;;  %v7031_v56 = vpop.eup %7030  ;;  %7036 = vtanh.f32 %v5300_v25 }
 0xd8b   :  { %v7033_v31 = vpop.eup %7032  ;;  %v5313_v9 = vmul.f32 0.5, %v7031_v56  ;;  %7038 = vtanh.f32 %v5299_v28  ;;  %v12777_v28 = vld [vmem:[#allocation148_spill] sm:$0xff] }
 0xd8c   :  { %v5326_v62 = vadd.f32 0.5, %v5318_v27  ;;  %v5311_v17 = vmul.f32 0.5, %v7033_v31 }
 0xd8d   :  { %v5321_v50 = vadd.f32 0.5, %v5313_v9  ;;  %v12776_v9 = vld [vmem:[#allocation147_spill] sm:$0xff] }
 0xd8e   :  { %v5328_v22 = vmul.f32 2.0, %v5326_v62  ;;  %v5319_v47 = vadd.f32 0.5, %v5311_v17  ;;  %v12780_v17 = vld [vmem:[#allocation156_spill] sm:$0xff] }
 0xd8f   :  { %v7035_v36 = vpop.eup %7034  ;;  %v5331_v20 = vmul.f32 %v5321_v50, %v10428_v12  ;;  %v12785_v50 = vld [vmem:[#allocation160_spill] sm:$0xff] }
 0xd90   :  { %v6623_v10 = vadd.f32 -1.0, %v5328_v22  ;;  %v5317_v61 = vmul.f32 0.5, %v7035_v36  ;;  %v7037_v7 = vpop.eup %7036  ;;  %v12773_v22 = vld [vmem:[#allocation121_spill] sm:$0xff] }
 0xd91   :  { %v5316_v40 = vmul.f32 0.5, %v7037_v7  ;;  %v7039_v41 = vpop.eup %7038  ;;  %v12774_v36 = vld [vmem:[#allocation145_spill] sm:$0xff]  ;;  %v12784_v7 = vld [vmem:[#allocation159_spill] sm:$0xff] }
 0xd92   :  { %v5334_v19 = vmul.f32 %v6623_v10, %v5320_v39  ;;  %v5325_v23 = vadd.f32 0.5, %v5317_v61  ;;  %v5315_v29 = vmul.f32 0.5, %v7039_v41  ;;  %v12775_v39 = vld [vmem:[#allocation146_spill] sm:$0xff]  ;;  %v12778_v10 = vld [vmem:[#allocation115_spill] sm:$0xff]  ;;  %v12779_v61 = vld [vmem:[#allocation125_spill] sm:$0xff] }
 0xd93   :  { %v5324_v33 = vadd.f32 0.5, %v5316_v40  ;;  %v12789_v40 = vld [vmem:[#allocation168_spill] sm:$0xff]  ;;  %v12792_v41 = vld [vmem:[#allocation171_spill] sm:$0xff] }
 0xd94   :  { %v10591_v60 = vadd.f32 %v5334_v19, %v5332_v35  ;;  %v5327_v6 = vmul.f32 2.0, %v5325_v23  ;;  %v5323_v62 = vadd.f32 0.5, %v5315_v29  ;;  %v12781_v35 = vld [vmem:[#allocation157_spill] sm:$0xff]  ;;  %v12782_v19 = vld [vmem:[#allocation120_spill] sm:$0xff]  ;;  %v12783_v23 = vld [vmem:[#allocation131_spill] sm:$0xff] }
 0xd95   :  { %v12795_v29 = vld [vmem:[#allocation151_spill] sm:$0xff] }
 0xd96   :  { %7040 = vtanh.f32 %v10591_v60  ;;  %v6622_v3 = vadd.f32 -1.0, %v5327_v6  ;;  %v12786_v6 = vld [vmem:[#allocation122_spill] sm:$0xff] }
 0xd98   :  { %v5333_v55 = vmul.f32 %v6622_v3, %v5319_v47  ;;  %v12787_v47 = vld [vmem:[#allocation137_spill] sm:$0xff]  ;;  %v12788_v3 = vld [vmem:[#allocation167_spill] sm:$0xff] }
 0xd9a   :  { %v10595_v25 = vadd.f32 %v5333_v55, %v5331_v20  ;;  %v12790_v20 = vld [vmem:[#allocation130_spill] sm:$0xff] }
 0xd9b   :  { %v12791_v55 = vld [vmem:[#allocation142_spill] sm:$0xff] }
 0xd9c   :  { %v7041_v27 = vpop.eup %7040  ;;  %7042 = vtanh.f32 %v10595_v25 }
 0xd9d   :  { %v5340_v16 = vmul.f32 %v7041_v27, %v5324_v33  ;;  %v12793_v33 = vld [vmem:[#allocation172_spill] sm:$0xff]  ;;  %v12794_v27 = vld [vmem:[#allocation135_spill] sm:$0xff] }
 0xd9f   :  { %6624 = vst [vmem:[%s10941_s5 + $0x18] sm:$0x3] %v5340_v16  ;;  %v10601_v42 = vpack.c.bf16 %v5340_v16, %v5340_v16  ;;  %v12796_v16 = vld [vmem:[#allocation177_spill] sm:$0xff] }
 0xda1   :  { %5385 = vmatmul.bf16.vlgmr.msra.gmra.mxu3 %v10601_v42  ;;  %5411 = vmatmul.bf16.vlgmr.msrb.gmra.mxu1 %v10601_v42 }
 0xda2   :  { %v7043_v12 = vpop.eup %7042  ;;  %5481 = vmatpush.bf16.msra.mxu3 %v11525_v63  ;;  %5507 = vmatpush.bf16.msrb.mxu1 %v11526_v53 }
 0xda3   :  { %v5339_v56 = vmul.f32 %v7043_v12, %v5323_v62  ;;  %v12797_v62 = vld [vmem:[#allocation178_spill] sm:$0xff]  ;;  %v12798_v12 = vld [vmem:[#allocation141_spill] sm:$0xff] }
 0xda5   :  { %v10607_v31 = vpack.c.bf16 %v5339_v56, %v5339_v56  ;;  %v12799_v56 = vld [vmem:[#allocation158_spill] sm:$0xff] }
 0xda6   :  { %5482 = vmatpush.bf16.msra.mxu3 %v11527_v34  ;;  %5508 = vmatpush.bf16.msrb.mxu1 %v11528_v1 }
 0xda7   :  { %5372 = vmatmul.bf16.vlgmr.msrb.gmra.mxu2 %v10607_v31  ;;  %5398 = vmatmul.bf16.vlgmr.msra.gmra.mxu0 %v10607_v31 }
 0xda8   :  { %5468 = vmatpush.bf16.msrb.mxu2 %v11529_v57  ;;  %5494 = vmatpush.bf16.msra.mxu0 %v11530_v58 }
 0xdaa   :  { %5483 = vmatpush.bf16.msra.mxu3 %v11531_v45  ;;  %5509 = vmatpush.bf16.msrb.mxu1 %v11532_v11 }
 0xdac   :  { %5469 = vmatpush.bf16.msrb.mxu2 %v7933_v0  ;;  %5495 = vmatpush.bf16.msra.mxu0 %v7935_v49 }
 0xdae   :  { %5484 = vmatpush.bf16.msra.mxu3 %v11533_v21  ;;  %5510 = vmatpush.bf16.msrb.mxu1 %v11534_v52 }
 0xdb0   :  { %5470 = vmatpush.bf16.msrb.mxu2 %v11535_v38  ;;  %5496 = vmatpush.bf16.msra.mxu0 %v11536_v13 }
 0xdb1   :  { %5437 = vmatmul.bf16.vlgmr.msrb.gmra.mxu3 %v10601_v42  ;;  %5463 = vmatmul.bf16.vlgmr.msra.gmra.mxu1 %v10601_v42 }
 0xdb2   :  { %5485 = vmatpush.bf16.msra.mxu3 %v11537_v54  ;;  %5511 = vmatpush.bf16.msrb.mxu1 %v11538_v37 }
 0xdb4   :  { %5471 = vmatpush.bf16.msrb.mxu2 %v7975_v2  ;;  %5497 = vmatpush.bf16.msra.mxu0 %v7977_v30 }
 0xdb6   :  { %5486 = vmatpush.bf16.msra.mxu3 %v11539_v15  ;;  %5512 = vmatpush.bf16.msrb.mxu1 %v11540_v59 }
 0xdb7   :  { %5424 = vmatmul.bf16.vlgmr.msra.gmra.mxu2 %v10607_v31  ;;  %5450 = vmatmul.bf16.vlgmr.msrb.gmra.mxu0 %v10607_v31 }
 0xdb8   :  { %5472 = vmatpush.bf16.msrb.mxu2 %v11541_v4  ;;  %5498 = vmatpush.bf16.msra.mxu0 %v11542_v43 }
 0xdba   :  { %5487 = vmatpush.bf16.msra.mxu3 %v11543_v24  ;;  %5513 = vmatpush.bf16.msrb.mxu1 %v11544_v46 }
 0xdbc   :  { %5473 = vmatpush.bf16.msrb.mxu2 %v11628_v18  ;;  %5499 = vmatpush.bf16.msra.mxu0 %v11546_v48 }
 0xdbe   :  { %5488 = vmatpush.bf16.msra.mxu3 %v11547_v14  ;;  %5514 = vmatpush.bf16.msrb.mxu1 %v11548_v26 }
 0xdc0   :  { %5474 = vmatpush.bf16.msrb.mxu2 %v11630_v32  ;;  %5500 = vmatpush.bf16.msra.mxu0 %v8052_v5 }
 0xdc1   :  { %5489 = vmatmul.bf16.vlgmr.msra.gmra.mxu3 %v10601_v42  ;;  %5515 = vmatmul.bf16.vlgmr.msrb.gmra.mxu1 %v10601_v42 }
 0xdc2   :  { %5533 = vmatpush.bf16.msrb.mxu3 %v11549_v51  ;;  %5559 = vmatpush.bf16.msra.mxu1 %v11629_v8 }
 0xdc4   :  { %5475 = vmatpush.bf16.msrb.mxu2 %v12774_v36  ;;  %5501 = vmatpush.bf16.msra.mxu0 %v12775_v39 }
 0xdc6   :  { %5534 = vmatpush.bf16.msrb.mxu3 %v12772_v44  ;;  %5560 = vmatpush.bf16.msra.mxu1 %v12773_v22 }
 0xdc7   :  { %5476 = vmatmul.bf16.vlgmr.msrb.gmra.mxu2 %v10607_v31  ;;  %5502 = vmatmul.bf16.vlgmr.msra.gmra.mxu0 %v10607_v31 }
 0xdc8   :  { %5520 = vmatpush.bf16.msra.mxu2 %v12776_v9  ;;  %5546 = vmatpush.bf16.msrb.mxu0 %v12777_v28 }
 0xdca   :  { %5535 = vmatpush.bf16.msrb.mxu3 %v12778_v10  ;;  %5561 = vmatpush.bf16.msra.mxu1 %v12779_v61 }
 0xdcc   :  { %5521 = vmatpush.bf16.msra.mxu2 %v12780_v17  ;;  %5547 = vmatpush.bf16.msrb.mxu0 %v12781_v35 }
 0xdce   :  { %5536 = vmatpush.bf16.msrb.mxu3 %v12782_v19  ;;  %5562 = vmatpush.bf16.msra.mxu1 %v12783_v23 }
 0xdd0   :  { %5522 = vmatpush.bf16.msra.mxu2 %v12784_v7  ;;  %5548 = vmatpush.bf16.msrb.mxu0 %v12785_v50 }
 0xdd2   :  { %5537 = vmatpush.bf16.msrb.mxu3 %v12786_v6  ;;  %5563 = vmatpush.bf16.msra.mxu1 %v12787_v47  ;;  %v12869_v47 = vld [vmem:[#allocation235_spill] sm:$0xff] }
 0xdd4   :  { %5523 = vmatpush.bf16.msra.mxu2 %v12788_v3  ;;  %5549 = vmatpush.bf16.msrb.mxu0 %v12789_v40  ;;  %v12800_v40 = vld [vmem:[#allocation13_spill] sm:$0xff] }
 0xdd6   :  { %5538 = vmatpush.bf16.msrb.mxu3 %v12790_v20  ;;  %5564 = vmatpush.bf16.msra.mxu1 %v12791_v55  ;;  %v12801_v20 = vld [vmem:[#allocation18_spill] sm:$0xff]  ;;  %v12802_v55 = vld [vmem:[#allocation183_spill] sm:$0xff] }
 0xdd8   :  { %5524 = vmatpush.bf16.msra.mxu2 %v12792_v41  ;;  %5550 = vmatpush.bf16.msrb.mxu0 %v12793_v33  ;;  %v12803_v41 = vld [vmem:[#allocation184_spill] sm:$0xff] }
 0xdda   :  { %5539 = vmatpush.bf16.msrb.mxu3 %v12794_v27  ;;  %5565 = vmatpush.bf16.msra.mxu1 %v12795_v29  ;;  %v12804_v29 = vld [vmem:[#allocation14_spill] sm:$0xff] }
 0xddc   :  { %5525 = vmatpush.bf16.msra.mxu2 %v12796_v16  ;;  %5551 = vmatpush.bf16.msrb.mxu0 %v12797_v62  ;;  %v12805_v16 = vld [vmem:[#allocation22_spill] sm:$0xff]  ;;  %v12806_v62 = vld [vmem:[#allocation189_spill] sm:$0xff] }
 0xdde   :  { %5540 = vmatpush.bf16.msrb.mxu3 %v12798_v12  ;;  %5566 = vmatpush.bf16.msra.mxu1 %v12799_v56  ;;  %v12807_v12 = vld [vmem:[#allocation190_spill] sm:$0xff]  ;;  %v12808_v56 = vld [vmem:[#allocation15_spill] sm:$0xff] }
 0xde0   :  { %5526 = vmatpush.bf16.msra.mxu2 %v12802_v55  ;;  %5552 = vmatpush.bf16.msrb.mxu0 %v12803_v41  ;;  %v12810_v41 = vld [vmem:[#allocation17_spill] sm:$0xff]  ;;  %v12811_v55 = vld [vmem:[#allocation26_spill] sm:$0xff] }
 0xde1   :  { %5541 = vmatmul.bf16.vlgmr.msrb.gmra.mxu3 %v10601_v42  ;;  %5567 = vmatmul.bf16.vlgmr.msra.gmra.mxu1 %v10601_v42  ;;  %v12812_v42 = vld [vmem:[#allocation19_spill] sm:$0xff] }
 0xde2   :  { %5654 = vmatpush.bf16.msra.mxu3 %v12800_v40  ;;  %5680 = vmatpush.bf16.msrb.mxu1 %v12801_v20  ;;  %v12809_v40 = vld [vmem:[#allocation16_spill] sm:$0xff]  ;;  %v12819_v20 = vld [vmem:[#allocation35_spill] sm:$0xff] }
 0xde4   :  { %5527 = vmatpush.bf16.msra.mxu2 %v12806_v62  ;;  %5553 = vmatpush.bf16.msrb.mxu0 %v12807_v12  ;;  %v12815_v62 = vld [vmem:[#allocation31_spill] sm:$0xff] }
 0xde5   :  { %v12816_v12 = vld [vmem:[#allocation23_spill] sm:$0xff] }
 0xde6   :  { %5655 = vmatpush.bf16.msra.mxu3 %v12804_v29  ;;  %5681 = vmatpush.bf16.msrb.mxu1 %v12805_v16  ;;  %v12813_v29 = vld [vmem:[#allocation20_spill] sm:$0xff]  ;;  %v12814_v16 = vld [vmem:[#allocation21_spill] sm:$0xff] }
 0xde7   :  { %5528 = vmatmul.bf16.vlgmr.msra.gmra.mxu2 %v10607_v31  ;;  %5554 = vmatmul.bf16.vlgmr.msrb.gmra.mxu0 %v10607_v31  ;;  %v12820_v31 = vld [vmem:[#allocation27_spill] sm:$0xff] }
 0xde8   :  { %5641 = vmatpush.bf16.msrb.mxu2 %v12808_v56  ;;  %5667 = vmatpush.bf16.msra.mxu0 %v12809_v40  ;;  %v12817_v56 = vld [vmem:[#allocation24_spill] sm:$0xff]  ;;  %v12818_v40 = vld [vmem:[#allocation25_spill] sm:$0xff] }
 0xdea   :  { %5656 = vmatpush.bf16.msra.mxu3 %v12810_v41  ;;  %5682 = vmatpush.bf16.msrb.mxu1 %v12811_v55  ;;  %v12821_v41 = vld [vmem:[#allocation28_spill] sm:$0xff]  ;;  %v12822_v55 = vld [vmem:[#allocation30_spill] sm:$0xff] }
 0xdec   :  { %5642 = vmatpush.bf16.msrb.mxu2 %v12812_v42  ;;  %5668 = vmatpush.bf16.msra.mxu0 %v12813_v29  ;;  %v12823_v42 = vld [vmem:[#allocation39_spill] sm:$0xff]  ;;  %v12824_v29 = vld [vmem:[#allocation32_spill] sm:$0xff] }
 0xdee   :  { %5657 = vmatpush.bf16.msra.mxu3 %v12814_v16  ;;  %5683 = vmatpush.bf16.msrb.mxu1 %v12815_v62  ;;  %v12825_v16 = vld [vmem:[#allocation33_spill] sm:$0xff]  ;;  %v12826_v62 = vld [vmem:[#allocation34_spill] sm:$0xff] }
 0xdf0   :  { %5643 = vmatpush.bf16.msrb.mxu2 %v12816_v12  ;;  %5669 = vmatpush.bf16.msra.mxu0 %v12817_v56  ;;  %v12827_v12 = vld [vmem:[#allocation47_spill] sm:$0xff]  ;;  %v12828_v56 = vld [vmem:[#allocation36_spill] sm:$0xff] }
 0xdf2   :  { %5658 = vmatpush.bf16.msra.mxu3 %v12818_v40  ;;  %5684 = vmatpush.bf16.msrb.mxu1 %v12819_v20  ;;  %v12829_v40 = vld [vmem:[#allocation37_spill] sm:$0xff]  ;;  %v12830_v20 = vld [vmem:[#allocation38_spill] sm:$0xff] }
 0xdf4   :  { %5644 = vmatpush.bf16.msrb.mxu2 %v12820_v31  ;;  %5670 = vmatpush.bf16.msra.mxu0 %v12821_v41  ;;  %v12831_v31 = vld [vmem:[#allocation53_spill] sm:$0xff]  ;;  %v12832_v41 = vld [vmem:[#allocation40_spill] sm:$0xff] }
 0xdf6   :  { %5659 = vmatpush.bf16.msra.mxu3 %v12822_v55  ;;  %5685 = vmatpush.bf16.msrb.mxu1 %v12823_v42  ;;  %v12833_v55 = vld [vmem:[#allocation57_spill] sm:$0xff] }
 0xdf7   :  { %v12834_v42 = vld [vmem:[#allocation41_spill] sm:$0xff] }
 0xdf8   :  { %5645 = vmatpush.bf16.msrb.mxu2 %v12824_v29  ;;  %5671 = vmatpush.bf16.msra.mxu0 %v12825_v16  ;;  %v12835_v29 = vld [vmem:[#allocation43_spill] sm:$0xff]  ;;  %v12836_v16 = vld [vmem:[#allocation48_spill] sm:$0xff] }
 0xdfa   :  { %5660 = vmatpush.bf16.msra.mxu3 %v12826_v62  ;;  %5686 = vmatpush.bf16.msrb.mxu1 %v12827_v12  ;;  %v12837_v62 = vld [vmem:[#allocation61_spill] sm:$0xff] }
 0xdfb   :  { %v12838_v12 = vld [vmem:[#allocation49_spill] sm:$0xff] }
 0xdfc   :  { %5646 = vmatpush.bf16.msrb.mxu2 %v12828_v56  ;;  %5672 = vmatpush.bf16.msra.mxu0 %v12829_v40  ;;  %v12839_v56 = vld [vmem:[#allocation50_spill] sm:$0xff]  ;;  %v12840_v40 = vld [vmem:[#allocation51_spill] sm:$0xff] }
 0xdfe   :  { %5661 = vmatpush.bf16.msra.mxu3 %v12830_v20  ;;  %5687 = vmatpush.bf16.msrb.mxu1 %v12831_v31  ;;  %v12841_v20 = vld [vmem:[#allocation52_spill] sm:$0xff]  ;;  %v12842_v31 = vld [vmem:[#allocation54_spill] sm:$0xff] }
 0xe00   :  { %5647 = vmatpush.bf16.msrb.mxu2 %v12834_v42  ;;  %5673 = vmatpush.bf16.msra.mxu0 %v12835_v29  ;;  %v12845_v42 = vld [vmem:[#allocation59_spill] sm:$0xff]  ;;  %v12846_v29 = vld [vmem:[#allocation60_spill] sm:$0xff] }
 0xe02   :  { %5706 = vmatpush.bf16.msrb.mxu3 %v12832_v41  ;;  %5732 = vmatpush.bf16.msra.mxu1 %v12833_v55  ;;  %v12843_v41 = vld [vmem:[#allocation65_spill] sm:$0xff]  ;;  %v12844_v55 = vld [vmem:[#allocation58_spill] sm:$0xff] }
 0xe04   :  { %5648 = vmatpush.bf16.msrb.mxu2 %v12838_v12  ;;  %5674 = vmatpush.bf16.msra.mxu0 %v12839_v56  ;;  %v12849_v12 = vld [vmem:[#allocation63_spill] sm:$0xff]  ;;  %v12850_v56 = vld [vmem:[#allocation64_spill] sm:$0xff] }
 0xe06   :  { %5707 = vmatpush.bf16.msrb.mxu3 %v12836_v16  ;;  %5733 = vmatpush.bf16.msra.mxu1 %v12837_v62  ;;  %v12847_v16 = vld [vmem:[#allocation72_spill] sm:$0xff]  ;;  %v12848_v62 = vld [vmem:[#allocation62_spill] sm:$0xff] }
 0xe08   :  { %5693 = vmatpush.bf16.msra.mxu2 %v12840_v40  ;;  %5719 = vmatpush.bf16.msrb.mxu0 %v12841_v20  ;;  %v12851_v40 = vld [vmem:[#allocation76_spill] sm:$0xff]  ;;  %v12852_v20 = vld [vmem:[#allocation69_spill] sm:$0xff] }
 0xe0a   :  { %5708 = vmatpush.bf16.msrb.mxu3 %v12842_v31  ;;  %5734 = vmatpush.bf16.msra.mxu1 %v12843_v41  ;;  %v12853_v31 = vld [vmem:[#allocation70_spill] sm:$0xff]  ;;  %v12854_v41 = vld [vmem:[#allocation71_spill] sm:$0xff] }
 0xe0c   :  { %5694 = vmatpush.bf16.msra.mxu2 %v12844_v55  ;;  %5720 = vmatpush.bf16.msrb.mxu0 %v12845_v42  ;;  %v12855_v55 = vld [vmem:[#allocation81_spill] sm:$0xff] }
 0xe0d   :  { %v12856_v42 = vld [vmem:[#allocation73_spill] sm:$0xff] }
 0xe0e   :  { %5709 = vmatpush.bf16.msrb.mxu3 %v12846_v29  ;;  %5735 = vmatpush.bf16.msra.mxu1 %v12847_v16  ;;  %v12857_v29 = vld [vmem:[#allocation74_spill] sm:$0xff]  ;;  %v12858_v16 = vld [vmem:[#allocation75_spill] sm:$0xff] }
 0xe10   :  { %5695 = vmatpush.bf16.msra.mxu2 %v12848_v62  ;;  %5721 = vmatpush.bf16.msrb.mxu0 %v12849_v12  ;;  %v12859_v62 = vld [vmem:[#allocation87_spill] sm:$0xff]  ;;  %v12860_v12 = vld [vmem:[#allocation77_spill] sm:$0xff] }
 0xe12   :  { %5710 = vmatpush.bf16.msrb.mxu3 %v12850_v56  ;;  %5736 = vmatpush.bf16.msra.mxu1 %v12851_v40  ;;  %v12861_v56 = vld [vmem:[#allocation78_spill] sm:$0xff]  ;;  %v12862_v40 = vld [vmem:[#allocation79_spill] sm:$0xff] }
 0xe14   :  { %5696 = vmatpush.bf16.msra.mxu2 %v12852_v20  ;;  %5722 = vmatpush.bf16.msrb.mxu0 %v12853_v31  ;;  %v12863_v20 = vld [vmem:[#allocation91_spill] sm:$0xff] }
 0xe15   :  { %v12864_v31 = vld [vmem:[#allocation83_spill] sm:$0xff] }
 0xe16   :  { %5711 = vmatpush.bf16.msrb.mxu3 %v12854_v41  ;;  %5737 = vmatpush.bf16.msra.mxu1 %v12855_v55  ;;  %v12865_v41 = vld [vmem:[#allocation86_spill] sm:$0xff]  ;;  %v12866_v55 = vld [vmem:[#allocation89_spill] sm:$0xff] }
 0xe18   :  { %5697 = vmatpush.bf16.msra.mxu2 %v12856_v42  ;;  %5723 = vmatpush.bf16.msrb.mxu0 %v12857_v29  ;;  %v12867_v42 = vld [vmem:[#allocation90_spill] sm:$0xff] }
 0xe1a   :  { %5712 = vmatpush.bf16.msrb.mxu3 %v12858_v16  ;;  %5738 = vmatpush.bf16.msra.mxu1 %v12859_v62  ;;  %v12868_v62 = vld [vmem:[#allocation234_spill] sm:$0xff] }
 0xe1c   :  { %5698 = vmatpush.bf16.msra.mxu2 %v12860_v12  ;;  %5724 = vmatpush.bf16.msrb.mxu0 %v12861_v56 }
 0xe1e   :  { %5713 = vmatpush.bf16.msrb.mxu3 %v12862_v40  ;;  %5739 = vmatpush.bf16.msra.mxu1 %v12863_v20  ;;  %v5412_v29 = vpop.f32.mrf.mxu1 }
 0xe20   :  { %5699 = vmatpush.bf16.msra.mxu2 %v12864_v31  ;;  %5725 = vmatpush.bf16.msrb.mxu0 %v12865_v41 }
 0xe24   :  { %5700 = vmatpush.bf16.msra.mxu2 %v12866_v55  ;;  %5726 = vmatpush.bf16.msrb.mxu0 %v12867_v42  ;;  %v5386_v16 = vpop.f32.mrf.mxu3  ;;  %v5399_v27 = vpop.f32.mrf.mxu0 }
 0xe25   :  { %v5400_v33 = vadd.f32 %v5399_v27, %v12868_v62 }
 0xe26   :  { %v5414_v12 = vpop.f32.mrf.mxu1 }
 0xe27   :  { %v5413_v3 = vadd.f32 %v5412_v29, %v5400_v33 }
 0xe29   :  { %v5573_v39 = vmul.f32 0.5, %v5413_v3 }
 0xe2a   :  { %v5373_v56 = vpop.f32.mrf.mxu2 }
 0xe2b   :  { %v5374_v40 = vadd.f32 %v5373_v56, %v12869_v47 }
 0xe2c   :  { %v5388_v6 = vpop.f32.mrf.mxu3  ;;  %v5401_v20 = vpop.f32.mrf.mxu0 }
 0xe2d   :  { %v5387_v50 = vadd.f32 %v5386_v16, %v5374_v40  ;;  %v12870_v6 = vld [vmem:[#allocation236_spill] sm:$0xff] }
 0xe2e   :  { %v5464_v31 = vpop.f32.mrf.mxu1 }
 0xe32   :  { %v5375_v7 = vpop.f32.mrf.mxu2 }
 0xe33   :  { %v12871_v7 = vld [vmem:[#allocation237_spill] sm:$0xff] }
 0xe34   :  { %v5438_v41 = vpop.f32.mrf.mxu3  ;;  %v5451_v23 = vpop.f32.mrf.mxu0 }
 0xe35   :  { %v5452_v56 = vadd.f32 %v5451_v23, %v12870_v6 }
 0xe36   :  { %v5466_v55 = vpop.f32.mrf.mxu1 }
 0xe37   :  { %v5465_v16 = vadd.f32 %v5464_v31, %v5452_v56  ;;  %v12874_v31 = vld [vmem:[#allocation240_spill] sm:$0xff] }
 0xe39   :  { %v5575_v9 = vmul.f32 0.5, %v5465_v16 }
 0xe3a   :  { %v5425_v19 = vpop.f32.mrf.mxu2 }
 0xe3b   :  { %v5426_v40 = vadd.f32 %v5425_v19, %v12871_v7  ;;  %7044 = vtanh.f32 %v5575_v9  ;;  %v5572_v19 = vmul.f32 0.5, %v5387_v50  ;;  %v12875_v9 = vld [vmem:[#allocation238_spill] sm:$0xff] }
 0xe3c   :  { %v5440_v42 = vpop.f32.mrf.mxu3  ;;  %v5453_v35 = vpop.f32.mrf.mxu0  ;;  %7046 = vtanh.f32 %v5573_v39 }
 0xe3d   :  { %v12872_v42 = vld [vmem:[#allocation239_spill] sm:$0xff]  ;;  %v5439_v36 = vadd.f32 %v5438_v41, %v5426_v40 }
 0xe3e   :  { %v5516_v17 = vpop.f32.mrf.mxu1 }
 0xe3f   :  { %v5574_v23 = vmul.f32 0.5, %v5439_v36 }
 0xe42   :  { %v5427_v61 = vpop.f32.mrf.mxu2 }
 0xe44   :  { %v5490_v10 = vpop.f32.mrf.mxu3  ;;  %v5503_v27 = vpop.f32.mrf.mxu0 }
 0xe46   :  { %v5518_v62 = vpop.f32.mrf.mxu1 }
 0xe4a   :  { %v5477_v33 = vpop.f32.mrf.mxu2 }
 0xe4c   :  { %v5492_v29 = vpop.f32.mrf.mxu3  ;;  %v5505_v12 = vpop.f32.mrf.mxu0 }
 0xe4d   :  { %v12873_v29 = vld [vmem:[#allocation100_spill] sm:$0xff] }
 0xe4e   :  { %v5504_v12 = vadd.f32 %v5503_v27, %v12873_v29 }
 0xe50   :  { %v5517_v44 = vadd.f32 %v5516_v17, %v5504_v12 }
 0xe52   :  { %v5479_v47 = vpop.f32.mrf.mxu2 }
 0xe5e   :  { %v5568_v20 = vpop.f32.mrf.mxu1 }
 0xe64   :  { %v5542_v28 = vpop.f32.mrf.mxu3  ;;  %v5555_v55 = vpop.f32.mrf.mxu0 }
 0xe65   :  { %v5556_v35 = vadd.f32 %v5555_v55, %v12872_v42  ;;  %v7045_v55 = vpop.eup %7044 }
 0xe66   :  { %v5570_v61 = vpop.f32.mrf.mxu1  ;;  %v7047_v41 = vpop.eup %7046  ;;  %v5591_v27 = vmul.f32 0.5, %v7045_v55 }
 0xe67   :  { %v5569_v22 = vadd.f32 %v5568_v20, %v5556_v35  ;;  %v5577_v20 = vmul.f32 0.5, %v5517_v44  ;;  %v5589_v42 = vmul.f32 0.5, %v7047_v41 }
 0xe69   :  { %v5579_v62 = vmul.f32 0.5, %v5569_v22  ;;  %v5478_v22 = vadd.f32 %v5477_v33, %v12875_v9  ;;  %v5597_v12 = vadd.f32 0.5, %v5589_v42 }
 0xe6a   :  { %v5529_v47 = vpop.f32.mrf.mxu2 }
 0xe6b   :  { %7048 = vtanh.f32 %v5579_v62  ;;  %v5530_v6 = vadd.f32 %v5529_v47, %v12874_v31  ;;  %v5491_v35 = vadd.f32 %v5490_v10, %v5478_v22 }
 0xe6c   :  { %v5544_v56 = vpop.f32.mrf.mxu3  ;;  %v5557_v7 = vpop.f32.mrf.mxu0  ;;  %7050 = vtanh.f32 %v5574_v23 }
 0xe6d   :  { %v5543_v16 = vadd.f32 %v5542_v28, %v5530_v6  ;;  %7052 = vtanh.f32 %v5572_v19  ;;  %v5599_v28 = vadd.f32 0.5, %v5591_v27  ;;  %v5576_v23 = vmul.f32 0.5, %v5491_v35 }
 0xe6f   :  { %v5578_v3 = vmul.f32 0.5, %v5543_v16  ;;  %v5609_v19 = vmul.f32 %v5599_v28, %v10591_v60  ;;  %v12892_v28 = vld [vmem:[#allocation167_spill] sm:$0xff] }
 0xe71   :  { %v7049_v39 = vpop.eup %7048  ;;  %7054 = vtanh.f32 %v5578_v3 }
 0xe72   :  { %v5595_v36 = vmul.f32 0.5, %v7049_v39  ;;  %v5531_v40 = vpop.f32.mrf.mxu2  ;;  %v7051_v61 = vpop.eup %7050  ;;  %7056 = vtanh.f32 %v5577_v20 }
 0xe73   :  { %v7053_v62 = vpop.eup %7052  ;;  %v5590_v47 = vmul.f32 0.5, %v7051_v61  ;;  %7058 = vtanh.f32 %v5576_v23  ;;  %v12897_v23 = vld [vmem:[#allocation172_spill] sm:$0xff] }
 0xe74   :  { %v5603_v50 = vadd.f32 0.5, %v5595_v36  ;;  %v5588_v6 = vmul.f32 0.5, %v7053_v62 }
 0xe75   :  { %v5598_v16 = vadd.f32 0.5, %v5590_v47  ;;  %v12896_v47 = vld [vmem:[#allocation171_spill] sm:$0xff] }
 0xe76   :  { %v5605_v17 = vmul.f32 2.0, %v5603_v50  ;;  %v5596_v3 = vadd.f32 0.5, %v5588_v6  ;;  %v12900_v6 = vld [vmem:[#allocation177_spill] sm:$0xff] }
 0xe77   :  { %v7055_v29 = vpop.eup %7054  ;;  %v5608_v22 = vmul.f32 %v5598_v16, %v10595_v25  ;;  %v12905_v16 = vld [vmem:[#allocation57_spill] sm:$0xff] }
 0xe78   :  { %v6626_v31 = vadd.f32 -1.0, %v5605_v17  ;;  %v5594_v33 = vmul.f32 0.5, %v7055_v29  ;;  %v7057_v7 = vpop.eup %7056  ;;  %v12893_v17 = vld [vmem:[#allocation168_spill] sm:$0xff]  ;;  %v12894_v29 = vld [vmem:[#allocation130_spill] sm:$0xff] }
 0xe79   :  { %v5593_v9 = vmul.f32 0.5, %v7057_v7  ;;  %v7059_v27 = vpop.eup %7058  ;;  %v12904_v7 = vld [vmem:[#allocation18_spill] sm:$0xff] }
 0xe7a   :  { %v5611_v44 = vmul.f32 %v6626_v31, %v5597_v12  ;;  %v5602_v56 = vadd.f32 0.5, %v5594_v33  ;;  %v5592_v40 = vmul.f32 0.5, %v7059_v27  ;;  %v12895_v12 = vld [vmem:[#allocation142_spill] sm:$0xff]  ;;  %v12898_v31 = vld [vmem:[#allocation135_spill] sm:$0xff]  ;;  %v12912_v27 = vld [vmem:[#allocation16_spill] sm:$0xff] }
 0xe7b   :  { %v5601_v60 = vadd.f32 0.5, %v5593_v9  ;;  %v12899_v33 = vld [vmem:[#allocation151_spill] sm:$0xff]  ;;  %v12909_v9 = vld [vmem:[#allocation61_spill] sm:$0xff] }
 0xe7c   :  { %v10758_v10 = vadd.f32 %v5611_v44, %v5609_v19  ;;  %v5604_v55 = vmul.f32 2.0, %v5602_v56  ;;  %v5600_v50 = vadd.f32 0.5, %v5592_v40  ;;  %v12901_v19 = vld [vmem:[#allocation178_spill] sm:$0xff]  ;;  %v12902_v44 = vld [vmem:[#allocation141_spill] sm:$0xff] }
 0xe7d   :  { %v12903_v56 = vld [vmem:[#allocation158_spill] sm:$0xff]  ;;  %v12915_v40 = vld [vmem:[#allocation65_spill] sm:$0xff] }
 0xe7e   :  { %7060 = vtanh.f32 %v10758_v10  ;;  %v6625_v41 = vadd.f32 -1.0, %v5604_v55  ;;  %v12906_v55 = vld [vmem:[#allocation183_spill] sm:$0xff] }
 0xe80   :  { %v5610_v39 = vmul.f32 %v6625_v41, %v5596_v3  ;;  %v12907_v3 = vld [vmem:[#allocation184_spill] sm:$0xff]  ;;  %v12908_v41 = vld [vmem:[#allocation22_spill] sm:$0xff] }
 0xe82   :  { %v10762_v20 = vadd.f32 %v5610_v39, %v5608_v22  ;;  %v12910_v22 = vld [vmem:[#allocation189_spill] sm:$0xff]  ;;  %v12911_v39 = vld [vmem:[#allocation190_spill] sm:$0xff] }
 0xe84   :  { %v7061_v36 = vpop.eup %7060  ;;  %7062 = vtanh.f32 %v10762_v20 }
 0xe85   :  { %v5617_v42 = vmul.f32 %v7061_v36, %v5601_v60  ;;  %v12913_v60 = vld [vmem:[#allocation52_spill] sm:$0xff]  ;;  %v12914_v36 = vld [vmem:[#allocation26_spill] sm:$0xff] }
 0xe87   :  { %6627 = vst [vmem:[%s10941_s5 + $0x1a] sm:$0x3] %v5617_v42  ;;  %v10768_v35 = vpack.c.bf16 %v5617_v42, %v5617_v42  ;;  %v12916_v42 = vld [vmem:[#allocation20_spill] sm:$0xff] }
 0xe89   :  { %5662 = vmatmul.bf16.vlgmr.msra.gmra.mxu3 %v10768_v35  ;;  %5688 = vmatmul.bf16.vlgmr.msrb.gmra.mxu1 %v10768_v35 }
 0xe8a   :  { %v7063_v25 = vpop.eup %7062  ;;  %5758 = vmatpush.bf16.msra.mxu3 %v11525_v63  ;;  %5784 = vmatpush.bf16.msrb.mxu1 %v11526_v53  ;;  %v12878_v63 = vld [vmem:[#allocation145_spill] sm:$0xff] }
 0xe8b   :  { %v5616_v61 = vmul.f32 %v7063_v25, %v5600_v50  ;;  %v12918_v50 = vld [vmem:[#allocation31_spill] sm:$0xff]  ;;  %v12919_v25 = vld [vmem:[#allocation72_spill] sm:$0xff] }
 0xe8d   :  { %v10774_v62 = vpack.c.bf16 %v5616_v61, %v5616_v61  ;;  %v12920_v61 = vld [vmem:[#allocation24_spill] sm:$0xff] }
 0xe8e   :  { %5759 = vmatpush.bf16.msra.mxu3 %v11527_v34  ;;  %5785 = vmatpush.bf16.msrb.mxu1 %v11528_v1  ;;  %v12879_v34 = vld [vmem:[#allocation146_spill] sm:$0xff] }
 0xe8f   :  { %5649 = vmatmul.bf16.vlgmr.msrb.gmra.mxu2 %v10774_v62  ;;  %5675 = vmatmul.bf16.vlgmr.msra.gmra.mxu0 %v10774_v62 }
 0xe90   :  { %5745 = vmatpush.bf16.msrb.mxu2 %v11529_v57  ;;  %5771 = vmatpush.bf16.msra.mxu0 %v11530_v58  ;;  %v12880_v57 = vld [vmem:[#allocation147_spill] sm:$0xff] }
 0xe92   :  { %5760 = vmatpush.bf16.msra.mxu3 %v11531_v45  ;;  %5786 = vmatpush.bf16.msrb.mxu1 %v11532_v11  ;;  %v12881_v45 = vld [vmem:[#allocation148_spill] sm:$0xff] }
 0xe94   :  { %5746 = vmatpush.bf16.msrb.mxu2 %v7933_v0  ;;  %5772 = vmatpush.bf16.msra.mxu0 %v7935_v49  ;;  %v12877_v0 = vld [vmem:[#allocation121_spill] sm:$0xff] }
 0xe96   :  { %5761 = vmatpush.bf16.msra.mxu3 %v11533_v21  ;;  %5787 = vmatpush.bf16.msrb.mxu1 %v11534_v52  ;;  %v12882_v21 = vld [vmem:[#allocation115_spill] sm:$0xff] }
 0xe98   :  { %5747 = vmatpush.bf16.msrb.mxu2 %v11535_v38  ;;  %5773 = vmatpush.bf16.msra.mxu0 %v11536_v13  ;;  %v12883_v38 = vld [vmem:[#allocation125_spill] sm:$0xff] }
 0xe99   :  { %5714 = vmatmul.bf16.vlgmr.msrb.gmra.mxu3 %v10768_v35  ;;  %5740 = vmatmul.bf16.vlgmr.msra.gmra.mxu1 %v10768_v35 }
 0xe9a   :  { %5762 = vmatpush.bf16.msra.mxu3 %v11537_v54  ;;  %5788 = vmatpush.bf16.msrb.mxu1 %v11538_v37  ;;  %v12884_v54 = vld [vmem:[#allocation156_spill] sm:$0xff] }
 0xe9c   :  { %5748 = vmatpush.bf16.msrb.mxu2 %v7975_v2  ;;  %5774 = vmatpush.bf16.msra.mxu0 %v7977_v30  ;;  %v12876_v2 = vld [vmem:[#allocation113_spill] sm:$0xff] }
 0xe9e   :  { %5763 = vmatpush.bf16.msra.mxu3 %v11539_v15  ;;  %5789 = vmatpush.bf16.msrb.mxu1 %v11540_v59  ;;  %v12885_v15 = vld [vmem:[#allocation157_spill] sm:$0xff] }
 0xe9f   :  { %5701 = vmatmul.bf16.vlgmr.msra.gmra.mxu2 %v10774_v62  ;;  %5727 = vmatmul.bf16.vlgmr.msrb.gmra.mxu0 %v10774_v62 }
 0xea0   :  { %5749 = vmatpush.bf16.msrb.mxu2 %v11541_v4  ;;  %5775 = vmatpush.bf16.msra.mxu0 %v11542_v43  ;;  %v12886_v4 = vld [vmem:[#allocation120_spill] sm:$0xff] }
 0xea2   :  { %5764 = vmatpush.bf16.msra.mxu3 %v11543_v24  ;;  %5790 = vmatpush.bf16.msrb.mxu1 %v11544_v46  ;;  %v12887_v24 = vld [vmem:[#allocation131_spill] sm:$0xff] }
 0xea4   :  { %5750 = vmatpush.bf16.msrb.mxu2 %v11628_v18  ;;  %5776 = vmatpush.bf16.msra.mxu0 %v11546_v48  ;;  %v12890_v18 = vld [vmem:[#allocation122_spill] sm:$0xff] }
 0xea6   :  { %5765 = vmatpush.bf16.msra.mxu3 %v11547_v14  ;;  %5791 = vmatpush.bf16.msrb.mxu1 %v11548_v26  ;;  %v12888_v14 = vld [vmem:[#allocation159_spill] sm:$0xff] }
 0xea8   :  { %5751 = vmatpush.bf16.msrb.mxu2 %v11630_v32  ;;  %5777 = vmatpush.bf16.msra.mxu0 %v8052_v5  ;;  %v12891_v32 = vld [vmem:[#allocation137_spill] sm:$0xff] }
 0xea9   :  { %5766 = vmatmul.bf16.vlgmr.msra.gmra.mxu3 %v10768_v35  ;;  %5792 = vmatmul.bf16.vlgmr.msrb.gmra.mxu1 %v10768_v35 }
 0xeaa   :  { %5810 = vmatpush.bf16.msrb.mxu3 %v11549_v51  ;;  %5836 = vmatpush.bf16.msra.mxu1 %v11629_v8  ;;  %v12889_v51 = vld [vmem:[#allocation160_spill] sm:$0xff] }
 0xeac   :  { %5752 = vmatpush.bf16.msrb.mxu2 %v12878_v63  ;;  %5778 = vmatpush.bf16.msra.mxu0 %v12879_v34  ;;  %v12922_v63 = vld [vmem:[#allocation35_spill] sm:$0xff] }
 0xeae   :  { %5811 = vmatpush.bf16.msrb.mxu3 %v12876_v2  ;;  %5837 = vmatpush.bf16.msra.mxu1 %v12877_v0  ;;  %v12921_v2 = vld [vmem:[#allocation63_spill] sm:$0xff] }
 0xeaf   :  { %5753 = vmatmul.bf16.vlgmr.msrb.gmra.mxu2 %v10774_v62  ;;  %5779 = vmatmul.bf16.vlgmr.msra.gmra.mxu0 %v10774_v62 }
 0xeb0   :  { %5797 = vmatpush.bf16.msra.mxu2 %v12880_v57  ;;  %5823 = vmatpush.bf16.msrb.mxu0 %v12881_v45  ;;  %v12923_v57 = vld [vmem:[#allocation76_spill] sm:$0xff] }
 0xeb2   :  { %5812 = vmatpush.bf16.msrb.mxu3 %v12882_v21  ;;  %5838 = vmatpush.bf16.msra.mxu1 %v12883_v38  ;;  %v12925_v21 = vld [vmem:[#allocation70_spill] sm:$0xff] }
 0xeb4   :  { %5798 = vmatpush.bf16.msra.mxu2 %v12884_v54  ;;  %5824 = vmatpush.bf16.msrb.mxu0 %v12885_v15  ;;  %v12926_v54 = vld [vmem:[#allocation39_spill] sm:$0xff] }
 0xeb6   :  { %5813 = vmatpush.bf16.msrb.mxu3 %v12886_v4  ;;  %5839 = vmatpush.bf16.msra.mxu1 %v12887_v24  ;;  %v12927_v4 = vld [vmem:[#allocation81_spill] sm:$0xff] }
 0xeb8   :  { %5799 = vmatpush.bf16.msra.mxu2 %v12888_v14  ;;  %5825 = vmatpush.bf16.msrb.mxu0 %v12889_v51  ;;  %v12928_v14 = vld [vmem:[#allocation33_spill] sm:$0xff] }
 0xeba   :  { %5814 = vmatpush.bf16.msrb.mxu3 %v12890_v18  ;;  %5840 = vmatpush.bf16.msra.mxu1 %v12891_v32  ;;  %v12929_v18 = vld [vmem:[#allocation74_spill] sm:$0xff] }
 0xebc   :  { %5800 = vmatpush.bf16.msra.mxu2 %v12892_v28  ;;  %5826 = vmatpush.bf16.msrb.mxu0 %v12893_v17  ;;  %v12930_v28 = vld [vmem:[#allocation47_spill] sm:$0xff] }
 0xebe   :  { %5815 = vmatpush.bf16.msrb.mxu3 %v12894_v29  ;;  %5841 = vmatpush.bf16.msra.mxu1 %v12895_v12  ;;  %v12931_v29 = vld [vmem:[#allocation87_spill] sm:$0xff] }
 0xec0   :  { %5801 = vmatpush.bf16.msra.mxu2 %v12896_v47  ;;  %5827 = vmatpush.bf16.msrb.mxu0 %v12897_v23  ;;  %v12932_v47 = vld [vmem:[#allocation37_spill] sm:$0xff] }
 0xec2   :  { %5816 = vmatpush.bf16.msrb.mxu3 %v12898_v31  ;;  %5842 = vmatpush.bf16.msra.mxu1 %v12899_v33  ;;  %v12933_v31 = vld [vmem:[#allocation78_spill] sm:$0xff] }
 0xec4   :  { %5802 = vmatpush.bf16.msra.mxu2 %v12900_v6  ;;  %5828 = vmatpush.bf16.msrb.mxu0 %v12901_v19  ;;  %v12934_v6 = vld [vmem:[#allocation53_spill] sm:$0xff] }
 0xec6   :  { %5817 = vmatpush.bf16.msrb.mxu3 %v12902_v44  ;;  %5843 = vmatpush.bf16.msra.mxu1 %v12903_v56  ;;  %v12935_v44 = vld [vmem:[#allocation91_spill] sm:$0xff] }
 0xec8   :  { %5803 = vmatpush.bf16.msra.mxu2 %v12906_v55  ;;  %5829 = vmatpush.bf16.msrb.mxu0 %v12907_v3  ;;  %v12938_v55 = vld [vmem:[#allocation50_spill] sm:$0xff] }
 0xec9   :  { %5818 = vmatmul.bf16.vlgmr.msrb.gmra.mxu3 %v10768_v35  ;;  %5844 = vmatmul.bf16.vlgmr.msra.gmra.mxu1 %v10768_v35  ;;  %v12917_v35 = vld [vmem:[#allocation59_spill] sm:$0xff] }
 0xeca   :  { %5912 = vmatpush.bf16.msra.mxu3 %v12904_v7  ;;  %5938 = vmatpush.bf16.msrb.mxu1 %v12905_v16  ;;  %v12936_v7 = vld [vmem:[#allocation43_spill] sm:$0xff]  ;;  %v12937_v16 = vld [vmem:[#allocation86_spill] sm:$0xff] }
 0xecc   :  { %5804 = vmatpush.bf16.msra.mxu2 %v12910_v22  ;;  %5830 = vmatpush.bf16.msrb.mxu0 %v12911_v39 }
 0xece   :  { %5913 = vmatpush.bf16.msra.mxu3 %v12908_v41  ;;  %5939 = vmatpush.bf16.msrb.mxu1 %v12909_v9  ;;  %v12939_v41 = vld [vmem:[#allocation90_spill] sm:$0xff] }
 0xecf   :  { %5805 = vmatmul.bf16.vlgmr.msra.gmra.mxu2 %v10774_v62  ;;  %5831 = vmatmul.bf16.vlgmr.msrb.gmra.mxu0 %v10774_v62  ;;  %v12924_v62 = vld [vmem:[#allocation28_spill] sm:$0xff] }
 0xed0   :  { %5899 = vmatpush.bf16.msrb.mxu2 %v12912_v27  ;;  %5925 = vmatpush.bf16.msra.mxu0 %v12913_v60  ;;  %v5627_v27 = vld.sshfl [vmem:[#allocation1 + $0x10] sm:$0xff pattern:$0x73625140] }
 0xed2   :  { %5914 = vmatpush.bf16.msra.mxu3 %v12914_v36  ;;  %5940 = vmatpush.bf16.msrb.mxu1 %v12915_v40  ;;  %v5632_v40 = vld.sshfl [vmem:[#allocation1 + $0x38] sm:$0xff pattern:$0x73625140] }
 0xed4   :  { %5900 = vmatpush.bf16.msrb.mxu2 %v12916_v42  ;;  %5926 = vmatpush.bf16.msra.mxu0 %v12917_v35 }
 0xed6   :  { %5915 = vmatpush.bf16.msra.mxu3 %v12918_v50  ;;  %5941 = vmatpush.bf16.msrb.mxu1 %v12919_v25 }
 0xed8   :  { %5901 = vmatpush.bf16.msrb.mxu2 %v12920_v61  ;;  %5927 = vmatpush.bf16.msra.mxu0 %v12921_v2 }
 0xeda   :  { %5916 = vmatpush.bf16.msra.mxu3 %v12922_v63  ;;  %5942 = vmatpush.bf16.msrb.mxu1 %v12923_v57  ;;  %v5630_v57 = vld.sshfl [vmem:[#allocation1 + $0x28] sm:$0xff pattern:$0x73625140] }
 0xedc   :  { %5902 = vmatpush.bf16.msrb.mxu2 %v12924_v62  ;;  %5928 = vmatpush.bf16.msra.mxu0 %v12925_v21 }
 0xede   :  { %5917 = vmatpush.bf16.msra.mxu3 %v12926_v54  ;;  %5943 = vmatpush.bf16.msrb.mxu1 %v12927_v4  ;;  %v5631_v54 = vld.sshfl [vmem:[#allocation1 + $0x30] sm:$0xff pattern:$0x73625140] }
 0xee0   :  { %5903 = vmatpush.bf16.msrb.mxu2 %v12928_v14  ;;  %5929 = vmatpush.bf16.msra.mxu0 %v12929_v18 }
 0xee2   :  { %5918 = vmatpush.bf16.msra.mxu3 %v12930_v28  ;;  %5944 = vmatpush.bf16.msrb.mxu1 %v12931_v29 }
 0xee4   :  { %5904 = vmatpush.bf16.msrb.mxu2 %v12932_v47  ;;  %5930 = vmatpush.bf16.msra.mxu0 %v12933_v31 }
 0xee6   :  { %5919 = vmatpush.bf16.msra.mxu3 %v12934_v6  ;;  %5945 = vmatpush.bf16.msrb.mxu1 %v12935_v44 }
 0xee8   :  { %5905 = vmatpush.bf16.msrb.mxu2 %v12936_v7  ;;  %5931 = vmatpush.bf16.msra.mxu0 %v12937_v16  ;;  %v5629_v7 = vld.sshfl [vmem:[#allocation1 + $0x20] sm:$0xff pattern:$0x73625140] }
 0xeea   :  { %5964 = vmatpush.bf16.msrb.mxu3 %v11526_v53  ;;  %5990 = vmatpush.bf16.msra.mxu1 %v11629_v8  ;;  %v5626_v53 = vld.sshfl [vmem:[#allocation1 + $0x8] sm:$0xff pattern:$0x73625140] }
 0xeec   :  { %5906 = vmatpush.bf16.msrb.mxu2 %v12938_v55  ;;  %5932 = vmatpush.bf16.msra.mxu0 %v12939_v41 }
 0xeee   :  { %5965 = vmatpush.bf16.msrb.mxu3 %v11528_v1  ;;  %5991 = vmatpush.bf16.msra.mxu1 %v12877_v0 }
 0xef0   :  { %5951 = vmatpush.bf16.msra.mxu2 %v11530_v58  ;;  %5977 = vmatpush.bf16.msrb.mxu0 %v12881_v45 }
 0xef2   :  { %5966 = vmatpush.bf16.msrb.mxu3 %v11532_v11  ;;  %5992 = vmatpush.bf16.msra.mxu1 %v12883_v38 }
 0xef4   :  { %5952 = vmatpush.bf16.msra.mxu2 %v7935_v49  ;;  %5978 = vmatpush.bf16.msrb.mxu0 %v12885_v15 }
 0xef6   :  { %5967 = vmatpush.bf16.msrb.mxu3 %v11534_v52  ;;  %5993 = vmatpush.bf16.msra.mxu1 %v12887_v24 }
 0xef8   :  { %5953 = vmatpush.bf16.msra.mxu2 %v11536_v13  ;;  %5979 = vmatpush.bf16.msrb.mxu0 %v12889_v51  ;;  %v5625_v13 = vld.sshfl [vmem:[#allocation1] sm:$0xff pattern:$0x73625140] }
 0xefa   :  { %5968 = vmatpush.bf16.msrb.mxu3 %v11538_v37  ;;  %5994 = vmatpush.bf16.msra.mxu1 %v12891_v32 }
 0xefc   :  { %5954 = vmatpush.bf16.msra.mxu2 %v7977_v30  ;;  %5980 = vmatpush.bf16.msrb.mxu0 %v12893_v17 }
 0xefe   :  { %5969 = vmatpush.bf16.msrb.mxu3 %v11540_v59  ;;  %5995 = vmatpush.bf16.msra.mxu1 %v12895_v12 }
 0xf00   :  { %5955 = vmatpush.bf16.msra.mxu2 %v11542_v43  ;;  %5981 = vmatpush.bf16.msrb.mxu0 %v12897_v23 }
 0xf02   :  { %5970 = vmatpush.bf16.msrb.mxu3 %v11544_v46  ;;  %5996 = vmatpush.bf16.msra.mxu1 %v12899_v33 }
 0xf04   :  { %5956 = vmatpush.bf16.msra.mxu2 %v11546_v48  ;;  %5982 = vmatpush.bf16.msrb.mxu0 %v12901_v19 }
 0xf06   :  { %5971 = vmatpush.bf16.msrb.mxu3 %v11548_v26  ;;  %5997 = vmatpush.bf16.msra.mxu1 %v12903_v56  ;;  %v5689_v49 = vpop.f32.mrf.mxu1 }
 0xf08   :  { %5957 = vmatpush.bf16.msra.mxu2 %v8052_v5  ;;  %5983 = vmatpush.bf16.msrb.mxu0 %v12907_v3  ;;  %v5628_v3 = vld.sshfl [vmem:[#allocation1 + $0x18] sm:$0xff pattern:$0x73625140] }
 0xf0c   :  { %5958 = vmatpush.bf16.msra.mxu2 %v12879_v34  ;;  %5984 = vmatpush.bf16.msrb.mxu0 %v12911_v39  ;;  %v5663_v30 = vpop.f32.mrf.mxu3  ;;  %v5676_v1 = vpop.f32.mrf.mxu0 }
 0xf0d   :  { %v5677_v58 = vadd.f32 %v5676_v1, %v5626_v53 }
 0xf0e   :  { %v5691_v11 = vpop.f32.mrf.mxu1 }
 0xf0f   :  { %v5690_v52 = vadd.f32 %v5689_v49, %v5677_v58 }
 0xf11   :  { %v5850_v25 = vmul.f32 0.5, %v5690_v52 }
 0xf12   :  { %v5650_v37 = vpop.f32.mrf.mxu2 }
 0xf13   :  { %v5651_v59 = vadd.f32 %v5650_v37, %v5625_v13 }
 0xf14   :  { %v5665_v43 = vpop.f32.mrf.mxu3  ;;  %v5678_v46 = vpop.f32.mrf.mxu0 }
 0xf15   :  { %v5664_v48 = vadd.f32 %v5663_v30, %v5651_v59 }
 0xf16   :  { %v5741_v5 = vpop.f32.mrf.mxu1 }
 0xf17   :  { %v5849_v28 = vmul.f32 0.5, %v5664_v48 }
 0xf1a   :  { %v5652_v26 = vpop.f32.mrf.mxu2 }
 0xf1c   :  { %v5715_v8 = vpop.f32.mrf.mxu3  ;;  %v5728_v0 = vpop.f32.mrf.mxu0 }
 0xf1d   :  { %v5729_v9 = vadd.f32 %v5728_v0, %v5628_v3 }
 0xf1e   :  { %v5743_v34 = vpop.f32.mrf.mxu1 }
 0xf1f   :  { %v5742_v39 = vadd.f32 %v5741_v5, %v5729_v9 }
 0xf21   :  { %v5852_v35 = vmul.f32 0.5, %v5742_v39 }
 0xf22   :  { %v5702_v45 = vpop.f32.mrf.mxu2 }
 0xf23   :  { %v5703_v60 = vadd.f32 %v5702_v45, %v5627_v27  ;;  %7064 = vtanh.f32 %v5852_v35 }
 0xf24   :  { %v5717_v38 = vpop.f32.mrf.mxu3  ;;  %v5730_v15 = vpop.f32.mrf.mxu0  ;;  %7066 = vtanh.f32 %v5850_v25 }
 0xf25   :  { %v5716_v2 = vadd.f32 %v5715_v8, %v5703_v60 }
 0xf26   :  { %v5793_v24 = vpop.f32.mrf.mxu1 }
 0xf27   :  { %v5851_v14 = vmul.f32 0.5, %v5716_v2 }
 0xf29   :  { %v7065_v44 = vpop.eup %7064 }
 0xf2a   :  { %v5704_v51 = vpop.f32.mrf.mxu2  ;;  %v7067_v55 = vpop.eup %7066  ;;  %v5868_v30 = vmul.f32 0.5, %v7065_v44 }
 0xf2b   :  { %v5866_v11 = vmul.f32 0.5, %v7067_v55 }
 0xf2c   :  { %v5767_v32 = vpop.f32.mrf.mxu3  ;;  %v5780_v17 = vpop.f32.mrf.mxu0  ;;  %v5876_v43 = vadd.f32 0.5, %v5868_v30 }
 0xf2d   :  { %v5781_v21 = vadd.f32 %v5780_v17, %v5630_v57  ;;  %v5874_v5 = vadd.f32 0.5, %v5866_v11 }
 0xf2e   :  { %v5795_v12 = vpop.f32.mrf.mxu1  ;;  %v5886_v38 = vmul.f32 %v5876_v43, %v10758_v10 }
 0xf2f   :  { %v5794_v6 = vadd.f32 %v5793_v24, %v5781_v21  ;;  %v12940_v21 = vld [vmem:[#allocation8_spill] sm:$0xff] }
 0xf31   :  { %v5854_v53 = vmul.f32 0.5, %v5794_v6 }
 0xf32   :  { %v5754_v23 = vpop.f32.mrf.mxu2 }
 0xf33   :  { %v5755_v41 = vadd.f32 %v5754_v23, %v5629_v7 }
 0xf34   :  { %v5769_v33 = vpop.f32.mrf.mxu3  ;;  %v5782_v19 = vpop.f32.mrf.mxu0 }
 0xf35   :  { %v5768_v52 = vadd.f32 %v5767_v32, %v5755_v41 }
 0xf37   :  { %v5853_v8 = vmul.f32 0.5, %v5768_v52 }
 0xf3a   :  { %v5756_v56 = vpop.f32.mrf.mxu2 }
 0xf46   :  { %v5845_v22 = vpop.f32.mrf.mxu1 }
 0xf4c   :  { %v5819_v36 = vpop.f32.mrf.mxu3  ;;  %v5832_v42 = vpop.f32.mrf.mxu0 }
 0xf4d   :  { %v5833_v50 = vadd.f32 %v5832_v42, %v5632_v40 }
 0xf4e   :  { %v5847_v61 = vpop.f32.mrf.mxu1 }
 0xf4f   :  { %v5846_v63 = vadd.f32 %v5845_v22, %v5833_v50 }
 0xf51   :  { %v5856_v62 = vmul.f32 0.5, %v5846_v63 }
 0xf52   :  { %v5806_v4 = vpop.f32.mrf.mxu2 }
 0xf53   :  { %7068 = vtanh.f32 %v5856_v62  ;;  %v5807_v18 = vadd.f32 %v5806_v4, %v5631_v54  ;;  %v12941_v54 = vperm.slane %v12940_v21, 3 }
 0xf54   :  { %v5821_v29 = vpop.f32.mrf.mxu3  ;;  %v5834_v47 = vpop.f32.mrf.mxu0  ;;  %7070 = vtanh.f32 %v5851_v14  ;;  %v12942_v14 = vperm.slane %v12940_v21, 1 }
 0xf55   :  { %v5820_v31 = vadd.f32 %v5819_v36, %v5807_v18  ;;  %7072 = vtanh.f32 %v5849_v28 }
 0xf57   :  { %v5855_v16 = vmul.f32 0.5, %v5820_v31 }
 0xf59   :  { %v7069_v49 = vpop.eup %7068  ;;  %7074 = vtanh.f32 %v5855_v16  ;;  %v12943_v16 = vperm.slane %v12940_v21, 7 }
 0xf5a   :  { %v5872_v1 = vmul.f32 0.5, %v7069_v49  ;;  %v5808_v58 = vpop.f32.mrf.mxu2  ;;  %v7071_v37 = vpop.eup %7070  ;;  %7076 = vtanh.f32 %v5854_v53 }
 0xf5b   :  { %v7073_v59 = vpop.eup %7072  ;;  %v5867_v26 = vmul.f32 0.5, %v7071_v37  ;;  %7078 = vtanh.f32 %v5853_v8  ;;  %v12944_v58 = vperm.slane %v12940_v21, 5 }
 0xf5c   :  { %v5880_v13 = vadd.f32 0.5, %v5872_v1  ;;  %v5865_v45 = vmul.f32 0.5, %v7073_v59 }
 0xf5d   :  { %v5875_v17 = vadd.f32 0.5, %v5867_v26 }
 0xf5e   :  { %v5882_v46 = vmul.f32 2.0, %v5880_v13  ;;  %v5873_v23 = vadd.f32 0.5, %v5865_v45 }
 0xf5f   :  { %v7075_v48 = vpop.eup %7074  ;;  %v5885_v56 = vmul.f32 %v5875_v17, %v10762_v20 }
 0xf60   :  { %v6629_v0 = vadd.f32 -1.0, %v5882_v46  ;;  %v5871_v34 = vmul.f32 0.5, %v7075_v48  ;;  %v7077_v51 = vpop.eup %7076 }
 0xf61   :  { %v5870_v19 = vmul.f32 0.5, %v7077_v51  ;;  %v7079_v9 = vpop.eup %7078 }
 0xf62   :  { %v5888_v15 = vmul.f32 %v6629_v0, %v5874_v5  ;;  %v5879_v24 = vadd.f32 0.5, %v5871_v34  ;;  %v5869_v27 = vmul.f32 0.5, %v7079_v9 }
 0xf63   :  { %v5878_v39 = vadd.f32 0.5, %v5870_v19 }
 0xf64   :  { %v10917_v32 = vadd.f32 %v5888_v15, %v5886_v38  ;;  %v5881_v12 = vmul.f32 2.0, %v5879_v24  ;;  %v5877_v40 = vadd.f32 0.5, %v5869_v27 }
 0xf66   :  { %7080 = vtanh.f32 %v10917_v32  ;;  %v6628_v33 = vadd.f32 -1.0, %v5881_v12 }
 0xf68   :  { %v5887_v3 = vmul.f32 %v6628_v33, %v5873_v23 }
 0xf6a   :  { %v5889_v22 = vadd.f32 %v5887_v3, %v5885_v56 }
 0xf6c   :  { %v7081_v10 = vpop.eup %7080  ;;  %7082 = vtanh.f32 %v5889_v22 }
 0xf6d   :  { %v5894_v60 = vmul.f32 %v7081_v10, %v5878_v39 }
 0xf6f   :  { %6630 = vst [vmem:[%s10941_s5 + $0x1c] sm:$0x3] %v5894_v60  ;;  %v5898_v36 = vpack.c.bf16 %v5894_v60, %v5894_v60 }
 0xf71   :  { %5920 = vmatmul.bf16.vlgmr.msra.gmra.mxu3 %v5898_v36  ;;  %5946 = vmatmul.bf16.vlgmr.msrb.gmra.mxu1 %v5898_v36 }
 0xf72   :  { %v7083_v42 = vpop.eup %7082 }
 0xf73   :  { %v5893_v35 = vmul.f32 %v7083_v42, %v5877_v40 }
 0xf75   :  { %v5897_v50 = vpack.c.bf16 %v5893_v35, %v5893_v35 }
 0xf77   :  { %5907 = vmatmul.bf16.vlgmr.msrb.gmra.mxu2 %v5897_v50  ;;  %5933 = vmatmul.bf16.vlgmr.msra.gmra.mxu0 %v5897_v50 }
 0xf81   :  { %5972 = vmatmul.bf16.vlgmr.msrb.gmra.mxu3 %v5898_v36  ;;  %5998 = vmatmul.bf16.vlgmr.msra.gmra.mxu1 %v5898_v36 }
 0xf87   :  { %5959 = vmatmul.bf16.vlgmr.msra.gmra.mxu2 %v5897_v50  ;;  %5985 = vmatmul.bf16.vlgmr.msrb.gmra.mxu0 %v5897_v50 }
 0xfee   :  { %v5947_v20 = vpop.f32.mrf.mxu1 }
 0xff4   :  { %v5921_v25 = vpop.f32.mrf.mxu3  ;;  %v5934_v61 = vpop.f32.mrf.mxu0 }
 0xff5   :  { %v5935_v4 = vadd.f32 %v5934_v61, %v12941_v54 }
 0xff6   :  { %v5949_v2 = vpop.f32.mrf.mxu1 }
 0xff7   :  { %v5948_v29 = vadd.f32 %v5947_v20, %v5935_v4 }
 0xff9   :  { %v6004_v7 = vmul.f32 0.5, %v5948_v29 }
 0xffa   :  { %v5908_v63 = vpop.f32.mrf.mxu2 }
 0xffb   :  { %v5909_v18 = vadd.f32 %v5908_v63, %v12942_v14  ;;  %7084 = vtanh.f32 %v6004_v7 }
 0xffc   :  { %v5923_v57 = vpop.f32.mrf.mxu3  ;;  %v5936_v62 = vpop.f32.mrf.mxu0 }
 0xffd   :  { %v5922_v47 = vadd.f32 %v5921_v25, %v5909_v18 }
 0xffe   :  { %v5999_v28 = vpop.f32.mrf.mxu1 }
 0xfff   :  { %v6003_v41 = vmul.f32 0.5, %v5922_v47 }
0x1001   :  { %7086 = vtanh.f32 %v6003_v41  ;;  %v7085_v59 = vpop.eup %7084 }
0x1002   :  { %v5910_v31 = vpop.f32.mrf.mxu2  ;;  %v6012_v48 = vmul.f32 0.5, %v7085_v59 }
0x1004   :  { %v5973_v6 = vpop.f32.mrf.mxu3  ;;  %v5986_v44 = vpop.f32.mrf.mxu0  ;;  %v6016_v45 = vadd.f32 0.5, %v6012_v48 }
0x1005   :  { %v5987_v55 = vadd.f32 %v5986_v44, %v12943_v16 }
0x1006   :  { %v6001_v49 = vpop.f32.mrf.mxu1  ;;  %v6021_v51 = vmul.f32 %v6016_v45, %v10917_v32 }
0x1007   :  { %v6000_v30 = vadd.f32 %v5999_v28, %v5987_v55  ;;  %v7087_v43 = vpop.eup %7086 }
0x1008   :  { %v6011_v0 = vmul.f32 0.5, %v7087_v43 }
0x1009   :  { %v6006_v53 = vmul.f32 0.5, %v6000_v30 }
0x100a   :  { %v5960_v1 = vpop.f32.mrf.mxu2  ;;  %v6015_v15 = vadd.f32 0.5, %v6011_v0 }
0x100b   :  { %7088 = vtanh.f32 %v6006_v53  ;;  %v5961_v11 = vadd.f32 %v5960_v1, %v12944_v58 }
0x100c   :  { %v5975_v52 = vpop.f32.mrf.mxu3  ;;  %v5988_v13 = vpop.f32.mrf.mxu0 }
0x100d   :  { %v5974_v37 = vadd.f32 %v5973_v6, %v5961_v11 }
0x100f   :  { %v6005_v26 = vmul.f32 0.5, %v5974_v37 }
0x1011   :  { %v7089_v46 = vpop.eup %7088  ;;  %7090 = vtanh.f32 %v6005_v26 }
0x1012   :  { %v6014_v5 = vmul.f32 0.5, %v7089_v46  ;;  %v5962_v8 = vpop.f32.mrf.mxu2 }
0x1014   :  { %v6018_v34 = vadd.f32 0.5, %v6014_v5 }
0x1016   :  { %v6019_v38 = vmul.f32 2.0, %v6018_v34 }
0x1017   :  { %v7091_v12 = vpop.eup %7090 }
0x1018   :  { %v6631_v24 = vadd.f32 -1.0, %v6019_v38  ;;  %v6013_v33 = vmul.f32 0.5, %v7091_v12 }
0x101a   :  { %v6022_v17 = vmul.f32 %v6631_v24, %v6015_v15  ;;  %v6017_v19 = vadd.f32 0.5, %v6013_v33 }
0x101c   :  { %v6023_v23 = vadd.f32 %v6022_v17, %v6021_v51 }
0x101e   :  { %7092 = vtanh.f32 %v6023_v23 }
0x1024   :  { %v7093_v56 = vpop.eup %7092 }
0x1025   :  { %v6025_v3 = vmul.f32 %v7093_v56, %v6017_v19 }
0x1027   :  { %6632 = vst [vmem:[%s10941_s5 + $0x1e] sm:$0x3] %v6025_v3 }
0x1028   :  { %6032 = vsyncpa [#allocation3], 1 }
0x1029   :  { %6033 = vsyncpa [#allocation5], 1 }

</bundles_post_ra>
